<compile_context>
chip_gen: v5e
topology: v5e:2x2
jax: 0.10.0
libtpu: 0.0.40
codegen_flags: <defaults>
</compile_context>

<pallas_src>
import functools
import math

import jax
import jax.numpy as jnp
from jax import lax
from jax.experimental import pallas as pl
from jax.experimental.pallas import tpu as pltpu

BN_EPS = 1e-5                      # PyTorch BatchNorm2d default eps
VMEM_LIMIT = 32 * 1024 * 1024      # safe headroom on v5e / v6e / v7x


def _round_up(x, m):
    return ((x + m - 1) // m) * m


# ---------------------------------------------------------------------------
# Kernel 1: tiled matmul + bias + per-tile BatchNorm partial statistics
# ---------------------------------------------------------------------------
def _fc_matmul_kernel(x_ref, w_ref, b_ref, y_ref, ps_ref, *, tm, m_true):
    i = pl.program_id(0)
    y = jnp.dot(x_ref[...], w_ref[...], preferred_element_type=jnp.float32)
    y = y + b_ref[...]
    y_ref[...] = y
    # Mask zero-padded rows of the M axis so global BN statistics stay exact.
    row = i * tm + lax.broadcasted_iota(jnp.int32, y.shape, 0)
    ym = jnp.where(row < m_true, y, 0.0)
    s1 = jnp.sum(ym, axis=0, keepdims=True)        # [1, Cout]  sum
    s2 = jnp.sum(ym * ym, axis=0, keepdims=True)   # [1, Cout]  sum of squares
    ps_ref[0] = jnp.concatenate([s1, s2], axis=0)  # [2, Cout]


def fc_matmul_stats(x2d, W, b, *, block_m=1024):
    """y = x @ W + b (pre-BN), plus global per-feature mean / biased var."""
    M, Cin = x2d.shape
    Cout = W.shape[1]
    tm = min(block_m, _round_up(M, 64))
    Mp = _round_up(M, tm)
    if Mp != M:
        x2d = jnp.pad(x2d, ((0, Mp - M), (0, 0)))
    n_tiles = Mp // tm

    kernel = functools.partial(_fc_matmul_kernel, tm=tm, m_true=M)
    cost = pl.CostEstimate(
        flops=2 * Mp * Cin * Cout,
        transcendentals=0,
        bytes_accessed=4 * (Mp * Cin + Cin * Cout + Mp * Cout))
    y, pstats = pl.pallas_call(
        kernel,
        out_shape=(jax.ShapeDtypeStruct((Mp, Cout), jnp.float32),
                   jax.ShapeDtypeStruct((n_tiles, 2, Cout), jnp.float32)),
        grid=(n_tiles,),
        in_specs=[pl.BlockSpec((tm, Cin), lambda i: (i, 0)),
                  pl.BlockSpec((Cin, Cout), lambda i: (0, 0)),
                  pl.BlockSpec((1, Cout), lambda i: (0, 0))],
        out_specs=(pl.BlockSpec((tm, Cout), lambda i: (i, 0)),
                   pl.BlockSpec((1, 2, Cout), lambda i: (i, 0, 0))),
        compiler_params=pltpu.CompilerParams(
            dimension_semantics=("parallel",),
            vmem_limit_bytes=VMEM_LIMIT),
        cost_estimate=cost,
    )(x2d, W, b.reshape(1, Cout))

    stats = jnp.sum(pstats, axis=0)                       # [2, Cout]
    mean = stats[0] / M
    var = jnp.maximum(stats[1] / M - mean * mean, 0.0)    # biased var (BN training)
    return y[:M], mean, var


def _bn_scale_shift(layer, mean, var):
    scale = layer['gamma'] * lax.rsqrt(var + BN_EPS)
    shift = layer['beta'] - mean * scale
    return scale, shift


# ---------------------------------------------------------------------------
# Kernel 2: attention over time per (head, batch, vertex), with fused q/k/v
#           BatchNorm-apply + ReLU.  Heads are static lane slices of D.
# ---------------------------------------------------------------------------
def _attention_kernel(q_ref, k_ref, v_ref,
                      qs_ref, qb_ref, ks_ref, kb_ref, vs_ref, vb_ref,
                      o_ref, *, num_heads, head_dim, scale):
    q = jnp.maximum(q_ref[...] * qs_ref[...] + qb_ref[...], 0.0)   # [g, Tp, D]
    k = jnp.maximum(k_ref[...] * ks_ref[...] + kb_ref[...], 0.0)   # [g, Th, D]
    v = jnp.maximum(v_ref[...] * vs_ref[...] + vb_ref[...], 0.0)   # [g, Th, D]
    outs = []
    for h in range(num_heads):               # static unroll; heads = lane slices
        sl = slice(h * head_dim, (h + 1) * head_dim)
        qh, kh, vh = q[..., sl], k[..., sl], v[..., sl]
        s = jnp.einsum('gpc,gtc->gpt', qh, kh,
                       preferred_element_type=jnp.float32) * scale
        s = s - jnp.max(s, axis=-1, keepdims=True)
        p = jnp.exp(s)
        p = p * pl.reciprocal(jnp.sum(p, axis=-1, keepdims=True), approx=True)
        outs.append(jnp.einsum('gpt,gtc->gpc', p, vh,
                               preferred_element_type=jnp.float32))
    o_ref[...] = jnp.concatenate(outs, axis=-1)


def attention(q, k, v, bn_q, bn_k, bn_v, *, num_heads, head_dim, block_g=256):
    """q: [G, Tp, D] (pre-BN), k/v: [G, Th, D] (pre-BN); G = batch*vertex."""
    G, Tp, D = q.shape
    Th = k.shape[1]
    bg = min(block_g, G)
    Gp = _round_up(G, bg)                    # pad G (no gcd collapse to 1)
    if Gp != G:
        pad = ((0, Gp - G), (0, 0), (0, 0))
        q, k, v = jnp.pad(q, pad), jnp.pad(k, pad), jnp.pad(v, pad)
    vecs = [a.reshape(1, 1, D) for pair in (bn_q, bn_k, bn_v) for a in pair]

    def qkv_spec(T):
        return pl.BlockSpec((bg, T, D), lambda g: (g, 0, 0))

    vec_spec = pl.BlockSpec((1, 1, D), lambda g: (0, 0, 0))
    cost = pl.CostEstimate(
        flops=4 * Gp * Tp * Th * D,
        transcendentals=Gp * Tp * Th,
        bytes_accessed=4 * Gp * (2 * Tp * D + 2 * Th * D))
    out = pl.pallas_call(
        functools.partial(_attention_kernel, num_heads=num_heads,
                          head_dim=head_dim, scale=1.0 / math.sqrt(num_heads)),
        out_shape=jax.ShapeDtypeStruct((Gp, Tp, D), jnp.float32),
        grid=(Gp // bg,),
        in_specs=[qkv_spec(Tp), qkv_spec(Th), qkv_spec(Th)] + [vec_spec] * 6,
        out_specs=qkv_spec(Tp),
        compiler_params=pltpu.CompilerParams(
            dimension_semantics=("parallel",),
            vmem_limit_bytes=VMEM_LIMIT),
        cost_estimate=cost,
    )(q, k, v, *vecs)
    return out[:G]


# ---------------------------------------------------------------------------
# Kernel 3: lane-dense BatchNorm-apply + ReLU (output FC)
# ---------------------------------------------------------------------------
def _scale_shift_relu_kernel(y_ref, s_ref, t_ref, o_ref, *, relu):
    out = y_ref[...] * s_ref[...] + t_ref[...]
    if relu:
        out = jnp.maximum(out, 0.0)
    o_ref[...] = out


def bn_relu_apply(y, scale, shift, *, relu=True, block_rows=1024):
    M, C = y.shape
    pack = 128 // C if (C < 128 and 128 % C == 0) else 1   # pack rows into 128 lanes
    lanes = C * pack
    R = (M + pack - 1) // pack
    tr = min(block_rows, _round_up(R, 8))
    Rp = _round_up(R, tr)
    Mp = Rp * pack
    if Mp != M:
        y = jnp.pad(y, ((0, Mp - M), (0, 0)))
    yp = y.reshape(Rp, lanes)
    sv = jnp.tile(scale.reshape(1, C), (1, pack))
    tv = jnp.tile(shift.reshape(1, C), (1, pack))
    out = pl.pallas_call(
        functools.partial(_scale_shift_relu_kernel, relu=relu),
        out_shape=jax.ShapeDtypeStruct((Rp, lanes), jnp.float32),
        grid=(Rp // tr,),
        in_specs=[pl.BlockSpec((tr, lanes), lambda i: (i, 0)),
                  pl.BlockSpec((1, lanes), lambda i: (0, 0)),
                  pl.BlockSpec((1, lanes), lambda i: (0, 0))],
        out_specs=pl.BlockSpec((tr, lanes), lambda i: (i, 0)),
        compiler_params=pltpu.CompilerParams(
            dimension_semantics=("parallel",),
            vmem_limit_bytes=VMEM_LIMIT),
    )(yp, sv, tv)
    return out.reshape(Mp, C)[:M]


# ---------------------------------------------------------------------------
# transformAttention forward
# ---------------------------------------------------------------------------
def transform_attention_forward(X, STE_his, STE_pred, params, *, K, d):
    """
    X:        [B, num_his,  N, D]
    STE_his:  [B, num_his,  N, D]
    STE_pred: [B, num_pred, N, D]
    returns   [B, num_pred, N, D]
    Note: torch.split(., K, dim=-1) yields d heads of dim K, scaled by 1/sqrt(d).
    """
    B, Th, N, D = X.shape
    Tp = STE_pred.shape[1]

    # q/k/v projections: tiled matmul + bias + global BN statistics (Pallas).
    yq, mq, vq = fc_matmul_stats(STE_pred.reshape(B * Tp * N, D),
                                 params['FC_q']['W'], params['FC_q']['b'])
    yk, mk, vk = fc_matmul_stats(STE_his.reshape(B * Th * N, D),
                                 params['FC_k']['W'], params['FC_k']['b'])
    yv, mv, vv = fc_matmul_stats(X.reshape(B * Th * N, D),
                                 params['FC_v']['W'], params['FC_v']['b'])
    bn_q = _bn_scale_shift(params['FC_q'], mq, vq)
    bn_k = _bn_scale_shift(params['FC_k'], mk, vk)
    bn_v = _bn_scale_shift(params['FC_v'], mv, vv)

    # [B, T, N, D] -> [B*N, T, D]; BN-apply + ReLU is deferred into the
    # attention kernel (fused), heads stay packed on the D lane axis.
    def to_gtd(y2d, T):
        return jnp.transpose(y2d.reshape(B, T, N, D),
                             (0, 2, 1, 3)).reshape(B * N, T, D)

    og = attention(to_gtd(yq, Tp), to_gtd(yk, Th), to_gtd(yv, Th),
                   bn_q, bn_k, bn_v, num_heads=d, head_dim=K)   # [B*N, Tp, D]

    # Output FC directly on the [B*N*Tp, D] view (BatchNorm stats are
    # order-independent), then one transpose back to [B, Tp, N, D].
    yo, mo, vo = fc_matmul_stats(og.reshape(B * N * Tp, D),
                                 params['FC']['W'], params['FC']['b'])
    so, to = _bn_scale_shift(params['FC'], mo, vo)
    out2d = bn_relu_apply(yo, so, to, relu=True)
    return jnp.transpose(out2d.reshape(B, N, Tp, D), (0, 2, 1, 3))


# ---------------------------------------------------------------------------
# Parameter init (mirrors conv2d_: xavier-uniform 1x1 conv, zero bias, fresh BN)
# ---------------------------------------------------------------------------
def _xavier_uniform(key, cin, cout):
    a = math.sqrt(6.0 / (cin + cout))
    return jax.random.uniform(key, (cin, cout), jnp.float32, -a, a)


def init_params(key, K, d):
    D = K * d
    names = ['FC_q', 'FC_k', 'FC_v', 'FC']
    keys = jax.random.split(key, len(names))
    return {name: {'W': _xavier_uniform(k, D, D),
                   'b': jnp.zeros((D,), jnp.float32),
                   'gamma': jnp.ones((D,), jnp.float32),
                   'beta': jnp.zeros((D,), jnp.float32)}
            for name, k in zip(names, keys)}


if __name__ == "__main__":
    K, d = 8, 4                       # module params; D = K*d = 32, d=4 heads of dim K=8
    D = K * d
    B, num_his, num_pred, N = 2, 8, 4, 16

    key = jax.random.PRNGKey(0)
    kx, kh, kp, kw = jax.random.split(key, 4)
    X        = jax.random.normal(kx, (B, num_his,  N, D), jnp.float32)
    STE_his  = jax.random.normal(kh, (B, num_his,  N, D), jnp.float32)
    STE_pred = jax.random.normal(kp, (B, num_pred, N, D), jnp.float32)
    params = init_params(kw, K, d)

    fwd = jax.jit(functools.partial(transform_attention_forward, K=K, d=d))
    out = jax.block_until_ready(fwd(X, STE_his, STE_pred, params))
    assert out.shape == (B, num_pred, N, D)
    assert bool(jnp.all(jnp.isfinite(out)))
    print("KERNEL_OK")
</pallas_src>

<mosaic_0001>
module attributes {stable_mosaic.version = 11 : i64} {
  func.func @_fc_matmul_kernel(%arg0: i32, %arg1: memref<128x32xf32, #tpu.memory_space<vmem>>, %arg2: memref<32x32xf32, #tpu.memory_space<vmem>>, %arg3: memref<1x32xf32, #tpu.memory_space<vmem>>, %arg4: memref<128x32xf32, #tpu.memory_space<vmem>>, %arg5: memref<1x2x32xf32, #tpu.memory_space<vmem>>) attributes {dimension_semantics = [#tpu.dimension_semantics<parallel>], iteration_bounds = array<i64: 1>, scalar_prefetch = 0 : i64, scratch_operands = 0 : i64, tpu.core_type = #tpu.core_type<tc>, window_params = [{transform_indices = @transform_0, window_bounds = array<i64: 128, 32>}, {pipeline_mode = #tpu.pipeline_mode<synchronous>, transform_indices = @transform_1, window_bounds = array<i64: 32, 32>}, {pipeline_mode = #tpu.pipeline_mode<synchronous>, transform_indices = @transform_2, window_bounds = array<i64: 1, 32>}, {transform_indices = @transform_3, window_bounds = array<i64: 128, 32>}, {transform_indices = @transform_4, window_bounds = array<i64: 1, 2, 32>}]} {
    %c0 = arith.constant 0 : index
    %c0_0 = arith.constant 0 : index
    %0 = vector.load %arg1[%c0, %c0_0] : memref<128x32xf32, #tpu.memory_space<vmem>>, vector<128x32xf32>
    %c0_1 = arith.constant 0 : index
    %c0_2 = arith.constant 0 : index
    %1 = vector.load %arg2[%c0_1, %c0_2] : memref<32x32xf32, #tpu.memory_space<vmem>>, vector<32x32xf32>
    %cst = arith.constant dense<0.000000e+00> : vector<128x32xf32>
    %2 = tpu.matmul %0, %1, %cst {dimension_numbers = #tpu.dot_dimension_numbers<[1], [0], [0], [1], [0, 0, 1, 1], [], []>} : vector<128x32xf32>, vector<32x32xf32>, vector<128x32xf32> -> vector<128x32xf32>
    %c0_3 = arith.constant 0 : index
    %c0_4 = arith.constant 0 : index
    %3 = vector.load %arg3[%c0_3, %c0_4] : memref<1x32xf32, #tpu.memory_space<vmem>>, vector<1x32xf32>
    %4 = vector.broadcast %3 : vector<1x32xf32> to vector<128x32xf32>
    %5 = arith.addf %2, %4 : vector<128x32xf32>
    %c0_5 = arith.constant 0 : index
    %c0_6 = arith.constant 0 : index
    %6 = vector.load %arg4[%c0_5, %c0_6] : memref<128x32xf32, #tpu.memory_space<vmem>>, vector<128x32xf32>
    tpu.vector_store %arg4[%c0_5, %c0_6], %5 {strides = array<i32>} : memref<128x32xf32, #tpu.memory_space<vmem>>, vector<128x32xf32>,
    %c128_i32 = arith.constant 128 : i32
    %7 = arith.muli %arg0, %c128_i32 : i32
    %8 = tpu.iota {dimensions = array<i32: 0>} : vector<128x32xi32>
    %9 = vector.broadcast %7 : i32 to vector<128x32xi32>
    %10 = arith.addi %9, %8 : vector<128x32xi32>
    %c128_i32_7 = arith.constant 128 : i32
    %11 = vector.broadcast %c128_i32_7 : i32 to vector<128x32xi32>
    %12 = arith.cmpi slt, %10, %11 : vector<128x32xi32>
    %cst_8 = arith.constant 0.000000e+00 : f32
    %13 = vector.broadcast %cst_8 : f32 to vector<128x32xf32>
    %14 = arith.select %12, %5, %13 : vector<128x32xi1>, vector<128x32xf32>
    %cst_9 = arith.constant dense<0.000000e+00> : vector<32xf32>
    %15 = vector.multi_reduction <add>, %14, %cst_9 [0] : vector<128x32xf32> to vector<32xf32>
    %16 = vector.shape_cast %15 : vector<32xf32> to vector<1x32xf32>
    %17 = arith.mulf %14, %14 : vector<128x32xf32>
    %cst_10 = arith.constant dense<0.000000e+00> : vector<32xf32>
    %18 = vector.multi_reduction <add>, %17, %cst_10 [0] : vector<128x32xf32> to vector<32xf32>
    %19 = vector.shape_cast %18 : vector<32xf32> to vector<1x32xf32>
    %20 = tpu.concatenate %16, %19 in 0 : vector<1x32xf32>, vector<1x32xf32> -> vector<2x32xf32>
    %c0_11 = arith.constant 0 : index
    %c0_12 = arith.constant 0 : index
    %c0_13 = arith.constant 0 : index
    %21 = vector.load %arg5[%c0_11, %c0_12, %c0_13] : memref<1x2x32xf32, #tpu.memory_space<vmem>>, vector<1x2x32xf32>
    %22 = vector.shape_cast %21 : vector<1x2x32xf32> to vector<2x32xf32>
    %23 = vector.shape_cast %20 : vector<2x32xf32> to vector<1x2x32xf32>
    tpu.vector_store %arg5[%c0_11, %c0_12, %c0_13], %23 {strides = array<i32>} : memref<1x2x32xf32, #tpu.memory_space<vmem>>, vector<1x2x32xf32>,
    return
  }
  func.func @transform_0(%arg0: i32) -> (i32, i32) {
    %c0_i32 = arith.constant 0 : i32
    %c0_i32_0 = arith.constant 0 : i32
    return %arg0, %c0_i32 : i32, i32
  }
  func.func @transform_1(%arg0: i32) -> (i32, i32) {
    %c0_i32 = arith.constant 0 : i32
    %c0_i32_0 = arith.constant 0 : i32
    %c0_i32_1 = arith.constant 0 : i32
    return %c0_i32, %c0_i32_0 : i32, i32
  }
  func.func @transform_2(%arg0: i32) -> (i32, i32) {
    %c0_i32 = arith.constant 0 : i32
    %c0_i32_0 = arith.constant 0 : i32
    %c0_i32_1 = arith.constant 0 : i32
    return %c0_i32, %c0_i32_0 : i32, i32
  }
  func.func @transform_3(%arg0: i32) -> (i32, i32) {
    %c0_i32 = arith.constant 0 : i32
    %c0_i32_0 = arith.constant 0 : i32
    return %arg0, %c0_i32 : i32, i32
  }
  func.func @transform_4(%arg0: i32) -> (i32, i32, i32) {
    %c0_i32 = arith.constant 0 : i32
    %c0_i32_0 = arith.constant 0 : i32
    %c0_i32_1 = arith.constant 0 : i32
    return %arg0, %c0_i32, %c0_i32_0 : i32, i32, i32
  }
}

module attributes {stable_mosaic.version = 11 : i64} {
  func.func @_fc_matmul_kernel(%arg0: i32, %arg1: memref<256x32xf32, #tpu.memory_space<vmem>>, %arg2: memref<32x32xf32, #tpu.memory_space<vmem>>, %arg3: memref<1x32xf32, #tpu.memory_space<vmem>>, %arg4: memref<256x32xf32, #tpu.memory_space<vmem>>, %arg5: memref<1x2x32xf32, #tpu.memory_space<vmem>>) attributes {dimension_semantics = [#tpu.dimension_semantics<parallel>], iteration_bounds = array<i64: 1>, scalar_prefetch = 0 : i64, scratch_operands = 0 : i64, tpu.core_type = #tpu.core_type<tc>, window_params = [{transform_indices = @transform_0, window_bounds = array<i64: 256, 32>}, {pipeline_mode = #tpu.pipeline_mode<synchronous>, transform_indices = @transform_1, window_bounds = array<i64: 32, 32>}, {pipeline_mode = #tpu.pipeline_mode<synchronous>, transform_indices = @transform_2, window_bounds = array<i64: 1, 32>}, {transform_indices = @transform_3, window_bounds = array<i64: 256, 32>}, {transform_indices = @transform_4, window_bounds = array<i64: 1, 2, 32>}]} {
    %c0 = arith.constant 0 : index
    %c0_0 = arith.constant 0 : index
    %0 = vector.load %arg1[%c0, %c0_0] : memref<256x32xf32, #tpu.memory_space<vmem>>, vector<256x32xf32>
    %c0_1 = arith.constant 0 : index
    %c0_2 = arith.constant 0 : index
    %1 = vector.load %arg2[%c0_1, %c0_2] : memref<32x32xf32, #tpu.memory_space<vmem>>, vector<32x32xf32>
    %cst = arith.constant dense<0.000000e+00> : vector<256x32xf32>
    %2 = tpu.matmul %0, %1, %cst {dimension_numbers = #tpu.dot_dimension_numbers<[1], [0], [0], [1], [0, 0, 1, 1], [], []>} : vector<256x32xf32>, vector<32x32xf32>, vector<256x32xf32> -> vector<256x32xf32>
    %c0_3 = arith.constant 0 : index
    %c0_4 = arith.constant 0 : index
    %3 = vector.load %arg3[%c0_3, %c0_4] : memref<1x32xf32, #tpu.memory_space<vmem>>, vector<1x32xf32>
    %4 = vector.broadcast %3 : vector<1x32xf32> to vector<256x32xf32>
    %5 = arith.addf %2, %4 : vector<256x32xf32>
    %c0_5 = arith.constant 0 : index
    %c0_6 = arith.constant 0 : index
    %6 = vector.load %arg4[%c0_5, %c0_6] : memref<256x32xf32, #tpu.memory_space<vmem>>, vector<256x32xf32>
    tpu.vector_store %arg4[%c0_5, %c0_6], %5 {strides = array<i32>} : memref<256x32xf32, #tpu.memory_space<vmem>>, vector<256x32xf32>,
    %c256_i32 = arith.constant 256 : i32
    %7 = arith.muli %arg0, %c256_i32 : i32
    %8 = tpu.iota {dimensions = array<i32: 0>} : vector<256x32xi32>
    %9 = vector.broadcast %7 : i32 to vector<256x32xi32>
    %10 = arith.addi %9, %8 : vector<256x32xi32>
    %c256_i32_7 = arith.constant 256 : i32
    %11 = vector.broadcast %c256_i32_7 : i32 to vector<256x32xi32>
    %12 = arith.cmpi slt, %10, %11 : vector<256x32xi32>
    %cst_8 = arith.constant 0.000000e+00 : f32
    %13 = vector.broadcast %cst_8 : f32 to vector<256x32xf32>
    %14 = arith.select %12, %5, %13 : vector<256x32xi1>, vector<256x32xf32>
    %cst_9 = arith.constant dense<0.000000e+00> : vector<32xf32>
    %15 = vector.multi_reduction <add>, %14, %cst_9 [0] : vector<256x32xf32> to vector<32xf32>
    %16 = vector.shape_cast %15 : vector<32xf32> to vector<1x32xf32>
    %17 = arith.mulf %14, %14 : vector<256x32xf32>
    %cst_10 = arith.constant dense<0.000000e+00> : vector<32xf32>
    %18 = vector.multi_reduction <add>, %17, %cst_10 [0] : vector<256x32xf32> to vector<32xf32>
    %19 = vector.shape_cast %18 : vector<32xf32> to vector<1x32xf32>
    %20 = tpu.concatenate %16, %19 in 0 : vector<1x32xf32>, vector<1x32xf32> -> vector<2x32xf32>
    %c0_11 = arith.constant 0 : index
    %c0_12 = arith.constant 0 : index
    %c0_13 = arith.constant 0 : index
    %21 = vector.load %arg5[%c0_11, %c0_12, %c0_13] : memref<1x2x32xf32, #tpu.memory_space<vmem>>, vector<1x2x32xf32>
    %22 = vector.shape_cast %21 : vector<1x2x32xf32> to vector<2x32xf32>
    %23 = vector.shape_cast %20 : vector<2x32xf32> to vector<1x2x32xf32>
    tpu.vector_store %arg5[%c0_11, %c0_12, %c0_13], %23 {strides = array<i32>} : memref<1x2x32xf32, #tpu.memory_space<vmem>>, vector<1x2x32xf32>,
    return
  }
  func.func @transform_0(%arg0: i32) -> (i32, i32) {
    %c0_i32 = arith.constant 0 : i32
    %c0_i32_0 = arith.constant 0 : i32
    return %arg0, %c0_i32 : i32, i32
  }
  func.func @transform_1(%arg0: i32) -> (i32, i32) {
    %c0_i32 = arith.constant 0 : i32
    %c0_i32_0 = arith.constant 0 : i32
    %c0_i32_1 = arith.constant 0 : i32
    return %c0_i32, %c0_i32_0 : i32, i32
  }
  func.func @transform_2(%arg0: i32) -> (i32, i32) {
    %c0_i32 = arith.constant 0 : i32
    %c0_i32_0 = arith.constant 0 : i32
    %c0_i32_1 = arith.constant 0 : i32
    return %c0_i32, %c0_i32_0 : i32, i32
  }
  func.func @transform_3(%arg0: i32) -> (i32, i32) {
    %c0_i32 = arith.constant 0 : i32
    %c0_i32_0 = arith.constant 0 : i32
    return %arg0, %c0_i32 : i32, i32
  }
  func.func @transform_4(%arg0: i32) -> (i32, i32, i32) {
    %c0_i32 = arith.constant 0 : i32
    %c0_i32_0 = arith.constant 0 : i32
    %c0_i32_1 = arith.constant 0 : i32
    return %arg0, %c0_i32, %c0_i32_0 : i32, i32, i32
  }
}

module attributes {stable_mosaic.version = 11 : i64} {
  func.func @_attention_kernel(%arg0: i32, %arg1: memref<32x4x32xf32, #tpu.memory_space<vmem>>, %arg2: memref<32x8x32xf32, #tpu.memory_space<vmem>>, %arg3: memref<32x8x32xf32, #tpu.memory_space<vmem>>, %arg4: memref<1x1x32xf32, #tpu.memory_space<vmem>>, %arg5: memref<1x1x32xf32, #tpu.memory_space<vmem>>, %arg6: memref<1x1x32xf32, #tpu.memory_space<vmem>>, %arg7: memref<1x1x32xf32, #tpu.memory_space<vmem>>, %arg8: memref<1x1x32xf32, #tpu.memory_space<vmem>>, %arg9: memref<1x1x32xf32, #tpu.memory_space<vmem>>, %arg10: memref<32x4x32xf32, #tpu.memory_space<vmem>>) attributes {dimension_semantics = [#tpu.dimension_semantics<parallel>], iteration_bounds = array<i64: 1>, scalar_prefetch = 0 : i64, scratch_operands = 0 : i64, tpu.core_type = #tpu.core_type<tc>, window_params = [{transform_indices = @transform_0, window_bounds = array<i64: 32, 4, 32>}, {transform_indices = @transform_1, window_bounds = array<i64: 32, 8, 32>}, {transform_indices = @transform_2, window_bounds = array<i64: 32, 8, 32>}, {pipeline_mode = #tpu.pipeline_mode<synchronous>, transform_indices = @transform_3, window_bounds = array<i64: 1, 1, 32>}, {pipeline_mode = #tpu.pipeline_mode<synchronous>, transform_indices = @transform_4, window_bounds = array<i64: 1, 1, 32>}, {pipeline_mode = #tpu.pipeline_mode<synchronous>, transform_indices = @transform_5, window_bounds = array<i64: 1, 1, 32>}, {pipeline_mode = #tpu.pipeline_mode<synchronous>, transform_indices = @transform_6, window_bounds = array<i64: 1, 1, 32>}, {pipeline_mode = #tpu.pipeline_mode<synchronous>, transform_indices = @transform_7, window_bounds = array<i64: 1, 1, 32>}, {pipeline_mode = #tpu.pipeline_mode<synchronous>, transform_indices = @transform_8, window_bounds = array<i64: 1, 1, 32>}, {transform_indices = @transform_9, window_bounds = array<i64: 32, 4, 32>}]} {
    %c0 = arith.constant 0 : index
    %c0_0 = arith.constant 0 : index
    %c0_1 = arith.constant 0 : index
    %0 = vector.load %arg1[%c0, %c0_0, %c0_1] : memref<32x4x32xf32, #tpu.memory_space<vmem>>, vector<32x4x32xf32>
    %c0_2 = arith.constant 0 : index
    %c0_3 = arith.constant 0 : index
    %c0_4 = arith.constant 0 : index
    %1 = vector.load %arg4[%c0_2, %c0_3, %c0_4] : memref<1x1x32xf32, #tpu.memory_space<vmem>>, vector<1x1x32xf32>
    %2 = vector.broadcast %1 : vector<1x1x32xf32> to vector<32x4x32xf32>
    %3 = arith.mulf %0, %2 : vector<32x4x32xf32>
    %c0_5 = arith.constant 0 : index
    %c0_6 = arith.constant 0 : index
    %c0_7 = arith.constant 0 : index
    %4 = vector.load %arg5[%c0_5, %c0_6, %c0_7] : memref<1x1x32xf32, #tpu.memory_space<vmem>>, vector<1x1x32xf32>
    %5 = vector.broadcast %4 : vector<1x1x32xf32> to vector<32x4x32xf32>
    %6 = arith.addf %3, %5 : vector<32x4x32xf32>
    %cst = arith.constant 0.000000e+00 : f32
    %7 = vector.broadcast %cst : f32 to vector<32x4x32xf32>
    %8 = arith.maximumf %6, %7 : vector<32x4x32xf32>
    %c0_8 = arith.constant 0 : index
    %c0_9 = arith.constant 0 : index
    %c0_10 = arith.constant 0 : index
    %9 = vector.load %arg2[%c0_8, %c0_9, %c0_10] : memref<32x8x32xf32, #tpu.memory_space<vmem>>, vector<32x8x32xf32>
    %c0_11 = arith.constant 0 : index
    %c0_12 = arith.constant 0 : index
    %c0_13 = arith.constant 0 : index
    %10 = vector.load %arg6[%c0_11, %c0_12, %c0_13] : memref<1x1x32xf32, #tpu.memory_space<vmem>>, vector<1x1x32xf32>
    %11 = vector.broadcast %10 : vector<1x1x32xf32> to vector<32x8x32xf32>
    %12 = arith.mulf %9, %11 : vector<32x8x32xf32>
    %c0_14 = arith.constant 0 : index
    %c0_15 = arith.constant 0 : index
    %c0_16 = arith.constant 0 : index
    %13 = vector.load %arg7[%c0_14, %c0_15, %c0_16] : memref<1x1x32xf32, #tpu.memory_space<vmem>>, vector<1x1x32xf32>
    %14 = vector.broadcast %13 : vector<1x1x32xf32> to vector<32x8x32xf32>
    %15 = arith.addf %12, %14 : vector<32x8x32xf32>
    %cst_17 = arith.constant 0.000000e+00 : f32
    %16 = vector.broadcast %cst_17 : f32 to vector<32x8x32xf32>
    %17 = arith.maximumf %15, %16 : vector<32x8x32xf32>
    %c0_18 = arith.constant 0 : index
    %c0_19 = arith.constant 0 : index
    %c0_20 = arith.constant 0 : index
    %18 = vector.load %arg3[%c0_18, %c0_19, %c0_20] : memref<32x8x32xf32, #tpu.memory_space<vmem>>, vector<32x8x32xf32>
    %c0_21 = arith.constant 0 : index
    %c0_22 = arith.constant 0 : index
    %c0_23 = arith.constant 0 : index
    %19 = vector.load %arg8[%c0_21, %c0_22, %c0_23] : memref<1x1x32xf32, #tpu.memory_space<vmem>>, vector<1x1x32xf32>
    %20 = vector.broadcast %19 : vector<1x1x32xf32> to vector<32x8x32xf32>
    %21 = arith.mulf %18, %20 : vector<32x8x32xf32>
    %c0_24 = arith.constant 0 : index
    %c0_25 = arith.constant 0 : index
    %c0_26 = arith.constant 0 : index
    %22 = vector.load %arg9[%c0_24, %c0_25, %c0_26] : memref<1x1x32xf32, #tpu.memory_space<vmem>>, vector<1x1x32xf32>
    %23 = vector.broadcast %22 : vector<1x1x32xf32> to vector<32x8x32xf32>
    %24 = arith.addf %21, %23 : vector<32x8x32xf32>
    %cst_27 = arith.constant 0.000000e+00 : f32
    %25 = vector.broadcast %cst_27 : f32 to vector<32x8x32xf32>
    %26 = arith.maximumf %24, %25 : vector<32x8x32xf32>
    %27 = vector.extract_strided_slice %8 {offsets = [0, 0, 0], sizes = [32, 4, 8], strides = [1, 1, 1]} : vector<32x4x32xf32> to vector<32x4x8xf32>
    %28 = vector.extract_strided_slice %17 {offsets = [0, 0, 0], sizes = [32, 8, 8], strides = [1, 1, 1]} : vector<32x8x32xf32> to vector<32x8x8xf32>
    %29 = vector.extract_strided_slice %26 {offsets = [0, 0, 0], sizes = [32, 8, 8], strides = [1, 1, 1]} : vector<32x8x32xf32> to vector<32x8x8xf32>
    "tpu.trace_start"() <{level = 10 : i32, message = "gpc,gtc->gpt"}> : () -> ()
    %cst_28 = arith.constant dense<0.000000e+00> : vector<32x4x8xf32>
    %30 = tpu.matmul %27, %28, %cst_28 {dimension_numbers = #tpu.dot_dimension_numbers<[2], [2], [1], [1], [0, 0, 0, 1, 1, 1], [0], [0]>} : vector<32x4x8xf32>, vector<32x8x8xf32>, vector<32x4x8xf32> -> vector<32x4x8xf32>
    "tpu.trace_stop"() : () -> ()
    %cst_29 = arith.constant 5.000000e-01 : f32
    %31 = vector.broadcast %cst_29 : f32 to vector<32x4x8xf32>
    %32 = arith.mulf %30, %31 : vector<32x4x8xf32>
    %cst_30 = arith.constant dense<0xFF800000> : vector<32x4xf32>
    %33 = vector.multi_reduction <maximumf>, %32, %cst_30 [2] : vector<32x4x8xf32> to vector<32x4xf32>
    %34 = vector.shape_cast %33 : vector<32x4xf32> to vector<32x4x1xf32>
    %35 = vector.broadcast %34 : vector<32x4x1xf32> to vector<32x4x8xf32>
    %36 = arith.subf %32, %35 : vector<32x4x8xf32>
    %37 = math.exp %36 : vector<32x4x8xf32>
    %cst_31 = arith.constant dense<0.000000e+00> : vector<32x4xf32>
    %38 = vector.multi_reduction <add>, %37, %cst_31 [2] : vector<32x4x8xf32> to vector<32x4xf32>
    %39 = vector.shape_cast %38 : vector<32x4xf32> to vector<32x4x1xf32>
    %40 = tpu.reciprocal %39 {approx = true} : vector<32x4x1xf32> -> vector<32x4x1xf32>
    %41 = vector.broadcast %40 : vector<32x4x1xf32> to vector<32x4x8xf32>
    %42 = arith.mulf %37, %41 : vector<32x4x8xf32>
    "tpu.trace_start"() <{level = 10 : i32, message = "gpt,gtc->gpc"}> : () -> ()
    %cst_32 = arith.constant dense<0.000000e+00> : vector<32x4x8xf32>
    %43 = tpu.matmul %42, %29, %cst_32 {dimension_numbers = #tpu.dot_dimension_numbers<[2], [1], [1], [2], [0, 0, 0, 1, 1, 2], [0], [0]>} : vector<32x4x8xf32>, vector<32x8x8xf32>, vector<32x4x8xf32> -> vector<32x4x8xf32>
    "tpu.trace_stop"() : () -> ()
    %44 = vector.extract_strided_slice %8 {offsets = [0, 0, 8], sizes = [32, 4, 8], strides = [1, 1, 1]} : vector<32x4x32xf32> to vector<32x4x8xf32>
    %45 = vector.extract_strided_slice %17 {offsets = [0, 0, 8], sizes = [32, 8, 8], strides = [1, 1, 1]} : vector<32x8x32xf32> to vector<32x8x8xf32>
    %46 = vector.extract_strided_slice %26 {offsets = [0, 0, 8], sizes = [32, 8, 8], strides = [1, 1, 1]} : vector<32x8x32xf32> to vector<32x8x8xf32>
    "tpu.trace_start"() <{level = 10 : i32, message = "gpc,gtc->gpt"}> : () -> ()
    %cst_33 = arith.constant dense<0.000000e+00> : vector<32x4x8xf32>
    %47 = tpu.matmul %44, %45, %cst_33 {dimension_numbers = #tpu.dot_dimension_numbers<[2], [2], [1], [1], [0, 0, 0, 1, 1, 1], [0], [0]>} : vector<32x4x8xf32>, vector<32x8x8xf32>, vector<32x4x8xf32> -> vector<32x4x8xf32>
    "tpu.trace_stop"() : () -> ()
    %cst_34 = arith.constant 5.000000e-01 : f32
    %48 = vector.broadcast %cst_34 : f32 to vector<32x4x8xf32>
    %49 = arith.mulf %47, %48 : vector<32x4x8xf32>
    %cst_35 = arith.constant dense<0xFF800000> : vector<32x4xf32>
    %50 = vector.multi_reduction <maximumf>, %49, %cst_35 [2] : vector<32x4x8xf32> to vector<32x4xf32>
    %51 = vector.shape_cast %50 : vector<32x4xf32> to vector<32x4x1xf32>
    %52 = vector.broadcast %51 : vector<32x4x1xf32> to vector<32x4x8xf32>
    %53 = arith.subf %49, %52 : vector<32x4x8xf32>
    %54 = math.exp %53 : vector<32x4x8xf32>
    %cst_36 = arith.constant dense<0.000000e+00> : vector<32x4xf32>
    %55 = vector.multi_reduction <add>, %54, %cst_36 [2] : vector<32x4x8xf32> to vector<32x4xf32>
    %56 = vector.shape_cast %55 : vector<32x4xf32> to vector<32x4x1xf32>
    %57 = tpu.reciprocal %56 {approx = true} : vector<32x4x1xf32> -> vector<32x4x1xf32>
    %58 = vector.broadcast %57 : vector<32x4x1xf32> to vector<32x4x8xf32>
    %59 = arith.mulf %54, %58 : vector<32x4x8xf32>
    "tpu.trace_start"() <{level = 10 : i32, message = "gpt,gtc->gpc"}> : () -> ()
    %cst_37 = arith.constant dense<0.000000e+00> : vector<32x4x8xf32>
    %60 = tpu.matmul %59, %46, %cst_37 {dimension_numbers = #tpu.dot_dimension_numbers<[2], [1], [1], [2], [0, 0, 0, 1, 1, 2], [0], [0]>} : vector<32x4x8xf32>, vector<32x8x8xf32>, vector<32x4x8xf32> -> vector<32x4x8xf32>
    "tpu.trace_stop"() : () -> ()
    %61 = vector.extract_strided_slice %8 {offsets = [0, 0, 16], sizes = [32, 4, 8], strides = [1, 1, 1]} : vector<32x4x32xf32> to vector<32x4x8xf32>
    %62 = vector.extract_strided_slice %17 {offsets = [0, 0, 16], sizes = [32, 8, 8], strides = [1, 1, 1]} : vector<32x8x32xf32> to vector<32x8x8xf32>
    %63 = vector.extract_strided_slice %26 {offsets = [0, 0, 16], sizes = [32, 8, 8], strides = [1, 1, 1]} : vector<32x8x32xf32> to vector<32x8x8xf32>
    "tpu.trace_start"() <{level = 10 : i32, message = "gpc,gtc->gpt"}> : () -> ()
    %cst_38 = arith.constant dense<0.000000e+00> : vector<32x4x8xf32>
    %64 = tpu.matmul %61, %62, %cst_38 {dimension_numbers = #tpu.dot_dimension_numbers<[2], [2], [1], [1], [0, 0, 0, 1, 1, 1], [0], [0]>} : vector<32x4x8xf32>, vector<32x8x8xf32>, vector<32x4x8xf32> -> vector<32x4x8xf32>
    "tpu.trace_stop"() : () -> ()
    %cst_39 = arith.constant 5.000000e-01 : f32
    %65 = vector.broadcast %cst_39 : f32 to vector<32x4x8xf32>
    %66 = arith.mulf %64, %65 : vector<32x4x8xf32>
    %cst_40 = arith.constant dense<0xFF800000> : vector<32x4xf32>
    %67 = vector.multi_reduction <maximumf>, %66, %cst_40 [2] : vector<32x4x8xf32> to vector<32x4xf32>
    %68 = vector.shape_cast %67 : vector<32x4xf32> to vector<32x4x1xf32>
    %69 = vector.broadcast %68 : vector<32x4x1xf32> to vector<32x4x8xf32>
    %70 = arith.subf %66, %69 : vector<32x4x8xf32>
    %71 = math.exp %70 : vector<32x4x8xf32>
    %cst_41 = arith.constant dense<0.000000e+00> : vector<32x4xf32>
    %72 = vector.multi_reduction <add>, %71, %cst_41 [2] : vector<32x4x8xf32> to vector<32x4xf32>
    %73 = vector.shape_cast %72 : vector<32x4xf32> to vector<32x4x1xf32>
    %74 = tpu.reciprocal %73 {approx = true} : vector<32x4x1xf32> -> vector<32x4x1xf32>
    %75 = vector.broadcast %74 : vector<32x4x1xf32> to vector<32x4x8xf32>
    %76 = arith.mulf %71, %75 : vector<32x4x8xf32>
    "tpu.trace_start"() <{level = 10 : i32, message = "gpt,gtc->gpc"}> : () -> ()
    %cst_42 = arith.constant dense<0.000000e+00> : vector<32x4x8xf32>
    %77 = tpu.matmul %76, %63, %cst_42 {dimension_numbers = #tpu.dot_dimension_numbers<[2], [1], [1], [2], [0, 0, 0, 1, 1, 2], [0], [0]>} : vector<32x4x8xf32>, vector<32x8x8xf32>, vector<32x4x8xf32> -> vector<32x4x8xf32>
    "tpu.trace_stop"() : () -> ()
    %78 = vector.extract_strided_slice %8 {offsets = [0, 0, 24], sizes = [32, 4, 8], strides = [1, 1, 1]} : vector<32x4x32xf32> to vector<32x4x8xf32>
    %79 = vector.extract_strided_slice %17 {offsets = [0, 0, 24], sizes = [32, 8, 8], strides = [1, 1, 1]} : vector<32x8x32xf32> to vector<32x8x8xf32>
    %80 = vector.extract_strided_slice %26 {offsets = [0, 0, 24], sizes = [32, 8, 8], strides = [1, 1, 1]} : vector<32x8x32xf32> to vector<32x8x8xf32>
    "tpu.trace_start"() <{level = 10 : i32, message = "gpc,gtc->gpt"}> : () -> ()
    %cst_43 = arith.constant dense<0.000000e+00> : vector<32x4x8xf32>
    %81 = tpu.matmul %78, %79, %cst_43 {dimension_numbers = #tpu.dot_dimension_numbers<[2], [2], [1], [1], [0, 0, 0, 1, 1, 1], [0], [0]>} : vector<32x4x8xf32>, vector<32x8x8xf32>, vector<32x4x8xf32> -> vector<32x4x8xf32>
    "tpu.trace_stop"() : () -> ()
    %cst_44 = arith.constant 5.000000e-01 : f32
    %82 = vector.broadcast %cst_44 : f32 to vector<32x4x8xf32>
    %83 = arith.mulf %81, %82 : vector<32x4x8xf32>
    %cst_45 = arith.constant dense<0xFF800000> : vector<32x4xf32>
    %84 = vector.multi_reduction <maximumf>, %83, %cst_45 [2] : vector<32x4x8xf32> to vector<32x4xf32>
    %85 = vector.shape_cast %84 : vector<32x4xf32> to vector<32x4x1xf32>
    %86 = vector.broadcast %85 : vector<32x4x1xf32> to vector<32x4x8xf32>
    %87 = arith.subf %83, %86 : vector<32x4x8xf32>
    %88 = math.exp %87 : vector<32x4x8xf32>
    %cst_46 = arith.constant dense<0.000000e+00> : vector<32x4xf32>
    %89 = vector.multi_reduction <add>, %88, %cst_46 [2] : vector<32x4x8xf32> to vector<32x4xf32>
    %90 = vector.shape_cast %89 : vector<32x4xf32> to vector<32x4x1xf32>
    %91 = tpu.reciprocal %90 {approx = true} : vector<32x4x1xf32> -> vector<32x4x1xf32>
    %92 = vector.broadcast %91 : vector<32x4x1xf32> to vector<32x4x8xf32>
    %93 = arith.mulf %88, %92 : vector<32x4x8xf32>
    "tpu.trace_start"() <{level = 10 : i32, message = "gpt,gtc->gpc"}> : () -> ()
    %cst_47 = arith.constant dense<0.000000e+00> : vector<32x4x8xf32>
    %94 = tpu.matmul %93, %80, %cst_47 {dimension_numbers = #tpu.dot_dimension_numbers<[2], [1], [1], [2], [0, 0, 0, 1, 1, 2], [0], [0]>} : vector<32x4x8xf32>, vector<32x8x8xf32>, vector<32x4x8xf32> -> vector<32x4x8xf32>
    "tpu.trace_stop"() : () -> ()
    %95 = tpu.concatenate %43, %60, %77, %94 in 2 : vector<32x4x8xf32>, vector<32x4x8xf32>, vector<32x4x8xf32>, vector<32x4x8xf32> -> vector<32x4x32xf32>
    %c0_48 = arith.constant 0 : index
    %c0_49 = arith.constant 0 : index
    %c0_50 = arith.constant 0 : index
    %96 = vector.load %arg10[%c0_48, %c0_49, %c0_50] : memref<32x4x32xf32, #tpu.memory_space<vmem>>, vector<32x4x32xf32>
    tpu.vector_store %arg10[%c0_48, %c0_49, %c0_50], %95 {strides = array<i32>} : memref<32x4x32xf32, #tpu.memory_space<vmem>>, vector<32x4x32xf32>,
    return
  }
  func.func @transform_0(%arg0: i32) -> (i32, i32, i32) {
    %c0_i32 = arith.constant 0 : i32
    %c0_i32_0 = arith.constant 0 : i32
    %c0_i32_1 = arith.constant 0 : i32
    return %arg0, %c0_i32, %c0_i32_0 : i32, i32, i32
  }
  func.func @transform_1(%arg0: i32) -> (i32, i32, i32) {
    %c0_i32 = arith.constant 0 : i32
    %c0_i32_0 = arith.constant 0 : i32
    %c0_i32_1 = arith.constant 0 : i32
    return %arg0, %c0_i32, %c0_i32_0 : i32, i32, i32
  }
  func.func @transform_2(%arg0: i32) -> (i32, i32, i32) {
    %c0_i32 = arith.constant 0 : i32
    %c0_i32_0 = arith.constant 0 : i32
    %c0_i32_1 = arith.constant 0 : i32
    return %arg0, %c0_i32, %c0_i32_0 : i32, i32, i32
  }
  func.func @transform_3(%arg0: i32) -> (i32, i32, i32) {
    %c0_i32 = arith.constant 0 : i32
    %c0_i32_0 = arith.constant 0 : i32
    %c0_i32_1 = arith.constant 0 : i32
    %c0_i32_2 = arith.constant 0 : i32
    return %c0_i32, %c0_i32_0, %c0_i32_1 : i32, i32, i32
  }
  func.func @transform_4(%arg0: i32) -> (i32, i32, i32) {
    %c0_i32 = arith.constant 0 : i32
    %c0_i32_0 = arith.constant 0 : i32
    %c0_i32_1 = arith.constant 0 : i32
    %c0_i32_2 = arith.constant 0 : i32
    return %c0_i32, %c0_i32_0, %c0_i32_1 : i32, i32, i32
  }
  func.func @transform_5(%arg0: i32) -> (i32, i32, i32) {
    %c0_i32 = arith.constant 0 : i32
    %c0_i32_0 = arith.constant 0 : i32
    %c0_i32_1 = arith.constant 0 : i32
    %c0_i32_2 = arith.constant 0 : i32
    return %c0_i32, %c0_i32_0, %c0_i32_1 : i32, i32, i32
  }
  func.func @transform_6(%arg0: i32) -> (i32, i32, i32) {
    %c0_i32 = arith.constant 0 : i32
    %c0_i32_0 = arith.constant 0 : i32
    %c0_i32_1 = arith.constant 0 : i32
    %c0_i32_2 = arith.constant 0 : i32
    return %c0_i32, %c0_i32_0, %c0_i32_1 : i32, i32, i32
  }
  func.func @transform_7(%arg0: i32) -> (i32, i32, i32) {
    %c0_i32 = arith.constant 0 : i32
    %c0_i32_0 = arith.constant 0 : i32
    %c0_i32_1 = arith.constant 0 : i32
    %c0_i32_2 = arith.constant 0 : i32
    return %c0_i32, %c0_i32_0, %c0_i32_1 : i32, i32, i32
  }
  func.func @transform_8(%arg0: i32) -> (i32, i32, i32) {
    %c0_i32 = arith.constant 0 : i32
    %c0_i32_0 = arith.constant 0 : i32
    %c0_i32_1 = arith.constant 0 : i32
    %c0_i32_2 = arith.constant 0 : i32
    return %c0_i32, %c0_i32_0, %c0_i32_1 : i32, i32, i32
  }
  func.func @transform_9(%arg0: i32) -> (i32, i32, i32) {
    %c0_i32 = arith.constant 0 : i32
    %c0_i32_0 = arith.constant 0 : i32
    %c0_i32_1 = arith.constant 0 : i32
    return %arg0, %c0_i32, %c0_i32_0 : i32, i32, i32
  }
}

module attributes {stable_mosaic.version = 11 : i64} {
  func.func @_fc_matmul_kernel(%arg0: i32, %arg1: memref<128x32xf32, #tpu.memory_space<vmem>>, %arg2: memref<32x32xf32, #tpu.memory_space<vmem>>, %arg3: memref<1x32xf32, #tpu.memory_space<vmem>>, %arg4: memref<128x32xf32, #tpu.memory_space<vmem>>, %arg5: memref<1x2x32xf32, #tpu.memory_space<vmem>>) attributes {dimension_semantics = [#tpu.dimension_semantics<parallel>], iteration_bounds = array<i64: 1>, scalar_prefetch = 0 : i64, scratch_operands = 0 : i64, tpu.core_type = #tpu.core_type<tc>, window_params = [{transform_indices = @transform_0, window_bounds = array<i64: 128, 32>}, {pipeline_mode = #tpu.pipeline_mode<synchronous>, transform_indices = @transform_1, window_bounds = array<i64: 32, 32>}, {pipeline_mode = #tpu.pipeline_mode<synchronous>, transform_indices = @transform_2, window_bounds = array<i64: 1, 32>}, {transform_indices = @transform_3, window_bounds = array<i64: 128, 32>}, {transform_indices = @transform_4, window_bounds = array<i64: 1, 2, 32>}]} {
    %c0 = arith.constant 0 : index
    %c0_0 = arith.constant 0 : index
    %0 = vector.load %arg1[%c0, %c0_0] : memref<128x32xf32, #tpu.memory_space<vmem>>, vector<128x32xf32>
    %c0_1 = arith.constant 0 : index
    %c0_2 = arith.constant 0 : index
    %1 = vector.load %arg2[%c0_1, %c0_2] : memref<32x32xf32, #tpu.memory_space<vmem>>, vector<32x32xf32>
    %cst = arith.constant dense<0.000000e+00> : vector<128x32xf32>
    %2 = tpu.matmul %0, %1, %cst {dimension_numbers = #tpu.dot_dimension_numbers<[1], [0], [0], [1], [0, 0, 1, 1], [], []>} : vector<128x32xf32>, vector<32x32xf32>, vector<128x32xf32> -> vector<128x32xf32>
    %c0_3 = arith.constant 0 : index
    %c0_4 = arith.constant 0 : index
    %3 = vector.load %arg3[%c0_3, %c0_4] : memref<1x32xf32, #tpu.memory_space<vmem>>, vector<1x32xf32>
    %4 = vector.broadcast %3 : vector<1x32xf32> to vector<128x32xf32>
    %5 = arith.addf %2, %4 : vector<128x32xf32>
    %c0_5 = arith.constant 0 : index
    %c0_6 = arith.constant 0 : index
    %6 = vector.load %arg4[%c0_5, %c0_6] : memref<128x32xf32, #tpu.memory_space<vmem>>, vector<128x32xf32>
    tpu.vector_store %arg4[%c0_5, %c0_6], %5 {strides = array<i32>} : memref<128x32xf32, #tpu.memory_space<vmem>>, vector<128x32xf32>,
    %c128_i32 = arith.constant 128 : i32
    %7 = arith.muli %arg0, %c128_i32 : i32
    %8 = tpu.iota {dimensions = array<i32: 0>} : vector<128x32xi32>
    %9 = vector.broadcast %7 : i32 to vector<128x32xi32>
    %10 = arith.addi %9, %8 : vector<128x32xi32>
    %c128_i32_7 = arith.constant 128 : i32
    %11 = vector.broadcast %c128_i32_7 : i32 to vector<128x32xi32>
    %12 = arith.cmpi slt, %10, %11 : vector<128x32xi32>
    %cst_8 = arith.constant 0.000000e+00 : f32
    %13 = vector.broadcast %cst_8 : f32 to vector<128x32xf32>
    %14 = arith.select %12, %5, %13 : vector<128x32xi1>, vector<128x32xf32>
    %cst_9 = arith.constant dense<0.000000e+00> : vector<32xf32>
    %15 = vector.multi_reduction <add>, %14, %cst_9 [0] : vector<128x32xf32> to vector<32xf32>
    %16 = vector.shape_cast %15 : vector<32xf32> to vector<1x32xf32>
    %17 = arith.mulf %14, %14 : vector<128x32xf32>
    %cst_10 = arith.constant dense<0.000000e+00> : vector<32xf32>
    %18 = vector.multi_reduction <add>, %17, %cst_10 [0] : vector<128x32xf32> to vector<32xf32>
    %19 = vector.shape_cast %18 : vector<32xf32> to vector<1x32xf32>
    %20 = tpu.concatenate %16, %19 in 0 : vector<1x32xf32>, vector<1x32xf32> -> vector<2x32xf32>
    %c0_11 = arith.constant 0 : index
    %c0_12 = arith.constant 0 : index
    %c0_13 = arith.constant 0 : index
    %21 = vector.load %arg5[%c0_11, %c0_12, %c0_13] : memref<1x2x32xf32, #tpu.memory_space<vmem>>, vector<1x2x32xf32>
    %22 = vector.shape_cast %21 : vector<1x2x32xf32> to vector<2x32xf32>
    %23 = vector.shape_cast %20 : vector<2x32xf32> to vector<1x2x32xf32>
    tpu.vector_store %arg5[%c0_11, %c0_12, %c0_13], %23 {strides = array<i32>} : memref<1x2x32xf32, #tpu.memory_space<vmem>>, vector<1x2x32xf32>,
    return
  }
  func.func @transform_0(%arg0: i32) -> (i32, i32) {
    %c0_i32 = arith.constant 0 : i32
    %c0_i32_0 = arith.constant 0 : i32
    return %arg0, %c0_i32 : i32, i32
  }
  func.func @transform_1(%arg0: i32) -> (i32, i32) {
    %c0_i32 = arith.constant 0 : i32
    %c0_i32_0 = arith.constant 0 : i32
    %c0_i32_1 = arith.constant 0 : i32
    return %c0_i32, %c0_i32_0 : i32, i32
  }
  func.func @transform_2(%arg0: i32) -> (i32, i32) {
    %c0_i32 = arith.constant 0 : i32
    %c0_i32_0 = arith.constant 0 : i32
    %c0_i32_1 = arith.constant 0 : i32
    return %c0_i32, %c0_i32_0 : i32, i32
  }
  func.func @transform_3(%arg0: i32) -> (i32, i32) {
    %c0_i32 = arith.constant 0 : i32
    %c0_i32_0 = arith.constant 0 : i32
    return %arg0, %c0_i32 : i32, i32
  }
  func.func @transform_4(%arg0: i32) -> (i32, i32, i32) {
    %c0_i32 = arith.constant 0 : i32
    %c0_i32_0 = arith.constant 0 : i32
    %c0_i32_1 = arith.constant 0 : i32
    return %arg0, %c0_i32, %c0_i32_0 : i32, i32, i32
  }
}

module attributes {stable_mosaic.version = 11 : i64} {
  func.func @_scale_shift_relu_kernel(%arg0: i32, %arg1: memref<32x128xf32, #tpu.memory_space<vmem>>, %arg2: memref<1x128xf32, #tpu.memory_space<vmem>>, %arg3: memref<1x128xf32, #tpu.memory_space<vmem>>, %arg4: memref<32x128xf32, #tpu.memory_space<vmem>>) attributes {dimension_semantics = [#tpu.dimension_semantics<parallel>], iteration_bounds = array<i64: 1>, scalar_prefetch = 0 : i64, scratch_operands = 0 : i64, tpu.core_type = #tpu.core_type<tc>, window_params = [{transform_indices = @transform_0, window_bounds = array<i64: 32, 128>}, {pipeline_mode = #tpu.pipeline_mode<synchronous>, transform_indices = @transform_1, window_bounds = array<i64: 1, 128>}, {pipeline_mode = #tpu.pipeline_mode<synchronous>, transform_indices = @transform_2, window_bounds = array<i64: 1, 128>}, {transform_indices = @transform_3, window_bounds = array<i64: 32, 128>}]} {
    %c0 = arith.constant 0 : index
    %c0_0 = arith.constant 0 : index
    %0 = vector.load %arg1[%c0, %c0_0] : memref<32x128xf32, #tpu.memory_space<vmem>>, vector<32x128xf32>
    %c0_1 = arith.constant 0 : index
    %c0_2 = arith.constant 0 : index
    %1 = vector.load %arg2[%c0_1, %c0_2] : memref<1x128xf32, #tpu.memory_space<vmem>>, vector<1x128xf32>
    %2 = vector.broadcast %1 : vector<1x128xf32> to vector<32x128xf32>
    %3 = arith.mulf %0, %2 : vector<32x128xf32>
    %c0_3 = arith.constant 0 : index
    %c0_4 = arith.constant 0 : index
    %4 = vector.load %arg3[%c0_3, %c0_4] : memref<1x128xf32, #tpu.memory_space<vmem>>, vector<1x128xf32>
    %5 = vector.broadcast %4 : vector<1x128xf32> to vector<32x128xf32>
    %6 = arith.addf %3, %5 : vector<32x128xf32>
    %cst = arith.constant 0.000000e+00 : f32
    %7 = vector.broadcast %cst : f32 to vector<32x128xf32>
    %8 = arith.maximumf %6, %7 : vector<32x128xf32>
    %c0_5 = arith.constant 0 : index
    %c0_6 = arith.constant 0 : index
    %9 = vector.load %arg4[%c0_5, %c0_6] : memref<32x128xf32, #tpu.memory_space<vmem>>, vector<32x128xf32>
    tpu.vector_store %arg4[%c0_5, %c0_6], %8 {strides = array<i32>} : memref<32x128xf32, #tpu.memory_space<vmem>>, vector<32x128xf32>,
    return
  }
  func.func @transform_0(%arg0: i32) -> (i32, i32) {
    %c0_i32 = arith.constant 0 : i32
    %c0_i32_0 = arith.constant 0 : i32
    return %arg0, %c0_i32 : i32, i32
  }
  func.func @transform_1(%arg0: i32) -> (i32, i32) {
    %c0_i32 = arith.constant 0 : i32
    %c0_i32_0 = arith.constant 0 : i32
    %c0_i32_1 = arith.constant 0 : i32
    return %c0_i32, %c0_i32_0 : i32, i32
  }
  func.func @transform_2(%arg0: i32) -> (i32, i32) {
    %c0_i32 = arith.constant 0 : i32
    %c0_i32_0 = arith.constant 0 : i32
    %c0_i32_1 = arith.constant 0 : i32
    return %c0_i32, %c0_i32_0 : i32, i32
  }
  func.func @transform_3(%arg0: i32) -> (i32, i32) {
    %c0_i32 = arith.constant 0 : i32
    %c0_i32_0 = arith.constant 0 : i32
    return %arg0, %c0_i32 : i32, i32
  }
}

</mosaic_0001>

<bundles_post_ra>
// kernel: transform_attention_forward.6
= control target key start
LH: loop header
LB: loop body
LE: loop exit
PB: predicated region body
PF: predicated region fallthrough
CT: control target
= control target key end

     0   :  { %10 = vsyncpa [#allocation3], 0  ;;  %s659_s0 = inlined_call_operand.hbm [shape: f32[128,32], index: 0, kind: input, shape index: {}]   ;;  %s660_s1 = inlined_call_operand.hbm [shape: f32[32,32], index: 1, kind: input, shape index: {}]   ;;  %s661_s2 = inlined_call_operand.vmem [shape: f32[1,32], index: 2, kind: input, shape index: {}]   ;;  %s662_s3 = inlined_call_operand.vmem [shape: f32[128,32], index: 3, kind: output, shape index: {0}]   ;;  %s663_s4 = inlined_call_operand.vmem [shape: f32[1,2,32], index: 4, kind: output, shape index: {1}]  }
   0x1   :  { %s16_s17 = sshll.u32 %s659_s0, 4  ;;  %s17_s17 = int_to_ptr.hbm [resolvable:$true] %s16_s17 }
   0x2   :  { %11 = vsyncpa [#allocation5], 0  ;;  %s458_s18 = smov [#allocation2]   ;;  %s29_s22 = sshll.u32 %s660_s1, 4  ;;  %s30_s22 = int_to_ptr.hbm [resolvable:$true] %s29_s22 }
   0x3   :  { %s18_s19 = sshll.u32 %s458_s18, 4  ;;  %s459_s23 = smov 128   ;;  %s19_s19 = int_to_ptr.vmem [resolvable:$true] %s18_s19 }
   0x4   :  { %s460_s24 = smov 8   ;;  %s461_s25 = smov [#allocation4]  }
   0x5   :  { %24 = dma.hbm_to_vmem [thread:$0]  %s17_s17, 2048, %s19_s19, [#allocation3], %s459_s23, %s459_s23, %s460_s24  }
   0x6   :  { %s31_s26 = sshll.u32 %s461_s25, 4  ;;  %s32_s26 = int_to_ptr.vmem [resolvable:$true] %s31_s26 }
   0x7   :  { %37 = dma.hbm_to_vmem [thread:$0]  %s30_s22, 512, %s32_s26, [#allocation5], %s459_s23, %s459_s23, %s460_s24  }
   0x8   :  { %454 = dma.done.wait [#allocation3], 2048  }
   0x9   :  { %455 = vsyncadd [#allocation3], 4294965248 }
   0xa   :  { %456 = dma.done.wait [#allocation5], 512  }
   0xb   :  { %457 = vsyncadd [#allocation5], 4294966784  ;;  %v67_v0 = vld [vmem:[#allocation4 + $0x18] sm:$0xff]  ;;  %v66_v1 = vld [vmem:[#allocation4 + $0x10] sm:$0xff]  ;;  %vm72_vm0 = vcmask 261120   ;;  %vm359_vm1 = vcmask 1040384  }
   0xc   :  { %133 = vmatpush.msra.mxu0 %v67_v0  ;;  %389 = vmatpush.msra.mxu1 %v67_v0  ;;  %v65_v2 = vld [vmem:[#allocation4 + $0x8] sm:$0xff]  ;;  %v64_v3 = vld [vmem:[#allocation4] sm:$0xff]  ;;  %v50_v12 = vld [vmem:[#allocation2 + $0x10] sm:$0xff]  ;;  %vm361_vm2 = vcmask 254976  }
   0xd   :  { %390 = vmatpush.msra.mxu2 %v67_v0  ;;  %391 = vmatpush.msra.mxu3 %v67_v0  ;;  %v48_v4 = vld [vmem:[#allocation2] sm:$0xff]  ;;  %v49_v8 = vld [vmem:[#allocation2 + $0x8] sm:$0xff]  ;;  %v54_v13 = vld [vmem:[#allocation2 + $0x30] sm:$0xff] }
   0xe   :  { %134 = vmatpush.msra.mxu0 %v66_v1  ;;  %392 = vmatpush.msra.mxu1 %v66_v1  ;;  %v52_v5 = vld [vmem:[#allocation2 + $0x20] sm:$0xff]  ;;  %v53_v9 = vld [vmem:[#allocation2 + $0x28] sm:$0xff]  ;;  %v58_v14 = vld [vmem:[#allocation2 + $0x50] sm:$0xff] }
   0xf   :  { %393 = vmatpush.msra.mxu2 %v66_v1  ;;  %394 = vmatpush.msra.mxu3 %v66_v1  ;;  %v56_v6 = vld [vmem:[#allocation2 + $0x40] sm:$0xff]  ;;  %v57_v10 = vld [vmem:[#allocation2 + $0x48] sm:$0xff]  ;;  %v62_v15 = vld [vmem:[#allocation2 + $0x70] sm:$0xff] }
  0x10   :  { %135 = vmatpush.msra.mxu0 %v65_v2  ;;  %395 = vmatpush.msra.mxu1 %v65_v2  ;;  %v60_v7 = vld [vmem:[#allocation2 + $0x60] sm:$0xff]  ;;  %v61_v11 = vld [vmem:[#allocation2 + $0x68] sm:$0xff]  ;;  %v51_v16 = vld [vmem:[#allocation2 + $0x18] sm:$0xff] }
  0x11   :  { %396 = vmatpush.msra.mxu2 %v65_v2  ;;  %397 = vmatpush.msra.mxu3 %v65_v2  ;;  %v55_v17 = vld [vmem:[#allocation2 + $0x38] sm:$0xff]  ;;  %v512_v20 = vld [vmem:[%s661_s2] ss:$0 sm:$0xff] }
  0x12   :  { %136 = vmatpush.msra.mxu0 %v64_v3  ;;  %398 = vmatpush.msra.mxu1 %v64_v3  ;;  %v59_v18 = vld [vmem:[#allocation2 + $0x58] sm:$0xff] }
  0x13   :  { %373 = vmatmul.msk.f32.vlgmr.msra.gmra.mxu0 %vm72_vm0, %v48_v4  ;;  %377 = vmatmul.msk.f32.vlgmr.msra.gmra.mxu1 %vm72_vm0, %v52_v5  ;;  %v63_v19 = vld [vmem:[#allocation2 + $0x78] sm:$0xff] }
  0x14   :  { %399 = vmatpush.msra.mxu2 %v64_v3  ;;  %400 = vmatpush.msra.mxu3 %v64_v3 }
  0x15   :  { %381 = vmatmul.msk.f32.vlgmr.msra.gmra.mxu2 %vm72_vm0, %v56_v6  ;;  %385 = vmatmul.msk.f32.vlgmr.msra.gmra.mxu3 %vm72_vm0, %v60_v7 }
  0x1b   :  { %374 = vmatmul.msk.f32.gmra.mxu0 %vm72_vm0, %v49_v8  ;;  %378 = vmatmul.msk.f32.gmra.mxu1 %vm72_vm0, %v53_v9 }
  0x1d   :  { %382 = vmatmul.msk.f32.gmra.mxu2 %vm72_vm0, %v57_v10  ;;  %386 = vmatmul.msk.f32.gmra.mxu3 %vm72_vm0, %v61_v11 }
  0x23   :  { %375 = vmatmul.msk.f32.gmra.mxu0 %vm72_vm0, %v50_v12  ;;  %379 = vmatmul.msk.f32.gmra.mxu1 %vm72_vm0, %v54_v13 }
  0x25   :  { %383 = vmatmul.msk.f32.gmra.mxu2 %vm72_vm0, %v58_v14  ;;  %387 = vmatmul.msk.f32.gmra.mxu3 %vm72_vm0, %v62_v15 }
  0x2b   :  { %376 = vmatmul.msk.f32.gmra.mxu0 %vm72_vm0, %v51_v16  ;;  %380 = vmatmul.msk.f32.gmra.mxu1 %vm72_vm0, %v55_v17 }
  0x2d   :  { %384 = vmatmul.msk.f32.gmra.mxu2 %vm72_vm0, %v59_v18  ;;  %388 = vmatmul.msk.f32.gmra.mxu3 %vm72_vm0, %v63_v19 }
  0x90   :  { %v138_v21 = vpop.f32.mrf.mxu0  ;;  %v150_v22 = vpop.f32.mrf.mxu1 }
  0x91   :  { %v139_v23 = vadd.f32 %v512_v20, %v138_v21  ;;  %v151_v24 = vadd.f32 %v512_v20, %v150_v22 }
  0x93   :  { %186 = vst.msk [vmem:[%s662_s3] sm:$0xff] %vm72_vm0, %v139_v23  ;;  %v306_v42 = vmul.f32 %v139_v23, %v139_v23  ;;  %v269_v45 = vsel %vm72_vm0, %v139_v23, 0.0  ;;  %v310_v61 = vmul.f32 %v151_v24, %v151_v24  ;;  %v276_v2 = vsel %vm72_vm0, %v151_v24, 0.0 }
  0x94   :  { %190 = vst.msk [vmem:[%s662_s3 + $0x20] sm:$0xff] %vm72_vm0, %v151_v24 }
  0x95   :  { %v322_v51 = vsel %vm72_vm0, %v306_v42, 0.0  ;;  %v329_v7 = vsel %vm72_vm0, %v310_v61, 0.0 }
  0x98   :  { %v141_v25 = vpop.f32.mrf.mxu0  ;;  %v153_v26 = vpop.f32.mrf.mxu1 }
  0x99   :  { %v142_v27 = vadd.f32 %v512_v20, %v141_v25  ;;  %v154_v28 = vadd.f32 %v512_v20, %v153_v26  ;;  %v162_v29 = vpop.f32.mrf.mxu2  ;;  %v174_v30 = vpop.f32.mrf.mxu3 }
  0x9a   :  { %v527_v31 = vadd.f32 %v512_v20, %v162_v29  ;;  %v530_v32 = vadd.f32 %v512_v20, %v174_v30 }
  0x9b   :  { %187 = vst.msk [vmem:[%s662_s3 + $0x8] sm:$0xff] %vm72_vm0, %v142_v27  ;;  %v307_v41 = vmul.f32 %v142_v27, %v142_v27  ;;  %v270_v43 = vsel %vm72_vm0, %v142_v27, 0.0  ;;  %v311_v3 = vmul.f32 %v154_v28, %v154_v28  ;;  %v278_v8 = vsel %vm72_vm0, %v154_v28, 0.0 }
  0x9c   :  { %191 = vst.msk [vmem:[%s662_s3 + $0x28] sm:$0xff] %vm72_vm0, %v154_v28  ;;  %v271_v48 = vadd.f32 %v270_v43, %v269_v45  ;;  %v314_v23 = vmul.f32 %v527_v31, %v527_v31  ;;  %v284_v28 = vsel %vm72_vm0, %v527_v31, 0.0  ;;  %v318_v45 = vmul.f32 %v530_v32, %v530_v32 }
  0x9d   :  { %194 = vst.msk [vmem:[%s662_s3 + $0x40] sm:$0xff] %vm72_vm0, %v527_v31  ;;  %v323_v46 = vsel %vm72_vm0, %v307_v41, 0.0  ;;  %v331_v13 = vsel %vm72_vm0, %v311_v3, 0.0 }
  0x9e   :  { %198 = vst.msk [vmem:[%s662_s3 + $0x60] sm:$0xff] %vm72_vm0, %v530_v32  ;;  %v324_v57 = vadd.f32 %v323_v46, %v322_v51 }
  0xa0   :  { %v144_v33 = vpop.f32.mrf.mxu0  ;;  %v156_v34 = vpop.f32.mrf.mxu1 }
  0xa1   :  { %v145_v35 = vadd.f32 %v512_v20, %v144_v33  ;;  %v157_v36 = vadd.f32 %v512_v20, %v156_v34  ;;  %v165_v37 = vpop.f32.mrf.mxu2  ;;  %v177_v38 = vpop.f32.mrf.mxu3  ;;  %v337_v33 = vsel %vm72_vm0, %v314_v23, 0.0 }
  0xa2   :  { %v553_v39 = vadd.f32 %v512_v20, %v165_v37  ;;  %v556_v40 = vadd.f32 %v512_v20, %v177_v38 }
  0xa3   :  { %188 = vst.msk [vmem:[%s662_s3 + $0x10] sm:$0xff] %vm72_vm0, %v145_v35  ;;  %v308_v44 = vmul.f32 %v145_v35, %v145_v35  ;;  %v272_v47 = vsel %vm72_vm0, %v145_v35, 0.0  ;;  %v312_v9 = vmul.f32 %v157_v36, %v157_v36  ;;  %v280_v14 = vsel %vm72_vm0, %v157_v36, 0.0 }
  0xa4   :  { %192 = vst.msk [vmem:[%s662_s3 + $0x30] sm:$0xff] %vm72_vm0, %v157_v36  ;;  %v273_v58 = vadd.f32 %v272_v47, %v271_v48  ;;  %v286_v34 = vsel %vm72_vm0, %v553_v39, 0.0 }
  0xa5   :  { %195 = vst.msk [vmem:[%s662_s3 + $0x48] sm:$0xff] %vm72_vm0, %v553_v39  ;;  %v325_v52 = vsel %vm72_vm0, %v308_v44, 0.0  ;;  %v333_v24 = vsel %vm72_vm0, %v312_v9, 0.0 }
  0xa6   :  { %199 = vst.msk [vmem:[%s662_s3 + $0x68] sm:$0xff] %vm72_vm0, %v556_v40  ;;  %v326_v0 = vadd.f32 %v325_v52, %v324_v57 }
  0xa8   :  { %v147_v49 = vpop.f32.mrf.mxu0  ;;  %v159_v50 = vpop.f32.mrf.mxu1 }
  0xa9   :  { %v148_v53 = vadd.f32 %v512_v20, %v147_v49  ;;  %v160_v54 = vadd.f32 %v512_v20, %v159_v50  ;;  %v168_v55 = vpop.f32.mrf.mxu2  ;;  %v180_v56 = vpop.f32.mrf.mxu3  ;;  %v292_v49 = vsel %vm72_vm0, %v530_v32, 0.0  ;;  %v319_v50 = vmul.f32 %v556_v40, %v556_v40 }
  0xaa   :  { %v169_v59 = vadd.f32 %v512_v20, %v168_v55  ;;  %v586_v60 = vadd.f32 %v512_v20, %v180_v56 }
  0xab   :  { %189 = vst.msk [vmem:[%s662_s3 + $0x18] sm:$0xff] %vm72_vm0, %v148_v53  ;;  %v274_v62 = vsel %vm72_vm0, %v148_v53, 0.0  ;;  %v309_v63 = vmul.f32 %v148_v53, %v148_v53  ;;  %v313_v10 = vmul.f32 %v160_v54, %v160_v54  ;;  %v282_v15 = vsel %vm72_vm0, %v160_v54, 0.0 }
  0xac   :  { %v275_v1 = vadd.f32 %v274_v62, %v273_v58  ;;  %193 = vst.msk [vmem:[%s662_s3 + $0x38] sm:$0xff] %vm72_vm0, %v160_v54  ;;  %v316_v35 = vmul.f32 %v169_v59, %v169_v59  ;;  %v288_v41 = vsel %vm72_vm0, %v169_v59, 0.0  ;;  %v345_v53 = vsel %vm72_vm0, %v318_v45, 0.0 }
  0xad   :  { %v327_v4 = vsel %vm72_vm0, %v309_v63, 0.0  ;;  %196 = vst.msk [vmem:[%s662_s3 + $0x50] sm:$0xff] %vm72_vm0, %v169_v59  ;;  %v335_v25 = vsel %vm72_vm0, %v313_v10, 0.0  ;;  %v294_v54 = vsel %vm72_vm0, %v556_v40, 0.0  ;;  %v320_v55 = vmul.f32 %v586_v60, %v586_v60 }
  0xae   :  { %v277_v5 = vadd.f32 %v276_v2, %v275_v1  ;;  %v328_v6 = vadd.f32 %v327_v4, %v326_v0  ;;  %200 = vst.msk [vmem:[%s662_s3 + $0x70] sm:$0xff] %vm72_vm0, %v586_v60  ;;  %v341_v46 = vsel %vm72_vm0, %v316_v35, 0.0  ;;  %v347_v59 = vsel %vm72_vm0, %v319_v50, 0.0 }
  0xaf   :  { %v296_v32 = vsel %vm72_vm0, %v586_v60, 0.0  ;;  %v349_v0 = vsel %vm72_vm0, %v320_v55, 0.0 }
  0xb0   :  { %v330_v11 = vadd.f32 %v329_v7, %v328_v6  ;;  %v279_v12 = vadd.f32 %v278_v8, %v277_v5 }
  0xb1   :  { %v171_v16 = vpop.f32.mrf.mxu2  ;;  %v183_v17 = vpop.f32.mrf.mxu3 }
  0xb2   :  { %v281_v18 = vadd.f32 %v280_v14, %v279_v12  ;;  %v332_v19 = vadd.f32 %v331_v13, %v330_v11  ;;  %v172_v21 = vadd.f32 %v512_v20, %v171_v16  ;;  %v184_v22 = vadd.f32 %v512_v20, %v183_v17 }
  0xb3   :  { %v315_v20 = vmul.f32 %v553_v39, %v553_v39 }
  0xb4   :  { %v334_v26 = vadd.f32 %v333_v24, %v332_v19  ;;  %v283_v27 = vadd.f32 %v282_v15, %v281_v18  ;;  %197 = vst.msk [vmem:[%s662_s3 + $0x58] sm:$0xff] %vm72_vm0, %v172_v21  ;;  %v317_v36 = vmul.f32 %v172_v21, %v172_v21  ;;  %v290_v42 = vsel %vm72_vm0, %v172_v21, 0.0 }
  0xb5   :  { %201 = vst.msk [vmem:[%s662_s3 + $0x78] sm:$0xff] %vm72_vm0, %v184_v22  ;;  %v339_v31 = vsel %vm72_vm0, %v315_v20, 0.0  ;;  %v321_v56 = vmul.f32 %v184_v22, %v184_v22  ;;  %v298_v61 = vsel %vm72_vm0, %v184_v22, 0.0 }
  0xb6   :  { %v285_v29 = vadd.f32 %v284_v28, %v283_v27  ;;  %v336_v30 = vadd.f32 %v335_v25, %v334_v26  ;;  %v343_v47 = vsel %vm72_vm0, %v317_v36, 0.0 }
  0xb7   :  { %v351_v1 = vsel %vm72_vm0, %v321_v56, 0.0 }
  0xb8   :  { %v338_v37 = vadd.f32 %v337_v33, %v336_v30  ;;  %v287_v38 = vadd.f32 %v286_v34, %v285_v29 }
  0xba   :  { %v289_v43 = vadd.f32 %v288_v41, %v287_v38  ;;  %v340_v44 = vadd.f32 %v339_v31, %v338_v37 }
  0xbc   :  { %v342_v39 = vadd.f32 %v341_v46, %v340_v44  ;;  %v291_v48 = vadd.f32 %v290_v42, %v289_v43 }
  0xbe   :  { %v293_v51 = vadd.f32 %v292_v49, %v291_v48  ;;  %v344_v52 = vadd.f32 %v343_v47, %v342_v39 }
  0xc0   :  { %v346_v57 = vadd.f32 %v345_v53, %v344_v52  ;;  %v295_v58 = vadd.f32 %v294_v54, %v293_v51 }
  0xc2   :  { %v297_v62 = vadd.f32 %v296_v32, %v295_v58  ;;  %v348_v63 = vadd.f32 %v347_v59, %v346_v57 }
  0xc4   :  { %v350_v40 = vadd.f32 %v349_v0, %v348_v63  ;;  %v299_v2 = vadd.f32 %v298_v61, %v297_v62 }
  0xc6   :  { %v300_v3 = vrot.slane %v299_v2, 4  ;;  %v352_v4 = vadd.f32 %v351_v1, %v350_v40 }
  0xc8   :  { %v301_v5 = vadd.f32 %v300_v3, %v299_v2  ;;  %v353_v6 = vrot.slane %v352_v4, 4 }
  0xca   :  { %v302_v7 = vrot.slane %v301_v5, 2  ;;  %v354_v8 = vadd.f32 %v353_v6, %v352_v4 }
  0xcc   :  { %v303_v9 = vadd.f32 %v302_v7, %v301_v5  ;;  %v355_v10 = vrot.slane %v354_v8, 2 }
  0xce   :  { %v304_v11 = vrot.slane %v303_v9, 1  ;;  %v356_v60 = vadd.f32 %v355_v10, %v354_v8 }
  0xd0   :  { %v357_v12 = vrot.slane %v356_v60, 1  ;;  %v305_v13 = vadd.f32 %v304_v11, %v303_v9 }
  0xd2   :  { %v358_v14 = vadd.f32 %v357_v12, %v356_v60 }
  0xd4   :  { %v360_v15 = vsel %vm359_vm1, %v305_v13, %v358_v14 }
  0xd5   :  { %362 = vst.msk [vmem:[%s663_s4] sm:$0x3] %vm361_vm2, %v360_v15 }
  0xd6   :  { %371 = vsyncpa [#allocation3], 1 }
  0xd7   :  { %372 = vsyncpa [#allocation5], 1 }

// kernel: transform_attention_forward.8
= control target key start
LH: loop header
LB: loop body
LE: loop exit
PB: predicated region body
PF: predicated region fallthrough
CT: control target
= control target key end

     0   :  { %vm56_vm0 = vcmask 261120   ;;  %vm599_vm1 = vcmask 1040384   ;;  %vm601_vm2 = vcmask 254976   ;;  %s1197_s1 = inlined_call_operand.vmem [shape: f32[32,32], index: 1, kind: input, shape index: {}]   ;;  %s1198_s0 = inlined_call_operand.vmem [shape: f32[256,32], index: 0, kind: input, shape index: {}]   ;;  %s1199_s2 = inlined_call_operand.vmem [shape: f32[1,32], index: 2, kind: input, shape index: {}]   ;;  %s1200_s3 = inlined_call_operand.vmem [shape: f32[256,32], index: 3, kind: output, shape index: {0}]   ;;  %s1201_s4 = inlined_call_operand.vmem [shape: f32[1,2,32], index: 4, kind: output, shape index: {1}]  }
   0x1   :  { %v51_v0 = vld [vmem:[%s1197_s1 + $0x18] sm:$0xff]  ;;  %v50_v1 = vld [vmem:[%s1197_s1 + $0x10] sm:$0xff]  ;;  %v49_v2 = vld [vmem:[%s1197_s1 + $0x8] sm:$0xff] }
   0x2   :  { %165 = vmatpush.msra.mxu0 %v51_v0  ;;  %643 = vmatpush.msra.mxu1 %v51_v0  ;;  %v48_v3 = vld [vmem:[%s1197_s1] sm:$0xff]  ;;  %v17_v7 = vld [vmem:[%s1198_s0 + $0x8] sm:$0xff]  ;;  %v18_v11 = vld [vmem:[%s1198_s0 + $0x10] sm:$0xff] }
   0x3   :  { %644 = vmatpush.msra.mxu2 %v51_v0  ;;  %645 = vmatpush.msra.mxu3 %v51_v0  ;;  %v16_v4 = vld [vmem:[%s1198_s0] sm:$0xff]  ;;  %v25_v8 = vld [vmem:[%s1198_s0 + $0x48] sm:$0xff]  ;;  %v26_v12 = vld [vmem:[%s1198_s0 + $0x50] sm:$0xff] }
   0x4   :  { %166 = vmatpush.msra.mxu0 %v50_v1  ;;  %646 = vmatpush.msra.mxu1 %v50_v1  ;;  %v24_v5 = vld [vmem:[%s1198_s0 + $0x40] sm:$0xff]  ;;  %v33_v9 = vld [vmem:[%s1198_s0 + $0x88] sm:$0xff]  ;;  %v34_v13 = vld [vmem:[%s1198_s0 + $0x90] sm:$0xff] }
   0x5   :  { %647 = vmatpush.msra.mxu2 %v50_v1  ;;  %648 = vmatpush.msra.mxu3 %v50_v1  ;;  %v32_v6 = vld [vmem:[%s1198_s0 + $0x80] sm:$0xff]  ;;  %v41_v14 = vld [vmem:[%s1198_s0 + $0xc8] sm:$0xff]  ;;  %v19_v15 = vld [vmem:[%s1198_s0 + $0x18] sm:$0xff] }
   0x6   :  { %167 = vmatpush.msra.mxu0 %v49_v2  ;;  %649 = vmatpush.msra.mxu1 %v49_v2  ;;  %v40_v10 = vld [vmem:[%s1198_s0 + $0xc0] sm:$0xff]  ;;  %v27_v16 = vld [vmem:[%s1198_s0 + $0x58] sm:$0xff]  ;;  %v42_v18 = vld [vmem:[%s1198_s0 + $0xd0] sm:$0xff] }
   0x7   :  { %650 = vmatpush.msra.mxu2 %v49_v2  ;;  %651 = vmatpush.msra.mxu3 %v49_v2  ;;  %v35_v17 = vld [vmem:[%s1198_s0 + $0x98] sm:$0xff]  ;;  %v20_v19 = vld [vmem:[%s1198_s0 + $0x20] sm:$0xff]  ;;  %v21_v23 = vld [vmem:[%s1198_s0 + $0x28] sm:$0xff] }
   0x8   :  { %168 = vmatpush.msra.mxu0 %v48_v3  ;;  %652 = vmatpush.msra.mxu1 %v48_v3  ;;  %v28_v20 = vld [vmem:[%s1198_s0 + $0x60] sm:$0xff]  ;;  %v43_v21 = vld [vmem:[%s1198_s0 + $0xd8] sm:$0xff]  ;;  %v29_v24 = vld [vmem:[%s1198_s0 + $0x68] sm:$0xff] }
   0x9   :  { %611 = vmatmul.msk.f32.vlgmr.msra.gmra.mxu0 %vm56_vm0, %v16_v4  ;;  %619 = vmatmul.msk.f32.vlgmr.msra.gmra.mxu1 %vm56_vm0, %v24_v5  ;;  %v36_v22 = vld [vmem:[%s1198_s0 + $0xa0] sm:$0xff]  ;;  %v37_v26 = vld [vmem:[%s1198_s0 + $0xa8] sm:$0xff]  ;;  %v22_v27 = vld [vmem:[%s1198_s0 + $0x30] sm:$0xff] }
   0xa   :  { %653 = vmatpush.msra.mxu2 %v48_v3  ;;  %654 = vmatpush.msra.mxu3 %v48_v3  ;;  %v44_v25 = vld [vmem:[%s1198_s0 + $0xe0] sm:$0xff]  ;;  %v30_v28 = vld [vmem:[%s1198_s0 + $0x70] sm:$0xff]  ;;  %v45_v29 = vld [vmem:[%s1198_s0 + $0xe8] sm:$0xff] }
   0xb   :  { %627 = vmatmul.msk.f32.vlgmr.msra.gmra.mxu2 %vm56_vm0, %v32_v6  ;;  %635 = vmatmul.msk.f32.vlgmr.msra.gmra.mxu3 %vm56_vm0, %v40_v10  ;;  %v38_v30 = vld [vmem:[%s1198_s0 + $0xb0] sm:$0xff]  ;;  %v23_v31 = vld [vmem:[%s1198_s0 + $0x38] sm:$0xff]  ;;  %v824_v36 = vld [vmem:[%s1199_s2] ss:$0 sm:$0xff] }
   0xc   :  { %v31_v32 = vld [vmem:[%s1198_s0 + $0x78] sm:$0xff]  ;;  %v46_v33 = vld [vmem:[%s1198_s0 + $0xf0] sm:$0xff] }
   0xd   :  { %v39_v34 = vld [vmem:[%s1198_s0 + $0xb8] sm:$0xff] }
   0xe   :  { %v47_v35 = vld [vmem:[%s1198_s0 + $0xf8] sm:$0xff] }
  0x11   :  { %612 = vmatmul.msk.f32.gmra.mxu0 %vm56_vm0, %v17_v7  ;;  %620 = vmatmul.msk.f32.gmra.mxu1 %vm56_vm0, %v25_v8 }
  0x13   :  { %628 = vmatmul.msk.f32.gmra.mxu2 %vm56_vm0, %v33_v9  ;;  %636 = vmatmul.msk.f32.gmra.mxu3 %vm56_vm0, %v41_v14 }
  0x19   :  { %613 = vmatmul.msk.f32.gmra.mxu0 %vm56_vm0, %v18_v11  ;;  %621 = vmatmul.msk.f32.gmra.mxu1 %vm56_vm0, %v26_v12 }
  0x1b   :  { %629 = vmatmul.msk.f32.gmra.mxu2 %vm56_vm0, %v34_v13  ;;  %637 = vmatmul.msk.f32.gmra.mxu3 %vm56_vm0, %v42_v18 }
  0x21   :  { %614 = vmatmul.msk.f32.gmra.mxu0 %vm56_vm0, %v19_v15  ;;  %622 = vmatmul.msk.f32.gmra.mxu1 %vm56_vm0, %v27_v16 }
  0x23   :  { %630 = vmatmul.msk.f32.gmra.mxu2 %vm56_vm0, %v35_v17  ;;  %638 = vmatmul.msk.f32.gmra.mxu3 %vm56_vm0, %v43_v21 }
  0x29   :  { %615 = vmatmul.msk.f32.gmra.mxu0 %vm56_vm0, %v20_v19  ;;  %623 = vmatmul.msk.f32.gmra.mxu1 %vm56_vm0, %v28_v20 }
  0x2b   :  { %631 = vmatmul.msk.f32.gmra.mxu2 %vm56_vm0, %v36_v22  ;;  %639 = vmatmul.msk.f32.gmra.mxu3 %vm56_vm0, %v44_v25 }
  0x31   :  { %616 = vmatmul.msk.f32.gmra.mxu0 %vm56_vm0, %v21_v23  ;;  %624 = vmatmul.msk.f32.gmra.mxu1 %vm56_vm0, %v29_v24 }
  0x33   :  { %632 = vmatmul.msk.f32.gmra.mxu2 %vm56_vm0, %v37_v26  ;;  %640 = vmatmul.msk.f32.gmra.mxu3 %vm56_vm0, %v45_v29 }
  0x39   :  { %617 = vmatmul.msk.f32.gmra.mxu0 %vm56_vm0, %v22_v27  ;;  %625 = vmatmul.msk.f32.gmra.mxu1 %vm56_vm0, %v30_v28 }
  0x3b   :  { %633 = vmatmul.msk.f32.gmra.mxu2 %vm56_vm0, %v38_v30  ;;  %641 = vmatmul.msk.f32.gmra.mxu3 %vm56_vm0, %v46_v33 }
  0x41   :  { %618 = vmatmul.msk.f32.gmra.mxu0 %vm56_vm0, %v23_v31  ;;  %626 = vmatmul.msk.f32.gmra.mxu1 %vm56_vm0, %v31_v32 }
  0x43   :  { %634 = vmatmul.msk.f32.gmra.mxu2 %vm56_vm0, %v39_v34  ;;  %642 = vmatmul.msk.f32.gmra.mxu3 %vm56_vm0, %v47_v35 }
  0x86   :  { %v170_v37 = vpop.f32.mrf.mxu0  ;;  %v194_v38 = vpop.f32.mrf.mxu1 }
  0x87   :  { %v827_v39 = vadd.f32 %v824_v36, %v170_v37  ;;  %v830_v40 = vadd.f32 %v824_v36, %v194_v38 }
  0x89   :  { %266 = vst.msk [vmem:[%s1200_s3] sm:$0xff] %vm56_vm0, %v827_v39  ;;  %v498_v16 = vmul.f32 %v827_v39, %v827_v39  ;;  %v429_v19 = vsel %vm56_vm0, %v827_v39, 0.0 }
  0x8a   :  { %274 = vst.msk [vmem:[%s1200_s3 + $0x40] sm:$0xff] %vm56_vm0, %v830_v40 }
  0x8b   :  { %v530_v23 = vsel %vm56_vm0, %v498_v16, 0.0 }
  0x8e   :  { %v173_v41 = vpop.f32.mrf.mxu0  ;;  %v197_v42 = vpop.f32.mrf.mxu1 }
  0x8f   :  { %v174_v43 = vadd.f32 %v824_v36, %v173_v41  ;;  %v844_v44 = vadd.f32 %v824_v36, %v197_v42  ;;  %v218_v45 = vpop.f32.mrf.mxu2  ;;  %v242_v52 = vpop.f32.mrf.mxu3 }
  0x90   :  { %v847_v46 = vadd.f32 %v824_v36, %v218_v45  ;;  %v871_v54 = vadd.f32 %v824_v36, %v242_v52 }
  0x91   :  { %267 = vst.msk [vmem:[%s1200_s3 + $0x8] sm:$0xff] %vm56_vm0, %v174_v43  ;;  %v499_v15 = vmul.f32 %v174_v43, %v174_v43  ;;  %v430_v18 = vsel %vm56_vm0, %v174_v43, 0.0 }
  0x92   :  { %275 = vst.msk [vmem:[%s1200_s3 + $0x48] sm:$0xff] %vm56_vm0, %v844_v44  ;;  %v431_v24 = vadd.f32 %v430_v18, %v429_v19 }
  0x93   :  { %282 = vst.msk [vmem:[%s1200_s3 + $0x80] sm:$0xff] %vm56_vm0, %v847_v46  ;;  %v531_v20 = vsel %vm56_vm0, %v499_v15, 0.0  ;;  %v506_v15 = vmul.f32 %v830_v40, %v830_v40 }
  0x94   :  { %290 = vst.msk [vmem:[%s1200_s3 + $0xc0] sm:$0xff] %vm56_vm0, %v871_v54  ;;  %v532_v34 = vadd.f32 %v531_v20, %v530_v23  ;;  %v444_v20 = vsel %vm56_vm0, %v830_v40, 0.0 }
  0x95   :  { %v545_v40 = vsel %vm56_vm0, %v506_v15, 0.0 }
  0x96   :  { %v176_v47 = vpop.f32.mrf.mxu0  ;;  %v200_v48 = vpop.f32.mrf.mxu1 }
  0x97   :  { %v177_v49 = vadd.f32 %v824_v36, %v176_v47  ;;  %v865_v50 = vadd.f32 %v824_v36, %v200_v48  ;;  %v221_v51 = vpop.f32.mrf.mxu2  ;;  %v245_v60 = vpop.f32.mrf.mxu3 }
  0x98   :  { %v868_v53 = vadd.f32 %v824_v36, %v221_v51  ;;  %v900_v62 = vadd.f32 %v824_v36, %v245_v60 }
  0x99   :  { %268 = vst.msk [vmem:[%s1200_s3 + $0x10] sm:$0xff] %vm56_vm0, %v177_v49  ;;  %v500_v17 = vmul.f32 %v177_v49, %v177_v49  ;;  %v432_v21 = vsel %vm56_vm0, %v177_v49, 0.0 }
  0x9a   :  { %276 = vst.msk [vmem:[%s1200_s3 + $0x50] sm:$0xff] %vm56_vm0, %v865_v50  ;;  %v433_v35 = vadd.f32 %v432_v21, %v431_v24  ;;  %v507_v21 = vmul.f32 %v844_v44, %v844_v44 }
  0x9b   :  { %283 = vst.msk [vmem:[%s1200_s3 + $0x88] sm:$0xff] %vm56_vm0, %v868_v53  ;;  %v533_v25 = vsel %vm56_vm0, %v500_v17, 0.0 }
  0x9c   :  { %291 = vst.msk [vmem:[%s1200_s3 + $0xc8] sm:$0xff] %vm56_vm0, %v900_v62  ;;  %v534_v43 = vadd.f32 %v533_v25, %v532_v34  ;;  %v446_v25 = vsel %vm56_vm0, %v844_v44, 0.0 }
  0x9e   :  { %v179_v55 = vpop.f32.mrf.mxu0  ;;  %v203_v56 = vpop.f32.mrf.mxu1 }
  0x9f   :  { %v180_v57 = vadd.f32 %v824_v36, %v179_v55  ;;  %v894_v58 = vadd.f32 %v824_v36, %v203_v56  ;;  %v224_v59 = vpop.f32.mrf.mxu2  ;;  %v248_v4 = vpop.f32.mrf.mxu3 }
  0xa0   :  { %v897_v61 = vadd.f32 %v824_v36, %v224_v59  ;;  %v929_v6 = vadd.f32 %v824_v36, %v248_v4 }
  0xa1   :  { %269 = vst.msk [vmem:[%s1200_s3 + $0x18] sm:$0xff] %vm56_vm0, %v180_v57  ;;  %v501_v22 = vmul.f32 %v180_v57, %v180_v57  ;;  %v434_v28 = vsel %vm56_vm0, %v180_v57, 0.0 }
  0xa2   :  { %277 = vst.msk [vmem:[%s1200_s3 + $0x58] sm:$0xff] %vm56_vm0, %v894_v58  ;;  %v435_v45 = vadd.f32 %v434_v28, %v433_v35 }
  0xa3   :  { %284 = vst.msk [vmem:[%s1200_s3 + $0x90] sm:$0xff] %vm56_vm0, %v897_v61  ;;  %v535_v39 = vsel %vm56_vm0, %v501_v22, 0.0 }
  0xa4   :  { %292 = vst.msk [vmem:[%s1200_s3 + $0xd0] sm:$0xff] %vm56_vm0, %v929_v6  ;;  %v536_v51 = vadd.f32 %v535_v39, %v534_v43  ;;  %v450_v43 = vsel %vm56_vm0, %v894_v58, 0.0 }
  0xa6   :  { %v182_v63 = vpop.f32.mrf.mxu0  ;;  %v206_v0 = vpop.f32.mrf.mxu1 }
  0xa7   :  { %v183_v1 = vadd.f32 %v824_v36, %v182_v63  ;;  %v923_v2 = vadd.f32 %v824_v36, %v206_v0  ;;  %v227_v3 = vpop.f32.mrf.mxu2  ;;  %v251_v12 = vpop.f32.mrf.mxu3 }
  0xa8   :  { %v926_v5 = vadd.f32 %v824_v36, %v227_v3  ;;  %v958_v14 = vadd.f32 %v824_v36, %v251_v12 }
  0xa9   :  { %270 = vst.msk [vmem:[%s1200_s3 + $0x20] sm:$0xff] %vm56_vm0, %v183_v1  ;;  %v502_v29 = vmul.f32 %v183_v1, %v183_v1  ;;  %v436_v41 = vsel %vm56_vm0, %v183_v1, 0.0 }
  0xaa   :  { %278 = vst.msk [vmem:[%s1200_s3 + $0x60] sm:$0xff] %vm56_vm0, %v923_v2  ;;  %v437_v52 = vadd.f32 %v436_v41, %v435_v45 }
  0xab   :  { %285 = vst.msk [vmem:[%s1200_s3 + $0x98] sm:$0xff] %vm56_vm0, %v926_v5  ;;  %v537_v47 = vsel %vm56_vm0, %v502_v29, 0.0  ;;  %v547_v29 = vsel %vm56_vm0, %v507_v21, 0.0  ;;  %v462_v21 = vsel %vm56_vm0, %v868_v53, 0.0 }
  0xac   :  { %293 = vst.msk [vmem:[%s1200_s3 + $0xd8] sm:$0xff] %vm56_vm0, %v958_v14  ;;  %v538_v57 = vadd.f32 %v537_v47, %v536_v51 }
  0xae   :  { %v185_v7 = vpop.f32.mrf.mxu0  ;;  %v209_v8 = vpop.f32.mrf.mxu1 }
  0xaf   :  { %v186_v9 = vadd.f32 %v824_v36, %v185_v7  ;;  %v952_v10 = vadd.f32 %v824_v36, %v209_v8  ;;  %v230_v11 = vpop.f32.mrf.mxu2  ;;  %v254_v33 = vpop.f32.mrf.mxu3 }
  0xb0   :  { %v955_v13 = vadd.f32 %v824_v36, %v230_v11  ;;  %v997_v38 = vadd.f32 %v824_v36, %v254_v33 }
  0xb1   :  { %271 = vst.msk [vmem:[%s1200_s3 + $0x28] sm:$0xff] %vm56_vm0, %v186_v9  ;;  %v503_v42 = vmul.f32 %v186_v9, %v186_v9  ;;  %v438_v48 = vsel %vm56_vm0, %v186_v9, 0.0  ;;  %v511_v51 = vmul.f32 %v952_v10, %v952_v10 }
  0xb2   :  { %279 = vst.msk [vmem:[%s1200_s3 + $0x68] sm:$0xff] %vm56_vm0, %v952_v10  ;;  %v439_v59 = vadd.f32 %v438_v48, %v437_v52 }
  0xb3   :  { %286 = vst.msk [vmem:[%s1200_s3 + $0xa0] sm:$0xff] %vm56_vm0, %v955_v13  ;;  %v539_v55 = vsel %vm56_vm0, %v503_v42, 0.0 }
  0xb4   :  { %294 = vst.msk [vmem:[%s1200_s3 + $0xe0] sm:$0xff] %vm56_vm0, %v997_v38  ;;  %v540_v8 = vadd.f32 %v539_v55, %v538_v57 }
  0xb6   :  { %v188_v26 = vpop.f32.mrf.mxu0  ;;  %v212_v27 = vpop.f32.mrf.mxu1 }
  0xb7   :  { %v189_v30 = vadd.f32 %v824_v36, %v188_v26  ;;  %v991_v31 = vadd.f32 %v824_v36, %v212_v27  ;;  %v233_v32 = vpop.f32.mrf.mxu2  ;;  %v257_v7 = vpop.f32.mrf.mxu3  ;;  %v508_v26 = vmul.f32 %v865_v50, %v865_v50 }
  0xb8   :  { %v994_v37 = vadd.f32 %v824_v36, %v233_v32  ;;  %v1031_v12 = vadd.f32 %v824_v36, %v257_v7  ;;  %v509_v32 = vmul.f32 %v894_v58, %v894_v58 }
  0xb9   :  { %272 = vst.msk [vmem:[%s1200_s3 + $0x30] sm:$0xff] %vm56_vm0, %v189_v30  ;;  %v504_v49 = vmul.f32 %v189_v30, %v189_v30  ;;  %v440_v56 = vsel %vm56_vm0, %v189_v30, 0.0  ;;  %v448_v30 = vsel %vm56_vm0, %v865_v50, 0.0  ;;  %v549_v42 = vsel %vm56_vm0, %v508_v26, 0.0 }
  0xba   :  { %280 = vst.msk [vmem:[%s1200_s3 + $0x70] sm:$0xff] %vm56_vm0, %v991_v31  ;;  %v441_v9 = vadd.f32 %v440_v56, %v439_v59  ;;  %v510_v50 = vmul.f32 %v923_v2, %v923_v2  ;;  %v551_v48 = vsel %vm56_vm0, %v509_v32, 0.0  ;;  %v454_v56 = vsel %vm56_vm0, %v952_v10, 0.0 }
  0xbb   :  { %287 = vst.msk [vmem:[%s1200_s3 + $0xa8] sm:$0xff] %vm56_vm0, %v994_v37  ;;  %v541_v0 = vsel %vm56_vm0, %v504_v49, 0.0  ;;  %v452_v49 = vsel %vm56_vm0, %v923_v2, 0.0  ;;  %v512_v57 = vmul.f32 %v991_v31, %v991_v31  ;;  %v514_v10 = vmul.f32 %v847_v46, %v847_v46 }
  0xbc   :  { %v542_v18 = vadd.f32 %v541_v0, %v540_v8  ;;  %295 = vst.msk [vmem:[%s1200_s3 + $0xe8] sm:$0xff] %vm56_vm0, %v1031_v12  ;;  %v553_v55 = vsel %vm56_vm0, %v510_v50, 0.0  ;;  %v456_v0 = vsel %vm56_vm0, %v991_v31, 0.0  ;;  %v460_v31 = vsel %vm56_vm0, %v847_v46, 0.0 }
  0xbd   :  { %v557_v15 = vsel %vm56_vm0, %v512_v57, 0.0  ;;  %v464_v46 = vsel %vm56_vm0, %v897_v61, 0.0 }
  0xbe   :  { %v191_v60 = vpop.f32.mrf.mxu0  ;;  %v215_v63 = vpop.f32.mrf.mxu1 }
  0xbf   :  { %v192_v1 = vadd.f32 %v824_v36, %v191_v60  ;;  %v216_v3 = vadd.f32 %v824_v36, %v215_v63  ;;  %v236_v4 = vpop.f32.mrf.mxu2  ;;  %v260_v34 = vpop.f32.mrf.mxu3  ;;  %v555_v63 = vsel %vm56_vm0, %v511_v51, 0.0 }
  0xc0   :  { %v1028_v11 = vadd.f32 %v824_v36, %v236_v4  ;;  %v1073_v44 = vadd.f32 %v824_v36, %v260_v34  ;;  %v519_v34 = vmul.f32 %v994_v37, %v994_v37 }
  0xc1   :  { %273 = vst.msk [vmem:[%s1200_s3 + $0x38] sm:$0xff] %vm56_vm0, %v192_v1  ;;  %v442_v16 = vsel %vm56_vm0, %v192_v1, 0.0  ;;  %v505_v17 = vmul.f32 %v192_v1, %v192_v1  ;;  %v513_v2 = vmul.f32 %v216_v3, %v216_v3  ;;  %v458_v1 = vsel %vm56_vm0, %v216_v3, 0.0 }
  0xc2   :  { %v443_v19 = vadd.f32 %v442_v16, %v441_v9  ;;  %281 = vst.msk [vmem:[%s1200_s3 + $0x78] sm:$0xff] %vm56_vm0, %v216_v3 }
  0xc3   :  { %v543_v22 = vsel %vm56_vm0, %v505_v17, 0.0  ;;  %288 = vst.msk [vmem:[%s1200_s3 + $0xb0] sm:$0xff] %vm56_vm0, %v1028_v11  ;;  %v559_v16 = vsel %vm56_vm0, %v513_v2, 0.0  ;;  %v476_v2 = vsel %vm56_vm0, %v871_v54, 0.0 }
  0xc4   :  { %v445_v23 = vadd.f32 %v444_v20, %v443_v19  ;;  %v544_v24 = vadd.f32 %v543_v22, %v542_v18  ;;  %296 = vst.msk [vmem:[%s1200_s3 + $0xf0] sm:$0xff] %vm56_vm0, %v1073_v44  ;;  %v561_v20 = vsel %vm56_vm0, %v514_v10, 0.0  ;;  %v516_v22 = vmul.f32 %v897_v61, %v897_v61 }
  0xc5   :  { %v468_v61 = vsel %vm56_vm0, %v955_v13, 0.0 }
  0xc6   :  { %v447_v27 = vadd.f32 %v446_v25, %v445_v23  ;;  %v546_v28 = vadd.f32 %v545_v40, %v544_v24  ;;  %v517_v25 = vmul.f32 %v926_v5, %v926_v5 }
  0xc7   :  { %v239_v33 = vpop.f32.mrf.mxu2  ;;  %v263_v4 = vpop.f32.mrf.mxu3 }
  0xc8   :  { %v548_v35 = vadd.f32 %v547_v29, %v546_v28  ;;  %v449_v39 = vadd.f32 %v448_v30, %v447_v27  ;;  %v1070_v41 = vadd.f32 %v824_v36, %v239_v33  ;;  %v1105_v9 = vadd.f32 %v824_v36, %v263_v4 }
  0xc9   :  { %v515_v36 = vmul.f32 %v868_v53, %v868_v53  ;;  %v565_v28 = vsel %vm56_vm0, %v516_v22, 0.0  ;;  %v466_v53 = vsel %vm56_vm0, %v926_v5, 0.0  ;;  %v518_v29 = vmul.f32 %v955_v13, %v955_v13 }
  0xca   :  { %v451_v45 = vadd.f32 %v450_v43, %v449_v39  ;;  %v550_v47 = vadd.f32 %v549_v42, %v548_v35  ;;  %289 = vst.msk [vmem:[%s1200_s3 + $0xb8] sm:$0xff] %vm56_vm0, %v1070_v41  ;;  %v567_v33 = vsel %vm56_vm0, %v517_v25, 0.0  ;;  %v470_v5 = vsel %vm56_vm0, %v994_v37, 0.0 }
  0xcb   :  { %297 = vst.msk [vmem:[%s1200_s3 + $0xf8] sm:$0xff] %vm56_vm0, %v1105_v9  ;;  %v563_v40 = vsel %vm56_vm0, %v515_v36, 0.0  ;;  %v569_v42 = vsel %vm56_vm0, %v518_v29, 0.0  ;;  %v520_v43 = vmul.f32 %v1028_v11, %v1028_v11  ;;  %v521_v50 = vmul.f32 %v1070_v41, %v1070_v41 }
  0xcc   :  { %v453_v58 = vadd.f32 %v452_v49, %v451_v45  ;;  %v552_v52 = vadd.f32 %v551_v48, %v550_v47  ;;  %v571_v13 = vsel %vm56_vm0, %v519_v34, 0.0  ;;  %v472_v48 = vsel %vm56_vm0, %v1028_v11, 0.0 }
  0xcd   :  { %v474_v49 = vsel %vm56_vm0, %v1070_v41, 0.0  ;;  %v522_v37 = vmul.f32 %v871_v54, %v871_v54  ;;  %v523_v11 = vmul.f32 %v900_v62, %v900_v62  ;;  %v480_v54 = vsel %vm56_vm0, %v929_v6, 0.0 }
  0xce   :  { %v455_v59 = vadd.f32 %v454_v56, %v453_v58  ;;  %v554_v60 = vadd.f32 %v553_v55, %v552_v52  ;;  %v573_v52 = vsel %vm56_vm0, %v520_v43, 0.0  ;;  %v575_v55 = vsel %vm56_vm0, %v521_v50, 0.0 }
  0xcf   :  { %v577_v41 = vsel %vm56_vm0, %v522_v37, 0.0  ;;  %v528_v22 = vmul.f32 %v1073_v44, %v1073_v44  ;;  %v490_v25 = vsel %vm56_vm0, %v1105_v9, 0.0 }
  0xd0   :  { %v556_v7 = vadd.f32 %v555_v63, %v554_v60  ;;  %v457_v8 = vadd.f32 %v456_v0, %v455_v59  ;;  %v478_v63 = vsel %vm56_vm0, %v900_v62, 0.0  ;;  %v524_v0 = vmul.f32 %v929_v6, %v929_v6 }
  0xd1   :  { %v482_v62 = vsel %vm56_vm0, %v958_v14, 0.0  ;;  %v484_v6 = vsel %vm56_vm0, %v997_v38, 0.0 }
  0xd2   :  { %v558_v17 = vadd.f32 %v557_v15, %v556_v7  ;;  %v459_v18 = vadd.f32 %v458_v1, %v457_v8  ;;  %v579_v7 = vsel %vm56_vm0, %v523_v11, 0.0  ;;  %v525_v8 = vmul.f32 %v958_v14, %v958_v14 }
  0xd3   :  { %v486_v14 = vsel %vm56_vm0, %v1031_v12, 0.0 }
  0xd4   :  { %v461_v3 = vadd.f32 %v460_v31, %v459_v18  ;;  %v560_v19 = vadd.f32 %v559_v16, %v558_v17  ;;  %v581_v16 = vsel %vm56_vm0, %v524_v0, 0.0  ;;  %v526_v17 = vmul.f32 %v997_v38, %v997_v38 }
  0xd5   :  { %v583_v36 = vsel %vm56_vm0, %v525_v8, 0.0 }
  0xd6   :  { %v463_v23 = vadd.f32 %v462_v21, %v461_v3  ;;  %v562_v24 = vadd.f32 %v561_v20, %v560_v19  ;;  %v527_v3 = vmul.f32 %v1031_v12, %v1031_v12  ;;  %v585_v21 = vsel %vm56_vm0, %v526_v17, 0.0 }
  0xd7   :  { %v589_v12 = vsel %vm56_vm0, %v528_v22, 0.0 }
  0xd8   :  { %v564_v26 = vadd.f32 %v563_v40, %v562_v24  ;;  %v465_v27 = vadd.f32 %v464_v46, %v463_v23  ;;  %v529_v23 = vmul.f32 %v1105_v9, %v1105_v9  ;;  %v587_v38 = vsel %vm56_vm0, %v527_v3, 0.0 }
  0xd9   :  { %v488_v46 = vsel %vm56_vm0, %v1073_v44, 0.0 }
  0xda   :  { %v467_v30 = vadd.f32 %v466_v53, %v465_v27  ;;  %v566_v32 = vadd.f32 %v565_v28, %v564_v26  ;;  %v591_v28 = vsel %vm56_vm0, %v529_v23, 0.0 }
  0xdc   :  { %v469_v35 = vadd.f32 %v468_v61, %v467_v30  ;;  %v568_v39 = vadd.f32 %v567_v33, %v566_v32 }
  0xde   :  { %v471_v45 = vadd.f32 %v470_v5, %v469_v35  ;;  %v570_v47 = vadd.f32 %v569_v42, %v568_v39 }
  0xe0   :  { %v572_v51 = vadd.f32 %v571_v13, %v570_v47  ;;  %v473_v58 = vadd.f32 %v472_v48, %v471_v45 }
  0xe2   :  { %v574_v56 = vadd.f32 %v573_v52, %v572_v51  ;;  %v475_v57 = vadd.f32 %v474_v49, %v473_v58 }
  0xe4   :  { %v477_v59 = vadd.f32 %v476_v2, %v475_v57  ;;  %v576_v60 = vadd.f32 %v575_v55, %v574_v56 }
  0xe6   :  { %v479_v1 = vadd.f32 %v478_v63, %v477_v59  ;;  %v578_v4 = vadd.f32 %v577_v41, %v576_v60 }
  0xe8   :  { %v580_v10 = vadd.f32 %v579_v7, %v578_v4  ;;  %v481_v15 = vadd.f32 %v480_v54, %v479_v1 }
  0xea   :  { %v483_v18 = vadd.f32 %v482_v62, %v481_v15  ;;  %v582_v31 = vadd.f32 %v581_v16, %v580_v10 }
  0xec   :  { %v485_v19 = vadd.f32 %v484_v6, %v483_v18  ;;  %v584_v20 = vadd.f32 %v583_v36, %v582_v31 }
  0xee   :  { %v487_v24 = vadd.f32 %v486_v14, %v485_v19  ;;  %v586_v40 = vadd.f32 %v585_v21, %v584_v20 }
  0xf0   :  { %v588_v26 = vadd.f32 %v587_v38, %v586_v40  ;;  %v489_v27 = vadd.f32 %v488_v46, %v487_v24 }
  0xf2   :  { %v590_v53 = vadd.f32 %v589_v12, %v588_v26  ;;  %v491_v29 = vadd.f32 %v490_v25, %v489_v27 }
  0xf4   :  { %v492_v30 = vrot.slane %v491_v29, 4  ;;  %v592_v32 = vadd.f32 %v591_v28, %v590_v53 }
  0xf6   :  { %v493_v33 = vadd.f32 %v492_v30, %v491_v29  ;;  %v593_v61 = vrot.slane %v592_v32, 4 }
  0xf8   :  { %v494_v34 = vrot.slane %v493_v33, 2  ;;  %v594_v35 = vadd.f32 %v593_v61, %v592_v32 }
  0xfa   :  { %v495_v39 = vadd.f32 %v494_v34, %v493_v33  ;;  %v595_v42 = vrot.slane %v594_v35, 2 }
  0xfc   :  { %v496_v44 = vrot.slane %v495_v39, 1  ;;  %v596_v5 = vadd.f32 %v595_v42, %v594_v35 }
  0xfe   :  { %v597_v43 = vrot.slane %v596_v5, 1  ;;  %v497_v9 = vadd.f32 %v496_v44, %v495_v39 }
 0x100   :  { %v598_v50 = vadd.f32 %v597_v43, %v596_v5 }
 0x102   :  { %v600_v45 = vsel %vm599_vm1, %v497_v9, %v598_v50 }
 0x103   :  { %602 = vst.msk [vmem:[%s1201_s4] sm:$0x3] %vm601_vm2, %v600_v45 }

// kernel: transform_attention_forward.10
= control target key start
LH: loop header
LB: loop body
LE: loop exit
PB: predicated region body
PF: predicated region fallthrough
CT: control target
= control target key end

     0   :  { %vm40_vm0 = vcmask 261120   ;;  %vm327_vm1 = vcmask 1040384   ;;  %vm329_vm2 = vcmask 254976   ;;  %s619_s1 = inlined_call_operand.vmem [shape: f32[32,32], index: 1, kind: input, shape index: {}]   ;;  %s620_s0 = inlined_call_operand.vmem [shape: f32[128,32], index: 0, kind: input, shape index: {}]   ;;  %s621_s2 = inlined_call_operand.vmem [shape: f32[1,32], index: 2, kind: input, shape index: {}]   ;;  %s622_s3 = inlined_call_operand.vmem [shape: f32[128,32], index: 3, kind: output, shape index: {0}]   ;;  %s623_s4 = inlined_call_operand.vmem [shape: f32[1,2,32], index: 4, kind: output, shape index: {1}]  }
   0x1   :  { %v35_v0 = vld [vmem:[%s619_s1 + $0x18] sm:$0xff]  ;;  %v34_v1 = vld [vmem:[%s619_s1 + $0x10] sm:$0xff]  ;;  %v33_v2 = vld [vmem:[%s619_s1 + $0x8] sm:$0xff] }
   0x2   :  { %101 = vmatpush.msra.mxu0 %v35_v0  ;;  %355 = vmatpush.msra.mxu1 %v35_v0  ;;  %v32_v3 = vld [vmem:[%s619_s1] sm:$0xff]  ;;  %v17_v8 = vld [vmem:[%s620_s0 + $0x8] sm:$0xff]  ;;  %v18_v12 = vld [vmem:[%s620_s0 + $0x10] sm:$0xff] }
   0x3   :  { %356 = vmatpush.msra.mxu2 %v35_v0  ;;  %357 = vmatpush.msra.mxu3 %v35_v0  ;;  %v16_v4 = vld [vmem:[%s620_s0] sm:$0xff]  ;;  %v21_v9 = vld [vmem:[%s620_s0 + $0x28] sm:$0xff]  ;;  %v22_v13 = vld [vmem:[%s620_s0 + $0x30] sm:$0xff] }
   0x4   :  { %102 = vmatpush.msra.mxu0 %v34_v1  ;;  %358 = vmatpush.msra.mxu1 %v34_v1  ;;  %v20_v5 = vld [vmem:[%s620_s0 + $0x20] sm:$0xff]  ;;  %v25_v10 = vld [vmem:[%s620_s0 + $0x48] sm:$0xff]  ;;  %v26_v14 = vld [vmem:[%s620_s0 + $0x50] sm:$0xff] }
   0x5   :  { %359 = vmatpush.msra.mxu2 %v34_v1  ;;  %360 = vmatpush.msra.mxu3 %v34_v1  ;;  %v24_v6 = vld [vmem:[%s620_s0 + $0x40] sm:$0xff]  ;;  %v29_v11 = vld [vmem:[%s620_s0 + $0x68] sm:$0xff]  ;;  %v30_v15 = vld [vmem:[%s620_s0 + $0x70] sm:$0xff] }
   0x6   :  { %103 = vmatpush.msra.mxu0 %v33_v2  ;;  %361 = vmatpush.msra.mxu1 %v33_v2  ;;  %v28_v7 = vld [vmem:[%s620_s0 + $0x60] sm:$0xff]  ;;  %v19_v16 = vld [vmem:[%s620_s0 + $0x18] sm:$0xff] }
   0x7   :  { %362 = vmatpush.msra.mxu2 %v33_v2  ;;  %363 = vmatpush.msra.mxu3 %v33_v2  ;;  %v23_v17 = vld [vmem:[%s620_s0 + $0x38] sm:$0xff]  ;;  %v472_v20 = vld [vmem:[%s621_s2] ss:$0 sm:$0xff] }
   0x8   :  { %104 = vmatpush.msra.mxu0 %v32_v3  ;;  %364 = vmatpush.msra.mxu1 %v32_v3  ;;  %v27_v18 = vld [vmem:[%s620_s0 + $0x58] sm:$0xff] }
   0x9   :  { %339 = vmatmul.msk.f32.vlgmr.msra.gmra.mxu0 %vm40_vm0, %v16_v4  ;;  %343 = vmatmul.msk.f32.vlgmr.msra.gmra.mxu1 %vm40_vm0, %v20_v5  ;;  %v31_v19 = vld [vmem:[%s620_s0 + $0x78] sm:$0xff] }
   0xa   :  { %365 = vmatpush.msra.mxu2 %v32_v3  ;;  %366 = vmatpush.msra.mxu3 %v32_v3 }
   0xb   :  { %347 = vmatmul.msk.f32.vlgmr.msra.gmra.mxu2 %vm40_vm0, %v24_v6  ;;  %351 = vmatmul.msk.f32.vlgmr.msra.gmra.mxu3 %vm40_vm0, %v28_v7 }
  0x11   :  { %340 = vmatmul.msk.f32.gmra.mxu0 %vm40_vm0, %v17_v8  ;;  %344 = vmatmul.msk.f32.gmra.mxu1 %vm40_vm0, %v21_v9 }
  0x13   :  { %348 = vmatmul.msk.f32.gmra.mxu2 %vm40_vm0, %v25_v10  ;;  %352 = vmatmul.msk.f32.gmra.mxu3 %vm40_vm0, %v29_v11 }
  0x19   :  { %341 = vmatmul.msk.f32.gmra.mxu0 %vm40_vm0, %v18_v12  ;;  %345 = vmatmul.msk.f32.gmra.mxu1 %vm40_vm0, %v22_v13 }
  0x1b   :  { %349 = vmatmul.msk.f32.gmra.mxu2 %vm40_vm0, %v26_v14  ;;  %353 = vmatmul.msk.f32.gmra.mxu3 %vm40_vm0, %v30_v15 }
  0x21   :  { %342 = vmatmul.msk.f32.gmra.mxu0 %vm40_vm0, %v19_v16  ;;  %346 = vmatmul.msk.f32.gmra.mxu1 %vm40_vm0, %v23_v17 }
  0x23   :  { %350 = vmatmul.msk.f32.gmra.mxu2 %vm40_vm0, %v27_v18  ;;  %354 = vmatmul.msk.f32.gmra.mxu3 %vm40_vm0, %v31_v19 }
  0x86   :  { %v106_v21 = vpop.f32.mrf.mxu0  ;;  %v118_v22 = vpop.f32.mrf.mxu1 }
  0x87   :  { %v107_v23 = vadd.f32 %v472_v20, %v106_v21  ;;  %v119_v24 = vadd.f32 %v472_v20, %v118_v22 }
  0x89   :  { %154 = vst.msk [vmem:[%s622_s3] sm:$0xff] %vm40_vm0, %v107_v23  ;;  %v274_v42 = vmul.f32 %v107_v23, %v107_v23  ;;  %v237_v45 = vsel %vm40_vm0, %v107_v23, 0.0  ;;  %v278_v61 = vmul.f32 %v119_v24, %v119_v24  ;;  %v244_v2 = vsel %vm40_vm0, %v119_v24, 0.0 }
  0x8a   :  { %158 = vst.msk [vmem:[%s622_s3 + $0x20] sm:$0xff] %vm40_vm0, %v119_v24 }
  0x8b   :  { %v290_v51 = vsel %vm40_vm0, %v274_v42, 0.0  ;;  %v297_v7 = vsel %vm40_vm0, %v278_v61, 0.0 }
  0x8e   :  { %v109_v25 = vpop.f32.mrf.mxu0  ;;  %v121_v26 = vpop.f32.mrf.mxu1 }
  0x8f   :  { %v110_v27 = vadd.f32 %v472_v20, %v109_v25  ;;  %v122_v28 = vadd.f32 %v472_v20, %v121_v26  ;;  %v130_v29 = vpop.f32.mrf.mxu2  ;;  %v142_v30 = vpop.f32.mrf.mxu3 }
  0x90   :  { %v487_v31 = vadd.f32 %v472_v20, %v130_v29  ;;  %v490_v32 = vadd.f32 %v472_v20, %v142_v30 }
  0x91   :  { %155 = vst.msk [vmem:[%s622_s3 + $0x8] sm:$0xff] %vm40_vm0, %v110_v27  ;;  %v275_v41 = vmul.f32 %v110_v27, %v110_v27  ;;  %v238_v43 = vsel %vm40_vm0, %v110_v27, 0.0  ;;  %v279_v3 = vmul.f32 %v122_v28, %v122_v28  ;;  %v246_v8 = vsel %vm40_vm0, %v122_v28, 0.0 }
  0x92   :  { %159 = vst.msk [vmem:[%s622_s3 + $0x28] sm:$0xff] %vm40_vm0, %v122_v28  ;;  %v239_v48 = vadd.f32 %v238_v43, %v237_v45  ;;  %v282_v23 = vmul.f32 %v487_v31, %v487_v31  ;;  %v252_v28 = vsel %vm40_vm0, %v487_v31, 0.0  ;;  %v286_v45 = vmul.f32 %v490_v32, %v490_v32 }
  0x93   :  { %162 = vst.msk [vmem:[%s622_s3 + $0x40] sm:$0xff] %vm40_vm0, %v487_v31  ;;  %v291_v46 = vsel %vm40_vm0, %v275_v41, 0.0  ;;  %v299_v13 = vsel %vm40_vm0, %v279_v3, 0.0 }
  0x94   :  { %166 = vst.msk [vmem:[%s622_s3 + $0x60] sm:$0xff] %vm40_vm0, %v490_v32  ;;  %v292_v57 = vadd.f32 %v291_v46, %v290_v51 }
  0x96   :  { %v112_v33 = vpop.f32.mrf.mxu0  ;;  %v124_v34 = vpop.f32.mrf.mxu1 }
  0x97   :  { %v113_v35 = vadd.f32 %v472_v20, %v112_v33  ;;  %v125_v36 = vadd.f32 %v472_v20, %v124_v34  ;;  %v133_v37 = vpop.f32.mrf.mxu2  ;;  %v145_v38 = vpop.f32.mrf.mxu3  ;;  %v305_v33 = vsel %vm40_vm0, %v282_v23, 0.0 }
  0x98   :  { %v513_v39 = vadd.f32 %v472_v20, %v133_v37  ;;  %v516_v40 = vadd.f32 %v472_v20, %v145_v38 }
  0x99   :  { %156 = vst.msk [vmem:[%s622_s3 + $0x10] sm:$0xff] %vm40_vm0, %v113_v35  ;;  %v276_v44 = vmul.f32 %v113_v35, %v113_v35  ;;  %v240_v47 = vsel %vm40_vm0, %v113_v35, 0.0  ;;  %v280_v9 = vmul.f32 %v125_v36, %v125_v36  ;;  %v248_v14 = vsel %vm40_vm0, %v125_v36, 0.0 }
  0x9a   :  { %160 = vst.msk [vmem:[%s622_s3 + $0x30] sm:$0xff] %vm40_vm0, %v125_v36  ;;  %v241_v58 = vadd.f32 %v240_v47, %v239_v48  ;;  %v254_v34 = vsel %vm40_vm0, %v513_v39, 0.0 }
  0x9b   :  { %163 = vst.msk [vmem:[%s622_s3 + $0x48] sm:$0xff] %vm40_vm0, %v513_v39  ;;  %v293_v52 = vsel %vm40_vm0, %v276_v44, 0.0  ;;  %v301_v24 = vsel %vm40_vm0, %v280_v9, 0.0 }
  0x9c   :  { %167 = vst.msk [vmem:[%s622_s3 + $0x68] sm:$0xff] %vm40_vm0, %v516_v40  ;;  %v294_v0 = vadd.f32 %v293_v52, %v292_v57 }
  0x9e   :  { %v115_v49 = vpop.f32.mrf.mxu0  ;;  %v127_v50 = vpop.f32.mrf.mxu1 }
  0x9f   :  { %v116_v53 = vadd.f32 %v472_v20, %v115_v49  ;;  %v128_v54 = vadd.f32 %v472_v20, %v127_v50  ;;  %v136_v55 = vpop.f32.mrf.mxu2  ;;  %v148_v56 = vpop.f32.mrf.mxu3  ;;  %v260_v49 = vsel %vm40_vm0, %v490_v32, 0.0  ;;  %v287_v50 = vmul.f32 %v516_v40, %v516_v40 }
  0xa0   :  { %v137_v59 = vadd.f32 %v472_v20, %v136_v55  ;;  %v546_v60 = vadd.f32 %v472_v20, %v148_v56 }
  0xa1   :  { %157 = vst.msk [vmem:[%s622_s3 + $0x18] sm:$0xff] %vm40_vm0, %v116_v53  ;;  %v242_v62 = vsel %vm40_vm0, %v116_v53, 0.0  ;;  %v277_v63 = vmul.f32 %v116_v53, %v116_v53  ;;  %v281_v10 = vmul.f32 %v128_v54, %v128_v54  ;;  %v250_v15 = vsel %vm40_vm0, %v128_v54, 0.0 }
  0xa2   :  { %v243_v1 = vadd.f32 %v242_v62, %v241_v58  ;;  %161 = vst.msk [vmem:[%s622_s3 + $0x38] sm:$0xff] %vm40_vm0, %v128_v54  ;;  %v284_v35 = vmul.f32 %v137_v59, %v137_v59  ;;  %v256_v41 = vsel %vm40_vm0, %v137_v59, 0.0  ;;  %v313_v53 = vsel %vm40_vm0, %v286_v45, 0.0 }
  0xa3   :  { %v295_v4 = vsel %vm40_vm0, %v277_v63, 0.0  ;;  %164 = vst.msk [vmem:[%s622_s3 + $0x50] sm:$0xff] %vm40_vm0, %v137_v59  ;;  %v303_v25 = vsel %vm40_vm0, %v281_v10, 0.0  ;;  %v262_v54 = vsel %vm40_vm0, %v516_v40, 0.0  ;;  %v288_v55 = vmul.f32 %v546_v60, %v546_v60 }
  0xa4   :  { %v245_v5 = vadd.f32 %v244_v2, %v243_v1  ;;  %v296_v6 = vadd.f32 %v295_v4, %v294_v0  ;;  %168 = vst.msk [vmem:[%s622_s3 + $0x70] sm:$0xff] %vm40_vm0, %v546_v60  ;;  %v309_v46 = vsel %vm40_vm0, %v284_v35, 0.0  ;;  %v315_v59 = vsel %vm40_vm0, %v287_v50, 0.0 }
  0xa5   :  { %v264_v32 = vsel %vm40_vm0, %v546_v60, 0.0  ;;  %v317_v0 = vsel %vm40_vm0, %v288_v55, 0.0 }
  0xa6   :  { %v298_v11 = vadd.f32 %v297_v7, %v296_v6  ;;  %v247_v12 = vadd.f32 %v246_v8, %v245_v5 }
  0xa7   :  { %v139_v16 = vpop.f32.mrf.mxu2  ;;  %v151_v17 = vpop.f32.mrf.mxu3 }
  0xa8   :  { %v249_v18 = vadd.f32 %v248_v14, %v247_v12  ;;  %v300_v19 = vadd.f32 %v299_v13, %v298_v11  ;;  %v140_v21 = vadd.f32 %v472_v20, %v139_v16  ;;  %v152_v22 = vadd.f32 %v472_v20, %v151_v17 }
  0xa9   :  { %v283_v20 = vmul.f32 %v513_v39, %v513_v39 }
  0xaa   :  { %v302_v26 = vadd.f32 %v301_v24, %v300_v19  ;;  %v251_v27 = vadd.f32 %v250_v15, %v249_v18  ;;  %165 = vst.msk [vmem:[%s622_s3 + $0x58] sm:$0xff] %vm40_vm0, %v140_v21  ;;  %v285_v36 = vmul.f32 %v140_v21, %v140_v21  ;;  %v258_v42 = vsel %vm40_vm0, %v140_v21, 0.0 }
  0xab   :  { %169 = vst.msk [vmem:[%s622_s3 + $0x78] sm:$0xff] %vm40_vm0, %v152_v22  ;;  %v307_v31 = vsel %vm40_vm0, %v283_v20, 0.0  ;;  %v289_v56 = vmul.f32 %v152_v22, %v152_v22  ;;  %v266_v61 = vsel %vm40_vm0, %v152_v22, 0.0 }
  0xac   :  { %v253_v29 = vadd.f32 %v252_v28, %v251_v27  ;;  %v304_v30 = vadd.f32 %v303_v25, %v302_v26  ;;  %v311_v47 = vsel %vm40_vm0, %v285_v36, 0.0 }
  0xad   :  { %v319_v1 = vsel %vm40_vm0, %v289_v56, 0.0 }
  0xae   :  { %v306_v37 = vadd.f32 %v305_v33, %v304_v30  ;;  %v255_v38 = vadd.f32 %v254_v34, %v253_v29 }
  0xb0   :  { %v257_v43 = vadd.f32 %v256_v41, %v255_v38  ;;  %v308_v44 = vadd.f32 %v307_v31, %v306_v37 }
  0xb2   :  { %v310_v39 = vadd.f32 %v309_v46, %v308_v44  ;;  %v259_v48 = vadd.f32 %v258_v42, %v257_v43 }
  0xb4   :  { %v261_v51 = vadd.f32 %v260_v49, %v259_v48  ;;  %v312_v52 = vadd.f32 %v311_v47, %v310_v39 }
  0xb6   :  { %v314_v57 = vadd.f32 %v313_v53, %v312_v52  ;;  %v263_v58 = vadd.f32 %v262_v54, %v261_v51 }
  0xb8   :  { %v265_v62 = vadd.f32 %v264_v32, %v263_v58  ;;  %v316_v63 = vadd.f32 %v315_v59, %v314_v57 }
  0xba   :  { %v318_v40 = vadd.f32 %v317_v0, %v316_v63  ;;  %v267_v2 = vadd.f32 %v266_v61, %v265_v62 }
  0xbc   :  { %v268_v3 = vrot.slane %v267_v2, 4  ;;  %v320_v4 = vadd.f32 %v319_v1, %v318_v40 }
  0xbe   :  { %v269_v5 = vadd.f32 %v268_v3, %v267_v2  ;;  %v321_v6 = vrot.slane %v320_v4, 4 }
  0xc0   :  { %v270_v7 = vrot.slane %v269_v5, 2  ;;  %v322_v8 = vadd.f32 %v321_v6, %v320_v4 }
  0xc2   :  { %v271_v9 = vadd.f32 %v270_v7, %v269_v5  ;;  %v323_v10 = vrot.slane %v322_v8, 2 }
  0xc4   :  { %v272_v11 = vrot.slane %v271_v9, 1  ;;  %v324_v60 = vadd.f32 %v323_v10, %v322_v8 }
  0xc6   :  { %v325_v12 = vrot.slane %v324_v60, 1  ;;  %v273_v13 = vadd.f32 %v272_v11, %v271_v9 }
  0xc8   :  { %v326_v14 = vadd.f32 %v325_v12, %v324_v60 }
  0xca   :  { %v328_v15 = vsel %vm327_vm1, %v273_v13, %v326_v14 }
  0xcb   :  { %330 = vst.msk [vmem:[%s623_s4] sm:$0x3] %vm329_vm2, %v328_v15 }

// kernel: transform_attention_forward.11
= control target key start
LH: loop header
LB: loop body
LE: loop exit
PB: predicated region body
PF: predicated region fallthrough
CT: control target
= control target key end

     0   :  { %s98_s0 = inlined_call_operand.vmem [shape: f32[32,128], index: 0, kind: input, shape index: {}]   ;;  %s99_s1 = inlined_call_operand.vmem [shape: f32[1,128], index: 1, kind: input, shape index: {}]   ;;  %s100_s2 = inlined_call_operand.vmem [shape: f32[1,128], index: 2, kind: input, shape index: {}]   ;;  %s101_s3 = inlined_call_operand.vmem [shape: f32[32,128], index: 3, kind: output, shape index: {}]  }
   0x1   :  { %v14_v0 = vld [vmem:[%s98_s0] sm:$0xff]  ;;  %v15_v3 = vld [vmem:[%s98_s0 + $0x8] sm:$0xff]  ;;  %v16_v6 = vld [vmem:[%s98_s0 + $0x10] sm:$0xff] }
   0x2   :  { %v46_v1 = vld [vmem:[%s99_s1] ss:$0 sm:$0xff]  ;;  %v17_v7 = vld [vmem:[%s98_s0 + $0x18] sm:$0xff] }
   0x3   :  { %v47_v2 = vld [vmem:[%s100_s2] ss:$0 sm:$0xff]  ;;  %v22_v4 = vmul.f32 %v46_v1, %v14_v0  ;;  %v23_v5 = vmul.f32 %v46_v1, %v15_v3  ;;  %v24_v8 = vmul.f32 %v46_v1, %v16_v6  ;;  %v25_v9 = vmul.f32 %v46_v1, %v17_v7 }
   0x5   :  { %v30_v10 = vadd.f32 %v47_v2, %v22_v4  ;;  %v31_v11 = vadd.f32 %v47_v2, %v23_v5  ;;  %v32_v12 = vadd.f32 %v47_v2, %v24_v8  ;;  %v33_v13 = vadd.f32 %v47_v2, %v25_v9 }
   0x7   :  { %v34_v14 = vmax.f32 %v30_v10, 0.0  ;;  %v35_v15 = vmax.f32 %v31_v11, 0.0  ;;  %v36_v16 = vmax.f32 %v32_v12, 0.0  ;;  %v37_v17 = vmax.f32 %v33_v13, 0.0 }
   0x9   :  { %38 = vst [vmem:[%s101_s3] sm:$0xff] %v34_v14 }
   0xa   :  { %39 = vst [vmem:[%s101_s3 + $0x8] sm:$0xff] %v35_v15 }
   0xb   :  { %40 = vst [vmem:[%s101_s3 + $0x10] sm:$0xff] %v36_v16 }
   0xc   :  { %41 = vst [vmem:[%s101_s3 + $0x18] sm:$0xff] %v37_v17 }

// kernel: transform_attention_forward.9
= control target key start
LH: loop header
LB: loop body
LE: loop exit
PB: predicated region body
PF: predicated region fallthrough
CT: control target
= control target key end

     0   :  { %vm440_vm0 = vcmask 64512   ;;  %vm1305_vm1 = vcmask 60416   ;;  %s10433_s30 = smov 16   ;;  %s10434_s10 = smov 24   ;;  %vm9178_vm2 = vcmask 130048   ;;  %vm9211_vm3 = vcmask 195584   ;;  %s15050_s1 = inlined_call_operand.vmem [shape: f32[32,8,32], index: 1, kind: input, shape index: {}]   ;;  %s15051_s5 = inlined_call_operand.vmem [shape: f32[1,1,32], index: 5, kind: input, shape index: {}]   ;;  %s15052_s6 = inlined_call_operand.vmem [shape: f32[1,1,32], index: 6, kind: input, shape index: {}]   ;;  %s15053_s0 = inlined_call_operand.vmem [shape: f32[32,4,32], index: 0, kind: input, shape index: {}]   ;;  %s15054_s3 = inlined_call_operand.vmem [shape: f32[1,1,32], index: 3, kind: input, shape index: {}]   ;;  %s15055_s4 = inlined_call_operand.vmem [shape: f32[1,1,32], index: 4, kind: input, shape index: {}]   ;;  %s15056_s7 = inlined_call_operand.vmem [shape: f32[1,1,32], index: 7, kind: input, shape index: {}]   ;;  %s15057_s8 = inlined_call_operand.vmem [shape: f32[1,1,32], index: 8, kind: input, shape index: {}]   ;;  %s15058_s2 = inlined_call_operand.vmem [shape: f32[32,8,32], index: 2, kind: input, shape index: {}]   ;;  %s15059_s9 = inlined_call_operand.vmem [shape: f32[32,4,32], index: 9, kind: output, shape index: {}]  }
   0x1   :  { %v168_v0 = vld [vmem:[%s15050_s1] sm:$0xff]  ;;  %v170_v3 = vld [vmem:[%s15050_s1 + $0x10] sm:$0xff]  ;;  %v34_v14 = vld [vmem:[%s15053_s0 + $0x8] sm:$0xf]  ;;  %vm9244_vm4 = vcmask 257024  }
   0x2   :  { %v10491_v1 = vld [vmem:[%s15051_s5] ss:$0 sm:$0xff]  ;;  %v33_v6 = vld [vmem:[%s15053_s0 + $0x4] sm:$0xf]  ;;  %v169_v15 = vld [vmem:[%s15050_s1 + $0x8] sm:$0xff]  ;;  %s10429_s5 = smov 120  }
   0x3   :  { %v10496_v2 = vld [vmem:[%s15052_s6] ss:$0 sm:$0xff]  ;;  %v204_v4 = vmul.f32 %v10491_v1, %v168_v0  ;;  %v206_v5 = vmul.f32 %v10491_v1, %v170_v3  ;;  %v171_v16 = vld [vmem:[%s15050_s1 + $0x18] sm:$0xff]  ;;  %v205_v18 = vmul.f32 %v10491_v1, %v169_v15  ;;  %v174_v21 = vld [vmem:[%s15050_s1 + $0x30] sm:$0xff] }
   0x4   :  { %v10509_v7 = vld [vmem:[%s15054_s3] ss:$0 sm:$0xff]  ;;  %v207_v19 = vmul.f32 %v10491_v1, %v171_v16  ;;  %v35_v22 = vld [vmem:[%s15053_s0 + $0xc] sm:$0xf]  ;;  %v36_v31 = vld [vmem:[%s15053_s0 + $0x10] sm:$0xf]  ;;  %v210_v34 = vmul.f32 %v10491_v1, %v174_v21 }
   0x5   :  { %v10514_v8 = vld [vmem:[%s15055_s4] ss:$0 sm:$0xff]  ;;  %v240_v10 = vadd.f32 %v10496_v2, %v204_v4  ;;  %v242_v11 = vadd.f32 %v10496_v2, %v206_v5  ;;  %v69_v12 = vmul.f32 %v10509_v7, %v33_v6  ;;  %v70_v17 = vmul.f32 %v10509_v7, %v34_v14  ;;  %v173_v36 = vld [vmem:[%s15050_s1 + $0x28] sm:$0xff]  ;;  %v175_v37 = vld [vmem:[%s15050_s1 + $0x38] sm:$0xff] }
   0x6   :  { %v32_v9 = vld [vmem:[%s15053_s0] sm:$0xf]  ;;  %v241_v28 = vadd.f32 %v10496_v2, %v205_v18  ;;  %v243_v29 = vadd.f32 %v10496_v2, %v207_v19  ;;  %v71_v35 = vmul.f32 %v10509_v7, %v35_v22  ;;  %v37_v38 = vld [vmem:[%s15053_s0 + $0x14] sm:$0xf]  ;;  %v38_v43 = vld [vmem:[%s15053_s0 + $0x18] sm:$0xf]  ;;  %v246_v44 = vadd.f32 %v10496_v2, %v210_v34 }
   0x7   :  { %v68_v13 = vmul.f32 %v10509_v7, %v32_v9  ;;  %v172_v20 = vld [vmem:[%s15050_s1 + $0x20] sm:$0xff]  ;;  %v10544_v23 = vmax.f32 %v240_v10, 0.0  ;;  %v10546_v24 = vmax.f32 %v242_v11, 0.0  ;;  %v105_v25 = vadd.f32 %v10514_v8, %v69_v12  ;;  %v39_v47 = vld [vmem:[%s15053_s0 + $0x1c] sm:$0xf]  ;;  %v178_v52 = vld [vmem:[%s15050_s1 + $0x50] sm:$0xff] }
   0x8   :  { %v106_v27 = vadd.f32 %v10514_v8, %v70_v17  ;;  %v208_v30 = vmul.f32 %v10491_v1, %v172_v20  ;;  %v10580_v40 = vmax.f32 %v241_v28, 0.0  ;;  %v10582_v41 = vmax.f32 %v243_v29, 0.0  ;;  %v176_v53 = vld [vmem:[%s15050_s1 + $0x40] sm:$0xff]  ;;  %v177_v62 = vld [vmem:[%s15050_s1 + $0x48] sm:$0xff]  ;;  %v179_v4 = vld [vmem:[%s15050_s1 + $0x58] sm:$0xff] }
   0x9   :  { %15242 = vst [vmem:[#allocation2_spill] sm:$0xff] %v10544_v23  ;;  %v104_v26 = vadd.f32 %v10514_v8, %v68_v13  ;;  %9281 = vmatpush.xpose.msk.msra.mxu0 %vm440_vm0, %v10544_v23  ;;  %9285 = vmatpush.xpose.msk.msra.mxu2 %vm440_vm0, %v10546_v24  ;;  %v10561_v32 = vmax.f32 %v105_v25, 0.0  ;;  %v107_v45 = vadd.f32 %v10514_v8, %v71_v35  ;;  %v10617_v54 = vmax.f32 %v246_v44, 0.0  ;;  %v40_v5 = vld [vmem:[%s15053_s0 + $0x20] sm:$0xf]  ;;  %v181_v44 = vld [vmem:[%s15050_s1 + $0x68] sm:$0xff] }
   0xa   :  { %15243 = vst [vmem:[#allocation3_spill] sm:$0xff] %v10546_v24  ;;  %2396 = vrot.lane.b32.xlu2 %v10544_v23, %s10429_s5  ;;  %v10578_v39 = vmax.f32 %v106_v27, 0.0  ;;  %v244_v42 = vadd.f32 %v10496_v2, %v208_v30  ;;  %v72_v46 = vmul.f32 %v10509_v7, %v36_v31  ;;  %v209_v49 = vmul.f32 %v10491_v1, %v173_v36  ;;  %v42_v6 = vld [vmem:[%s15053_s0 + $0x28] sm:$0xf]  ;;  %v43_v13 = vld [vmem:[%s15053_s0 + $0x2c] sm:$0xf] }
   0xb   :  { %15244 = vst [vmem:[#allocation4_spill] sm:$0xff] %v10561_v32  ;;  %v10563_v33 = vmax.f32 %v104_v26, 0.0  ;;  %2422 = vrot.lane.b32.xlu0 %v10561_v32, %s10429_s5  ;;  %v211_v50 = vmul.f32 %v10491_v1, %v175_v37  ;;  %v73_v51 = vmul.f32 %v10509_v7, %v37_v38  ;;  %9283 = vmatpush.xpose.msk.msra.mxu1 %vm440_vm0, %v10580_v40  ;;  %v10619_v55 = vmax.f32 %v107_v45, 0.0  ;;  %v41_v22 = vld [vmem:[%s15053_s0 + $0x24] sm:$0xf]  ;;  %v182_v30 = vld [vmem:[%s15050_s1 + $0x70] sm:$0xff] }
   0xc   :  { %15246 = vst [vmem:[#allocation6_spill] sm:$0xff] %v10578_v39  ;;  %9286 = vmatmul.msk.f32.vlgmr.msra.gmra.mxu2 %vm440_vm0, %v10578_v39  ;;  %v10602_v48 = vmax.f32 %v244_v42, 0.0  ;;  %9287 = vmatpush.xpose.msk.msra.mxu3 %vm440_vm0, %v10582_v41  ;;  %v108_v56 = vadd.f32 %v10514_v8, %v72_v46  ;;  %v74_v57 = vmul.f32 %v10509_v7, %v38_v43  ;;  %v180_v25 = vld [vmem:[%s15050_s1 + $0x60] sm:$0xff]  ;;  %v183_v37 = vld [vmem:[%s15050_s1 + $0x78] sm:$0xff] }
   0xd   :  { %15245 = vst [vmem:[#allocation5_spill] sm:$0xff] %v10563_v33  ;;  %2394 = vrot.lane.b32.xlu1 %v10563_v33, %s10429_s5  ;;  %9282 = vmatmul.msk.f32.vlgmr.msra.gmra.mxu0 %vm440_vm0, %v10563_v33  ;;  %v245_v58 = vadd.f32 %v10496_v2, %v209_v49  ;;  %v247_v59 = vadd.f32 %v10496_v2, %v211_v50  ;;  %v46_v49 = vld [vmem:[%s15053_s0 + $0x38] sm:$0xf]  ;;  %v44_v50 = vld [vmem:[%s15053_s0 + $0x30] sm:$0xf] }
   0xe   :  { %15247 = vst [vmem:[#allocation7_spill] sm:$0xff] %v10580_v40  ;;  %9289 = vmatpush.xpose.msk.msrb.mxu0 %vm440_vm0, %v10602_v48  ;;  %v109_v60 = vadd.f32 %v10514_v8, %v73_v51  ;;  %v75_v61 = vmul.f32 %v10509_v7, %v39_v47  ;;  %9293 = vmatpush.xpose.msk.msrb.mxu2 %vm440_vm0, %v10617_v54  ;;  %v10650_v9 = vmax.f32 %v108_v56, 0.0 }
   0xf   :  { %15248 = vst [vmem:[#allocation8_spill] sm:$0xff] %v10582_v41  ;;  %v110_v63 = vadd.f32 %v10514_v8, %v74_v57  ;;  %v214_v0 = vmul.f32 %v10491_v1, %v178_v52  ;;  %v212_v3 = vmul.f32 %v10491_v1, %v176_v53  ;;  %9284 = vmatmul.msk.f32.vlgmr.msra.gmra.mxu1 %vm440_vm0, %v10561_v32  ;;  %v10652_v10 = vmax.f32 %v245_v58, 0.0 }
  0x10   :  { %15249 = vst [vmem:[#allocation9_spill] sm:$0xff] %v10602_v48  ;;  %9288 = vmatmul.msk.f32.vlgmr.msra.gmra.mxu3 %vm440_vm0, %v10619_v55  ;;  %v10654_v11 = vmax.f32 %v247_v59, 0.0  ;;  %v111_v12 = vadd.f32 %v10514_v8, %v75_v61  ;;  %v213_v17 = vmul.f32 %v10491_v1, %v177_v62  ;;  %v10669_v18 = vmax.f32 %v109_v60, 0.0  ;;  %v45_v60 = vld [vmem:[%s15053_s0 + $0x34] sm:$0xf] }
  0x11   :  { %15250 = vst [vmem:[#allocation10_spill] sm:$0xff] %v10617_v54  ;;  %v10660_v14 = vmax.f32 %v110_v63, 0.0  ;;  %v250_v15 = vadd.f32 %v10496_v2, %v214_v0  ;;  %v248_v16 = vadd.f32 %v10496_v2, %v212_v3  ;;  %9291 = vmatpush.xpose.msk.msrb.mxu1 %vm440_vm0, %v10652_v10  ;;  %v215_v19 = vmul.f32 %v10491_v1, %v179_v4  ;;  %v186_v61 = vld [vmem:[%s15050_s1 + $0x90] sm:$0xff]  ;;  %v47_v4 = vld [vmem:[%s15053_s0 + $0x3c] sm:$0xf] }
  0x12   :  { %15251 = vst [vmem:[#allocation11_spill] sm:$0xff] %v10619_v55  ;;  %2424 = vrot.lane.b32.xlu2 %v10580_v40, %s10429_s5  ;;  %v76_v20 = vmul.f32 %v10509_v7, %v40_v5  ;;  %v78_v21 = vmul.f32 %v10509_v7, %v42_v6  ;;  %v249_v28 = vadd.f32 %v10496_v2, %v213_v17  ;;  %v10697_v31 = vmax.f32 %v111_v12, 0.0  ;;  %v184_v5 = vld [vmem:[%s15050_s1 + $0x80] sm:$0xff] }
  0x13   :  { %15252 = vst [vmem:[#allocation12_spill] sm:$0xff] %v10650_v9  ;;  %2452 = vrot.lane.b32.xlu0 %v10546_v24, %s10429_s5  ;;  %v10684_v26 = vmax.f32 %v250_v15, 0.0  ;;  %v10686_v27 = vmax.f32 %v248_v16, 0.0  ;;  %v79_v29 = vmul.f32 %v10509_v7, %v43_v13  ;;  %9295 = vmatpush.xpose.msk.msrb.mxu3 %vm440_vm0, %v10654_v11  ;;  %v251_v34 = vadd.f32 %v10496_v2, %v215_v19  ;;  %v187_v15 = vld [vmem:[%s15050_s1 + $0x98] sm:$0xff] }
  0x14   :  { %15253 = vst [vmem:[#allocation13_spill] sm:$0xff] %v10652_v10  ;;  %v112_v35 = vadd.f32 %v10514_v8, %v76_v20  ;;  %v114_v36 = vadd.f32 %v10514_v8, %v78_v21  ;;  %9294 = vmatmul.msk.f32.vlgmr.msrb.gmra.mxu2 %vm440_vm0, %v10660_v14  ;;  %v10709_v38 = vmax.f32 %v249_v28, 0.0  ;;  %v77_v42 = vmul.f32 %v10509_v7, %v41_v22  ;;  %v185_v21 = vld [vmem:[%s15050_s1 + $0x88] sm:$0xff] }
  0x15   :  { %15254 = vst [vmem:[#allocation14_spill] sm:$0xff] %v10654_v11  ;;  %2450 = vrot.lane.b32.xlu1 %v10578_v39, %s10429_s5  ;;  %9290 = vmatmul.msk.f32.vlgmr.msrb.gmra.mxu0 %vm440_vm0, %v10650_v9  ;;  %v216_v43 = vmul.f32 %v10491_v1, %v180_v25  ;;  %v10718_v45 = vmax.f32 %v251_v34, 0.0  ;;  %v115_v46 = vadd.f32 %v10514_v8, %v79_v29  ;;  %v197_v39 = vld [vmem:[%s15050_s1 + $0xe8] sm:$0xff] }
  0x16   :  { %15255 = vst [vmem:[#allocation15_spill] sm:$0xff] %v10660_v14  ;;  %9297 = vmatpush.xpose.msk.msra.mxu0 %vm440_vm0, %v10686_v27  ;;  %9301 = vmatpush.xpose.msk.msra.mxu2 %vm440_vm0, %v10684_v26  ;;  %v218_v47 = vmul.f32 %v10491_v1, %v182_v30  ;;  %v113_v51 = vadd.f32 %v10514_v8, %v77_v42  ;;  %v10737_v56 = vmax.f32 %v112_v35, 0.0  ;;  %v10739_v57 = vmax.f32 %v114_v36, 0.0  ;;  %v48_v30 = vld [vmem:[%s15053_s0 + $0x40] sm:$0xf] }
  0x17   :  { %15256 = vst [vmem:[#allocation16_spill] sm:$0xff] %v10669_v18  ;;  %9299 = vmatpush.xpose.msk.msra.mxu1 %vm440_vm0, %v10709_v38  ;;  %v252_v52 = vadd.f32 %v10496_v2, %v216_v43  ;;  %v219_v53 = vmul.f32 %v10491_v1, %v183_v37  ;;  %v217_v59 = vmul.f32 %v10491_v1, %v181_v44  ;;  %v10764_v6 = vmax.f32 %v115_v46, 0.0  ;;  %v50_v43 = vld [vmem:[%s15053_s0 + $0x48] sm:$0xf]  ;;  %v190_v44 = vld [vmem:[%s15050_s1 + $0xb0] sm:$0xff] }
  0x18   :  { %15257 = vst [vmem:[#allocation17_spill] sm:$0xff] %v10684_v26  ;;  %9292 = vmatmul.msk.f32.vlgmr.msrb.gmra.mxu1 %vm440_vm0, %v10669_v18  ;;  %9296 = vmatmul.msk.f32.vlgmr.msrb.gmra.mxu3 %vm440_vm0, %v10697_v31  ;;  %v254_v58 = vadd.f32 %v10496_v2, %v218_v47  ;;  %v82_v0 = vmul.f32 %v10509_v7, %v46_v49  ;;  %v10776_v16 = vmax.f32 %v113_v51, 0.0  ;;  %v49_v51 = vld [vmem:[%s15053_s0 + $0x44] sm:$0xf] }
  0x19   :  { %15258 = vst [vmem:[#allocation18_spill] sm:$0xff] %v10686_v27  ;;  %9303 = vmatpush.xpose.msk.msra.mxu3 %vm440_vm0, %v10718_v45  ;;  %v10751_v62 = vmax.f32 %v252_v52, 0.0  ;;  %v255_v63 = vadd.f32 %v10496_v2, %v219_v53  ;;  %v80_v3 = vmul.f32 %v10509_v7, %v44_v50  ;;  %v253_v13 = vadd.f32 %v10496_v2, %v217_v59  ;;  %v188_v52 = vld [vmem:[%s15050_s1 + $0xa0] sm:$0xff] }
  0x1a   :  { %15259 = vst [vmem:[#allocation19_spill] sm:$0xff] %v10697_v31  ;;  %2478 = vrot.lane.b32.xlu2 %v10619_v55, %s10429_s5  ;;  %v10766_v12 = vmax.f32 %v254_v58, 0.0  ;;  %v81_v19 = vmul.f32 %v10509_v7, %v45_v60  ;;  %v222_v20 = vmul.f32 %v10491_v1, %v186_v61  ;;  %v83_v28 = vmul.f32 %v10509_v7, %v47_v4 }
  0x1b   :  { %15260 = vst [vmem:[#allocation20_spill] sm:$0xff] %v10709_v38  ;;  %2506 = vrot.lane.b32.xlu0 %v10650_v9, %s10429_s5  ;;  %v10778_v17 = vmax.f32 %v255_v63, 0.0  ;;  %v10789_v22 = vmax.f32 %v253_v13, 0.0  ;;  %v116_v25 = vadd.f32 %v10514_v8, %v80_v3  ;;  %v220_v29 = vmul.f32 %v10491_v1, %v184_v5  ;;  %9305 = vmatpush.xpose.msk.msrb.mxu0 %vm440_vm0, %v10751_v62  ;;  %v51_v3 = vld [vmem:[%s15053_s0 + $0x4c] sm:$0xf]  ;;  %v191_v5 = vld [vmem:[%s15050_s1 + $0xb8] sm:$0xff] }
  0x1c   :  { %15261 = vst [vmem:[#allocation21_spill] sm:$0xff] %v10718_v45  ;;  %9309 = vmatpush.xpose.msk.msrb.mxu2 %vm440_vm0, %v10766_v12  ;;  %v118_v34 = vadd.f32 %v10514_v8, %v82_v0  ;;  %v258_v35 = vadd.f32 %v10496_v2, %v222_v20  ;;  %v223_v36 = vmul.f32 %v10491_v1, %v187_v15  ;;  %v189_v20 = vld [vmem:[%s15050_s1 + $0xa8] sm:$0xff] }
  0x1d   :  { %15262 = vst [vmem:[#allocation22_spill] sm:$0xff] %v10737_v56  ;;  %2480 = vrot.lane.b32.xlu1 %v10582_v41, %s10429_s5  ;;  %9298 = vmatmul.msk.f32.vlgmr.msra.gmra.mxu0 %vm440_vm0, %v10737_v56  ;;  %v256_v37 = vadd.f32 %v10496_v2, %v220_v29  ;;  %v221_v42 = vmul.f32 %v10491_v1, %v185_v21  ;;  %v10831_v53 = vmax.f32 %v116_v25, 0.0  ;;  %v199_v41 = vld [vmem:[%s15050_s1 + $0xf8] sm:$0xff] }
  0x1e   :  { %15263 = vst [vmem:[#allocation23_spill] sm:$0xff] %v10739_v57  ;;  %9302 = vmatmul.msk.f32.vlgmr.msra.gmra.mxu2 %vm440_vm0, %v10739_v57  ;;  %9311 = vmatpush.xpose.msk.msrb.mxu3 %vm440_vm0, %v10778_v17  ;;  %v117_v46 = vadd.f32 %v10514_v8, %v81_v19  ;;  %v10817_v47 = vmax.f32 %v258_v35, 0.0  ;;  %v259_v49 = vadd.f32 %v10496_v2, %v223_v36  ;;  %v10837_v61 = vmax.f32 %v118_v34, 0.0 }
  0x1f   :  { %15264 = vst [vmem:[#allocation24_spill] sm:$0xff] %v10751_v62  ;;  %9307 = vmatpush.xpose.msk.msrb.mxu1 %vm440_vm0, %v10789_v22  ;;  %v84_v50 = vmul.f32 %v10509_v7, %v48_v30  ;;  %v119_v58 = vadd.f32 %v10514_v8, %v83_v28  ;;  %v10834_v59 = vmax.f32 %v256_v37, 0.0  ;;  %v257_v60 = vadd.f32 %v10496_v2, %v221_v42 }
  0x20   :  { %15265 = vst [vmem:[#allocation25_spill] sm:$0xff] %v10764_v6  ;;  %9304 = vmatmul.msk.f32.vlgmr.msra.gmra.mxu3 %vm440_vm0, %v10764_v6  ;;  %9300 = vmatmul.msk.f32.vlgmr.msra.gmra.mxu1 %vm440_vm0, %v10776_v16  ;;  %v10841_v63 = vmax.f32 %v259_v49, 0.0  ;;  %v86_v0 = vmul.f32 %v10509_v7, %v50_v43  ;;  %v226_v4 = vmul.f32 %v10491_v1, %v190_v44  ;;  %v10866_v21 = vmax.f32 %v117_v46, 0.0  ;;  %v52_v44 = vld [vmem:[%s15053_s0 + $0x50] sm:$0xf] }
  0x21   :  { %15266 = vst [vmem:[#allocation26_spill] sm:$0xff] %v10766_v12  ;;  %9317 = vmatpush.xpose.msk.msra.mxu2 %vm440_vm0, %v10817_v47  ;;  %9313 = vmatpush.xpose.msk.msra.mxu0 %vm440_vm0, %v10834_v59  ;;  %v10855_v13 = vmax.f32 %v257_v60, 0.0  ;;  %v85_v15 = vmul.f32 %v10509_v7, %v49_v51  ;;  %v224_v19 = vmul.f32 %v10491_v1, %v188_v52  ;;  %v10873_v30 = vmax.f32 %v119_v58, 0.0  ;;  %v54_v51 = vld [vmem:[%s15053_s0 + $0x58] sm:$0xf]  ;;  %v194_v52 = vld [vmem:[%s15050_s1 + $0xd0] sm:$0xff] }
  0x22   :  { %15267 = vst [vmem:[#allocation27_spill] sm:$0xff] %v10776_v16  ;;  %2508 = vrot.lane.b32.xlu2 %v10602_v48, %s10429_s5  ;;  %v120_v25 = vadd.f32 %v10514_v8, %v84_v50  ;;  %v262_v28 = vadd.f32 %v10496_v2, %v226_v4  ;;  %v225_v29 = vmul.f32 %v10491_v1, %v189_v20 }
  0x23   :  { %15268 = vst [vmem:[#allocation28_spill] sm:$0xff] %v10778_v17  ;;  %2536 = vrot.lane.b32.xlu0 %v10652_v10, %s10429_s5  ;;  %9319 = vmatpush.xpose.msk.msra.mxu3 %vm440_vm0, %v10841_v63  ;;  %v87_v34 = vmul.f32 %v10509_v7, %v51_v3  ;;  %v260_v35 = vadd.f32 %v10496_v2, %v224_v19 }
  0x24   :  { %15269 = vst [vmem:[#allocation29_spill] sm:$0xff] %v10789_v22  ;;  %v227_v36 = vmul.f32 %v10491_v1, %v191_v5  ;;  %9315 = vmatpush.xpose.msk.msra.mxu1 %vm440_vm0, %v10855_v13  ;;  %v122_v37 = vadd.f32 %v10514_v8, %v86_v0  ;;  %v10885_v42 = vmax.f32 %v262_v28, 0.0  ;;  %v261_v43 = vadd.f32 %v10496_v2, %v225_v29 }
  0x25   :  { %15270 = vst [vmem:[#allocation30_spill] sm:$0xff] %v10817_v47  ;;  %2534 = vrot.lane.b32.xlu1 %v10669_v18, %s10429_s5  ;;  %9306 = vmatmul.msk.f32.vlgmr.msrb.gmra.mxu0 %vm440_vm0, %v10831_v53  ;;  %v121_v46 = vadd.f32 %v10514_v8, %v85_v15  ;;  %v10892_v49 = vmax.f32 %v260_v35, 0.0  ;;  %v230_v60 = vmul.f32 %v10491_v1, %v194_v52  ;;  %v10910_v0 = vmax.f32 %v120_v25, 0.0  ;;  %v55_v15 = vld [vmem:[%s15053_s0 + $0x5c] sm:$0xf]  ;;  %v193_v35 = vld [vmem:[%s15050_s1 + $0xc8] sm:$0xff] }
  0x26   :  { %15271 = vst [vmem:[#allocation31_spill] sm:$0xff] %v10831_v53  ;;  %9310 = vmatmul.msk.f32.vlgmr.msrb.gmra.mxu2 %vm440_vm0, %v10837_v61  ;;  %v263_v50 = vadd.f32 %v10496_v2, %v227_v36  ;;  %v10903_v58 = vmax.f32 %v261_v43, 0.0  ;;  %v123_v3 = vadd.f32 %v10514_v8, %v87_v34  ;;  %v88_v5 = vmul.f32 %v10509_v7, %v52_v44  ;;  %v53_v25 = vld [vmem:[%s15053_s0 + $0x54] sm:$0xf]  ;;  %v192_v34 = vld [vmem:[%s15050_s1 + $0xc0] sm:$0xff]  ;;  %v195_v44 = vld [vmem:[%s15050_s1 + $0xd8] sm:$0xff] }
  0x27   :  { %15272 = vst [vmem:[#allocation32_spill] sm:$0xff] %v10834_v59  ;;  %9325 = vmatpush.xpose.msk.msrb.mxu2 %vm440_vm0, %v10885_v42  ;;  %v10919_v19 = vmax.f32 %v122_v37, 0.0  ;;  %9321 = vmatpush.xpose.msk.msrb.mxu0 %vm440_vm0, %v10892_v49  ;;  %v90_v20 = vmul.f32 %v10509_v7, %v54_v51  ;;  %v266_v28 = vadd.f32 %v10496_v2, %v230_v60  ;;  %v10932_v29 = vmax.f32 %v121_v46, 0.0 }
  0x28   :  { %15273 = vst [vmem:[#allocation33_spill] sm:$0xff] %v10837_v61  ;;  %9308 = vmatmul.msk.f32.vlgmr.msrb.gmra.mxu1 %vm440_vm0, %v10866_v21  ;;  %9312 = vmatmul.msk.f32.vlgmr.msrb.gmra.mxu3 %vm440_vm0, %v10873_v30  ;;  %v10913_v4 = vmax.f32 %v263_v50, 0.0  ;;  %v91_v36 = vmul.f32 %v10509_v7, %v55_v15  ;;  %v228_v37 = vmul.f32 %v10491_v1, %v192_v34  ;;  %v10956_v50 = vmax.f32 %v123_v3, 0.0  ;;  %v56_v3 = vld [vmem:[%s15053_s0 + $0x60] sm:$0xf] }
  0x29   :  { %15274 = vst [vmem:[#allocation34_spill] sm:$0xff] %v10841_v63  ;;  %9323 = vmatpush.xpose.msk.msrb.mxu1 %vm440_vm0, %v10903_v58  ;;  %v10948_v43 = vmax.f32 %v266_v28, 0.0  ;;  %v229_v46 = vmul.f32 %v10491_v1, %v193_v35  ;;  %v124_v51 = vadd.f32 %v10514_v8, %v88_v5  ;;  %v89_v52 = vmul.f32 %v10509_v7, %v53_v25  ;;  %v58_v25 = vld [vmem:[%s15053_s0 + $0x68] sm:$0xf] }
  0x2a   :  { %15275 = vst [vmem:[#allocation35_spill] sm:$0xff] %v10855_v13  ;;  %2562 = vrot.lane.b32.xlu2 %v10660_v14, %s10429_s5  ;;  %9327 = vmatpush.xpose.msk.msrb.mxu3 %vm440_vm0, %v10913_v4  ;;  %v231_v60 = vmul.f32 %v10491_v1, %v195_v44  ;;  %v126_v15 = vadd.f32 %v10514_v8, %v90_v20 }
  0x2b   :  { %15276 = vst [vmem:[#allocation36_spill] sm:$0xff] %v10866_v21  ;;  %2590 = vrot.lane.b32.xlu0 %v10697_v31, %s10429_s5  ;;  %v264_v28 = vadd.f32 %v10496_v2, %v228_v37  ;;  %v265_v34 = vadd.f32 %v10496_v2, %v229_v46  ;;  %v127_v35 = vadd.f32 %v10514_v8, %v91_v36  ;;  %v10985_v46 = vmax.f32 %v124_v51, 0.0  ;;  %v57_v36 = vld [vmem:[%s15053_s0 + $0x64] sm:$0xf]  ;;  %v59_v51 = vld [vmem:[%s15053_s0 + $0x6c] sm:$0xf] }
  0x2c   :  { %15277 = vst [vmem:[#allocation37_spill] sm:$0xff] %v10873_v30  ;;  %v267_v5 = vadd.f32 %v10496_v2, %v231_v60  ;;  %v92_v44 = vmul.f32 %v10509_v7, %v56_v3  ;;  %v125_v60 = vadd.f32 %v10514_v8, %v89_v52  ;;  %v196_v52 = vld [vmem:[%s15050_s1 + $0xe0] sm:$0xff] }
  0x2d   :  { %15278 = vst [vmem:[#allocation38_spill] sm:$0xff] %v10885_v42  ;;  %2564 = vrot.lane.b32.xlu1 %v10617_v54, %s10429_s5  ;;  %9314 = vmatmul.msk.f32.vlgmr.msra.gmra.mxu0 %vm440_vm0, %v10910_v0  ;;  %v10976_v20 = vmax.f32 %v264_v28, 0.0  ;;  %v10978_v37 = vmax.f32 %v265_v34, 0.0  ;;  %v10993_v28 = vmax.f32 %v126_v15, 0.0  ;;  %v94_v34 = vmul.f32 %v10509_v7, %v58_v25  ;;  %v198_v25 = vld [vmem:[%s15050_s1 + $0xf0] sm:$0xff] }
  0x2e   :  { %15279 = vst [vmem:[#allocation39_spill] sm:$0xff] %v10892_v49  ;;  %9318 = vmatmul.msk.f32.vlgmr.msra.gmra.mxu2 %vm440_vm0, %v10919_v19  ;;  %v10988_v54 = vmax.f32 %v267_v5, 0.0  ;;  %v11014_v15 = vmax.f32 %v127_v35, 0.0  ;;  %v128_v3 = vadd.f32 %v10514_v8, %v92_v44  ;;  %v93_v5 = vmul.f32 %v10509_v7, %v57_v36 }
  0x2f   :  { %15280 = vst [vmem:[#allocation40_spill] sm:$0xff] %v10903_v58  ;;  %9333 = vmatpush.xpose.msk.msra.mxu2 %vm440_vm0, %v10948_v43  ;;  %9329 = vmatpush.xpose.msk.msra.mxu0 %vm440_vm0, %v10976_v20  ;;  %v232_v18 = vmul.f32 %v10491_v1, %v196_v52  ;;  %v95_v35 = vmul.f32 %v10509_v7, %v59_v51  ;;  %v60_v51 = vld [vmem:[%s15053_s0 + $0x70] sm:$0xf] }
  0x30   :  { %15281 = vst [vmem:[#allocation41_spill] sm:$0xff] %v10910_v0  ;;  %9316 = vmatmul.msk.f32.vlgmr.msra.gmra.mxu1 %vm440_vm0, %v10932_v29  ;;  %9320 = vmatmul.msk.f32.vlgmr.msra.gmra.mxu3 %vm440_vm0, %v10956_v50  ;;  %v234_v44 = vmul.f32 %v10491_v1, %v198_v25  ;;  %v235_v36 = vmul.f32 %v10491_v1, %v199_v41 }
  0x31   :  { %15282 = vst [vmem:[#allocation42_spill] sm:$0xff] %v10913_v4  ;;  %9331 = vmatpush.xpose.msk.msra.mxu1 %vm440_vm0, %v10978_v37  ;;  %9335 = vmatpush.xpose.msk.msra.mxu3 %vm440_vm0, %v10988_v54  ;;  %v130_v52 = vadd.f32 %v10514_v8, %v94_v34  ;;  %v268_v23 = vadd.f32 %v10496_v2, %v232_v18 }
  0x32   :  { %15283 = vst [vmem:[#allocation43_spill] sm:$0xff] %v10919_v19  ;;  %2592 = vrot.lane.b32.xlu2 %v10654_v11, %s10429_s5  ;;  %v270_v25 = vadd.f32 %v10496_v2, %v234_v44  ;;  %v271_v41 = vadd.f32 %v10496_v2, %v235_v36  ;;  %v11045_v11 = vmax.f32 %v128_v3, 0.0  ;;  %v61_v44 = vld [vmem:[%s15053_s0 + $0x74] sm:$0xf] }
  0x33   :  { %15284 = vst [vmem:[#allocation44_spill] sm:$0xff] %v10932_v29  ;;  %2620 = vrot.lane.b32.xlu0 %v10686_v27, %s10429_s5  ;;  %v129_v27 = vadd.f32 %v10514_v8, %v93_v5  ;;  %v11048_v14 = vmax.f32 %v268_v23, 0.0  ;;  %v96_v23 = vmul.f32 %v10509_v7, %v60_v51  ;;  %v11064_v5 = vmax.f32 %v130_v52, 0.0 }
  0x34   :  { %15285 = vst [vmem:[#allocation45_spill] sm:$0xff] %v10948_v43  ;;  %v11059_v18 = vmax.f32 %v270_v25, 0.0  ;;  %v11061_v3 = vmax.f32 %v271_v41, 0.0  ;;  %v97_v25 = vmul.f32 %v10509_v7, %v61_v44 }
  0x35   :  { %15286 = vst [vmem:[#allocation46_spill] sm:$0xff] %v10956_v50  ;;  %2618 = vrot.lane.b32.xlu1 %v10737_v56, %s10429_s5  ;;  %9322 = vmatmul.msk.f32.vlgmr.msrb.gmra.mxu0 %vm440_vm0, %v10985_v46  ;;  %v11027_v56 = vmax.f32 %v125_v60, 0.0  ;;  %v233_v60 = vmul.f32 %v10491_v1, %v197_v39  ;;  %v62_v1 = vld [vmem:[%s15053_s0 + $0x78] sm:$0xf]  ;;  %v131_v39 = vadd.f32 %v10514_v8, %v95_v35  ;;  %v63_v35 = vld [vmem:[%s15053_s0 + $0x7c] sm:$0xf] }
  0x36   :  { %15287 = vst [vmem:[#allocation47_spill] sm:$0xff] %v10976_v20  ;;  %9326 = vmatmul.msk.f32.vlgmr.msrb.gmra.mxu2 %vm440_vm0, %v10993_v28  ;;  %9337 = vmatpush.xpose.msk.msrb.mxu0 %vm440_vm0, %v11048_v14  ;;  %v98_v36 = vmul.f32 %v10509_v7, %v62_v1  ;;  %v11085_v52 = vmax.f32 %v129_v27, 0.0  ;;  %v132_v51 = vadd.f32 %v10514_v8, %v96_v23 }
  0x37   :  { %15288 = vst [vmem:[#allocation48_spill] sm:$0xff] %v10978_v37  ;;  %v269_v34 = vadd.f32 %v10496_v2, %v233_v60  ;;  %9341 = vmatpush.xpose.msk.msrb.mxu2 %vm440_vm0, %v11059_v18  ;;  %v11089_v60 = vmax.f32 %v131_v39, 0.0  ;;  %v99_v41 = vmul.f32 %v10509_v7, %v63_v35  ;;  %v133_v1 = vadd.f32 %v10514_v8, %v97_v25 }
  0x38   :  { %15289 = vst [vmem:[#allocation49_spill] sm:$0xff] %v10985_v46  ;;  %9328 = vmatmul.msk.f32.vlgmr.msrb.gmra.mxu3 %vm440_vm0, %v11014_v15  ;;  %9324 = vmatmul.msk.f32.vlgmr.msrb.gmra.mxu1 %vm440_vm0, %v11027_v56  ;;  %v134_v27 = vadd.f32 %v10514_v8, %v98_v36 }
  0x39   :  { %15290 = vst [vmem:[#allocation50_spill] sm:$0xff] %v10988_v54  ;;  %v11068_v2 = vmax.f32 %v269_v34, 0.0  ;;  %9343 = vmatpush.xpose.msk.msrb.mxu3 %vm440_vm0, %v11061_v3  ;;  %v11105_v34 = vmax.f32 %v132_v51, 0.0  ;;  %v135_v7 = vadd.f32 %v10514_v8, %v99_v41  ;;  %v11119_v23 = vmax.f32 %v133_v1, 0.0 }
  0x3a   :  { %15291 = vst [vmem:[#allocation51_spill] sm:$0xff] %v10993_v28  ;;  %2646 = vrot.lane.b32.xlu2 %v10776_v16, %s10429_s5  ;;  %v11109_v39 = vmax.f32 %v134_v27, 0.0 }
  0x3b   :  { %15292 = vst [vmem:[#allocation52_spill] sm:$0xff] %v11014_v15  ;;  %2674 = vrot.lane.b32.xlu0 %v10739_v57, %s10429_s5  ;;  %9339 = vmatpush.xpose.msk.msrb.mxu1 %vm440_vm0, %v11068_v2  ;;  %v11121_v44 = vmax.f32 %v135_v7, 0.0 }
  0x3c   :  { %15293 = vst [vmem:[#allocation53_spill] sm:$0xff] %v11027_v56 }
  0x3d   :  { %15294 = vst [vmem:[#allocation54_spill] sm:$0xff] %v11045_v11  ;;  %2648 = vrot.lane.b32.xlu1 %v10709_v38, %s10429_s5  ;;  %9330 = vmatmul.msk.f32.vlgmr.msra.gmra.mxu0 %vm440_vm0, %v11045_v11 }
  0x3e   :  { %15295 = vst [vmem:[#allocation55_spill] sm:$0xff] %v11048_v14  ;;  %9334 = vmatmul.msk.f32.vlgmr.msra.gmra.mxu2 %vm440_vm0, %v11064_v5 }
  0x3f   :  { %15296 = vst [vmem:[#allocation56_spill] sm:$0xff] %v11059_v18 }
  0x40   :  { %15297 = vst [vmem:[#allocation57_spill] sm:$0xff] %v11061_v3  ;;  %9332 = vmatmul.msk.f32.vlgmr.msra.gmra.mxu1 %vm440_vm0, %v11085_v52  ;;  %9336 = vmatmul.msk.f32.vlgmr.msra.gmra.mxu3 %vm440_vm0, %v11089_v60 }
  0x41   :  { %15298 = vst [vmem:[#allocation58_spill] sm:$0xff] %v11064_v5 }
  0x42   :  { %15299 = vst [vmem:[#allocation59_spill] sm:$0xff] %v11068_v2  ;;  %2676 = vrot.lane.b32.xlu2 %v10684_v26, %s10429_s5 }
  0x43   :  { %15300 = vst [vmem:[#allocation60_spill] sm:$0xff] %v11085_v52  ;;  %2704 = vrot.lane.b32.xlu0 %v10718_v45, %s10429_s5 }
  0x44   :  { %15301 = vst [vmem:[#allocation61_spill] sm:$0xff] %v11089_v60 }
  0x45   :  { %15302 = vst [vmem:[#allocation62_spill] sm:$0xff] %v11105_v34  ;;  %2702 = vrot.lane.b32.xlu1 %v10764_v6, %s10429_s5  ;;  %9338 = vmatmul.msk.f32.vlgmr.msrb.gmra.mxu0 %vm440_vm0, %v11105_v34 }
  0x46   :  { %15303 = vst [vmem:[#allocation63_spill] sm:$0xff] %v11109_v39  ;;  %9342 = vmatmul.msk.f32.vlgmr.msrb.gmra.mxu2 %vm440_vm0, %v11109_v39 }
  0x47   :  { %15304 = vst [vmem:[#allocation64_spill] sm:$0xff] %v11119_v23 }
  0x48   :  { %15305 = vst [vmem:[#allocation65_spill] sm:$0xff] %v11121_v44  ;;  %9340 = vmatmul.msk.f32.vlgmr.msrb.gmra.mxu1 %vm440_vm0, %v11119_v23  ;;  %9344 = vmatmul.msk.f32.vlgmr.msrb.gmra.mxu3 %vm440_vm0, %v11121_v44 }
  0x4a   :  { %2730 = vrot.lane.b32.xlu2 %v10831_v53, %s10429_s5 }
  0x4b   :  { %2758 = vrot.lane.b32.xlu0 %v10866_v21, %s10429_s5 }
  0x4d   :  { %2732 = vrot.lane.b32.xlu1 %v10751_v62, %s10429_s5 }
  0x52   :  { %2760 = vrot.lane.b32.xlu2 %v10789_v22, %s10429_s5 }
  0x53   :  { %2788 = vrot.lane.b32.xlu0 %v10766_v12, %s10429_s5 }
  0x55   :  { %2786 = vrot.lane.b32.xlu1 %v10837_v61, %s10429_s5 }
  0x5a   :  { %2814 = vrot.lane.b32.xlu2 %v10873_v30, %s10429_s5 }
  0x5b   :  { %2842 = vrot.lane.b32.xlu0 %v10910_v0, %s10429_s5 }
  0x5d   :  { %2816 = vrot.lane.b32.xlu1 %v10778_v17, %s10429_s5 }
  0x62   :  { %2844 = vrot.lane.b32.xlu2 %v10834_v59, %s10429_s5 }
  0x63   :  { %2872 = vrot.lane.b32.xlu0 %v10855_v13, %s10429_s5 }
  0x65   :  { %2870 = vrot.lane.b32.xlu1 %v10932_v29, %s10429_s5 }
  0x6a   :  { %2898 = vrot.lane.b32.xlu2 %v10919_v19, %s10429_s5 }
  0x6b   :  { %2926 = vrot.lane.b32.xlu0 %v10956_v50, %s10429_s5 }
  0x6d   :  { %2900 = vrot.lane.b32.xlu1 %v10817_v47, %s10429_s5 }
  0x7d   :  { %v11177_v61 = vpop.permute.xlu0 %2422 }
  0x7e   :  { %15306 = vst [vmem:[#allocation66_spill] sm:$0xff] %v11177_v61 }
  0x7f   :  { %v11183_v38 = vpop.permute.xlu1 %2394 }
  0x80   :  { %15307 = vst [vmem:[#allocation67_spill] sm:$0xff] %v11183_v38 }
  0x85   :  { %v11199_v0 = vpop.permute.xlu0 %2452 }
  0x86   :  { %15309 = vst [vmem:[#allocation69_spill] sm:$0xff] %v11199_v0 }
  0x8a   :  { %v464_v8 = vpop.f32.mrf.mxu0 }
  0x8b   :  { %v11159_v35 = vmul.f32 0.5, %v464_v8 }
  0x8c   :  { %v490_v36 = vpop.f32.mrf.mxu1 }
  0x8d   :  { %v1306_v7 = vsel %vm1305_vm1, %v11159_v35, -inf  ;;  %v11171_v17 = vmul.f32 0.5, %v490_v36 }
  0x8f   :  { %v516_v51 = vpop.f32.mrf.mxu2  ;;  %v1309_v19 = vsel %vm1305_vm1, %v11171_v17, -inf }
  0x90   :  { %v11161_v25 = vmul.f32 0.5, %v516_v51 }
  0x92   :  { %v568_v41 = vpop.f32.mrf.mxu0  ;;  %v1312_v1 = vsel %vm1305_vm1, %v11161_v25, -inf }
  0x93   :  { %v11163_v27 = vmul.f32 0.5, %v568_v41  ;;  %v542_v29 = vpop.f32.mrf.mxu3 }
  0x94   :  { %v11173_v51 = vmul.f32 0.5, %v542_v29  ;;  %v11187_v29 = vpop.permute.xlu2 %2396 }
  0x95   :  { %v1318_v47 = vsel %vm1305_vm1, %v11163_v27, -inf  ;;  %1307 = vmax.xlane.f32.xlu0 %v1306_v7  ;;  %v594_v8 = vpop.f32.mrf.mxu1  ;;  %15308 = vst [vmem:[#allocation68_spill] sm:$0xff] %v11187_v29 }
  0x96   :  { %1319 = vmax.xlane.f32.xlu2 %v1318_v47  ;;  %v11175_v41 = vmul.f32 0.5, %v594_v8  ;;  %v1315_v6 = vsel %vm1305_vm1, %v11173_v51, -inf }
  0x97   :  { %1313 = vmax.xlane.f32.xlu1 %v1312_v1  ;;  %v620_v62 = vpop.f32.mrf.mxu2 }
  0x98   :  { %v1321_v36 = vsel %vm1305_vm1, %v11175_v41, -inf  ;;  %v11189_v7 = vmul.f32 0.5, %v620_v62 }
  0x9a   :  { %v672_v47 = vpop.f32.mrf.mxu0  ;;  %v1324_v30 = vsel %vm1305_vm1, %v11189_v7, -inf }
  0x9b   :  { %v646_v1 = vpop.f32.mrf.mxu3  ;;  %v11193_v50 = vmul.f32 0.5, %v672_v47 }
  0x9c   :  { %v11191_v8 = vmul.f32 0.5, %v646_v1  ;;  %v11211_v12 = vpop.permute.xlu2 %2424 }
  0x9d   :  { %1310 = vmax.xlane.f32.xlu0 %v1309_v19  ;;  %v698_v59 = vpop.f32.mrf.mxu1  ;;  %15311 = vst [vmem:[#allocation71_spill] sm:$0xff] %v11211_v12 }
  0x9e   :  { %1322 = vmax.xlane.f32.xlu2 %v1321_v36  ;;  %v1327_v13 = vsel %vm1305_vm1, %v11191_v8, -inf  ;;  %v11203_v36 = vpop.permute.xlu1 %2450  ;;  %v11205_v1 = vmul.f32 0.5, %v698_v59  ;;  %v11219_v59 = vpop.permute.xlu0 %2506 }
  0x9f   :  { %1316 = vmax.xlane.f32.xlu1 %v1315_v6  ;;  %v1330_v6 = vsel %vm1305_vm1, %v11193_v50, -inf  ;;  %15310 = vst [vmem:[#allocation70_spill] sm:$0xff] %v11203_v36 }
  0xa0   :  { %v1333_v26 = vsel %vm1305_vm1, %v11205_v1, -inf  ;;  %15312 = vst [vmem:[#allocation72_spill] sm:$0xff] %v11219_v59 }
  0xa1   :  { %v724_v19 = vpop.f32.mrf.mxu2 }
  0xa2   :  { %v11207_v47 = vmul.f32 0.5, %v724_v19  ;;  %v776_v53 = vpop.f32.mrf.mxu0 }
  0xa3   :  { %v750_v62 = vpop.f32.mrf.mxu3 }
  0xa4   :  { %v11209_v22 = vmul.f32 0.5, %v750_v62  ;;  %v1336_v21 = vsel %vm1305_vm1, %v11207_v47, -inf  ;;  %v11223_v62 = vmul.f32 0.5, %v776_v53  ;;  %v11229_v57 = vpop.permute.xlu2 %2478 }
  0xa5   :  { %1325 = vmax.xlane.f32.xlu0 %v1324_v30  ;;  %v802_v30 = vpop.f32.mrf.mxu1  ;;  %15314 = vst [vmem:[#allocation74_spill] sm:$0xff] %v11229_v57 }
  0xa6   :  { %1331 = vmax.xlane.f32.xlu2 %v1330_v6  ;;  %v11221_v19 = vpop.permute.xlu1 %2480  ;;  %v11225_v45 = vmul.f32 0.5, %v802_v30  ;;  %v1342_v59 = vsel %vm1305_vm1, %v11223_v62, -inf }
  0xa7   :  { %1328 = vmax.xlane.f32.xlu1 %v1327_v13  ;;  %v1339_v13 = vsel %vm1305_vm1, %v11209_v22, -inf  ;;  %15313 = vst [vmem:[#allocation73_spill] sm:$0xff] %v11221_v19 }
  0xa8   :  { %v1345_v61 = vsel %vm1305_vm1, %v11225_v45, -inf }
  0xa9   :  { %v828_v6 = vpop.f32.mrf.mxu2 }
  0xaa   :  { %v11227_v16 = vmul.f32 0.5, %v828_v6  ;;  %v11241_v6 = vpop.permute.xlu0 %2536 }
  0xab   :  { %v854_v36 = vpop.f32.mrf.mxu3  ;;  %15315 = vst [vmem:[#allocation75_spill] sm:$0xff] %v11241_v6 }
  0xac   :  { %v11237_v53 = vmul.f32 0.5, %v854_v36 }
  0xad   :  { %1334 = vmax.xlane.f32.xlu0 %v1333_v26  ;;  %v1348_v26 = vsel %vm1305_vm1, %v11227_v16, -inf }
  0xae   :  { %1340 = vmax.xlane.f32.xlu2 %v1339_v13  ;;  %v906_v13 = vpop.f32.mrf.mxu1  ;;  %v11245_v38 = vpop.permute.xlu1 %2534  ;;  %v1351_v31 = vsel %vm1305_vm1, %v11237_v53, -inf }
  0xaf   :  { %1337 = vmax.xlane.f32.xlu1 %v1336_v21  ;;  %v880_v21 = vpop.f32.mrf.mxu0  ;;  %v11243_v57 = vmul.f32 0.5, %v906_v13  ;;  %15316 = vst [vmem:[#allocation76_spill] sm:$0xff] %v11245_v38 }
  0xb0   :  { %v11239_v30 = vmul.f32 0.5, %v880_v21 }
  0xb1   :  { %v932_v19 = vpop.f32.mrf.mxu2 }
  0xb2   :  { %v1354_v48 = vsel %vm1305_vm1, %v11239_v30, -inf  ;;  %v11255_v21 = vmul.f32 0.5, %v932_v19  ;;  %v11261_v6 = vpop.permute.xlu0 %2590 }
  0xb3   :  { %v958_v36 = vpop.f32.mrf.mxu3  ;;  %15318 = vst [vmem:[#allocation78_spill] sm:$0xff] %v11261_v6 }
  0xb4   :  { %v11257_v13 = vmul.f32 0.5, %v958_v36  ;;  %v1360_v29 = vsel %vm1305_vm1, %v11255_v21, -inf }
  0xb5   :  { %1343 = vmax.xlane.f32.xlu0 %v1342_v59  ;;  %v11253_v59 = vpop.permute.xlu2 %2508 }
  0xb6   :  { %1349 = vmax.xlane.f32.xlu2 %v1348_v26  ;;  %15317 = vst [vmem:[#allocation77_spill] sm:$0xff] %v11253_v59  ;;  %v1010_v0 = vpop.f32.mrf.mxu1  ;;  %v11263_v12 = vpop.permute.xlu1 %2564  ;;  %v1363_v59 = vsel %vm1305_vm1, %v11257_v13, -inf }
  0xb7   :  { %1346 = vmax.xlane.f32.xlu1 %v1345_v61  ;;  %v1357_v61 = vsel %vm1305_vm1, %v11243_v57, -inf  ;;  %v984_v26 = vpop.f32.mrf.mxu0  ;;  %15319 = vst [vmem:[#allocation79_spill] sm:$0xff] %v11263_v12  ;;  %v11273_v36 = vmul.f32 0.5, %v1010_v0 }
  0xb8   :  { %v11259_v38 = vmul.f32 0.5, %v984_v26 }
  0xb9   :  { %v1369_v10 = vsel %vm1305_vm1, %v11273_v36, -inf }
  0xba   :  { %v11283_v9 = vpop.permute.xlu0 %2620 }
  0xbb   :  { %v1062_v19 = vpop.f32.mrf.mxu3  ;;  %15321 = vst [vmem:[#allocation81_spill] sm:$0xff] %v11283_v9 }
  0xbc   :  { %v11277_v6 = vmul.f32 0.5, %v1062_v19 }
  0xbd   :  { %1352 = vmax.xlane.f32.xlu0 %v1351_v31  ;;  %v1036_v31 = vpop.f32.mrf.mxu2 }
  0xbe   :  { %1358 = vmax.xlane.f32.xlu2 %v1357_v61  ;;  %v11271_v61 = vpop.permute.xlu2 %2562  ;;  %v11275_v26 = vmul.f32 0.5, %v1036_v31 }
  0xbf   :  { %1355 = vmax.xlane.f32.xlu1 %v1354_v48  ;;  %v1366_v48 = vsel %vm1305_vm1, %v11259_v38, -inf  ;;  %15320 = vst [vmem:[#allocation80_spill] sm:$0xff] %v11271_v61  ;;  %v1088_v12 = vpop.f32.mrf.mxu0 }
  0xc0   :  { %v1372_v55 = vsel %vm1305_vm1, %v11275_v26, -inf  ;;  %v11289_v31 = vmul.f32 0.5, %v1088_v12 }
  0xc2   :  { %v1378_v33 = vsel %vm1305_vm1, %v11289_v31, -inf  ;;  %v11303_v12 = vpop.permute.xlu0 %2674 }
  0xc3   :  { %v1166_v24 = vpop.f32.mrf.mxu3  ;;  %15324 = vst [vmem:[#allocation84_spill] sm:$0xff] %v11303_v12 }
  0xc5   :  { %1361 = vmax.xlane.f32.xlu0 %v1360_v29  ;;  %v1375_v29 = vsel %vm1305_vm1, %v11277_v6, -inf  ;;  %v1140_v0 = vpop.f32.mrf.mxu2 }
  0xc6   :  { %1367 = vmax.xlane.f32.xlu2 %v1366_v48  ;;  %v11287_v48 = vpop.permute.xlu1 %2618  ;;  %v11293_v61 = vmul.f32 0.5, %v1140_v0  ;;  %v11295_v40 = vpop.permute.xlu2 %2592  ;;  %v11307_v0 = vmul.f32 0.5, %v1166_v24 }
  0xc7   :  { %1364 = vmax.xlane.f32.xlu1 %v1363_v59  ;;  %v1114_v59 = vpop.f32.mrf.mxu1  ;;  %15322 = vst [vmem:[#allocation82_spill] sm:$0xff] %v11287_v48 }
  0xc8   :  { %v11291_v19 = vmul.f32 0.5, %v1114_v59  ;;  %15323 = vst [vmem:[#allocation83_spill] sm:$0xff] %v11295_v40  ;;  %v1387_v44 = vsel %vm1305_vm1, %v11307_v0, -inf }
  0xca   :  { %v1381_v9 = vsel %vm1305_vm1, %v11291_v19, -inf }
  0xcd   :  { %1370 = vmax.xlane.f32.xlu0 %v1369_v10  ;;  %v1384_v10 = vsel %vm1305_vm1, %v11293_v61, -inf  ;;  %v1244_v12 = vpop.f32.mrf.mxu2 }
  0xce   :  { %1376 = vmax.xlane.f32.xlu2 %v1375_v29  ;;  %v11305_v59 = vpop.permute.xlu1 %2648  ;;  %v11313_v32 = vpop.permute.xlu2 %2646  ;;  %v11321_v24 = vmul.f32 0.5, %v1244_v12 }
  0xcf   :  { %1373 = vmax.xlane.f32.xlu1 %v1372_v55  ;;  %v1192_v55 = vpop.f32.mrf.mxu0  ;;  %v1218_v29 = vpop.f32.mrf.mxu1  ;;  %15325 = vst [vmem:[#allocation85_spill] sm:$0xff] %v11305_v59 }
  0xd0   :  { %v11309_v40 = vmul.f32 0.5, %v1192_v55  ;;  %v11311_v48 = vmul.f32 0.5, %v1218_v29  ;;  %15326 = vst [vmem:[#allocation86_spill] sm:$0xff] %v11313_v32  ;;  %v1270_v59 = vpop.f32.mrf.mxu3  ;;  %v11325_v55 = vpop.permute.xlu0 %2704  ;;  %v1396_v32 = vsel %vm1305_vm1, %v11321_v24, -inf }
  0xd1   :  { %15327 = vst [vmem:[#allocation87_spill] sm:$0xff] %v11325_v55 }
  0xd5   :  { %1379 = vmax.xlane.f32.xlu0 %v1378_v33  ;;  %v1393_v33 = vsel %vm1305_vm1, %v11311_v48, -inf }
  0xd6   :  { %1385 = vmax.xlane.f32.xlu2 %v1384_v10  ;;  %v11323_v10 = vmul.f32 0.5, %v1270_v59  ;;  %v11327_v29 = vpop.permute.xlu1 %2702  ;;  %v11333_v3 = vpop.permute.xlu2 %2676 }
  0xd7   :  { %1382 = vmax.xlane.f32.xlu1 %v1381_v9  ;;  %v1390_v9 = vsel %vm1305_vm1, %v11309_v40, -inf  ;;  %15328 = vst [vmem:[#allocation88_spill] sm:$0xff] %v11327_v29 }
  0xd8   :  { %v1399_v2 = vsel %vm1305_vm1, %v11323_v10, -inf }
  0xdd   :  { %1388 = vmax.xlane.f32.xlu0 %v1387_v44  ;;  %v11335_v44 = vpop.permute.xlu0 %2758 }
  0xde   :  { %1394 = vmax.xlane.f32.xlu2 %v1393_v33  ;;  %15329 = vst [vmem:[#allocation89_spill] sm:$0xff] %v11335_v44  ;;  %v11337_v12 = vpop.permute.xlu1 %2732  ;;  %v11339_v59 = vpop.permute.xlu2 %2730 }
  0xdf   :  { %1391 = vmax.xlane.f32.xlu1 %v1390_v9  ;;  %15330 = vst [vmem:[#allocation90_spill] sm:$0xff] %v11339_v59 }
  0xe5   :  { %1397 = vmax.xlane.f32.xlu0 %v1396_v32  ;;  %v11341_v9 = vpop.permute.xlu0 %2788 }
  0xe6   :  { %15331 = vst [vmem:[#allocation91_spill] sm:$0xff] %v11341_v9  ;;  %v11343_v33 = vpop.permute.xlu1 %2786  ;;  %v11347_v29 = vpop.permute.xlu2 %2760 }
  0xe7   :  { %1400 = vmax.xlane.f32.xlu1 %v1399_v2  ;;  %15332 = vst [vmem:[#allocation92_spill] sm:$0xff] %v11343_v33 }
  0xed   :  { %v11351_v32 = vpop.permute.xlu0 %2842 }
  0xee   :  { %15333 = vst [vmem:[#allocation93_spill] sm:$0xff] %v11351_v32  ;;  %v11353_v2 = vpop.permute.xlu1 %2816  ;;  %v11361_v55 = vpop.permute.xlu2 %2814 }
  0xef   :  { %15334 = vst [vmem:[#allocation94_spill] sm:$0xff] %v11353_v2 }
  0xf0   :  { %15335 = vst [vmem:[#allocation95_spill] sm:$0xff] %v11361_v55 }
  0xf6   :  { %2928 = vrot.lane.b32.xlu2 %v10841_v63, %s10429_s5  ;;  %v11367_v63 = vpop.permute.xlu0 %2872  ;;  %v11369_v2 = vpop.permute.xlu1 %2870 }
  0xf7   :  { %15336 = vst [vmem:[#allocation96_spill] sm:$0xff] %v11367_v63 }
  0xf8   :  { %15337 = vst [vmem:[#allocation97_spill] sm:$0xff] %v11369_v2 }
  0xf9   :  { %2956 = vrot.lane.b32.xlu0 %v10892_v49, %s10429_s5 }
  0xfe   :  { %2982 = vrot.lane.b32.xlu2 %v11027_v56, %s10429_s5 }
 0x100   :  { %2954 = vrot.lane.b32.xlu1 %v10985_v46, %s10429_s5  ;;  %v11373_v46 = vpop.permute.xlu2 %2844 }
 0x101   :  { %3010 = vrot.lane.b32.xlu0 %v10993_v28, %s10429_s5  ;;  %15338 = vst [vmem:[#allocation98_spill] sm:$0xff] %v11373_v46 }
 0x106   :  { %3012 = vrot.lane.b32.xlu2 %v10885_v42, %s10429_s5  ;;  %v11383_v42 = vpop.permute.xlu1 %2900 }
 0x107   :  { %15340 = vst [vmem:[#allocation100_spill] sm:$0xff] %v11383_v42 }
 0x108   :  { %2984 = vrot.lane.b32.xlu1 %v10903_v58, %s10429_s5  ;;  %v11381_v58 = vpop.permute.xlu0 %2926  ;;  %v11385_v55 = vpop.permute.xlu2 %2898 }
 0x109   :  { %3040 = vrot.lane.b32.xlu0 %v10913_v4, %s10429_s5  ;;  %15339 = vst [vmem:[#allocation99_spill] sm:$0xff] %v11381_v58 }
 0x10a   :  { %15341 = vst [vmem:[#allocation101_spill] sm:$0xff] %v11385_v55 }
 0x10e   :  { %3066 = vrot.lane.b32.xlu2 %v11045_v11, %s10429_s5  ;;  %v1314_v11 = vpop.xlane.xlu1 %1313 }
 0x10f   :  { %v1404_v2 = vsub.f32 %v11161_v25, %v1314_v11 }
 0x110   :  { %3038 = vrot.lane.b32.xlu1 %v11014_v15, %s10429_s5  ;;  %v1308_v4 = vpop.xlane.xlu0 %1307  ;;  %v1320_v15 = vpop.xlane.xlu2 %1319 }
 0x111   :  { %3094 = vrot.lane.b32.xlu0 %v11085_v52, %s10429_s5  ;;  %v1402_v55 = vsub.f32 %v11159_v35, %v1308_v4  ;;  %v1438_v42 = vmul.f32 1.442695, %v1404_v2 }
 0x113   :  { %v1434_v33 = vmul.f32 1.442695, %v1402_v55 }
 0x116   :  { %3096 = vrot.lane.b32.xlu2 %v10978_v37, %s10429_s5  ;;  %v1317_v58 = vpop.xlane.xlu1 %1316 }
 0x117   :  { %v1405_v63 = vsub.f32 %v11173_v51, %v1317_v58 }
 0x118   :  { %3068 = vrot.lane.b32.xlu1 %v10976_v20, %s10429_s5  ;;  %v1311_v52 = vpop.xlane.xlu0 %1310  ;;  %v1323_v56 = vpop.xlane.xlu2 %1322 }
 0x119   :  { %3124 = vrot.lane.b32.xlu0 %v10948_v43, %s10429_s5  ;;  %v1403_v49 = vsub.f32 %v11171_v17, %v1311_v52  ;;  %v1407_v17 = vsub.f32 %v11175_v41, %v1323_v56 }
 0x11b   :  { %v1436_v43 = vmul.f32 1.442695, %v1403_v49  ;;  %v1440_v49 = vmul.f32 1.442695, %v1405_v63  ;;  %v1444_v4 = vmul.f32 1.442695, %v1407_v17 }
 0x11d   :  { %9917 = vpow2.f32 %v1436_v43 }
 0x11e   :  { %3150 = vrot.lane.b32.xlu2 %v11089_v60, %s10429_s5  ;;  %v1329_v20 = vpop.xlane.xlu1 %1328  ;;  %9919 = vpow2.f32 %v1434_v33 }
 0x11f   :  { %9921 = vpow2.f32 %v1438_v42  ;;  %v1409_v11 = vsub.f32 %v11191_v8, %v1329_v20 }
 0x120   :  { %3122 = vrot.lane.b32.xlu1 %v11064_v5, %s10429_s5  ;;  %v1326_v28 = vpop.xlane.xlu0 %1325  ;;  %v1332_v37 = vpop.xlane.xlu2 %1331  ;;  %v1406_v5 = vsub.f32 %v11163_v27, %v1320_v15 }
 0x121   :  { %v1448_v42 = vmul.f32 1.442695, %v1409_v11  ;;  %v1408_v56 = vsub.f32 %v11189_v7, %v1326_v28  ;;  %v1410_v63 = vsub.f32 %v11193_v50, %v1332_v37 }
 0x122   :  { %v1442_v59 = vmul.f32 1.442695, %v1406_v5 }
 0x123   :  { %v11403_v52 = vpop.eup %9917  ;;  %v1446_v41 = vmul.f32 1.442695, %v1408_v56  ;;  %v1450_v55 = vmul.f32 1.442695, %v1410_v63 }
 0x124   :  { %9923 = vpow2.f32 %v1442_v59  ;;  %v1501_v43 = vsel %vm1305_vm1, %v11403_v52, 0.0  ;;  %v11408_v15 = vpop.eup %9919 }
 0x125   :  { %v11410_v5 = vpop.eup %9921  ;;  %9925 = vpow2.f32 %v1440_v49  ;;  %v1498_v20 = vsel %vm1305_vm1, %v11408_v15, 0.0 }
 0x126   :  { %v1338_v60 = vpop.xlane.xlu1 %1337  ;;  %9927 = vpow2.f32 %v1444_v4  ;;  %v1504_v51 = vsel %vm1305_vm1, %v11410_v5, 0.0 }
 0x127   :  { %9929 = vpow2.f32 %v1448_v42  ;;  %v1412_v8 = vsub.f32 %v11207_v47, %v1338_v60 }
 0x128   :  { %v1335_v32 = vpop.xlane.xlu0 %1334  ;;  %v1341_v44 = vpop.xlane.xlu2 %1340  ;;  %9931 = vpow2.f32 %v1446_v41 }
 0x129   :  { %v1454_v59 = vmul.f32 1.442695, %v1412_v8  ;;  %v1411_v33 = vsub.f32 %v11205_v1, %v1335_v32  ;;  %9933 = vpow2.f32 %v1450_v55  ;;  %v1413_v2 = vsub.f32 %v11209_v22, %v1341_v44 }
 0x12a   :  { %v11416_v27 = vpop.eup %9923 }
 0x12b   :  { %v1510_v28 = vsel %vm1305_vm1, %v11416_v27, 0.0  ;;  %v11423_v50 = vpop.eup %9925  ;;  %9935 = vpow2.f32 %v1454_v59  ;;  %v1452_v4 = vmul.f32 1.442695, %v1411_v33  ;;  %v1456_v1 = vmul.f32 1.442695, %v1413_v2 }
 0x12c   :  { %v11425_v37 = vpop.eup %9927  ;;  %v1507_v60 = vsel %vm1305_vm1, %v11423_v50, 0.0 }
 0x12d   :  { %v11431_v47 = vpop.eup %9929  ;;  %v1513_v49 = vsel %vm1305_vm1, %v11425_v37, 0.0  ;;  %9937 = vpow2.f32 %v1452_v4 }
 0x12e   :  { %v1347_v58 = vpop.xlane.xlu1 %1346  ;;  %v1519_v22 = vsel %vm1305_vm1, %v11431_v47, 0.0  ;;  %v11438_v44 = vpop.eup %9931  ;;  %9939 = vpow2.f32 %v1456_v1 }
 0x12f   :  { %v11440_v32 = vpop.eup %9933 }
 0x130   :  { %v1344_v35 = vpop.xlane.xlu0 %1343  ;;  %v1350_v25 = vpop.xlane.xlu2 %1349 }
 0x131   :  { %v1414_v56 = vsub.f32 %v11223_v62, %v1344_v35  ;;  %v1416_v63 = vsub.f32 %v11227_v16, %v1350_v25 }
 0x133   :  { %v1458_v8 = vmul.f32 1.442695, %v1414_v56  ;;  %v1462_v62 = vmul.f32 1.442695, %v1416_v63 }
 0x136   :  { %v1356_v17 = vpop.xlane.xlu1 %1355 }
 0x137   :  { %v1418_v55 = vsub.f32 %v11239_v30, %v1356_v17 }
 0x138   :  { %v1353_v7 = vpop.xlane.xlu0 %1352  ;;  %v1359_v11 = vpop.xlane.xlu2 %1358 }
 0x139   :  { %v1417_v59 = vsub.f32 %v11237_v53, %v1353_v7  ;;  %v1466_v33 = vmul.f32 1.442695, %v1418_v55  ;;  %v1419_v2 = vsub.f32 %v11243_v57, %v1359_v11 }
 0x13b   :  { %v1464_v4 = vmul.f32 1.442695, %v1417_v59  ;;  %v1468_v53 = vmul.f32 1.442695, %v1419_v2 }
 0x13e   :  { %v1365_v41 = vpop.xlane.xlu1 %1364 }
 0x140   :  { %v1368_v35 = vpop.xlane.xlu2 %1367 }
 0x141   :  { %v1422_v63 = vsub.f32 %v11259_v38, %v1368_v35 }
 0x143   :  { %1502 = vadd.xlane.f32.xlu0 %v1501_v43  ;;  %v1415_v43 = vsub.f32 %v11225_v45, %v1347_v58  ;;  %v1516_v45 = vsel %vm1305_vm1, %v11438_v44, 0.0  ;;  %v11446_v58 = vpop.eup %9935  ;;  %v1474_v55 = vmul.f32 1.442695, %v1422_v63 }
 0x144   :  { %v1528_v16 = vsel %vm1305_vm1, %v11446_v58, 0.0  ;;  %v11453_v25 = vpop.eup %9937 }
 0x145   :  { %v1460_v42 = vmul.f32 1.442695, %v1415_v43  ;;  %v1525_v30 = vsel %vm1305_vm1, %v11453_v25, 0.0  ;;  %v1421_v43 = vsub.f32 %v11257_v13, %v1365_v41 }
 0x146   :  { %v1374_v7 = vpop.xlane.xlu1 %1373 }
 0x147   :  { %1499 = vadd.xlane.f32.xlu2 %v1498_v20  ;;  %v1362_v20 = vpop.xlane.xlu0 %1361  ;;  %9941 = vpow2.f32 %v1460_v42  ;;  %v1472_v56 = vmul.f32 1.442695, %v1421_v43 }
 0x148   :  { %9943 = vpow2.f32 %v1458_v8  ;;  %v1420_v42 = vsub.f32 %v11255_v21, %v1362_v20  ;;  %v1424_v8 = vsub.f32 %v11275_v26, %v1374_v7 }
 0x149   :  { %9945 = vpow2.f32 %v1462_v62 }
 0x14a   :  { %1505 = vadd.xlane.f32.xlu1 %v1504_v51  ;;  %v1522_v51 = vsel %vm1305_vm1, %v11440_v32, 0.0  ;;  %9947 = vpow2.f32 %v1466_v33  ;;  %v1470_v41 = vmul.f32 1.442695, %v1420_v42  ;;  %v1478_v59 = vmul.f32 1.442695, %v1424_v8 }
 0x14b   :  { %1511 = vadd.xlane.f32.xlu0 %v1510_v28  ;;  %v11455_v28 = vpop.eup %9939  ;;  %9949 = vpow2.f32 %v1464_v4 }
 0x14c   :  { %9951 = vpow2.f32 %v1468_v53 }
 0x14d   :  { %v11461_v17 = vpop.eup %9941  ;;  %9953 = vpow2.f32 %v1472_v56 }
 0x14e   :  { %v1537_v57 = vsel %vm1305_vm1, %v11461_v17, 0.0  ;;  %v11468_v11 = vpop.eup %9943  ;;  %v1383_v35 = vpop.xlane.xlu1 %1382  ;;  %9955 = vpow2.f32 %v1470_v41 }
 0x14f   :  { %1508 = vadd.xlane.f32.xlu2 %v1507_v60  ;;  %v1531_v60 = vsel %vm1305_vm1, %v11455_v28, 0.0  ;;  %v11470_v1 = vpop.eup %9945  ;;  %v1534_v13 = vsel %vm1305_vm1, %v11468_v11, 0.0  ;;  %9957 = vpow2.f32 %v1474_v55  ;;  %v1427_v43 = vsub.f32 %v11291_v19, %v1383_v35 }
 0x150   :  { %9959 = vpow2.f32 %v1478_v59 }
 0x152   :  { %1514 = vadd.xlane.f32.xlu1 %v1513_v49  ;;  %v1371_v49 = vpop.xlane.xlu0 %1370 }
 0x153   :  { %1520 = vadd.xlane.f32.xlu0 %v1519_v22  ;;  %v1377_v22 = vpop.xlane.xlu2 %1376 }
 0x154   :  { %v1425_v33 = vsub.f32 %v11277_v6, %v1377_v22 }
 0x156   :  { %v1392_v56 = vpop.xlane.xlu1 %1391 }
 0x157   :  { %1517 = vadd.xlane.f32.xlu2 %v1516_v45  ;;  %v11476_v45 = vpop.eup %9947  ;;  %v1430_v8 = vsub.f32 %v11309_v40, %v1392_v56 }
 0x158   :  { %v1546_v20 = vsel %vm1305_vm1, %v11476_v45, 0.0  ;;  %v11483_v38 = vpop.eup %9949 }
 0x159   :  { %v11485_v62 = vpop.eup %9951  ;;  %v1543_v26 = vsel %vm1305_vm1, %v11483_v38, 0.0  ;;  %v1490_v35 = vmul.f32 1.442695, %v1430_v8 }
 0x15a   :  { %1523 = vadd.xlane.f32.xlu1 %v1522_v51  ;;  %v1540_v51 = vsel %vm1305_vm1, %v11470_v1, 0.0  ;;  %v1380_v21 = vpop.xlane.xlu0 %1379 }
 0x15b   :  { %1529 = vadd.xlane.f32.xlu0 %v1528_v16  ;;  %v1423_v16 = vsub.f32 %v11273_v36, %v1371_v49  ;;  %v1386_v2 = vpop.xlane.xlu2 %1385  ;;  %v1480_v36 = vmul.f32 1.442695, %v1425_v33  ;;  %v1426_v22 = vsub.f32 %v11289_v31, %v1380_v21 }
 0x15c   :  { %v1428_v42 = vsub.f32 %v11293_v61, %v1386_v2 }
 0x15d   :  { %v1476_v4 = vmul.f32 1.442695, %v1423_v16  ;;  %v1482_v41 = vmul.f32 1.442695, %v1426_v22 }
 0x15e   :  { %v1486_v31 = vmul.f32 1.442695, %v1428_v42 }
 0x15f   :  { %1526 = vadd.xlane.f32.xlu2 %v1525_v30  ;;  %v11491_v30 = vpop.eup %9953  ;;  %9961 = vpow2.f32 %v1476_v4 }
 0x160   :  { %v1555_v49 = vsel %vm1305_vm1, %v11491_v30, 0.0  ;;  %v11498_v6 = vpop.eup %9955  ;;  %9963 = vpow2.f32 %v1480_v36 }
 0x161   :  { %v11500_v53 = vpop.eup %9957  ;;  %v1552_v19 = vsel %vm1305_vm1, %v11498_v6, 0.0 }
 0x162   :  { %1532 = vadd.xlane.f32.xlu1 %v1531_v60  ;;  %v1549_v60 = vsel %vm1305_vm1, %v11485_v62, 0.0  ;;  %v1389_v7 = vpop.xlane.xlu0 %1388  ;;  %v11506_v63 = vpop.eup %9959 }
 0x163   :  { %1538 = vadd.xlane.f32.xlu0 %v1537_v57  ;;  %v1484_v57 = vmul.f32 1.442695, %v1427_v43  ;;  %v1564_v61 = vsel %vm1305_vm1, %v11506_v63, 0.0 }
 0x165   :  { %9965 = vpow2.f32 %v1484_v57  ;;  %v11513_v55 = vpop.eup %9961 }
 0x166   :  { %v11515_v21 = vpop.eup %9963  ;;  %9967 = vpow2.f32 %v1482_v41  ;;  %v1561_v40 = vsel %vm1305_vm1, %v11513_v55, 0.0 }
 0x167   :  { %1535 = vadd.xlane.f32.xlu2 %v1534_v13  ;;  %v1558_v13 = vsel %vm1305_vm1, %v11500_v53, 0.0  ;;  %9969 = vpow2.f32 %v1486_v31  ;;  %v1567_v2 = vsel %vm1305_vm1, %v11515_v21, 0.0 }
 0x168   :  { %9971 = vpow2.f32 %v1490_v35 }
 0x16a   :  { %1541 = vadd.xlane.f32.xlu1 %v1540_v51  ;;  %v1395_v51 = vpop.xlane.xlu2 %1394  ;;  %v1398_v59 = vpop.xlane.xlu0 %1397 }
 0x16b   :  { %1547 = vadd.xlane.f32.xlu0 %v1546_v20  ;;  %v1429_v20 = vsub.f32 %v11307_v0, %v1389_v7  ;;  %v1431_v16 = vsub.f32 %v11311_v48, %v1395_v51  ;;  %v11521_v33 = vpop.eup %9965  ;;  %v11527_v0 = vpop.xlane.xlu1 %1400 }
 0x16c   :  { %v1573_v48 = vsel %vm1305_vm1, %v11521_v33, 0.0  ;;  %v11531_v43 = vpop.eup %9967 }
 0x16d   :  { %v1492_v4 = vmul.f32 1.442695, %v1431_v16  ;;  %v11533_v36 = vpop.eup %9969  ;;  %v1570_v57 = vsel %vm1305_vm1, %v11531_v43, 0.0 }
 0x16e   :  { %v11540_v22 = vpop.eup %9971  ;;  %v1576_v42 = vsel %vm1305_vm1, %v11533_v36, 0.0 }
 0x16f   :  { %1544 = vadd.xlane.f32.xlu2 %v1543_v26 }
 0x172   :  { %1550 = vadd.xlane.f32.xlu1 %v1549_v60  ;;  %v11525_v26 = vpop.permute.xlu2 %2928  ;;  %v1488_v60 = vmul.f32 1.442695, %v1429_v20  ;;  %v11536_v7 = vpop.permute.xlu0 %2956 }
 0x173   :  { %1556 = vadd.xlane.f32.xlu0 %v1555_v49  ;;  %15342 = vst [vmem:[#allocation102_spill] sm:$0xff] %v11525_v26  ;;  %v1432_v49 = vsub.f32 %v11321_v24, %v1398_v59  ;;  %v1582_v24 = vsel %vm1305_vm1, %v11540_v22, 0.0 }
 0x174   :  { %9973 = vpow2.f32 %v1488_v60  ;;  %15343 = vst [vmem:[#allocation103_spill] sm:$0xff] %v11536_v7 }
 0x175   :  { %9975 = vpow2.f32 %v1492_v4  ;;  %v1494_v56 = vmul.f32 1.442695, %v1432_v49 }
 0x177   :  { %1553 = vadd.xlane.f32.xlu2 %v1552_v19  ;;  %v11544_v19 = vpop.permute.xlu1 %2954  ;;  %9977 = vpow2.f32 %v1494_v56 }
 0x178   :  { %15344 = vst [vmem:[#allocation104_spill] sm:$0xff] %v11544_v19 }
 0x17a   :  { %1559 = vadd.xlane.f32.xlu1 %v1558_v13  ;;  %v11546_v13 = vpop.permute.xlu2 %2982  ;;  %v11550_v51 = vpop.eup %9973 }
 0x17b   :  { %1565 = vadd.xlane.f32.xlu0 %v1564_v61  ;;  %15345 = vst [vmem:[#allocation105_spill] sm:$0xff] %v11546_v13  ;;  %v11552_v41 = vpop.eup %9975  ;;  %v1579_v8 = vsel %vm1305_vm1, %v11550_v51, 0.0  ;;  %v11558_v61 = vpop.permute.xlu0 %3010 }
 0x17c   :  { %v1585_v31 = vsel %vm1305_vm1, %v11552_v41, 0.0  ;;  %15346 = vst [vmem:[#allocation106_spill] sm:$0xff] %v11558_v61 }
 0x17d   :  { %v11560_v20 = vpop.eup %9977 }
 0x17e   :  { %v1588_v59 = vsel %vm1305_vm1, %v11560_v20, 0.0 }
 0x17f   :  { %1562 = vadd.xlane.f32.xlu2 %v1561_v40  ;;  %v11562_v35 = vpop.permute.xlu1 %2984  ;;  %v11571_v40 = vld [vmem:[%s15056_s7] ss:$0 sm:$0xff] }
 0x180   :  { %15347 = vst [vmem:[#allocation107_spill] sm:$0xff] %v11562_v35 }
 0x182   :  { %1568 = vadd.xlane.f32.xlu1 %v1567_v2  ;;  %v11564_v16 = vpop.permute.xlu2 %3012  ;;  %v305_v2 = vld [vmem:[%s15058_s2 + $0x8] sm:$0xff] }
 0x183   :  { %1574 = vadd.xlane.f32.xlu0 %v1573_v48  ;;  %15348 = vst [vmem:[#allocation108_spill] sm:$0xff] %v11564_v16  ;;  %v11576_v60 = vpop.permute.xlu0 %3040  ;;  %v341_v4 = vmul.f32 %v11571_v40, %v305_v2  ;;  %v11582_v48 = vld [vmem:[%s15057_s8] ss:$0 sm:$0xff]  ;;  %s10430_s8 = smov 112  }
 0x184   :  { %15349 = vst [vmem:[#allocation109_spill] sm:$0xff] %v11576_v60 }
 0x185   :  { %v11585_v49 = vadd.f32 %v11582_v48, %v341_v4 }
 0x187   :  { %1571 = vadd.xlane.f32.xlu2 %v1570_v57  ;;  %v11587_v57 = vpop.permute.xlu1 %3038  ;;  %v15176_v56 = vmax.f32 %v11585_v49, 0.0 }
 0x188   :  { %15350 = vst [vmem:[#allocation110_spill] sm:$0xff] %v11587_v57 }
 0x189   :  { %1699 = vmatpush.msra.mxu1 %v15176_v56 }
 0x18a   :  { %1577 = vadd.xlane.f32.xlu1 %v1576_v42  ;;  %v11589_v42 = vpop.permute.xlu2 %3066 }
 0x18b   :  { %1583 = vadd.xlane.f32.xlu0 %v1582_v24  ;;  %15351 = vst [vmem:[#allocation111_spill] sm:$0xff] %v11589_v42  ;;  %v304_v24 = vld [vmem:[%s15058_s2] sm:$0xff]  ;;  %v11612_v26 = vpop.permute.xlu0 %3094 }
 0x18c   :  { %15352 = vst [vmem:[#allocation112_spill] sm:$0xff] %v11612_v26 }
 0x18f   :  { %1580 = vadd.xlane.f32.xlu2 %v1579_v8  ;;  %v306_v8 = vld [vmem:[%s15058_s2 + $0x10] sm:$0xff] }
 0x192   :  { %1586 = vadd.xlane.f32.xlu1 %v1585_v31  ;;  %v340_v31 = vmul.f32 %v11571_v40, %v304_v24  ;;  %v307_v24 = vld [vmem:[%s15058_s2 + $0x18] sm:$0xff] }
 0x193   :  { %v343_v56 = vmul.f32 %v11571_v40, %v307_v24 }
 0x194   :  { %v11605_v2 = vadd.f32 %v11582_v48, %v340_v31  ;;  %v309_v31 = vld [vmem:[%s15058_s2 + $0x28] sm:$0xff] }
 0x195   :  { %v11637_v26 = vadd.f32 %v11582_v48, %v343_v56  ;;  %v310_v56 = vld [vmem:[%s15058_s2 + $0x30] sm:$0xff] }
 0x196   :  { %v15177_v57 = vmax.f32 %v11605_v2, 0.0 }
 0x197   :  { %1589 = vadd.xlane.f32.xlu2 %v1588_v59  ;;  %v342_v59 = vmul.f32 %v11571_v40, %v306_v8  ;;  %v308_v8 = vld [vmem:[%s15058_s2 + $0x20] sm:$0xff]  ;;  %v15181_v13 = vmax.f32 %v11637_v26, 0.0 }
 0x198   :  { %1676 = vmatpush.msra.mxu0 %v15177_v57  ;;  %v344_v57 = vmul.f32 %v11571_v40, %v308_v8  ;;  %v11644_v8 = vpop.permute.xlu0 %3124 }
 0x199   :  { %v11608_v4 = vadd.f32 %v11582_v48, %v342_v59  ;;  %v11627_v59 = vpop.permute.xlu1 %3068  ;;  %1745 = vmatpush.msra.mxu3 %v15181_v13  ;;  %15355 = vst [vmem:[#allocation115_spill] sm:$0xff] %v11644_v8 }
 0x19a   :  { %15353 = vst [vmem:[#allocation113_spill] sm:$0xff] %v11627_v59  ;;  %v380_v42 = vadd.f32 %v11582_v48, %v344_v57  ;;  %v311_v57 = vld [vmem:[%s15058_s2 + $0x38] sm:$0xff] }
 0x19b   :  { %v15178_v60 = vmax.f32 %v11608_v4, 0.0 }
 0x19c   :  { %v412_v19 = vmax.f32 %v380_v42, 0.0 }
 0x19d   :  { %1722 = vmatpush.msra.mxu2 %v15178_v60  ;;  %v345_v60 = vmul.f32 %v11571_v40, %v309_v31 }
 0x19e   :  { %1768 = vmatpush.msrb.mxu0 %v412_v19 }
 0x19f   :  { %3178 = vrot.lane.b32.xlu0 %v11105_v34, %s10429_s5  ;;  %v11632_v34 = vpop.permute.xlu2 %3096  ;;  %v381_v61 = vadd.f32 %v11582_v48, %v345_v60  ;;  %v347_v60 = vmul.f32 %v11571_v40, %v311_v57  ;;  %v316_v57 = vld [vmem:[%s15058_s2 + $0x60] sm:$0xff] }
 0x1a0   :  { %15354 = vst [vmem:[#allocation114_spill] sm:$0xff] %v11632_v34 }
 0x1a1   :  { %v413_v24 = vmax.f32 %v381_v61, 0.0  ;;  %v346_v61 = vmul.f32 %v11571_v40, %v310_v56  ;;  %v11656_v42 = vpop.permute.xlu1 %3122  ;;  %v11664_v13 = vadd.f32 %v11582_v48, %v347_v60  ;;  %v312_v56 = vld [vmem:[%s15058_s2 + $0x40] sm:$0xff] }
 0x1a2   :  { %15356 = vst [vmem:[#allocation116_spill] sm:$0xff] %v11656_v42 }
 0x1a3   :  { %1791 = vmatpush.msrb.mxu1 %v413_v24  ;;  %v11661_v31 = vadd.f32 %v11582_v48, %v346_v61  ;;  %v1433_v61 = vsub.f32 %v11323_v10, %v11527_v0  ;;  %v348_v10 = vmul.f32 %v11571_v40, %v312_v56  ;;  %v352_v0 = vmul.f32 %v11571_v40, %v316_v57 }
 0x1a5   :  { %v15189_v8 = vmax.f32 %v11661_v31, 0.0  ;;  %v1496_v34 = vmul.f32 1.442695, %v1433_v61  ;;  %v11704_v16 = vadd.f32 %v11582_v48, %v348_v10  ;;  %v11707_v56 = vadd.f32 %v11582_v48, %v352_v0  ;;  %v15359_v10 = vld [vmem:[#allocation57_spill] sm:$0xff] }
 0x1a7   :  { %1814 = vmatpush.msrb.mxu2 %v15189_v8 }
 0x1ab   :  { %3152 = vrot.lane.b32.xlu1 %v10988_v54, %s10429_s5  ;;  %v11666_v54 = vpop.permute.xlu2 %3150 }
 0x1ac   :  { %15357 = vst [vmem:[#allocation117_spill] sm:$0xff] %v11666_v54  ;;  %v314_v54 = vld [vmem:[%s15058_s2 + $0x50] sm:$0xff] }
 0x1af   :  { %3180 = vrot.lane.b32.xlu2 %v11048_v14, %s10429_s5  ;;  %v15188_v14 = vmax.f32 %v11664_v13, 0.0 }
 0x1b1   :  { %1837 = vmatpush.msrb.mxu3 %v15188_v14  ;;  %v317_v14 = vld [vmem:[%s15058_s2 + $0x68] sm:$0xff] }
 0x1b3   :  { %3206 = vrot.lane.b32.xlu1 %v11119_v23, %s10429_s5  ;;  %v313_v23 = vld [vmem:[%s15058_s2 + $0x48] sm:$0xff] }
 0x1b4   :  { %v349_v8 = vmul.f32 %v11571_v40, %v313_v23  ;;  %v350_v23 = vmul.f32 %v11571_v40, %v314_v54 }
 0x1b6   :  { %v1503_v60 = vpop.xlane.xlu0 %1502  ;;  %v11699_v42 = vadd.f32 %v11582_v48, %v349_v8  ;;  %v11720_v61 = vadd.f32 %v11582_v48, %v350_v23 }
 0x1b7   :  { %9979 = vrcp.f32 %v1503_v60  ;;  %3234 = vrot.lane.b32.xlu2 %v11109_v39, %s10429_s5  ;;  %v353_v60 = vmul.f32 %v11571_v40, %v317_v14  ;;  %v315_v14 = vld [vmem:[%s15058_s2 + $0x58] sm:$0xff] }
 0x1b8   :  { %v15196_v8 = vmax.f32 %v11699_v42, 0.0  ;;  %v15197_v0 = vmax.f32 %v11720_v61, 0.0 }
 0x1b9   :  { %v11716_v54 = vadd.f32 %v11582_v48, %v353_v60 }
 0x1ba   :  { %v1500_v39 = vpop.xlane.xlu2 %1499 }
 0x1bb   :  { %3236 = vrot.lane.b32.xlu1 %v11059_v18, %s10429_s5  ;;  %9981 = vrcp.f32 %v1500_v39  ;;  %v11709_v18 = vpack.i.bf16 %v413_v24, %v412_v19  ;;  %v322_v19 = vld [vmem:[%s15058_s2 + $0x90] sm:$0xff]  ;;  %v323_v24 = vld [vmem:[%s15058_s2 + $0x98] sm:$0xff] }
 0x1bd   :  { %v1506_v59 = vpop.xlane.xlu1 %1505  ;;  %v9980_v57 = vpop.eup %9979  ;;  %15358 = vst [vmem:[#allocation118_spill] sm:$0xff] %v11709_v18 }
 0x1be   :  { %9983 = vrcp.f32 %v1506_v59  ;;  %v1627_v39 = vmul.f32 %v9980_v57, %v11403_v52  ;;  %v1512_v59 = vpop.xlane.xlu0 %1511  ;;  %v351_v52 = vmul.f32 %v11571_v40, %v315_v14  ;;  %v358_v57 = vmul.f32 %v11571_v40, %v322_v19  ;;  %v319_v19 = vld [vmem:[%s15058_s2 + $0x78] sm:$0xff] }
 0x1bf   :  { %9985 = vpow2.f32 %v1496_v34  ;;  %3264 = vrot.lane.b32.xlu2 %v15359_v10, %s10429_s5  ;;  %v416_v34 = vmax.f32 %v11704_v16, 0.0 }
 0x1c0   :  { %9346 = vmatmul.msk.f32.vlgmr.msra.gmra.mxu1 %vm440_vm0, %v1627_v39  ;;  %9987 = vrcp.f32 %v1512_v59  ;;  %v359_v39 = vmul.f32 %v11571_v40, %v323_v24  ;;  %v328_v24 = vld [vmem:[%s15058_s2 + $0xc0] sm:$0xff] }
 0x1c1   :  { %v9982_v60 = vpop.eup %9981  ;;  %1883 = vmatpush.msra.mxu1 %v15196_v8  ;;  %v15361_v8 = vmax.f32 %v11637_v26, 0.0 }
 0x1c2   :  { %v1626_v16 = vmul.f32 %v9982_v60, %v11408_v15  ;;  %v1509_v14 = vpop.xlane.xlu2 %1508  ;;  %v11754_v15 = vadd.f32 %v11582_v48, %v351_v52  ;;  %v320_v60 = vld [vmem:[%s15058_s2 + $0x80] sm:$0xff] }
 0x1c3   :  { %9682 = vrot.lane.b32.xlu1 %v11709_v18, %s10429_s5  ;;  %9989 = vrcp.f32 %v1509_v14  ;;  %v15360_v18 = vmax.f32 %v11608_v4, 0.0  ;;  %v15364_v4 = vmax.f32 %v11707_v56, 0.0 }
 0x1c4   :  { %v9984_v10 = vpop.eup %9983  ;;  %9345 = vmatmul.msk.f32.vlgmr.msra.gmra.mxu0 %vm440_vm0, %v1626_v16  ;;  %v355_v16 = vmul.f32 %v11571_v40, %v319_v19  ;;  %v356_v19 = vmul.f32 %v11571_v40, %v320_v60  ;;  %v321_v60 = vld [vmem:[%s15058_s2 + $0x88] sm:$0xff] }
 0x1c5   :  { %v1628_v59 = vmul.f32 %v9984_v10, %v11410_v5  ;;  %v1515_v35 = vpop.xlane.xlu1 %1514  ;;  %v11748_v7 = vpack.i.bf16 %v15361_v8, %v15360_v18  ;;  %v11750_v23 = vpop.eup %9985  ;;  %v318_v5 = vld [vmem:[%s15058_s2 + $0x70] sm:$0xff]  ;;  %1860 = vmatpush.msra.mxu0 %v416_v34  ;;  %v15365_v18 = vmax.f32 %v11716_v54, 0.0  ;;  %v11770_v8 = vadd.f32 %v11582_v48, %v359_v39  ;;  %v329_v10 = vld [vmem:[%s15058_s2 + $0xc8] sm:$0xff] }
 0x1c6   :  { %15363 = vst [vmem:[#allocation120_spill] sm:$0xff] %v11750_v23  ;;  %9991 = vrcp.f32 %v1515_v35  ;;  %v11767_v35 = vadd.f32 %v11582_v48, %v358_v57  ;;  %v1521_v52 = vpop.xlane.xlu0 %1520  ;;  %v9988_v57 = vpop.eup %9987  ;;  %v1591_v39 = vsel %vm1305_vm1, %v11750_v23, 0.0  ;;  %v391_v23 = vadd.f32 %v11582_v48, %v355_v16  ;;  %v325_v16 = vld [vmem:[%s15058_s2 + $0xa8] sm:$0xff] }
 0x1c7   :  { %15362 = vst [vmem:[#allocation119_spill] sm:$0xff] %v11748_v7  ;;  %9347 = vmatmul.msk.f32.vlgmr.msra.gmra.mxu2 %vm440_vm0, %v1628_v59  ;;  %v11764_v26 = vpack.i.bf16 %v15365_v18, %v15364_v4  ;;  %9677 = vrot.lane.b32.xlu2 %v11748_v7, %s10429_s5  ;;  %v354_v59 = vmul.f32 %v11571_v40, %v318_v5  ;;  %9993 = vrcp.f32 %v1521_v52  ;;  %v15201_v7 = vmax.f32 %v11770_v8, 0.0 }
 0x1c8   :  { %1906 = vmatpush.msra.mxu2 %v15197_v0  ;;  %v364_v4 = vmul.f32 %v11571_v40, %v328_v24  ;;  %v365_v18 = vmul.f32 %v11571_v40, %v329_v10  ;;  %v1630_v14 = vmul.f32 %v9988_v57, %v11416_v27  ;;  %v324_v57 = vld [vmem:[%s15058_s2 + $0xa0] sm:$0xff] }
 0x1c9   :  { %15366 = vst [vmem:[#allocation121_spill] sm:$0xff] %v11764_v26  ;;  %v9990_v0 = vpop.eup %9989  ;;  %1592 = vadd.xlane.f32.xlu0 %v1591_v39  ;;  %v15367_v39 = vmax.f32 %v11699_v42, 0.0  ;;  %v390_v27 = vadd.f32 %v11582_v48, %v354_v59  ;;  %v15370_v42 = vmax.f32 %v11767_v35, 0.0  ;;  %v15372_v59 = vmax.f32 %v11707_v56, 0.0 }
 0x1ca   :  { %v1629_v5 = vmul.f32 %v9990_v0, %v11423_v50  ;;  %v1518_v24 = vpop.xlane.xlu2 %1517  ;;  %v11812_v50 = vadd.f32 %v11582_v48, %v364_v4  ;;  %v11827_v0 = vadd.f32 %v11582_v48, %v356_v19  ;;  %v15373_v4 = vmax.f32 %v11716_v54, 0.0  ;;  %v335_v19 = vld [vmem:[%s15058_s2 + $0xf8] sm:$0xff] }
 0x1cb   :  { %9702 = vrot.lane.b32.xlu1 %v11764_v26, %s10429_s5  ;;  %9995 = vrcp.f32 %v1518_v24  ;;  %v11805_v9 = vpack.i.bf16 %v15367_v39, %v416_v34  ;;  %v11824_v34 = vpack.i.bf16 %v15201_v7, %v15370_v42  ;;  %v361_v24 = vmul.f32 %v11571_v40, %v325_v16 }
 0x1cc   :  { %v9992_v46 = vpop.eup %9991  ;;  %9348 = vmatmul.msk.f32.vlgmr.msra.gmra.mxu3 %vm440_vm0, %v1629_v5  ;;  %9349 = vmatmul.msk.f32.vlgmr.msrb.gmra.mxu0 %vm440_vm0, %v1630_v14  ;;  %v360_v5 = vmul.f32 %v11571_v40, %v324_v57  ;;  %v423_v56 = vmax.f32 %v391_v23, 0.0 }
 0x1cd   :  { %v1631_v10 = vmul.f32 %v9992_v46, %v11425_v37  ;;  %v1524_v52 = vpop.xlane.xlu1 %1523  ;;  %15368 = vst [vmem:[#allocation122_spill] sm:$0xff] %v11805_v9  ;;  %v11815_v46 = vadd.f32 %v11582_v48, %v365_v18  ;;  %v15369_v37 = vmax.f32 %v11754_v15, 0.0  ;;  %1952 = vmatpush.msrb.mxu0 %v15372_v59  ;;  %v334_v18 = vld [vmem:[%s15058_s2 + $0xf0] sm:$0xff]  ;;  %v371_v59 = vmul.f32 %v11571_v40, %v335_v19 }
 0x1ce   :  { %9997 = vrcp.f32 %v1524_v52  ;;  %15371 = vst [vmem:[#allocation123_spill] sm:$0xff] %v11824_v34  ;;  %v1530_v14 = vpop.xlane.xlu0 %1529  ;;  %v422_v52 = vmax.f32 %v390_v27, 0.0  ;;  %v370_v16 = vmul.f32 %v11571_v40, %v334_v18  ;;  %v11863_v39 = vadd.f32 %v11582_v48, %v360_v5  ;;  %v330_v5 = vld [vmem:[%s15058_s2 + $0xd0] sm:$0xff] }
 0x1cf   :  { %9350 = vmatmul.msk.f32.vlgmr.msrb.gmra.mxu1 %vm440_vm0, %v1631_v10  ;;  %1929 = vmatpush.msra.mxu3 %v15369_v37  ;;  %v9994_v10 = vpop.eup %9993  ;;  %v357_v37 = vmul.f32 %v11571_v40, %v321_v60  ;;  %9999 = vrcp.f32 %v1530_v14  ;;  %v11866_v60 = vadd.f32 %v11582_v48, %v361_v24  ;;  %v15376_v18 = vmax.f32 %v11815_v46, 0.0  ;;  %v331_v24 = vld [vmem:[%s15058_s2 + $0xd8] sm:$0xff] }
 0x1d0   :  { %1975 = vmatpush.msrb.mxu1 %v15373_v4  ;;  %9692 = vrot.lane.b32.xlu2 %v11805_v9, %s10429_s5  ;;  %v1633_v23 = vmul.f32 %v9994_v10, %v11431_v47  ;;  %v11869_v54 = vpack.i.bf16 %v423_v56, %v422_v52  ;;  %v11887_v19 = vadd.f32 %v11582_v48, %v371_v59 }
 0x1d1   :  { %v9996_v42 = vpop.eup %9995  ;;  %v11874_v47 = vadd.f32 %v11582_v48, %v357_v37  ;;  %v428_v37 = vmax.f32 %v11863_v39, 0.0  ;;  %v366_v59 = vmul.f32 %v11571_v40, %v330_v5 }
 0x1d2   :  { %v1632_v27 = vmul.f32 %v9996_v42, %v11438_v44  ;;  %v1527_v7 = vpop.xlane.xlu2 %1526  ;;  %15374 = vst [vmem:[#allocation124_spill] sm:$0xff] %v11869_v54  ;;  %v15375_v44 = vmax.f32 %v11812_v50, 0.0  ;;  %v429_v42 = vmax.f32 %v11866_v60, 0.0 }
 0x1d3   :  { %9717 = vrot.lane.b32.xlu1 %v11824_v34, %s10429_s5  ;;  %10001 = vrcp.f32 %v1527_v7  ;;  %v11884_v7 = vadd.f32 %v11582_v48, %v370_v16  ;;  %v326_v16 = vld [vmem:[%s15058_s2 + $0xb0] sm:$0xff]  ;;  %v11918_v39 = vadd.f32 %v11582_v48, %v366_v59  ;;  %v15384_v59 = vmax.f32 %v11767_v35, 0.0 }
 0x1d4   :  { %v9998_v4 = vpop.eup %9997  ;;  %9351 = vmatmul.msk.f32.vlgmr.msrb.gmra.mxu2 %vm440_vm0, %v1632_v27  ;;  %9352 = vmatmul.msk.f32.vlgmr.msrb.gmra.mxu3 %vm440_vm0, %v1633_v23  ;;  %v439_v27 = vmax.f32 %v11887_v19, 0.0  ;;  %v11913_v5 = vpack.i.bf16 %v429_v42, %v428_v37 }
 0x1d5   :  { %v1634_v14 = vmul.f32 %v9998_v4, %v11440_v32  ;;  %v1533_v57 = vpop.xlane.xlu1 %1532  ;;  %1998 = vmatpush.msrb.mxu2 %v422_v52  ;;  %v11881_v32 = vpack.i.bf16 %v15376_v18, %v15375_v44  ;;  %2021 = vmatpush.msrb.mxu3 %v423_v56  ;;  %v15378_v52 = vmax.f32 %v11827_v0, 0.0  ;;  %v367_v4 = vmul.f32 %v11571_v40, %v331_v24 }
 0x1d6   :  { %10003 = vrcp.f32 %v1533_v57  ;;  %v1539_v10 = vpop.xlane.xlu0 %1538  ;;  %v10000_v57 = vpop.eup %9999  ;;  %15379 = vst [vmem:[#allocation126_spill] sm:$0xff] %v11913_v5  ;;  %v362_v24 = vmul.f32 %v11571_v40, %v326_v16  ;;  %v15383_v16 = vmax.f32 %v11874_v47, 0.0 }
 0x1d7   :  { %9353 = vmatmul.msk.f32.vlgmr.msra.gmra.mxu0 %vm440_vm0, %v1634_v14  ;;  %15377 = vst [vmem:[#allocation125_spill] sm:$0xff] %v11881_v32  ;;  %10005 = vrcp.f32 %v1539_v10  ;;  %v1636_v14 = vmul.f32 %v10000_v57, %v11446_v58  ;;  %v11921_v23 = vadd.f32 %v11582_v48, %v367_v4  ;;  %v15380_v58 = vld [vmem:[#allocation59_spill] sm:$0xff] }
 0x1d8   :  { %2044 = vmatpush.msra.mxu0 %v15378_v52  ;;  %9707 = vrot.lane.b32.xlu2 %v11869_v54, %s10429_s5 }
 0x1d9   :  { %v10002_v56 = vpop.eup %10001 }
 0x1da   :  { %v1635_v44 = vmul.f32 %v10002_v56, %v11453_v25  ;;  %v1536_v18 = vpop.xlane.xlu2 %1535  ;;  %v15381_v25 = vmax.f32 %v11884_v7, 0.0  ;;  %v15385_v56 = vmax.f32 %v11770_v8, 0.0 }
 0x1db   :  { %9732 = vrot.lane.b32.xlu1 %v11881_v32, %s10429_s5  ;;  %10007 = vrcp.f32 %v1536_v18  ;;  %v435_v18 = vmax.f32 %v11921_v23, 0.0 }
 0x1dc   :  { %v10004_v60 = vpop.eup %10003  ;;  %9354 = vmatmul.msk.f32.vlgmr.msra.gmra.mxu1 %vm440_vm0, %v1635_v44  ;;  %9355 = vmatmul.msk.f32.vlgmr.msra.gmra.mxu2 %vm440_vm0, %v1636_v14  ;;  %v327_v14 = vld [vmem:[%s15058_s2 + $0xb8] sm:$0xff]  ;;  %v434_v44 = vmax.f32 %v11918_v39, 0.0  ;;  %v15400_v39 = vmax.f32 %v11754_v15, 0.0 }
 0x1dd   :  { %v1637_v10 = vmul.f32 %v10004_v60, %v11455_v28  ;;  %v1542_v52 = vpop.xlane.xlu1 %1541  ;;  %3208 = vrot.lane.b32.xlu0 %v15380_v58, %s10429_s5  ;;  %v11932_v28 = vpack.i.bf16 %v439_v27, %v15381_v25  ;;  %2067 = vmatpush.msra.mxu1 %v15383_v16  ;;  %v10006_v4 = vpop.eup %10005  ;;  %v11943_v60 = vadd.f32 %v11582_v48, %v362_v24 }
 0x1de   :  { %10009 = vrcp.f32 %v1542_v52  ;;  %v1548_v57 = vpop.xlane.xlu0 %1547  ;;  %2090 = vmatpush.msra.mxu2 %v15384_v59  ;;  %v363_v25 = vmul.f32 %v11571_v40, %v327_v14  ;;  %v332_v14 = vld [vmem:[%s15058_s2 + $0xe0] sm:$0xff] }
 0x1df   :  { %9356 = vmatmul.msk.f32.vlgmr.msra.gmra.mxu3 %vm440_vm0, %v1637_v10  ;;  %15382 = vst [vmem:[#allocation127_spill] sm:$0xff] %v11932_v28  ;;  %10011 = vrcp.f32 %v1548_v57  ;;  %v1639_v10 = vmul.f32 %v10006_v4, %v11461_v17  ;;  %v11961_v57 = vpack.i.bf16 %v435_v18, %v434_v44  ;;  %v15386_v17 = vld [vmem:[#allocation65_spill] sm:$0xff] }
 0x1e0   :  { %2113 = vmatpush.msra.mxu3 %v15385_v56  ;;  %9722 = vrot.lane.b32.xlu2 %v11913_v5, %s10429_s5  ;;  %v430_v56 = vmax.f32 %v11943_v60, 0.0  ;;  %v15414_v60 = vld [vmem:[#allocation73_spill] sm:$0xff] }
 0x1e1   :  { %v10008_v35 = vpop.eup %10007 }
 0x1e2   :  { %v1638_v52 = vmul.f32 %v10008_v35, %v11468_v11  ;;  %v1545_v24 = vpop.xlane.xlu2 %1544 }
 0x1e3   :  { %9747 = vrot.lane.b32.xlu1 %v11932_v28, %s10429_s5  ;;  %10013 = vrcp.f32 %v1545_v24 }
 0x1e4   :  { %v10010_v8 = vpop.eup %10009  ;;  %9357 = vmatmul.msk.f32.vlgmr.msrb.gmra.mxu0 %vm440_vm0, %v1638_v52  ;;  %9358 = vmatmul.msk.f32.vlgmr.msrb.gmra.mxu1 %vm440_vm0, %v1639_v10  ;;  %v15390_v10 = vld [vmem:[#allocation4_spill] sm:$0xff] }
 0x1e5   :  { %v1640_v16 = vmul.f32 %v10010_v8, %v11470_v1  ;;  %v1551_v59 = vpop.xlane.xlu1 %1550  ;;  %3262 = vrot.lane.b32.xlu0 %v15386_v17, %s10429_s5  ;;  %2136 = vmatpush.msrb.mxu0 %v428_v37  ;;  %v11969_v1 = vadd.f32 %v11582_v48, %v363_v25  ;;  %v10012_v4 = vpop.eup %10011  ;;  %v15387_v8 = vmax.f32 %v11605_v2, 0.0  ;;  %v15388_v37 = vmax.f32 %v11585_v49, 0.0 }
 0x1e6   :  { %10015 = vrcp.f32 %v1551_v59  ;;  %v1557_v11 = vpop.xlane.xlu0 %1556  ;;  %2159 = vmatpush.msrb.mxu1 %v429_v42  ;;  %v1642_v24 = vmul.f32 %v10012_v4, %v11476_v45 }
 0x1e7   :  { %9359 = vmatmul.msk.f32.vlgmr.msrb.gmra.mxu2 %vm440_vm0, %v1640_v16  ;;  %10017 = vrcp.f32 %v1557_v11  ;;  %v11982_v42 = vpack.i.bf16 %v15388_v37, %v15387_v8  ;;  %v431_v59 = vmax.f32 %v11969_v1, 0.0  ;;  %v368_v11 = vmul.f32 %v11571_v40, %v332_v14  ;;  %v15393_v8 = vld [vmem:[#allocation5_spill] sm:$0xff] }
 0x1e8   :  { %2182 = vmatpush.msrb.mxu2 %v430_v56  ;;  %9737 = vrot.lane.b32.xlu2 %v11961_v57, %s10429_s5  ;;  %v15392_v14 = vmax.f32 %v11815_v46, 0.0 }
 0x1e9   :  { %v10014_v35 = vpop.eup %10013  ;;  %15389 = vst [vmem:[#allocation128_spill] sm:$0xff] %v11982_v42 }
 0x1ea   :  { %v1641_v25 = vmul.f32 %v10014_v35, %v11483_v38  ;;  %v1554_v16 = vpop.xlane.xlu2 %1553  ;;  %v15391_v38 = vmax.f32 %v11812_v50, 0.0  ;;  %v333_v35 = vld [vmem:[%s15058_s2 + $0xe8] sm:$0xff]  ;;  %v15395_v50 = vmax.f32 %v11664_v13, 0.0  ;;  %s10431_s2 = smov 104  }
 0x1eb   :  { %4566 = vrot.lane.b32.xlu1 %v15390_v10, %s10430_s8  ;;  %10019 = vrcp.f32 %v1554_v16  ;;  %v15398_v13 = vld [vmem:[#allocation7_spill] sm:$0xff] }
 0x1ec   :  { %v10016_v52 = vpop.eup %10015  ;;  %9360 = vmatmul.msk.f32.vlgmr.msrb.gmra.mxu3 %vm440_vm0, %v1641_v25  ;;  %9361 = vmatmul.msk.f32.vlgmr.msra.gmra.mxu0 %vm440_vm0, %v1642_v24  ;;  %v15397_v25 = vld [vmem:[#allocation3_spill] sm:$0xff] }
 0x1ed   :  { %v1643_v2 = vmul.f32 %v10016_v52, %v11485_v62  ;;  %v1560_v49 = vpop.xlane.xlu1 %1559  ;;  %9672 = vrot.lane.b32.xlu0 %v11982_v42, %s10429_s5  ;;  %2205 = vmatpush.msrb.mxu3 %v431_v59  ;;  %v12001_v62 = vadd.f32 %v11582_v48, %v368_v11  ;;  %v10018_v4 = vpop.eup %10017  ;;  %v15394_v52 = vmax.f32 %v11661_v31, 0.0 }
 0x1ee   :  { %10021 = vrcp.f32 %v1560_v49  ;;  %v1566_v45 = vpop.xlane.xlu0 %1565  ;;  %2228 = vmatpush.msra.mxu0 %v15391_v38  ;;  %v1645_v16 = vmul.f32 %v10018_v4, %v11491_v30  ;;  %v369_v38 = vmul.f32 %v11571_v40, %v333_v35  ;;  %v15399_v4 = vmax.f32 %v11720_v61, 0.0 }
 0x1ef   :  { %9362 = vmatmul.msk.f32.vlgmr.msra.gmra.mxu1 %vm440_vm0, %v1643_v2  ;;  %10023 = vrcp.f32 %v1566_v45  ;;  %v12014_v24 = vpack.i.bf16 %v15395_v50, %v15394_v52  ;;  %v436_v49 = vmax.f32 %v12001_v62, 0.0  ;;  %v15423_v62 = vld [vmem:[#allocation81_spill] sm:$0xff] }
 0x1f0   :  { %2251 = vmatpush.msra.mxu1 %v15392_v14  ;;  %4538 = vrot.lane.b32.xlu2 %v15393_v8, %s10430_s8  ;;  %v15402_v14 = vld [vmem:[#allocation12_spill] sm:$0xff] }
 0x1f1   :  { %v10020_v37 = vpop.eup %10019  ;;  %15396 = vst [vmem:[#allocation129_spill] sm:$0xff] %v12014_v24 }
 0x1f2   :  { %v1644_v11 = vmul.f32 %v10020_v37, %v11498_v6  ;;  %v1563_v2 = vpop.xlane.xlu2 %1562  ;;  %v12033_v6 = vadd.f32 %v11582_v48, %v369_v38 }
 0x1f3   :  { %4596 = vrot.lane.b32.xlu1 %v15397_v25, %s10430_s8  ;;  %10025 = vrcp.f32 %v1563_v2  ;;  %v15407_v2 = vld [vmem:[#allocation13_spill] sm:$0xff] }
 0x1f4   :  { %v10022_v46 = vpop.eup %10021  ;;  %9363 = vmatmul.msk.f32.vlgmr.msra.gmra.mxu2 %vm440_vm0, %v1644_v11  ;;  %9364 = vmatmul.msk.f32.vlgmr.msra.gmra.mxu3 %vm440_vm0, %v1645_v16  ;;  %v437_v37 = vmax.f32 %v12033_v6, 0.0  ;;  %v15406_v16 = vmax.f32 %v11874_v47, 0.0  ;;  %v15411_v47 = vld [vmem:[#allocation9_spill] sm:$0xff]  ;;  %v12090_v6 = vpack.i.bf16 %v431_v59, %v430_v56  ;;  %v15419_v59 = vld [vmem:[#allocation18_spill] sm:$0xff] }
 0x1f5   :  { %v1646_v45 = vmul.f32 %v10022_v46, %v11500_v53  ;;  %v1569_v31 = vpop.xlane.xlu1 %1568  ;;  %9687 = vrot.lane.b32.xlu0 %v12014_v24, %s10429_s5  ;;  %2274 = vmatpush.msra.mxu2 %v434_v44  ;;  %v10024_v53 = vpop.eup %10023  ;;  %v12043_v44 = vpack.i.bf16 %v15400_v39, %v15399_v4  ;;  %v15405_v46 = vmax.f32 %v11827_v0, 0.0  ;;  %v15408_v0 = vld [vmem:[#allocation68_spill] sm:$0xff]  ;;  %v15415_v56 = vld [vmem:[#allocation77_spill] sm:$0xff] }
 0x1f6   :  { %10027 = vrcp.f32 %v1569_v31  ;;  %v1575_v30 = vpop.xlane.xlu0 %1574  ;;  %2297 = vmatpush.msra.mxu3 %v435_v18  ;;  %v1648_v35 = vmul.f32 %v10024_v53, %v11506_v63  ;;  %15412 = vst [vmem:[#allocation68_spill] sm:$0xff] %v12090_v6  ;;  %v15413_v53 = vld [vmem:[#allocation19_spill] sm:$0xff]  ;;  %v12112_v1 = vpack.i.bf16 %v437_v37, %v436_v49 }
 0x1f7   :  { %9365 = vmatmul.msk.f32.vlgmr.msrb.gmra.mxu0 %vm440_vm0, %v1646_v45  ;;  %10029 = vrcp.f32 %v1575_v30  ;;  %15401 = vst [vmem:[#allocation130_spill] sm:$0xff] %v12043_v44  ;;  %v12066_v11 = vpack.i.bf16 %v15406_v16, %v15405_v46  ;;  %v15431_v46 = vld [vmem:[#allocation27_spill] sm:$0xff]  ;;  %v15432_v16 = vld [vmem:[#allocation21_spill] sm:$0xff] }
 0x1f8   :  { %2320 = vmatpush.msrb.mxu0 %v436_v49  ;;  %4568 = vrot.lane.b32.xlu2 %v15398_v13, %s10430_s8  ;;  %v15424_v49 = vld [vmem:[#allocation85_spill] sm:$0xff] }
 0x1f9   :  { %v10026_v40 = vpop.eup %10025 }
 0x1fa   :  { %v1647_v23 = vmul.f32 %v10026_v40, %v11513_v55  ;;  %v1572_v18 = vpop.xlane.xlu2 %1571  ;;  %v15403_v55 = vmax.f32 %v11884_v7, 0.0 }
 0x1fb   :  { %4650 = vrot.lane.b32.xlu1 %v15402_v14, %s10430_s8  ;;  %10031 = vrcp.f32 %v1572_v18  ;;  %v15420_v18 = vld [vmem:[#allocation67_spill] sm:$0xff] }
 0x1fc   :  { %v10028_v48 = vpop.eup %10027  ;;  %9366 = vmatmul.msk.f32.vlgmr.msrb.gmra.mxu1 %vm440_vm0, %v1647_v23  ;;  %9367 = vmatmul.msk.f32.vlgmr.msrb.gmra.mxu2 %vm440_vm0, %v1648_v35 }
 0x1fd   :  { %v1649_v52 = vmul.f32 %v10028_v48, %v11515_v21  ;;  %v1578_v50 = vpop.xlane.xlu1 %1577  ;;  %9697 = vrot.lane.b32.xlu0 %v12043_v44, %s10429_s5  ;;  %2343 = vmatpush.msrb.mxu1 %v437_v37  ;;  %v10030_v61 = vpop.eup %10029  ;;  %v15404_v21 = vld [vmem:[#allocation11_spill] sm:$0xff] }
 0x1fe   :  { %10033 = vrcp.f32 %v1578_v50  ;;  %v1584_v63 = vpop.xlane.xlu0 %1583  ;;  %2366 = vmatpush.msrb.mxu2 %v15403_v55  ;;  %v1651_v38 = vmul.f32 %v10030_v61, %v11521_v33  ;;  %v15409_v33 = vld [vmem:[#allocation71_spill] sm:$0xff]  ;;  %v15428_v55 = vld [vmem:[#allocation72_spill] sm:$0xff]  ;;  %v15429_v61 = vld [vmem:[#allocation2_spill] sm:$0xff] }
 0x1ff   :  { %9368 = vmatmul.msk.f32.vlgmr.msrb.gmra.mxu3 %vm440_vm0, %v1649_v52  ;;  %10035 = vrcp.f32 %v1584_v63  ;;  %15418 = vst [vmem:[#allocation71_spill] sm:$0xff] %v12112_v1  ;;  %v15421_v52 = vld [vmem:[#allocation66_spill] sm:$0xff]  ;;  %v15422_v50 = vld [vmem:[#allocation79_spill] sm:$0xff] }
 0x200   :  { %2389 = vmatpush.msrb.mxu3 %v439_v27  ;;  %4622 = vrot.lane.b32.xlu2 %v15404_v21, %s10430_s8  ;;  %v15426_v37 = vld [vmem:[#allocation23_spill] sm:$0xff]  ;;  %v15427_v63 = vld [vmem:[#allocation70_spill] sm:$0xff] }
 0x201   :  { %v10032_v15 = vpop.eup %10031 }
 0x202   :  { %v1650_v19 = vmul.f32 %v10032_v15, %v11531_v43  ;;  %v1581_v27 = vpop.xlane.xlu2 %1580  ;;  %v15430_v15 = vld [vmem:[#allocation76_spill] sm:$0xff] }
 0x203   :  { %4680 = vrot.lane.b32.xlu1 %v15407_v2, %s10430_s8  ;;  %10037 = vrcp.f32 %v1581_v27  ;;  %v15439_v27 = vld [vmem:[#allocation96_spill] sm:$0xff] }
 0x204   :  { %v10034_v7 = vpop.eup %10033  ;;  %9369 = vmatmul.msk.f32.vlgmr.msra.gmra.mxu0 %vm440_vm0, %v1650_v19  ;;  %9370 = vmatmul.msk.f32.vlgmr.msra.gmra.mxu1 %vm440_vm0, %v1651_v38  ;;  %v15434_v38 = vld [vmem:[#allocation82_spill] sm:$0xff] }
 0x205   :  { %v1652_v45 = vmul.f32 %v10034_v7, %v11533_v36  ;;  %v1587_v31 = vpop.xlane.xlu1 %1586  ;;  %9712 = vrot.lane.b32.xlu0 %v12066_v11, %s10429_s5  ;;  %9377 = vmatpush.xpose.msk.msra.mxu0 %vm440_vm0, %v15408_v0  ;;  %v10036_v43 = vpop.eup %10035  ;;  %v15410_v36 = vld [vmem:[#allocation69_spill] sm:$0xff]  ;;  %v15433_v7 = vld [vmem:[#allocation80_spill] sm:$0xff]  ;;  %v15436_v19 = vld [vmem:[#allocation86_spill] sm:$0xff] }
 0x206   :  { %10039 = vrcp.f32 %v1587_v31  ;;  %9379 = vmatpush.xpose.msk.msra.mxu1 %vm440_vm0, %v15409_v33  ;;  %v1654_v4 = vmul.f32 %v10036_v43, %v11540_v22  ;;  %v15416_v22 = vld [vmem:[#allocation75_spill] sm:$0xff]  ;;  %v15441_v31 = vld [vmem:[#allocation36_spill] sm:$0xff]  ;;  %v15443_v33 = vld [vmem:[#allocation90_spill] sm:$0xff] }
 0x207   :  { %9371 = vmatmul.msk.f32.vlgmr.msra.gmra.mxu2 %vm440_vm0, %v1652_v45  ;;  %v15440_v45 = vld [vmem:[#allocation17_spill] sm:$0xff]  ;;  %v15442_v0 = vld [vmem:[#allocation84_spill] sm:$0xff] }
 0x208   :  { %9381 = vmatpush.xpose.msk.msra.mxu2 %vm440_vm0, %v15410_v36  ;;  %4652 = vrot.lane.b32.xlu2 %v15411_v47, %s10430_s8  ;;  %v15444_v43 = vld [vmem:[#allocation8_spill] sm:$0xff]  ;;  %v15445_v36 = vld [vmem:[#allocation89_spill] sm:$0xff] }
 0x209   :  { %v10038_v30 = vpop.eup %10037 }
 0x20a   :  { %v1653_v39 = vmul.f32 %v10038_v30, %v11550_v51  ;;  %v1590_v48 = vpop.xlane.xlu2 %1589  ;;  %v15417_v51 = vld [vmem:[#allocation15_spill] sm:$0xff]  ;;  %v15446_v30 = vld [vmem:[#allocation100_spill] sm:$0xff] }
 0x20b   :  { %4734 = vrot.lane.b32.xlu1 %v15413_v53, %s10430_s8  ;;  %10041 = vrcp.f32 %v1590_v48  ;;  %v15450_v48 = vld [vmem:[#allocation26_spill] sm:$0xff] }
 0x20c   :  { %v10040_v40 = vpop.eup %10039  ;;  %9372 = vmatmul.msk.f32.vlgmr.msra.gmra.mxu3 %vm440_vm0, %v1653_v39  ;;  %9373 = vmatmul.msk.f32.vlgmr.msrb.gmra.mxu0 %vm440_vm0, %v1654_v4  ;;  %v15448_v4 = vld [vmem:[#allocation107_spill] sm:$0xff] }
 0x20d   :  { %v1655_v35 = vmul.f32 %v10040_v40, %v11552_v41  ;;  %9727 = vrot.lane.b32.xlu0 %v12090_v6, %s10429_s5  ;;  %9383 = vmatpush.xpose.msk.msra.mxu3 %vm440_vm0, %v15414_v60  ;;  %v15447_v40 = vld [vmem:[#allocation103_spill] sm:$0xff] }
 0x20e   :  { %9385 = vmatpush.xpose.msk.msrb.mxu0 %vm440_vm0, %v15415_v56  ;;  %v15449_v39 = vld [vmem:[#allocation31_spill] sm:$0xff]  ;;  %v15451_v56 = vld [vmem:[#allocation92_spill] sm:$0xff] }
 0x20f   :  { %9374 = vmatmul.msk.f32.vlgmr.msrb.gmra.mxu1 %vm440_vm0, %v1655_v35 }
 0x210   :  { %9387 = vmatpush.xpose.msk.msrb.mxu1 %vm440_vm0, %v15416_v22  ;;  %4706 = vrot.lane.b32.xlu2 %v15417_v51, %s10430_s8  ;;  %v15452_v22 = vld [vmem:[#allocation93_spill] sm:$0xff] }
 0x211   :  { %v10042_v41 = vpop.eup %10041  ;;  %v3179_v60 = vpop.permute.xlu0 %3178 }
 0x212   :  { %v1656_v23 = vmul.f32 %v10042_v41, %v11560_v20  ;;  %v15425_v20 = vld [vmem:[#allocation14_spill] sm:$0xff]  ;;  %v15453_v41 = vld [vmem:[#allocation16_spill] sm:$0xff] }
 0x213   :  { %4764 = vrot.lane.b32.xlu1 %v15419_v59, %s10430_s8 }
 0x214   :  { %9375 = vmatmul.msk.f32.vlgmr.msrb.gmra.mxu2 %vm440_vm0, %v1656_v23  ;;  %9378 = vmatmul.msk.f32.vlgmr.msra.gmra.mxu0 %vm440_vm0, %v15420_v18  ;;  %v15454_v23 = vld [vmem:[#allocation97_spill] sm:$0xff]  ;;  %v15455_v18 = vld [vmem:[#allocation108_spill] sm:$0xff] }
 0x215   :  { %9742 = vrot.lane.b32.xlu0 %v12112_v1, %s10429_s5  ;;  %9389 = vmatpush.xpose.msk.msrb.mxu2 %vm440_vm0, %v15422_v50  ;;  %v15457_v50 = vld [vmem:[#allocation114_spill] sm:$0xff]  ;;  %s10432_s5 = smov 8  }
 0x216   :  { %9393 = vmatpush.xpose.msk.msra.mxu0 %vm440_vm0, %v15423_v62  ;;  %v15458_v62 = vld [vmem:[#allocation29_spill] sm:$0xff] }
 0x217   :  { %9380 = vmatmul.msk.f32.vlgmr.msra.gmra.mxu1 %vm440_vm0, %v15421_v52  ;;  %v15456_v52 = vld [vmem:[#allocation113_spill] sm:$0xff] }
 0x218   :  { %9395 = vmatpush.xpose.msk.msra.mxu1 %vm440_vm0, %v15424_v49  ;;  %4736 = vrot.lane.b32.xlu2 %v15425_v20, %s10430_s8  ;;  %v3181_v49 = vpop.permute.xlu2 %3180 }
 0x21b   :  { %4818 = vrot.lane.b32.xlu1 %v15426_v37, %s10430_s8 }
 0x21c   :  { %9382 = vmatmul.msk.f32.vlgmr.msra.gmra.mxu2 %vm440_vm0, %v15427_v63  ;;  %9386 = vmatmul.msk.f32.vlgmr.msrb.gmra.mxu0 %vm440_vm0, %v15428_v55  ;;  %v15459_v63 = vld [vmem:[#allocation41_spill] sm:$0xff] }
 0x21d   :  { %4540 = vrot.lane.b32.xlu0 %v15429_v61, %s10430_s8  ;;  %9397 = vmatpush.xpose.msk.msra.mxu2 %vm440_vm0, %v11333_v3  ;;  %v15435_v3 = vld [vmem:[#allocation6_spill] sm:$0xff]  ;;  %v12188_v35 = vpop.permute.xlu1 %3152 }
 0x21e   :  { %9401 = vmatpush.xpose.msk.msrb.mxu0 %vm440_vm0, %v11337_v12  ;;  %v15437_v12 = vld [vmem:[#allocation91_spill] sm:$0xff] }
 0x21f   :  { %9388 = vmatmul.msk.f32.vlgmr.msrb.gmra.mxu1 %vm440_vm0, %v15430_v15 }
 0x220   :  { %9403 = vmatpush.xpose.msk.msrb.mxu1 %vm440_vm0, %v11347_v29  ;;  %4790 = vrot.lane.b32.xlu2 %v15431_v46, %s10430_s8  ;;  %v15438_v29 = vld [vmem:[#allocation98_spill] sm:$0xff] }
 0x223   :  { %4848 = vrot.lane.b32.xlu1 %v15432_v16, %s10430_s8 }
 0x224   :  { %9390 = vmatmul.msk.f32.vlgmr.msrb.gmra.mxu2 %vm440_vm0, %v15433_v7  ;;  %9394 = vmatmul.msk.f32.vlgmr.msra.gmra.mxu0 %vm440_vm0, %v15434_v38  ;;  %v15460_v7 = vld [vmem:[#allocation101_spill] sm:$0xff]  ;;  %v15461_v38 = vld [vmem:[#allocation104_spill] sm:$0xff] }
 0x225   :  { %4594 = vrot.lane.b32.xlu0 %v15435_v3, %s10430_s8  ;;  %9405 = vmatpush.xpose.msk.msrb.mxu2 %vm440_vm0, %v15437_v12  ;;  %v3207_v55 = vpop.permute.xlu1 %3206  ;;  %v15463_v12 = vld [vmem:[#allocation105_spill] sm:$0xff] }
 0x226   :  { %9409 = vmatpush.xpose.msk.msra.mxu0 %vm440_vm0, %v15438_v29  ;;  %v15464_v29 = vld [vmem:[#allocation115_spill] sm:$0xff] }
 0x227   :  { %9396 = vmatmul.msk.f32.vlgmr.msra.gmra.mxu1 %vm440_vm0, %v15436_v19  ;;  %v15462_v19 = vld [vmem:[#allocation10_spill] sm:$0xff] }
 0x228   :  { %9411 = vmatpush.xpose.msk.msra.mxu1 %vm440_vm0, %v15439_v27  ;;  %4820 = vrot.lane.b32.xlu2 %v15440_v45, %s10430_s8  ;;  %v15465_v27 = vld [vmem:[#allocation37_spill] sm:$0xff] }
 0x22b   :  { %4902 = vrot.lane.b32.xlu1 %v15441_v31, %s10430_s8 }
 0x22c   :  { %9398 = vmatmul.msk.f32.vlgmr.msra.gmra.mxu2 %vm440_vm0, %v15442_v0  ;;  %9402 = vmatmul.msk.f32.vlgmr.msrb.gmra.mxu0 %vm440_vm0, %v15443_v33  ;;  %v3235_v0 = vpop.permute.xlu2 %3234  ;;  %v15466_v33 = vld [vmem:[#allocation35_spill] sm:$0xff] }
 0x22d   :  { %4624 = vrot.lane.b32.xlu0 %v15444_v43, %s10430_s8  ;;  %9413 = vmatpush.xpose.msk.msra.mxu2 %vm440_vm0, %v15446_v30  ;;  %v15467_v30 = vld [vmem:[#allocation120_spill] sm:$0xff] }
 0x22e   :  { %9417 = vmatpush.xpose.msk.msrb.mxu0 %vm440_vm0, %v15447_v40 }
 0x22f   :  { %9404 = vmatmul.msk.f32.vlgmr.msrb.gmra.mxu1 %vm440_vm0, %v15445_v36 }
 0x230   :  { %9419 = vmatpush.xpose.msk.msrb.mxu1 %vm440_vm0, %v15448_v4  ;;  %4874 = vrot.lane.b32.xlu2 %v15449_v39, %s10430_s8  ;;  %v15468_v4 = vld [vmem:[#allocation106_spill] sm:$0xff] }
 0x233   :  { %4932 = vrot.lane.b32.xlu1 %v15450_v48, %s10430_s8  ;;  %v15502_v48 = vld [vmem:[#allocation109_spill] sm:$0xff] }
 0x234   :  { %9406 = vmatmul.msk.f32.vlgmr.msrb.gmra.mxu2 %vm440_vm0, %v15451_v56  ;;  %9410 = vmatmul.msk.f32.vlgmr.msra.gmra.mxu0 %vm440_vm0, %v15452_v22  ;;  %v15469_v56 = vld [vmem:[#allocation111_spill] sm:$0xff]  ;;  %v15470_v22 = vld [vmem:[#allocation22_spill] sm:$0xff] }
 0x235   :  { %4678 = vrot.lane.b32.xlu0 %v15453_v41, %s10430_s8  ;;  %9421 = vmatpush.xpose.msk.msrb.mxu2 %vm440_vm0, %v15455_v18  ;;  %v3237_v18 = vpop.permute.xlu1 %3236 }
 0x236   :  { %9425 = vmatpush.xpose.msk.msra.mxu0 %vm440_vm0, %v15456_v52  ;;  %v15472_v52 = vld [vmem:[#allocation83_spill] sm:$0xff] }
 0x237   :  { %9412 = vmatmul.msk.f32.vlgmr.msra.gmra.mxu1 %vm440_vm0, %v15454_v23  ;;  %v15471_v23 = vld [vmem:[#allocation112_spill] sm:$0xff] }
 0x238   :  { %9427 = vmatpush.xpose.msk.msra.mxu1 %vm440_vm0, %v15457_v50  ;;  %4904 = vrot.lane.b32.xlu2 %v15458_v62, %s10430_s8  ;;  %v15473_v50 = vld [vmem:[#allocation32_spill] sm:$0xff] }
 0x23b   :  { %4986 = vrot.lane.b32.xlu1 %v15459_v63, %s10430_s8 }
 0x23c   :  { %v1593_v15 = vpop.xlane.xlu0 %1592  ;;  %9414 = vmatmul.msk.f32.vlgmr.msra.gmra.mxu2 %vm440_vm0, %v15460_v7  ;;  %9418 = vmatmul.msk.f32.vlgmr.msrb.gmra.mxu0 %vm440_vm0, %v15461_v38  ;;  %v15475_v7 = vld [vmem:[#allocation46_spill] sm:$0xff]  ;;  %v15476_v38 = vld [vmem:[#allocation116_spill] sm:$0xff] }
 0x23d   :  { %10043 = vrcp.f32 %v1593_v15  ;;  %4708 = vrot.lane.b32.xlu0 %v15462_v19, %s10430_s8  ;;  %9429 = vmatpush.xpose.msk.msra.mxu2 %vm440_vm0, %v15464_v29  ;;  %v15478_v29 = vld [vmem:[#allocation20_spill] sm:$0xff] }
 0x23e   :  { %9433 = vmatpush.xpose.msk.msrb.mxu0 %vm440_vm0, %v3181_v49  ;;  %v3265_v49 = vpop.permute.xlu2 %3264 }
 0x23f   :  { %9420 = vmatmul.msk.f32.vlgmr.msrb.gmra.mxu1 %vm440_vm0, %v15463_v12  ;;  %v12245_v12 = vpop.f32.mrf.mxu1 }
 0x240   :  { %4958 = vrot.lane.b32.xlu2 %v15465_v27, %s10430_s8  ;;  %15477 = vst [vmem:[#allocation73_spill] sm:$0xff] %v12245_v12  ;;  %v15493_v12 = vld [vmem:[#allocation24_spill] sm:$0xff] }
 0x241   :  { %v12238_v15 = vpop.f32.mrf.mxu0 }
 0x242   :  { %15474 = vst [vmem:[#allocation69_spill] sm:$0xff] %v12238_v15  ;;  %v9683_v15 = vpop.permute.xlu1 %9682 }
 0x243   :  { %5016 = vrot.lane.b32.xlu1 %v15466_v33, %s10430_s8  ;;  %v10044_v36 = vpop.eup %10043 }
 0x244   :  { %v1657_v40 = vmul.f32 %v10044_v36, %v15467_v30  ;;  %9422 = vmatmul.msk.f32.vlgmr.msrb.gmra.mxu2 %vm440_vm0, %v15468_v4  ;;  %9426 = vmatmul.msk.f32.vlgmr.msra.gmra.mxu0 %vm440_vm0, %v15469_v56  ;;  %v15479_v36 = vld [vmem:[#allocation74_spill] sm:$0xff]  ;;  %v15480_v30 = vld [vmem:[#allocation87_spill] sm:$0xff] }
 0x245   :  { %4762 = vrot.lane.b32.xlu0 %v15470_v22, %s10430_s8  ;;  %9437 = vmatpush.xpose.msk.msrb.mxu2 %vm440_vm0, %v3237_v18 }
 0x246   :  { %9376 = vmatmul.msk.f32.vlgmr.msrb.gmra.mxu3 %vm440_vm0, %v1657_v40  ;;  %v15481_v40 = vld [vmem:[#allocation43_spill] sm:$0xff]  ;;  %v9678_v56 = vpop.permute.xlu2 %9677 }
 0x247   :  { %9428 = vmatmul.msk.f32.vlgmr.msra.gmra.mxu1 %vm440_vm0, %v15471_v23  ;;  %9391 = vmatpush.xpose.msk.msrb.mxu3 %vm440_vm0, %v15472_v52  ;;  %v9679_v23 = vunpack.i.l.bf16 %v9678_v56 }
 0x248   :  { %4988 = vrot.lane.b32.xlu2 %v15473_v50, %s10430_s8 }
 0x249   :  { %v12258_v18 = vpop.f32.mrf.mxu0 }
 0x24a   :  { %15483 = vst [vmem:[#allocation77_spill] sm:$0xff] %v12258_v18  ;;  %v15489_v18 = vld [vmem:[#allocation34_spill] sm:$0xff] }
 0x24b   :  { %5070 = vrot.lane.b32.xlu1 %v15475_v7, %s10430_s8  ;;  %v9684_v7 = vunpack.i.l.bf16 %v9683_v15 }
 0x24c   :  { %9430 = vmatmul.msk.f32.vlgmr.msra.gmra.mxu2 %vm440_vm0, %v15476_v38  ;;  %9434 = vmatmul.msk.f32.vlgmr.msrb.gmra.mxu0 %vm440_vm0, %v3179_v60  ;;  %v15482_v60 = vld [vmem:[#allocation39_spill] sm:$0xff]  ;;  %v12262_v52 = vpop.f32.mrf.mxu1  ;;  %v15485_v38 = vld [vmem:[#allocation25_spill] sm:$0xff] }
 0x24d   :  { %4792 = vrot.lane.b32.xlu0 %v15478_v29, %s10430_s8  ;;  %3750 = vmatpush.msra.mxu2 %v9679_v23  ;;  %15484 = vst [vmem:[#allocation75_spill] sm:$0xff] %v12262_v52  ;;  %v15490_v23 = vld [vmem:[#allocation51_spill] sm:$0xff] }
 0x24e   :  { %9384 = vmatmul.msk.f32.vlgmr.msra.gmra.mxu3 %vm440_vm0, %v15479_v36  ;;  %v15486_v36 = vld [vmem:[#allocation78_spill] sm:$0xff] }
 0x24f   :  { %9399 = vmatpush.xpose.msk.msra.mxu3 %vm440_vm0, %v15480_v30  ;;  %v3209_v4 = vpop.permute.xlu0 %3208  ;;  %v12268_v30 = vpop.f32.mrf.mxu2 }
 0x250   :  { %5042 = vrot.lane.b32.xlu2 %v15481_v40, %s10430_s8  ;;  %9435 = vmatpush.xpose.msk.msrb.mxu1 %vm440_vm0, %v3209_v4  ;;  %15487 = vst [vmem:[#allocation67_spill] sm:$0xff] %v12268_v30  ;;  %v15488_v4 = vld [vmem:[#allocation94_spill] sm:$0xff] }
 0x253   :  { %5100 = vrot.lane.b32.xlu1 %v15482_v60, %s10430_s8  ;;  %9436 = vmatmul.msk.f32.vlgmr.msrb.gmra.mxu1 %vm440_vm0, %v3207_v55  ;;  %v15497_v60 = vld [vmem:[#allocation53_spill] sm:$0xff] }
 0x254   :  { %9438 = vmatmul.msk.f32.vlgmr.msrb.gmra.mxu2 %vm440_vm0, %v3235_v0  ;;  %v12276_v0 = vpop.f32.mrf.mxu0 }
 0x255   :  { %4846 = vrot.lane.b32.xlu0 %v15485_v38, %s10430_s8  ;;  %15491 = vst [vmem:[#allocation66_spill] sm:$0xff] %v12276_v0 }
 0x256   :  { %9392 = vmatmul.msk.f32.vlgmr.msrb.gmra.mxu3 %vm440_vm0, %v15486_v36  ;;  %v15494_v36 = vld [vmem:[#allocation88_spill] sm:$0xff] }
 0x257   :  { %9407 = vmatpush.xpose.msk.msrb.mxu3 %vm440_vm0, %v15488_v4  ;;  %v3263_v55 = vpop.permute.xlu0 %3262  ;;  %v12284_v30 = vpop.f32.mrf.mxu2  ;;  %v15496_v4 = vld [vmem:[#allocation102_spill] sm:$0xff] }
 0x258   :  { %5072 = vrot.lane.b32.xlu2 %v15489_v18, %s10430_s8  ;;  %15495 = vst [vmem:[#allocation81_spill] sm:$0xff] %v12284_v30  ;;  %v15500_v30 = vld [vmem:[#allocation95_spill] sm:$0xff] }
 0x259   :  { %v12278_v52 = vpop.f32.mrf.mxu1 }
 0x25a   :  { %15492 = vst [vmem:[#allocation79_spill] sm:$0xff] %v12278_v52 }
 0x25b   :  { %5154 = vrot.lane.b32.xlu1 %v15490_v23, %s10430_s8  ;;  %v9685_v23 = vunpack.i.h.bf16 %v9683_v15 }
 0x25d   :  { %4876 = vrot.lane.b32.xlu0 %v15493_v12, %s10430_s8 }
 0x25e   :  { %9400 = vmatmul.msk.f32.vlgmr.msra.gmra.mxu3 %vm440_vm0, %v15494_v36  ;;  %v15499_v36 = vld [vmem:[#allocation33_spill] sm:$0xff] }
 0x25f   :  { %9415 = vmatpush.xpose.msk.msra.mxu3 %vm440_vm0, %v15496_v4  ;;  %v9673_v0 = vpop.permute.xlu0 %9672  ;;  %v12300_v31 = vpop.f32.mrf.mxu2 }
 0x260   :  { %5126 = vrot.lane.b32.xlu2 %v15497_v60, %s10430_s8  ;;  %v9675_v33 = vunpack.i.h.bf16 %v9673_v0  ;;  %v9674_v52 = vunpack.i.l.bf16 %v9673_v0  ;;  %15503 = vst [vmem:[#allocation72_spill] sm:$0xff] %v12300_v31  ;;  %v15510_v31 = vld [vmem:[#allocation110_spill] sm:$0xff] }
 0x261   :  { %v12290_v63 = vpop.f32.mrf.mxu0  ;;  %v12296_v4 = vpop.f32.mrf.mxu1 }
 0x262   :  { %3696 = vmatpush.msra.mxu0 %v9674_v52  ;;  %3723 = vmatpush.msra.mxu1 %v9675_v33  ;;  %15498 = vst [vmem:[#allocation85_spill] sm:$0xff] %v12290_v63  ;;  %v15504_v33 = vld [vmem:[#allocation28_spill] sm:$0xff] }
 0x263   :  { %15501 = vst [vmem:[#allocation70_spill] sm:$0xff] %v12296_v4  ;;  %v9680_v4 = vunpack.i.h.bf16 %v9678_v56  ;;  %v12338_v56 = vpop.f32.mrf.mxu3 }
 0x264   :  { %3804 = vmatpush.msrb.mxu0 %v9684_v7  ;;  %3831 = vmatpush.msrb.mxu1 %v9685_v23  ;;  %v15505_v7 = vld [vmem:[#allocation99_spill] sm:$0xff]  ;;  %15520 = vst [vmem:[#allocation89_spill] sm:$0xff] %v12338_v56 }
 0x265   :  { %4930 = vrot.lane.b32.xlu0 %v15499_v36, %s10430_s8 }
 0x266   :  { %9408 = vmatmul.msk.f32.vlgmr.msrb.gmra.mxu3 %vm440_vm0, %v15500_v30 }
 0x267   :  { %9423 = vmatpush.xpose.msk.msrb.mxu3 %vm440_vm0, %v15502_v48  ;;  %v9688_v15 = vpop.permute.xlu0 %9687  ;;  %v15509_v48 = vld [vmem:[#allocation44_spill] sm:$0xff] }
 0x268   :  { %v9689_v52 = vunpack.i.l.bf16 %v9688_v15 }
 0x269   :  { %v12306_v23 = vpop.f32.mrf.mxu0 }
 0x26a   :  { %3858 = vmatpush.msrb.mxu2 %v9689_v52  ;;  %15506 = vst [vmem:[#allocation76_spill] sm:$0xff] %v12306_v23  ;;  %v12312_v0 = vpop.f32.mrf.mxu2 }
 0x26b   :  { %15508 = vst [vmem:[#allocation82_spill] sm:$0xff] %v12312_v0 }
 0x26c   :  { %v12310_v30 = vpop.f32.mrf.mxu1 }
 0x26d   :  { %4960 = vrot.lane.b32.xlu0 %v15504_v33, %s10430_s8  ;;  %15507 = vst [vmem:[#allocation80_spill] sm:$0xff] %v12310_v30  ;;  %v15515_v30 = vld [vmem:[#allocation117_spill] sm:$0xff] }
 0x26e   :  { %9416 = vmatmul.msk.f32.vlgmr.msra.gmra.mxu3 %vm440_vm0, %v15505_v7 }
 0x26f   :  { %9431 = vmatpush.xpose.msk.msra.mxu3 %vm440_vm0, %v12188_v35  ;;  %v15514_v35 = vld [vmem:[#allocation30_spill] sm:$0xff]  ;;  %v12352_v16 = vpop.permute.xlu0 %9697 }
 0x274   :  { %v12319_v52 = vpop.f32.mrf.mxu0 }
 0x275   :  { %5014 = vrot.lane.b32.xlu0 %v15509_v48, %s10430_s8  ;;  %15511 = vst [vmem:[#allocation86_spill] sm:$0xff] %v12319_v52  ;;  %v15519_v52 = vld [vmem:[#allocation49_spill] sm:$0xff] }
 0x276   :  { %9424 = vmatmul.msk.f32.vlgmr.msrb.gmra.mxu3 %vm440_vm0, %v15510_v31  ;;  %v9690_v31 = vunpack.i.h.bf16 %v9688_v15 }
 0x277   :  { %9439 = vmatpush.xpose.msk.msrb.mxu3 %vm440_vm0, %v3265_v49  ;;  %v12323_v63 = vpop.f32.mrf.mxu2  ;;  %v12368_v37 = vpop.permute.xlu0 %9712 }
 0x278   :  { %15513 = vst [vmem:[#allocation98_spill] sm:$0xff] %v12323_v63 }
 0x279   :  { %v12321_v7 = vpop.f32.mrf.mxu1  ;;  %15528 = vst [vmem:[#allocation108_spill] sm:$0xff] %v12368_v37 }
 0x27a   :  { %15512 = vst [vmem:[#allocation91_spill] sm:$0xff] %v12321_v7 }
 0x27d   :  { %5044 = vrot.lane.b32.xlu0 %v15514_v35, %s10430_s8 }
 0x27e   :  { %9432 = vmatmul.msk.f32.vlgmr.msra.gmra.mxu3 %vm440_vm0, %v15515_v30 }
 0x27f   :  { %3777 = vmatpush.msra.mxu3 %v9680_v4  ;;  %v12333_v49 = vpop.f32.mrf.mxu2  ;;  %v15523_v4 = vld [vmem:[#allocation40_spill] sm:$0xff] }
 0x280   :  { %15518 = vst [vmem:[#allocation90_spill] sm:$0xff] %v12333_v49  ;;  %v12350_v49 = vpop.f32.mrf.mxu3 }
 0x281   :  { %v12329_v0 = vpop.f32.mrf.mxu0  ;;  %v12331_v23 = vpop.f32.mrf.mxu1  ;;  %15525 = vst [vmem:[#allocation92_spill] sm:$0xff] %v12350_v49 }
 0x282   :  { %15516 = vst [vmem:[#allocation96_spill] sm:$0xff] %v12329_v0 }
 0x283   :  { %15517 = vst [vmem:[#allocation84_spill] sm:$0xff] %v12331_v23 }
 0x285   :  { %5098 = vrot.lane.b32.xlu0 %v15519_v52, %s10430_s8 }
 0x286   :  { %9440 = vmatmul.msk.f32.vlgmr.msrb.gmra.mxu3 %vm440_vm0, %v3263_v55 }
 0x287   :  { %3885 = vmatpush.msrb.mxu3 %v9690_v31  ;;  %v12356_v31 = vpop.permute.xlu2 %9692 }
 0x289   :  { %v12340_v7 = vpop.f32.mrf.mxu0 }
 0x28a   :  { %15521 = vst [vmem:[#allocation100_spill] sm:$0xff] %v12340_v7  ;;  %v12346_v30 = vpop.f32.mrf.mxu2 }
 0x28b   :  { %15524 = vst [vmem:[#allocation107_spill] sm:$0xff] %v12346_v30 }
 0x28c   :  { %v12342_v63 = vpop.f32.mrf.mxu1 }
 0x28d   :  { %15522 = vst [vmem:[#allocation103_spill] sm:$0xff] %v12342_v63  ;;  %5128 = vrot.lane.b32.xlu0 %v15523_v4, %s10430_s8  ;;  %v12360_v63 = vpop.permute.xlu1 %9702  ;;  %v12364_v4 = vpop.f32.mrf.mxu3 }
 0x28e   :  { %15527 = vst [vmem:[#allocation97_spill] sm:$0xff] %v12364_v4  ;;  %v12380_v4 = vpop.permute.xlu0 %9727 }
 0x28f   :  { %15532 = vst [vmem:[#allocation104_spill] sm:$0xff] %v12380_v4 }
 0x291   :  { %v2419_v15 = vpop.f32.mrf.mxu0 }
 0x292   :  { %v12348_v0 = vmul.f32 0.5, %v2419_v15 }
 0x294   :  { %v2447_v23 = vpop.f32.mrf.mxu1  ;;  %v3322_v55 = vsel %vm1305_vm1, %v12348_v0, -inf }
 0x295   :  { %3323 = vmax.xlane.f32.xlu1 %v3322_v55  ;;  %v12370_v55 = vpop.permute.xlu2 %9707  ;;  %v12376_v60 = vpop.f32.mrf.mxu3 }
 0x296   :  { %15529 = vst [vmem:[#allocation113_spill] sm:$0xff] %v12370_v55  ;;  %v12394_v2 = vpop.permute.xlu0 %9742 }
 0x297   :  { %v12358_v56 = vpop.f32.mrf.mxu2  ;;  %15531 = vst [vmem:[#allocation101_spill] sm:$0xff] %v12376_v60  ;;  %v12392_v60 = vmul.f32 0.5, %v2447_v23 }
 0x298   :  { %15526 = vst [vmem:[#allocation93_spill] sm:$0xff] %v12358_v56  ;;  %v12374_v56 = vpop.permute.xlu1 %9717 }
 0x299   :  { %v2531_v15 = vpop.f32.mrf.mxu0  ;;  %15530 = vst [vmem:[#allocation114_spill] sm:$0xff] %v12374_v56 }
 0x29a   :  { %15536 = vst [vmem:[#allocation106_spill] sm:$0xff] %v12394_v2  ;;  %v12404_v14 = vmul.f32 0.5, %v2531_v15 }
 0x29c   :  { %v2559_v7 = vpop.f32.mrf.mxu1  ;;  %v3334_v23 = vsel %vm1305_vm1, %v12404_v14, -inf }
 0x29d   :  { %v12362_v30 = vmul.f32 0.5, %v2559_v7  ;;  %v12384_v18 = vpop.permute.xlu2 %9722  ;;  %v12390_v48 = vpop.f32.mrf.mxu3 }
 0x29e   :  { %15533 = vst [vmem:[#allocation105_spill] sm:$0xff] %v12384_v18  ;;  %v12406_v50 = vpop.permute.xlu0 %4540 }
 0x29f   :  { %v3337_v49 = vsel %vm1305_vm1, %v12362_v30, -inf  ;;  %v2475_v52 = vpop.f32.mrf.mxu2  ;;  %15535 = vst [vmem:[#allocation120_spill] sm:$0xff] %v12390_v48 }
 0x2a0   :  { %3338 = vmax.xlane.f32.xlu2 %v3337_v49  ;;  %v12372_v59 = vmul.f32 0.5, %v2475_v52  ;;  %v12386_v49 = vpop.permute.xlu1 %9732  ;;  %15540 = vst [vmem:[#allocation116_spill] sm:$0xff] %v12406_v50 }
 0x2a1   :  { %v2643_v35 = vpop.f32.mrf.mxu0  ;;  %15534 = vst [vmem:[#allocation115_spill] sm:$0xff] %v12386_v49 }
 0x2a2   :  { %v3328_v7 = vsel %vm1305_vm1, %v12372_v59, -inf  ;;  %v12382_v53 = vmul.f32 0.5, %v2643_v35  ;;  %v3325_v35 = vsel %vm1305_vm1, %v12392_v60, -inf }
 0x2a4   :  { %v3346_v52 = vsel %vm1305_vm1, %v12382_v53, -inf  ;;  %v2671_v12 = vpop.f32.mrf.mxu1 }
 0x2a5   :  { %v12396_v40 = vpop.permute.xlu2 %9737  ;;  %v12402_v33 = vpop.f32.mrf.mxu3 }
 0x2a6   :  { %15537 = vst [vmem:[#allocation111_spill] sm:$0xff] %v12396_v40  ;;  %v12416_v25 = vpop.permute.xlu0 %4594 }
 0x2a7   :  { %15539 = vst [vmem:[#allocation83_spill] sm:$0xff] %v12402_v33 }
 0x2a8   :  { %3329 = vmax.xlane.f32.xlu2 %v3328_v7  ;;  %v12398_v7 = vpop.permute.xlu1 %9747  ;;  %15544 = vst [vmem:[#allocation94_spill] sm:$0xff] %v12416_v25  ;;  %v12434_v25 = vmul.f32 0.5, %v2671_v12 }
 0x2a9   :  { %15538 = vst [vmem:[#allocation112_spill] sm:$0xff] %v12398_v7 }
 0x2ac   :  { %v2783_v39 = vpop.f32.mrf.mxu1 }
 0x2ad   :  { %v12414_v36 = vpop.f32.mrf.mxu3 }
 0x2ae   :  { %15543 = vst [vmem:[#allocation78_spill] sm:$0xff] %v12414_v36  ;;  %v12424_v33 = vpop.permute.xlu0 %4624 }
 0x2af   :  { %15548 = vst [vmem:[#allocation109_spill] sm:$0xff] %v12424_v33 }
 0x2b0   :  { %3347 = vmax.xlane.f32.xlu2 %v3346_v52  ;;  %v12410_v52 = vpop.permute.xlu2 %4538  ;;  %v12412_v48 = vpop.permute.xlu1 %4566 }
 0x2b1   :  { %15541 = vst [vmem:[#allocation74_spill] sm:$0xff] %v12410_v52  ;;  %v2587_v52 = vpop.f32.mrf.mxu2 }
 0x2b2   :  { %15542 = vst [vmem:[#allocation87_spill] sm:$0xff] %v12412_v48  ;;  %v12448_v12 = vmul.f32 0.5, %v2587_v52 }
 0x2b4   :  { %v3340_v45 = vsel %vm1305_vm1, %v12448_v12, -inf }
 0x2b6   :  { %v12438_v29 = vpop.permute.xlu0 %4678 }
 0x2b7   :  { %3326 = vmax.xlane.f32.xlu0 %v3325_v35  ;;  %15551 = vst [vmem:[#allocation117_spill] sm:$0xff] %v12438_v29 }
 0x2b8   :  { %v12418_v27 = vpop.permute.xlu2 %4568  ;;  %v12422_v15 = vpop.permute.xlu1 %4596 }
 0x2b9   :  { %15545 = vst [vmem:[#allocation88_spill] sm:$0xff] %v12418_v27  ;;  %v2699_v29 = vpop.f32.mrf.mxu2 }
 0x2ba   :  { %15547 = vst [vmem:[#allocation95_spill] sm:$0xff] %v12422_v15  ;;  %v2755_v15 = vpop.f32.mrf.mxu0 }
 0x2bf   :  { %3335 = vmax.xlane.f32.xlu0 %v3334_v23 }
 0x2c0   :  { %v12428_v38 = vpop.permute.xlu2 %4622  ;;  %v12430_v23 = vpop.permute.xlu1 %4650 }
 0x2c1   :  { %15549 = vst [vmem:[#allocation99_spill] sm:$0xff] %v12428_v38  ;;  %v3349_v38 = vsel %vm1305_vm1, %v12434_v25, -inf }
 0x2c2   :  { %15550 = vst [vmem:[#allocation110_spill] sm:$0xff] %v12430_v23  ;;  %v2867_v50 = vpop.f32.mrf.mxu0 }
 0x2c8   :  { %v12444_v23 = vpop.permute.xlu2 %4652 }
 0x2c9   :  { %v12420_v35 = vpop.f32.mrf.mxu3  ;;  %15552 = vst [vmem:[#allocation131_spill] sm:$0xff] %v12444_v23  ;;  %v2895_v23 = vpop.f32.mrf.mxu1 }
 0x2ca   :  { %15546 = vst [vmem:[#allocation102_spill] sm:$0xff] %v12420_v35  ;;  %v12468_v22 = vmul.f32 0.5, %v2895_v23 }
 0x2d1   :  { %v2503_v10 = vpop.f32.mrf.mxu3  ;;  %v3007_v19 = vpop.f32.mrf.mxu1 }
 0x2d2   :  { %v12426_v62 = vmul.f32 0.5, %v2503_v10 }
 0x2d4   :  { %v3331_v36 = vsel %vm1305_vm1, %v12426_v62, -inf }
 0x2d5   :  { %3332 = vmax.xlane.f32.xlu1 %v3331_v36  ;;  %v12446_v36 = vpop.permute.xlu1 %4680 }
 0x2d6   :  { %15553 = vst [vmem:[#allocation132_spill] sm:$0xff] %v12446_v36  ;;  %v12470_v36 = vmul.f32 0.5, %v2699_v29 }
 0x2d9   :  { %v2615_v35 = vpop.f32.mrf.mxu3 }
 0x2da   :  { %v12436_v28 = vmul.f32 0.5, %v2615_v35  ;;  %v12450_v35 = vmul.f32 0.5, %v2783_v39  ;;  %v12462_v39 = vpop.permute.xlu2 %4706 }
 0x2db   :  { %15555 = vst [vmem:[#allocation134_spill] sm:$0xff] %v12462_v39 }
 0x2dc   :  { %v3343_v10 = vsel %vm1305_vm1, %v12436_v28, -inf }
 0x2dd   :  { %3344 = vmax.xlane.f32.xlu0 %v3343_v10  ;;  %3350 = vmax.xlane.f32.xlu1 %v3349_v38  ;;  %v12458_v10 = vpop.permute.xlu0 %4708  ;;  %v3361_v38 = vsel %vm1305_vm1, %v12450_v35, -inf  ;;  %v12466_v52 = vpop.permute.xlu1 %4734 }
 0x2de   :  { %15554 = vst [vmem:[#allocation133_spill] sm:$0xff] %v12458_v10  ;;  %v2811_v10 = vpop.f32.mrf.mxu2 }
 0x2df   :  { %15556 = vst [vmem:[#allocation135_spill] sm:$0xff] %v12466_v52  ;;  %v12480_v23 = vmul.f32 0.5, %v2811_v10  ;;  %v12484_v52 = vmul.f32 0.5, %v2867_v50  ;;  %v12498_v10 = vmul.f32 0.5, %v3007_v19 }
 0x2e1   :  { %v2727_v48 = vpop.f32.mrf.mxu3 }
 0x2e2   :  { %v12452_v32 = vmul.f32 0.5, %v2727_v48  ;;  %v12464_v48 = vmul.f32 0.5, %v2755_v15  ;;  %v3352_v15 = vsel %vm1305_vm1, %v12470_v36, -inf  ;;  %v12486_v39 = vpop.permute.xlu2 %4736 }
 0x2e3   :  { %15558 = vst [vmem:[#allocation137_spill] sm:$0xff] %v12486_v39 }
 0x2e4   :  { %v3355_v33 = vsel %vm1305_vm1, %v12452_v32, -inf }
 0x2e5   :  { %3356 = vmax.xlane.f32.xlu2 %v3355_v33  ;;  %3341 = vmax.xlane.f32.xlu1 %v3340_v45  ;;  %v3358_v33 = vsel %vm1305_vm1, %v12464_v48, -inf  ;;  %v3373_v45 = vsel %vm1305_vm1, %v12468_v22, -inf  ;;  %v12488_v46 = vpop.permute.xlu1 %4764 }
 0x2e6   :  { %3362 = vmax.xlane.f32.xlu0 %v3361_v38  ;;  %v12478_v38 = vpop.permute.xlu0 %4762  ;;  %15559 = vst [vmem:[#allocation138_spill] sm:$0xff] %v12488_v46  ;;  %v2923_v39 = vpop.f32.mrf.mxu2 }
 0x2e7   :  { %15557 = vst [vmem:[#allocation136_spill] sm:$0xff] %v12478_v38 }
 0x2e9   :  { %v2839_v34 = vpop.f32.mrf.mxu3 }
 0x2ea   :  { %v12482_v29 = vmul.f32 0.5, %v2839_v34  ;;  %v3370_v34 = vsel %vm1305_vm1, %v12484_v52, -inf  ;;  %v12504_v26 = vpop.permute.xlu2 %4790 }
 0x2eb   :  { %15561 = vst [vmem:[#allocation140_spill] sm:$0xff] %v12504_v26 }
 0x2ed   :  { %3359 = vmax.xlane.f32.xlu1 %v3358_v33  ;;  %3374 = vmax.xlane.f32.xlu2 %v3373_v45  ;;  %v3367_v33 = vsel %vm1305_vm1, %v12482_v29, -inf  ;;  %v3364_v45 = vsel %vm1305_vm1, %v12480_v23, -inf  ;;  %v12506_v7 = vpop.permute.xlu1 %4818 }
 0x2ee   :  { %3353 = vmax.xlane.f32.xlu0 %v3352_v15  ;;  %v2979_v15 = vpop.f32.mrf.mxu0  ;;  %v12500_v38 = vpop.permute.xlu0 %4792  ;;  %15562 = vst [vmem:[#allocation141_spill] sm:$0xff] %v12506_v7 }
 0x2ef   :  { %v12496_v50 = vmul.f32 0.5, %v2979_v15  ;;  %15560 = vst [vmem:[#allocation139_spill] sm:$0xff] %v12500_v38  ;;  %v3035_v7 = vpop.f32.mrf.mxu2 }
 0x2f1   :  { %v2951_v27 = vpop.f32.mrf.mxu3 }
 0x2f2   :  { %v12502_v46 = vmul.f32 0.5, %v2951_v27  ;;  %v12514_v27 = vmul.f32 0.5, %v2923_v39  ;;  %v12526_v2 = vpop.permute.xlu2 %4820 }
 0x2f3   :  { %15564 = vst [vmem:[#allocation143_spill] sm:$0xff] %v12526_v2 }
 0x2f4   :  { %v3379_v19 = vsel %vm1305_vm1, %v12502_v46, -inf  ;;  %v3376_v40 = vsel %vm1305_vm1, %v12514_v27, -inf }
 0x2f5   :  { %3368 = vmax.xlane.f32.xlu1 %v3367_v33  ;;  %3365 = vmax.xlane.f32.xlu2 %v3364_v45  ;;  %v3382_v33 = vsel %vm1305_vm1, %v12496_v50, -inf  ;;  %v3385_v45 = vsel %vm1305_vm1, %v12498_v10, -inf }
 0x2f6   :  { %3371 = vmax.xlane.f32.xlu0 %v3370_v34  ;;  %v3119_v34 = vpop.f32.mrf.mxu1  ;;  %v12520_v20 = vpop.permute.xlu0 %4846 }
 0x2f7   :  { %v12518_v26 = vmul.f32 0.5, %v3119_v34  ;;  %15563 = vst [vmem:[#allocation142_spill] sm:$0xff] %v12520_v20  ;;  %v3091_v41 = vpop.f32.mrf.mxu0 }
 0x2f8   :  { %v12532_v34 = vmul.f32 0.5, %v3091_v41 }
 0x2f9   :  { %v3063_v15 = vpop.f32.mrf.mxu3  ;;  %v3397_v39 = vsel %vm1305_vm1, %v12518_v26, -inf }
 0x2fa   :  { %v12516_v38 = vmul.f32 0.5, %v3063_v15  ;;  %v3394_v51 = vsel %vm1305_vm1, %v12532_v34, -inf }
 0x2fc   :  { %v3391_v24 = vsel %vm1305_vm1, %v12516_v38, -inf }
 0x2fd   :  { %3383 = vmax.xlane.f32.xlu2 %v3382_v33  ;;  %3386 = vmax.xlane.f32.xlu1 %v3385_v45  ;;  %v12530_v45 = vpop.permute.xlu1 %4848 }
 0x2fe   :  { %3380 = vmax.xlane.f32.xlu0 %v3379_v19  ;;  %v3231_v33 = vpop.f32.mrf.mxu1  ;;  %15565 = vst [vmem:[#allocation144_spill] sm:$0xff] %v12530_v45  ;;  %v12536_v19 = vmul.f32 0.5, %v3035_v7  ;;  %v12542_v2 = vpop.permute.xlu0 %4876 }
 0x2ff   :  { %v12534_v15 = vmul.f32 0.5, %v3231_v33  ;;  %15566 = vst [vmem:[#allocation145_spill] sm:$0xff] %v12542_v2  ;;  %v3203_v41 = vpop.f32.mrf.mxu0  ;;  %v12546_v33 = vpop.permute.xlu2 %4874 }
 0x300   :  { %15567 = vst [vmem:[#allocation146_spill] sm:$0xff] %v12546_v33  ;;  %v12552_v43 = vmul.f32 0.5, %v3203_v41 }
 0x301   :  { %v3175_v20 = vpop.f32.mrf.mxu3 }
 0x302   :  { %v12550_v45 = vmul.f32 0.5, %v3175_v20 }
 0x304   :  { %v3403_v2 = vsel %vm1305_vm1, %v12550_v45, -inf }
 0x305   :  { %3392 = vmax.xlane.f32.xlu2 %v3391_v24  ;;  %3377 = vmax.xlane.f32.xlu1 %v3376_v40  ;;  %v3409_v24 = vsel %vm1305_vm1, %v12534_v15, -inf  ;;  %v3147_v40 = vpop.f32.mrf.mxu2  ;;  %v12554_v42 = vpop.permute.xlu1 %4902 }
 0x306   :  { %3398 = vmax.xlane.f32.xlu0 %v3397_v39  ;;  %v3388_v39 = vsel %vm1305_vm1, %v12536_v19, -inf  ;;  %v12548_v7 = vmul.f32 0.5, %v3147_v40  ;;  %15568 = vst [vmem:[#allocation147_spill] sm:$0xff] %v12554_v42  ;;  %v12562_v20 = vpop.permute.xlu0 %4930 }
 0x307   :  { %15569 = vst [vmem:[#allocation148_spill] sm:$0xff] %v12562_v20  ;;  %v12568_v33 = vpop.permute.xlu2 %4904  ;;  %v15577_v20 = vld [vmem:[#allocation38_spill] sm:$0xff] }
 0x308   :  { %15570 = vst [vmem:[#allocation149_spill] sm:$0xff] %v12568_v33  ;;  %v15579_v33 = vld [vmem:[#allocation52_spill] sm:$0xff] }
 0x309   :  { %v3287_v4 = vpop.f32.mrf.mxu3 }
 0x30a   :  { %v12564_v40 = vmul.f32 0.5, %v3287_v4 }
 0x30c   :  { %v3415_v47 = vsel %vm1305_vm1, %v12564_v40, -inf }
 0x30d   :  { %3395 = vmax.xlane.f32.xlu1 %v3394_v51  ;;  %3410 = vmax.xlane.f32.xlu2 %v3409_v24  ;;  %v3400_v51 = vsel %vm1305_vm1, %v12548_v7, -inf  ;;  %v3259_v24 = vpop.f32.mrf.mxu2  ;;  %v12570_v42 = vpop.permute.xlu1 %4932 }
 0x30e   :  { %3389 = vmax.xlane.f32.xlu0 %v3388_v39  ;;  %v3406_v39 = vsel %vm1305_vm1, %v12552_v43, -inf  ;;  %v12566_v41 = vmul.f32 0.5, %v3259_v24  ;;  %15571 = vst [vmem:[#allocation150_spill] sm:$0xff] %v12570_v42 }
 0x310   :  { %v3412_v3 = vsel %vm1305_vm1, %v12566_v41, -inf }
 0x315   :  { %3404 = vmax.xlane.f32.xlu1 %v3403_v2  ;;  %3401 = vmax.xlane.f32.xlu2 %v3400_v51  ;;  %v12576_v2 = vpop.permute.xlu0 %4960  ;;  %v12578_v51 = vpop.permute.xlu2 %4958 }
 0x316   :  { %3407 = vmax.xlane.f32.xlu0 %v3406_v39  ;;  %15572 = vst [vmem:[#allocation151_spill] sm:$0xff] %v12576_v2  ;;  %v12580_v4 = vpop.permute.xlu1 %4986 }
 0x317   :  { %15573 = vst [vmem:[#allocation152_spill] sm:$0xff] %v12578_v51  ;;  %v15582_v51 = vld [vmem:[#allocation42_spill] sm:$0xff] }
 0x318   :  { %15574 = vst [vmem:[#allocation153_spill] sm:$0xff] %v12580_v4 }
 0x31d   :  { %3413 = vmax.xlane.f32.xlu1 %v3412_v3  ;;  %v12582_v24 = vpop.permute.xlu0 %5014  ;;  %v12584_v39 = vpop.permute.xlu2 %4988 }
 0x31e   :  { %3416 = vmax.xlane.f32.xlu0 %v3415_v47  ;;  %15575 = vst [vmem:[#allocation154_spill] sm:$0xff] %v12582_v24  ;;  %v12588_v42 = vpop.permute.xlu1 %5016  ;;  %v15581_v47 = vld [vmem:[#allocation54_spill] sm:$0xff]  ;;  %v15585_v24 = vld [vmem:[#allocation47_spill] sm:$0xff] }
 0x31f   :  { %15576 = vst [vmem:[#allocation155_spill] sm:$0xff] %v12584_v39 }
 0x320   :  { %15578 = vst [vmem:[#allocation156_spill] sm:$0xff] %v12588_v42 }
 0x325   :  { %v12592_v3 = vpop.permute.xlu0 %5044  ;;  %v12598_v2 = vpop.permute.xlu2 %5042 }
 0x326   :  { %15580 = vst [vmem:[#allocation157_spill] sm:$0xff] %v12592_v3  ;;  %v12600_v4 = vpop.permute.xlu1 %5070 }
 0x327   :  { %15583 = vst [vmem:[#allocation158_spill] sm:$0xff] %v12598_v2 }
 0x328   :  { %15584 = vst [vmem:[#allocation159_spill] sm:$0xff] %v12600_v4  ;;  %v15592_v4 = vld [vmem:[#allocation61_spill] sm:$0xff] }
 0x32d   :  { %5156 = vrot.lane.b32.xlu2 %v15577_v20, %s10430_s8  ;;  %v15586_v20 = vld [vmem:[#allocation48_spill] sm:$0xff]  ;;  %v12608_v3 = vpop.permute.xlu0 %5098  ;;  %v12610_v39 = vpop.permute.xlu2 %5072 }
 0x32e   :  { %15588 = vst [vmem:[#allocation160_spill] sm:$0xff] %v12608_v3 }
 0x32f   :  { %15589 = vst [vmem:[#allocation161_spill] sm:$0xff] %v12610_v39  ;;  %v15598_v39 = vld [vmem:[#allocation55_spill] sm:$0xff] }
 0x332   :  { %5182 = vrot.lane.b32.xlu0 %v15579_v33, %s10430_s8  ;;  %v15587_v33 = vld [vmem:[#allocation60_spill] sm:$0xff] }
 0x335   :  { %5210 = vrot.lane.b32.xlu2 %v15581_v47, %s10430_s8  ;;  %v15590_v47 = vld [vmem:[#allocation58_spill] sm:$0xff]  ;;  %v12620_v2 = vpop.permute.xlu0 %5128 }
 0x336   :  { %5184 = vrot.lane.b32.xlu1 %v15582_v51, %s10430_s8  ;;  %v12614_v51 = vpop.permute.xlu1 %5100  ;;  %15594 = vst [vmem:[#allocation163_spill] sm:$0xff] %v12620_v2  ;;  %v15601_v2 = vld [vmem:[#allocation63_spill] sm:$0xff] }
 0x337   :  { %15591 = vst [vmem:[#allocation162_spill] sm:$0xff] %v12614_v51 }
 0x33a   :  { %5212 = vrot.lane.b32.xlu0 %v15585_v24, %s10430_s8  ;;  %v15593_v24 = vld [vmem:[#allocation45_spill] sm:$0xff] }
 0x33d   :  { %5240 = vrot.lane.b32.xlu2 %v15586_v20, %s10430_s8  ;;  %v15595_v20 = vld [vmem:[#allocation50_spill] sm:$0xff]  ;;  %v3327_v51 = vpop.xlane.xlu0 %3326 }
 0x33e   :  { %5238 = vrot.lane.b32.xlu1 %v15587_v33, %s10430_s8  ;;  %v12624_v33 = vpop.permute.xlu2 %5126  ;;  %v12626_v3 = vpop.permute.xlu1 %5154  ;;  %v3419_v18 = vsub.f32 %v12392_v60, %v3327_v51 }
 0x33f   :  { %15596 = vst [vmem:[#allocation164_spill] sm:$0xff] %v12624_v33 }
 0x340   :  { %15597 = vst [vmem:[#allocation165_spill] sm:$0xff] %v12626_v3  ;;  %v3452_v1 = vmul.f32 1.442695, %v3419_v18 }
 0x342   :  { %5266 = vrot.lane.b32.xlu0 %v15590_v47, %s10430_s8  ;;  %v15599_v47 = vld [vmem:[#allocation62_spill] sm:$0xff] }
 0x345   :  { %5294 = vrot.lane.b32.xlu2 %v15592_v4, %s10430_s8  ;;  %v15600_v4 = vld [vmem:[#allocation64_spill] sm:$0xff]  ;;  %v3336_v33 = vpop.xlane.xlu0 %3335 }
 0x346   :  { %5268 = vrot.lane.b32.xlu1 %v15593_v24, %s10430_s8  ;;  %v3339_v24 = vpop.xlane.xlu2 %3338 }
 0x34a   :  { %5296 = vrot.lane.b32.xlu0 %v15595_v20, %s10430_s8  ;;  %v3324_v20 = vpop.xlane.xlu1 %3323 }
 0x34b   :  { %v3418_v61 = vsub.f32 %v12348_v0, %v3324_v20 }
 0x34d   :  { %5324 = vrot.lane.b32.xlu2 %v15598_v39, %s10430_s8  ;;  %v3450_v13 = vmul.f32 1.442695, %v3418_v61 }
 0x34e   :  { %5322 = vrot.lane.b32.xlu1 %v15599_v47, %s10430_s8  ;;  %v3330_v3 = vpop.xlane.xlu2 %3329  ;;  %v3423_v47 = vsub.f32 %v12362_v30, %v3339_v24  ;;  %v3422_v30 = vsub.f32 %v12404_v14, %v3336_v33 }
 0x350   :  { %v3345_v49 = vpop.xlane.xlu0 %3344 }
 0x352   :  { %5350 = vrot.lane.b32.xlu0 %v15600_v4, %s10430_s8  ;;  %v3333_v42 = vpop.xlane.xlu1 %3332  ;;  %v3460_v4 = vmul.f32 1.442695, %v3423_v47 }
 0x353   :  { %v3421_v55 = vsub.f32 %v12426_v62, %v3333_v42 }
 0x354   :  { %10045 = vpow2.f32 %v3460_v4 }
 0x355   :  { %5378 = vrot.lane.b32.xlu2 %v15601_v2, %s10430_s8  ;;  %10047 = vpow2.f32 %v3450_v13  ;;  %v3456_v0 = vmul.f32 1.442695, %v3421_v55 }
 0x356   :  { %5352 = vrot.lane.b32.xlu1 %v15380_v58, %s10430_s8  ;;  %v3348_v39 = vpop.xlane.xlu2 %3347  ;;  %v3420_v58 = vsub.f32 %v12372_v59, %v3330_v3  ;;  %10049 = vpow2.f32 %v3452_v1  ;;  %v3458_v59 = vmul.f32 1.442695, %v3422_v30 }
 0x357   :  { %v3426_v61 = vsub.f32 %v12382_v53, %v3348_v39 }
 0x358   :  { %v3454_v8 = vmul.f32 1.442695, %v3420_v58 }
 0x359   :  { %v3363_v56 = vpop.xlane.xlu0 %3362  ;;  %v3466_v62 = vmul.f32 1.442695, %v3426_v61 }
 0x35a   :  { %v3351_v21 = vpop.xlane.xlu1 %3350  ;;  %v12644_v24 = vpop.eup %10045  ;;  %10051 = vpow2.f32 %v3454_v8  ;;  %v3425_v8 = vsub.f32 %v12436_v28, %v3345_v49 }
 0x35b   :  { %v12648_v60 = vpop.eup %10047  ;;  %v3529_v13 = vsel %vm1305_vm1, %v12644_v24, 0.0  ;;  %10053 = vpow2.f32 %v3456_v0  ;;  %v3427_v58 = vsub.f32 %v12434_v25, %v3351_v21  ;;  %v3431_v0 = vsub.f32 %v12450_v35, %v3363_v56 }
 0x35c   :  { %v12653_v42 = vpop.eup %10049  ;;  %v3514_v1 = vsel %vm1305_vm1, %v12648_v60, 0.0  ;;  %10055 = vpow2.f32 %v3458_v59  ;;  %v3464_v25 = vmul.f32 1.442695, %v3425_v8 }
 0x35d   :  { %v3517_v53 = vsel %vm1305_vm1, %v12653_v42, 0.0  ;;  %v3468_v33 = vmul.f32 1.442695, %v3427_v58  ;;  %10057 = vpow2.f32 %v3466_v62 }
 0x35e   :  { %v3357_v2 = vpop.xlane.xlu2 %3356 }
 0x35f   :  { %v3429_v21 = vsub.f32 %v12452_v32, %v3357_v2  ;;  %10059 = vpow2.f32 %v3468_v33 }
 0x360   :  { %v12661_v55 = vpop.eup %10051  ;;  %10061 = vpow2.f32 %v3464_v25 }
 0x361   :  { %v12646_v20 = vpop.xlane.xlu0 %3353  ;;  %v12663_v51 = vpop.eup %10053  ;;  %v3520_v39 = vsel %vm1305_vm1, %v12661_v55, 0.0  ;;  %v3472_v30 = vmul.f32 1.442695, %v3429_v21 }
 0x362   :  { %v3342_v37 = vpop.xlane.xlu1 %3341  ;;  %v12668_v3 = vpop.eup %10055  ;;  %v3523_v47 = vsel %vm1305_vm1, %v12663_v51, 0.0  ;;  %v3428_v8 = vsub.f32 %v12470_v36, %v12646_v20 }
 0x363   :  { %v3424_v28 = vsub.f32 %v12448_v12, %v3342_v37  ;;  %v3526_v2 = vsel %vm1305_vm1, %v12668_v3, 0.0  ;;  %v12676_v61 = vpop.eup %10057  ;;  %10063 = vpow2.f32 %v3472_v30  ;;  %v3476_v37 = vmul.f32 1.442695, %v3431_v0 }
 0x364   :  { %v3538_v58 = vsel %vm1305_vm1, %v12676_v61, 0.0  ;;  %v3470_v21 = vmul.f32 1.442695, %v3428_v8 }
 0x365   :  { %v3462_v59 = vmul.f32 1.442695, %v3424_v28 }
 0x366   :  { %v3375_v18 = vpop.xlane.xlu2 %3374 }
 0x367   :  { %v3435_v12 = vsub.f32 %v12468_v22, %v3375_v18  ;;  %10065 = vpow2.f32 %v3462_v59 }
 0x368   :  { %10067 = vpow2.f32 %v3476_v37 }
 0x369   :  { %v3372_v4 = vpop.xlane.xlu0 %3371 }
 0x36a   :  { %v3360_v14 = vpop.xlane.xlu1 %3359  ;;  %v3434_v30 = vsub.f32 %v12484_v52, %v3372_v4 }
 0x36b   :  { %v3430_v56 = vsub.f32 %v12464_v48, %v3360_v14 }
 0x36d   :  { %v3474_v25 = vmul.f32 1.442695, %v3430_v56 }
 0x36e   :  { %v3366_v49 = vpop.xlane.xlu2 %3365 }
 0x371   :  { %v3381_v35 = vpop.xlane.xlu0 %3380 }
 0x372   :  { %v3369_v32 = vpop.xlane.xlu1 %3368  ;;  %v3437_v8 = vsub.f32 %v12502_v46, %v3381_v35 }
 0x373   :  { %v3433_v28 = vsub.f32 %v12482_v29, %v3369_v32  ;;  %v3482_v29 = vmul.f32 1.442695, %v3434_v30 }
 0x375   :  { %v3480_v59 = vmul.f32 1.442695, %v3433_v28 }
 0x376   :  { %v3384_v22 = vpop.xlane.xlu2 %3383 }
 0x377   :  { %v3438_v32 = vsub.f32 %v12496_v50, %v3384_v22 }
 0x37a   :  { %v3387_v48 = vpop.xlane.xlu1 %3386 }
 0x37b   :  { %v3439_v56 = vsub.f32 %v12498_v10, %v3387_v48  ;;  %v3488_v10 = vmul.f32 1.442695, %v3437_v8 }
 0x37c   :  { %3530 = vadd.xlane.f32.xlu0 %v3529_v13  ;;  %v12678_v13 = vpop.eup %10059 }
 0x37d   :  { %v3541_v62 = vsel %vm1305_vm1, %v12678_v13, 0.0 }
 0x37e   :  { %3515 = vadd.xlane.f32.xlu2 %v3514_v1  ;;  %v12683_v1 = vpop.eup %10061  ;;  %v3393_v37 = vpop.xlane.xlu2 %3392 }
 0x37f   :  { %v3535_v18 = vsel %vm1305_vm1, %v12683_v1, 0.0  ;;  %v12692_v33 = vpop.eup %10063  ;;  %v3441_v48 = vsub.f32 %v12516_v38, %v3393_v37 }
 0x380   :  { %3518 = vadd.xlane.f32.xlu1 %v3517_v53  ;;  %v3484_v53 = vmul.f32 1.442695, %v3435_v12  ;;  %v12694_v14 = vpop.eup %10065  ;;  %v3547_v36 = vsel %vm1305_vm1, %v12692_v33, 0.0 }
 0x381   :  { %v12699_v20 = vpop.eup %10067  ;;  %v3496_v30 = vmul.f32 1.442695, %v3441_v48 }
 0x382   :  { %10069 = vpow2.f32 %v3484_v53  ;;  %v3490_v53 = vmul.f32 1.442695, %v3438_v32 }
 0x383   :  { %10071 = vpow2.f32 %v3474_v25 }
 0x384   :  { %3521 = vadd.xlane.f32.xlu0 %v3520_v39  ;;  %v3432_v39 = vsub.f32 %v12480_v23, %v3366_v49  ;;  %10073 = vpow2.f32 %v3470_v21  ;;  %v3553_v23 = vsel %vm1305_vm1, %v12699_v20, 0.0 }
 0x386   :  { %3524 = vadd.xlane.f32.xlu2 %v3523_v47  ;;  %v3532_v47 = vsel %vm1305_vm1, %v12694_v14, 0.0  ;;  %v3478_v0 = vmul.f32 1.442695, %v3432_v39  ;;  %v3411_v39 = vpop.xlane.xlu2 %3410 }
 0x388   :  { %3527 = vadd.xlane.f32.xlu1 %v3526_v2  ;;  %v3399_v2 = vpop.xlane.xlu0 %3398  ;;  %v12707_v49 = vpop.eup %10069  ;;  %10075 = vpow2.f32 %v3478_v0 }
 0x389   :  { %v12709_v12 = vpop.eup %10071  ;;  %v3565_v52 = vsel %vm1305_vm1, %v12707_v49, 0.0  ;;  %10077 = vpow2.f32 %v3480_v59  ;;  %v3443_v0 = vsub.f32 %v12518_v26, %v3399_v2 }
 0x38a   :  { %v12714_v4 = vpop.eup %10073  ;;  %10079 = vpow2.f32 %v3482_v29  ;;  %v3447_v29 = vsub.f32 %v12534_v15, %v3411_v39 }
 0x38b   :  { %v3544_v50 = vsel %vm1305_vm1, %v12714_v4, 0.0  ;;  %10081 = vpow2.f32 %v3490_v53 }
 0x38c   :  { %3539 = vadd.xlane.f32.xlu0 %v3538_v58  ;;  %v3378_v58 = vpop.xlane.xlu1 %3377  ;;  %v3508_v8 = vmul.f32 1.442695, %v3447_v29 }
 0x38e   :  { %3542 = vadd.xlane.f32.xlu2 %v3541_v62  ;;  %v3550_v62 = vsel %vm1305_vm1, %v12709_v12, 0.0  ;;  %v12722_v22 = vpop.eup %10075  ;;  %v3402_v2 = vpop.xlane.xlu2 %3401 }
 0x38f   :  { %v12724_v21 = vpop.eup %10077  ;;  %v3556_v46 = vsel %vm1305_vm1, %v12722_v22, 0.0  ;;  %v3444_v48 = vsub.f32 %v12548_v7, %v3402_v2 }
 0x390   :  { %3536 = vadd.xlane.f32.xlu1 %v3535_v18  ;;  %v3492_v18 = vmul.f32 1.442695, %v3439_v56  ;;  %v3390_v25 = vpop.xlane.xlu0 %3389  ;;  %v12729_v35 = vpop.eup %10079 }
 0x391   :  { %v3562_v38 = vsel %vm1305_vm1, %v12729_v35, 0.0  ;;  %v3502_v7 = vmul.f32 1.442695, %v3444_v48 }
 0x392   :  { %10083 = vpow2.f32 %v3492_v18 }
 0x393   :  { %10085 = vpow2.f32 %v3488_v10 }
 0x394   :  { %3548 = vadd.xlane.f32.xlu0 %v3547_v36  ;;  %v3436_v36 = vsub.f32 %v12514_v27, %v3378_v58  ;;  %v3396_v28 = vpop.xlane.xlu1 %3395  ;;  %10087 = vpow2.f32 %v3496_v30  ;;  %v3500_v27 = vmul.f32 1.442695, %v3443_v0 }
 0x395   :  { %v3442_v26 = vsub.f32 %v12532_v34, %v3396_v28 }
 0x396   :  { %3533 = vadd.xlane.f32.xlu2 %v3532_v47  ;;  %v3559_v47 = vsel %vm1305_vm1, %v12724_v21, 0.0  ;;  %v3486_v59 = vmul.f32 1.442695, %v3436_v36  ;;  %v12766_v28 = vpop.permute.xlu2 %5156 }
 0x397   :  { %v3498_v18 = vmul.f32 1.442695, %v3442_v26 }
 0x398   :  { %3554 = vadd.xlane.f32.xlu1 %v3553_v23  ;;  %v12737_v23 = vpop.eup %10081  ;;  %v3408_v32 = vpop.xlane.xlu0 %3407  ;;  %10089 = vpow2.f32 %v3486_v59 }
 0x399   :  { %v12739_v37 = vpop.eup %10083  ;;  %v3574_v58 = vsel %vm1305_vm1, %v12737_v23, 0.0  ;;  %10091 = vpow2.f32 %v3500_v27 }
 0x39a   :  { %v3577_v56 = vsel %vm1305_vm1, %v12739_v37, 0.0  ;;  %10093 = vpow2.f32 %v3508_v8 }
 0x39b   :  { %10095 = vpow2.f32 %v3498_v18 }
 0x39c   :  { %3566 = vadd.xlane.f32.xlu0 %v3565_v52  ;;  %v12744_v52 = vpop.eup %10085  ;;  %v3405_v15 = vpop.xlane.xlu1 %3404 }
 0x39d   :  { %v3571_v53 = vsel %vm1305_vm1, %v12744_v52, 0.0 }
 0x39e   :  { %3551 = vadd.xlane.f32.xlu2 %v3550_v62  ;;  %v3440_v62 = vsub.f32 %v12536_v19, %v3390_v25  ;;  %v3445_v25 = vsub.f32 %v12550_v45, %v3405_v15 }
 0x3a0   :  { %3545 = vadd.xlane.f32.xlu1 %v3544_v50  ;;  %v12752_v50 = vpop.eup %10087  ;;  %v3494_v34 = vmul.f32 1.442695, %v3440_v62 }
 0x3a1   :  { %v12754_v10 = vpop.eup %10089  ;;  %v3583_v39 = vsel %vm1305_vm1, %v12752_v50, 0.0 }
 0x3a2   :  { %v12759_v19 = vpop.eup %10091  ;;  %v3568_v36 = vsel %vm1305_vm1, %v12754_v10, 0.0  ;;  %10097 = vpow2.f32 %v3494_v34 }
 0x3a3   :  { %v3589_v30 = vsel %vm1305_vm1, %v12759_v19, 0.0  ;;  %v12771_v0 = vpop.eup %10093  ;;  %10099 = vpow2.f32 %v3502_v7 }
 0x3a4   :  { %3557 = vadd.xlane.f32.xlu0 %v3556_v46  ;;  %v12762_v46 = vpop.xlane.xlu0 %3416  ;;  %v3414_v45 = vpop.xlane.xlu1 %3413  ;;  %v3601_v29 = vsel %vm1305_vm1, %v12771_v0, 0.0 }
 0x3a5   :  { %v12773_v59 = vpop.eup %10095 }
 0x3a6   :  { %3560 = vadd.xlane.f32.xlu2 %v3559_v47  ;;  %v3446_v47 = vsub.f32 %v12552_v43, %v3408_v32  ;;  %v3448_v43 = vsub.f32 %v12566_v41, %v3414_v45  ;;  %v3586_v32 = vsel %vm1305_vm1, %v12773_v59, 0.0 }
 0x3a8   :  { %3563 = vadd.xlane.f32.xlu1 %v3562_v38  ;;  %v3504_v38 = vmul.f32 1.442695, %v3445_v25  ;;  %v3506_v27 = vmul.f32 1.442695, %v3446_v47  ;;  %v3510_v8 = vmul.f32 1.442695, %v3448_v43 }
 0x3aa   :  { %10101 = vpow2.f32 %v3504_v38 }
 0x3ab   :  { %10103 = vpow2.f32 %v3506_v27  ;;  %v15604_v27 = vld [vmem:[#allocation56_spill] sm:$0xff] }
 0x3ac   :  { %3575 = vadd.xlane.f32.xlu0 %v3574_v58  ;;  %v12777_v58 = vpop.eup %10097  ;;  %v12782_v26 = vpop.permute.xlu0 %5182  ;;  %10105 = vpow2.f32 %v3510_v8 }
 0x3ad   :  { %15602 = vst [vmem:[#allocation166_spill] sm:$0xff] %v12782_v26  ;;  %v3580_v2 = vsel %vm1305_vm1, %v12777_v58, 0.0  ;;  %v12788_v62 = vpop.eup %10099  ;;  %v12792_v41 = vpop.permute.xlu1 %5184 }
 0x3ae   :  { %3578 = vadd.xlane.f32.xlu2 %v3577_v56  ;;  %v12786_v56 = vpop.permute.xlu2 %5210 }
 0x3b0   :  { %3572 = vadd.xlane.f32.xlu1 %v3571_v53  ;;  %v12790_v15 = vpop.eup %10101  ;;  %v3592_v53 = vsel %vm1305_vm1, %v12788_v62, 0.0 }
 0x3b1   :  { %v12796_v18 = vpop.eup %10103  ;;  %v3595_v34 = vsel %vm1305_vm1, %v12790_v15, 0.0 }
 0x3b2   :  { %v3598_v48 = vsel %vm1305_vm1, %v12796_v18, 0.0 }
 0x3b4   :  { %3584 = vadd.xlane.f32.xlu0 %v3583_v39  ;;  %v12802_v39 = vpop.permute.xlu0 %5212 }
 0x3b5   :  { %v12808_v47 = vpop.permute.xlu1 %5238 }
 0x3b6   :  { %3569 = vadd.xlane.f32.xlu2 %v3568_v36  ;;  %v12804_v25 = vpop.permute.xlu2 %5240  ;;  %v12806_v36 = vpop.eup %10105 }
 0x3b7   :  { %v3604_v7 = vsel %vm1305_vm1, %v12806_v36, 0.0 }
 0x3b8   :  { %3590 = vadd.xlane.f32.xlu1 %v3589_v30 }
 0x3bc   :  { %3602 = vadd.xlane.f32.xlu0 %v3601_v29  ;;  %v12812_v30 = vpop.permute.xlu0 %5266 }
 0x3bd   :  { %v12816_v45 = vpop.permute.xlu1 %5268 }
 0x3be   :  { %3587 = vadd.xlane.f32.xlu2 %v3586_v32  ;;  %v12814_v38 = vpop.permute.xlu2 %5294  ;;  %v15605_v32 = vld [vmem:[#allocation118_spill] sm:$0xff] }
 0x3bf   :  { %15603 = vst [vmem:[#allocation167_spill] sm:$0xff] %v12814_v38 }
 0x3c0   :  { %3581 = vadd.xlane.f32.xlu1 %v3580_v2 }
 0x3c4   :  { %3593 = vadd.xlane.f32.xlu0 %v3592_v53  ;;  %v12820_v29 = vpop.permute.xlu0 %5296  ;;  %v15606_v53 = vld [vmem:[#allocation57_spill] sm:$0xff] }
 0x3c5   :  { %v12826_v2 = vpop.permute.xlu1 %5322 }
 0x3c6   :  { %3596 = vadd.xlane.f32.xlu2 %v3595_v34  ;;  %v12822_v43 = vpop.permute.xlu2 %5324 }
 0x3c8   :  { %3599 = vadd.xlane.f32.xlu1 %v3598_v48 }
 0x3cc   :  { %v12830_v8 = vpop.permute.xlu0 %5350 }
 0x3cd   :  { %v12838_v48 = vpop.permute.xlu1 %5352 }
 0x3ce   :  { %3605 = vadd.xlane.f32.xlu2 %v3604_v7  ;;  %v12834_v34 = vpop.permute.xlu2 %5378  ;;  %v15607_v7 = vld [vmem:[#allocation119_spill] sm:$0xff] }
 0x3d8   :  { %5380 = vrot.lane.b32.xlu0 %v15604_v27, %s10430_s8 }
 0x3e0   :  { %9762 = vrot.lane.b32.xlu0 %v15605_v32, %s10430_s8 }
 0x3e1   :  { %5406 = vrot.lane.b32.xlu1 %v15386_v17, %s10430_s8 }
 0x3e6   :  { %5408 = vrot.lane.b32.xlu2 %v15606_v53, %s10430_s8 }
 0x3e8   :  { %9772 = vrot.lane.b32.xlu0 %v11805_v9, %s10430_s8  ;;  %v3449_v9 = vsub.f32 %v12564_v40, %v12762_v46 }
 0x3ee   :  { %9757 = vrot.lane.b32.xlu2 %v15607_v7, %s10430_s8 }
 0x3ef   :  { %v3531_v32 = vpop.xlane.xlu0 %3530 }
 0x3f0   :  { %9787 = vrot.lane.b32.xlu0 %v11869_v54, %s10430_s8 }
 0x3f1   :  { %v3516_v17 = vpop.xlane.xlu2 %3515 }
 0x3f2   :  { %10107 = vrcp.f32 %v3516_v17  ;;  %v9694_v17 = vunpack.i.l.bf16 %v12356_v31 }
 0x3f3   :  { %v3519_v27 = vpop.xlane.xlu1 %3518 }
 0x3f4   :  { %10109 = vrcp.f32 %v3519_v27 }
 0x3f6   :  { %9777 = vrot.lane.b32.xlu2 %v12043_v44, %s10430_s8 }
 0x3f7   :  { %v3522_v53 = vpop.xlane.xlu0 %3521 }
 0x3f8   :  { %v10108_v38 = vpop.eup %10107  ;;  %10111 = vrcp.f32 %v3522_v53  ;;  %9802 = vrot.lane.b32.xlu0 %v11913_v5, %s10430_s8  ;;  %v9695_v53 = vunpack.i.h.bf16 %v12356_v31  ;;  %v3512_v5 = vmul.f32 1.442695, %v3449_v9 }
 0x3f9   :  { %10113 = vrcp.f32 %v3531_v32  ;;  %v3642_v7 = vmul.f32 %v10108_v38, %v12648_v60  ;;  %v3525_v54 = vpop.xlane.xlu2 %3524  ;;  %v9700_v38 = vunpack.i.h.bf16 %v12352_v16 }
 0x3fa   :  { %v10110_v26 = vpop.eup %10109  ;;  %10115 = vrcp.f32 %v3525_v54 }
 0x3fb   :  { %v3643_v27 = vmul.f32 %v10110_v26, %v12653_v42  ;;  %9441 = vmatmul.msk.f32.vlgmr.msra.gmra.mxu0 %vm440_vm0, %v3642_v7  ;;  %v3528_v44 = vpop.xlane.xlu1 %3527  ;;  %v9699_v26 = vunpack.i.l.bf16 %v12352_v16 }
 0x3fc   :  { %10117 = vrcp.f32 %v3528_v44  ;;  %3912 = vmatpush.msra.mxu0 %v9694_v17  ;;  %v15608_v17 = vld [vmem:[#allocation5_spill] sm:$0xff] }
 0x3fd   :  { %9442 = vmatmul.msk.f32.vlgmr.msra.gmra.mxu1 %vm440_vm0, %v3643_v27  ;;  %10119 = vpow2.f32 %v3512_v5  ;;  %v9705_v5 = vunpack.i.h.bf16 %v12360_v63 }
 0x3fe   :  { %v10112_v40 = vpop.eup %10111  ;;  %3939 = vmatpush.msra.mxu1 %v9695_v53  ;;  %9792 = vrot.lane.b32.xlu2 %v12066_v11, %s10430_s8 }
 0x3ff   :  { %v10114_v60 = vpop.eup %10113  ;;  %v3644_v54 = vmul.f32 %v10112_v40, %v12661_v55  ;;  %v3540_v46 = vpop.xlane.xlu0 %3539 }
 0x400   :  { %v10116_v42 = vpop.eup %10115  ;;  %9817 = vrot.lane.b32.xlu0 %v11961_v57, %s10430_s8  ;;  %10121 = vrcp.f32 %v3540_v46  ;;  %v3647_v55 = vmul.f32 %v10114_v60, %v12644_v24 }
 0x401   :  { %v3645_v9 = vmul.f32 %v10116_v42, %v12663_v51  ;;  %9443 = vmatmul.msk.f32.vlgmr.msra.gmra.mxu2 %vm440_vm0, %v3644_v54  ;;  %v3543_v44 = vpop.xlane.xlu2 %3542  ;;  %v9704_v51 = vunpack.i.l.bf16 %v12360_v63  ;;  %v15609_v42 = vld [vmem:[#allocation113_spill] sm:$0xff] }
 0x402   :  { %v10118_v31 = vpop.eup %10117  ;;  %3966 = vmatpush.msra.mxu2 %v9699_v26  ;;  %10123 = vrcp.f32 %v3543_v44  ;;  %v9710_v26 = vunpack.i.h.bf16 %v15609_v42  ;;  %v15610_v44 = vld [vmem:[#allocation108_spill] sm:$0xff] }
 0x403   :  { %v3646_v32 = vmul.f32 %v10118_v31, %v12668_v3  ;;  %9444 = vmatmul.msk.f32.vlgmr.msra.gmra.mxu3 %vm440_vm0, %v3645_v9  ;;  %v3537_v7 = vpop.xlane.xlu1 %3536  ;;  %v12872_v16 = vpop.eup %10119  ;;  %v9715_v31 = vunpack.i.h.bf16 %v15610_v44 }
 0x404   :  { %3993 = vmatpush.msra.mxu3 %v9700_v38  ;;  %10125 = vrcp.f32 %v3537_v7  ;;  %v3607_v40 = vsel %vm1305_vm1, %v12872_v16, 0.0  ;;  %v9714_v38 = vunpack.i.l.bf16 %v15610_v44 }
 0x405   :  { %9445 = vmatmul.msk.f32.vlgmr.msrb.gmra.mxu0 %vm440_vm0, %v3646_v32  ;;  %9446 = vmatmul.msk.f32.vlgmr.msrb.gmra.mxu1 %vm440_vm0, %v3647_v55  ;;  %v15611_v32 = vld [vmem:[#allocation71_spill] sm:$0xff] }
 0x406   :  { %4020 = vmatpush.msrb.mxu0 %v9704_v51  ;;  %4047 = vmatpush.msrb.mxu1 %v9705_v5  ;;  %v10122_v3 = vpop.eup %10121 }
 0x407   :  { %v3549_v24 = vpop.xlane.xlu0 %3548  ;;  %9807 = vrot.lane.b32.xlu2 %v12090_v6, %s10430_s8  ;;  %v3650_v60 = vmul.f32 %v10122_v3, %v12676_v61 }
 0x408   :  { %6650 = vrot.lane.b32.xlu0 %v15608_v17, %s10431_s2  ;;  %v10124_v63 = vpop.eup %10123  ;;  %10127 = vrcp.f32 %v3549_v24  ;;  %v9709_v24 = vunpack.i.l.bf16 %v15609_v42 }
 0x409   :  { %v3534_v27 = vpop.xlane.xlu2 %3533  ;;  %v3651_v9 = vmul.f32 %v10124_v63, %v12678_v13  ;;  %v15612_v13 = vld [vmem:[#allocation7_spill] sm:$0xff] }
 0x40a   :  { %v10126_v53 = vpop.eup %10125  ;;  %10129 = vrcp.f32 %v3534_v27  ;;  %v15613_v27 = vld [vmem:[#allocation114_spill] sm:$0xff] }
 0x40b   :  { %v3649_v54 = vmul.f32 %v10126_v53, %v12683_v1  ;;  %3608 = vadd.xlane.f32.xlu1 %v3607_v40  ;;  %v3555_v46 = vpop.xlane.xlu1 %3554  ;;  %v9720_v53 = vunpack.i.h.bf16 %v15613_v27  ;;  %v15614_v40 = vld [vmem:[#allocation105_spill] sm:$0xff] }
 0x40c   :  { %10131 = vrcp.f32 %v3555_v46  ;;  %v9724_v44 = vunpack.i.l.bf16 %v15614_v40 }
 0x40d   :  { %9448 = vmatmul.msk.f32.vlgmr.msrb.gmra.mxu3 %vm440_vm0, %v3649_v54  ;;  %9449 = vmatmul.msk.f32.vlgmr.msra.gmra.mxu0 %vm440_vm0, %v3650_v60  ;;  %v9725_v60 = vunpack.i.h.bf16 %v15614_v40  ;;  %v15616_v54 = vld [vmem:[#allocation11_spill] sm:$0xff] }
 0x40e   :  { %9450 = vmatmul.msk.f32.vlgmr.msra.gmra.mxu1 %vm440_vm0, %v3651_v9  ;;  %4101 = vmatpush.msrb.mxu3 %v9710_v26  ;;  %v10128_v61 = vpop.eup %10127 }
 0x40f   :  { %4128 = vmatpush.msra.mxu0 %v9714_v38  ;;  %4155 = vmatpush.msra.mxu1 %v9715_v31  ;;  %v3567_v1 = vpop.xlane.xlu0 %3566  ;;  %v3653_v3 = vmul.f32 %v10128_v61, %v12692_v33  ;;  %v9719_v61 = vunpack.i.l.bf16 %v15613_v27 }
 0x410   :  { %v10130_v55 = vpop.eup %10129  ;;  %9822 = vrot.lane.b32.xlu2 %v15611_v32, %s10430_s8  ;;  %6680 = vrot.lane.b32.xlu0 %v15612_v13, %s10431_s2  ;;  %v15819_v32 = vld [vmem:[#allocation65_spill] sm:$0xff] }
 0x411   :  { %v3648_v7 = vmul.f32 %v10130_v55, %v12694_v14  ;;  %v3552_v5 = vpop.xlane.xlu2 %3551  ;;  %v15617_v55 = vld [vmem:[#allocation115_spill] sm:$0xff] }
 0x412   :  { %v10132_v51 = vpop.eup %10131  ;;  %10133 = vrcp.f32 %v3552_v5  ;;  %v9735_v13 = vunpack.i.h.bf16 %v15617_v55  ;;  %v15618_v5 = vld [vmem:[#allocation6_spill] sm:$0xff] }
 0x413   :  { %v3655_v17 = vmul.f32 %v10132_v51, %v12699_v20  ;;  %10135 = vrcp.f32 %v3567_v1  ;;  %9447 = vmatmul.msk.f32.vlgmr.msrb.gmra.mxu2 %vm440_vm0, %v3648_v7  ;;  %v3546_v63 = vpop.xlane.xlu1 %3545  ;;  %v15615_v20 = vld [vmem:[#allocation2_spill] sm:$0xff]  ;;  %v15619_v51 = vld [vmem:[#allocation9_spill] sm:$0xff] }
 0x414   :  { %4074 = vmatpush.msrb.mxu2 %v9709_v24  ;;  %10137 = vrcp.f32 %v3546_v63 }
 0x415   :  { %9452 = vmatmul.msk.f32.vlgmr.msra.gmra.mxu3 %vm440_vm0, %v3653_v3 }
 0x416   :  { %9454 = vmatmul.msk.f32.vlgmr.msrb.gmra.mxu1 %vm440_vm0, %v3655_v17  ;;  %4209 = vmatpush.msra.mxu3 %v9720_v53  ;;  %v15620_v17 = vld [vmem:[#allocation104_spill] sm:$0xff] }
 0x417   :  { %4263 = vmatpush.msrb.mxu1 %v9725_v60  ;;  %v3558_v14 = vpop.xlane.xlu0 %3557  ;;  %v9730_v63 = vunpack.i.h.bf16 %v15620_v17  ;;  %v9734_v60 = vunpack.i.l.bf16 %v15617_v55 }
 0x418   :  { %v10134_v33 = vpop.eup %10133  ;;  %6652 = vrot.lane.b32.xlu2 %v15615_v20, %s10431_s2  ;;  %6734 = vrot.lane.b32.xlu0 %v15616_v54, %s10431_s2  ;;  %10139 = vrcp.f32 %v3558_v14  ;;  %v9729_v14 = vunpack.i.l.bf16 %v15620_v17  ;;  %v15622_v20 = vld [vmem:[#allocation8_spill] sm:$0xff]  ;;  %v15623_v54 = vld [vmem:[#allocation15_spill] sm:$0xff] }
 0x419   :  { %v10136_v46 = vpop.eup %10135  ;;  %v3654_v42 = vmul.f32 %v10134_v33, %v12709_v12  ;;  %v3561_v26 = vpop.xlane.xlu2 %3560 }
 0x41a   :  { %v10138_v9 = vpop.eup %10137  ;;  %10141 = vrcp.f32 %v3561_v26  ;;  %v3659_v1 = vmul.f32 %v10136_v46, %v12707_v49 }
 0x41b   :  { %v3652_v31 = vmul.f32 %v10138_v9, %v12714_v4  ;;  %v3564_v38 = vpop.xlane.xlu1 %3563  ;;  %9453 = vmatmul.msk.f32.vlgmr.msrb.gmra.mxu0 %vm440_vm0, %v3654_v42  ;;  %v15624_v9 = vld [vmem:[#allocation106_spill] sm:$0xff] }
 0x41c   :  { %10143 = vrcp.f32 %v3564_v38  ;;  %4236 = vmatpush.msrb.mxu0 %v9724_v44  ;;  %v9745_v44 = vunpack.i.h.bf16 %v15624_v9 }
 0x41d   :  { %9451 = vmatmul.msk.f32.vlgmr.msra.gmra.mxu2 %vm440_vm0, %v3652_v31 }
 0x41e   :  { %9458 = vmatmul.msk.f32.vlgmr.msra.gmra.mxu1 %vm440_vm0, %v3659_v1  ;;  %4182 = vmatpush.msra.mxu2 %v9719_v61  ;;  %v10140_v12 = vpop.eup %10139  ;;  %v15625_v1 = vld [vmem:[#allocation111_spill] sm:$0xff] }
 0x41f   :  { %4371 = vmatpush.msra.mxu1 %v9735_v13  ;;  %v3576_v7 = vpop.xlane.xlu0 %3575  ;;  %v3656_v27 = vmul.f32 %v10140_v12, %v12722_v22  ;;  %v9740_v55 = vunpack.i.h.bf16 %v15625_v1  ;;  %v9744_v13 = vunpack.i.l.bf16 %v15624_v9  ;;  %v15634_v9 = vld [vmem:[#allocation116_spill] sm:$0xff] }
 0x420   :  { %v10142_v4 = vpop.eup %10141  ;;  %6706 = vrot.lane.b32.xlu2 %v15618_v5, %s10431_s2  ;;  %6764 = vrot.lane.b32.xlu0 %v15619_v51, %s10431_s2  ;;  %10145 = vrcp.f32 %v3576_v7  ;;  %v15627_v7 = vld [vmem:[#allocation16_spill] sm:$0xff] }
 0x421   :  { %v3657_v49 = vmul.f32 %v10142_v4, %v12724_v21  ;;  %v3579_v24 = vpop.xlane.xlu2 %3578  ;;  %v15621_v21 = vld [vmem:[#allocation128_spill] sm:$0xff]  ;;  %v15628_v4 = vld [vmem:[#allocation14_spill] sm:$0xff] }
 0x422   :  { %v10144_v3 = vpop.eup %10143  ;;  %10147 = vrcp.f32 %v3579_v24  ;;  %v9739_v24 = vunpack.i.l.bf16 %v15625_v1 }
 0x423   :  { %v3658_v53 = vmul.f32 %v10144_v3, %v12729_v35  ;;  %9456 = vmatmul.msk.f32.vlgmr.msrb.gmra.mxu3 %vm440_vm0, %v3657_v49  ;;  %v3573_v40 = vpop.xlane.xlu1 %3572 }
 0x424   :  { %10149 = vrcp.f32 %v3573_v40  ;;  %4317 = vmatpush.msrb.mxu3 %v9730_v63  ;;  %9752 = vrot.lane.b32.xlu1 %v15621_v21, %s10430_s8  ;;  %v15630_v40 = vld [vmem:[#allocation121_spill] sm:$0xff] }
 0x425   :  { %9455 = vmatmul.msk.f32.vlgmr.msrb.gmra.mxu2 %vm440_vm0, %v3656_v27  ;;  %9457 = vmatmul.msk.f32.vlgmr.msra.gmra.mxu0 %vm440_vm0, %v3658_v53  ;;  %v15629_v27 = vld [vmem:[#allocation112_spill] sm:$0xff] }
 0x426   :  { %4290 = vmatpush.msrb.mxu2 %v9729_v14  ;;  %4344 = vmatpush.msra.mxu0 %v9734_v60  ;;  %v10146_v22 = vpop.eup %10145  ;;  %v9750_v53 = vunpack.i.h.bf16 %v15629_v27  ;;  %v15632_v14 = vld [vmem:[#allocation10_spill] sm:$0xff] }
 0x427   :  { %v3585_v35 = vpop.xlane.xlu0 %3584  ;;  %v3662_v31 = vmul.f32 %v10146_v22, %v12737_v23  ;;  %v15633_v22 = vld [vmem:[#allocation27_spill] sm:$0xff] }
 0x428   :  { %v10148_v33 = vpop.eup %10147  ;;  %6736 = vrot.lane.b32.xlu2 %v15622_v20, %s10431_s2  ;;  %6818 = vrot.lane.b32.xlu0 %v15623_v54, %s10431_s2  ;;  %10151 = vrcp.f32 %v3585_v35 }
 0x429   :  { %v3663_v46 = vmul.f32 %v10148_v33, %v12739_v37  ;;  %v3570_v42 = vpop.xlane.xlu2 %3569  ;;  %v15626_v37 = vld [vmem:[#allocation129_spill] sm:$0xff] }
 0x42a   :  { %v10150_v26 = vpop.eup %10149  ;;  %10153 = vrcp.f32 %v3570_v42 }
 0x42b   :  { %v3661_v38 = vmul.f32 %v10150_v26, %v12744_v52  ;;  %v3591_v61 = vpop.xlane.xlu1 %3590  ;;  %9462 = vmatmul.msk.f32.vlgmr.msrb.gmra.mxu1 %vm440_vm0, %v3663_v46  ;;  %v9749_v26 = vunpack.i.l.bf16 %v15629_v27  ;;  %v15651_v27 = vld [vmem:[#allocation138_spill] sm:$0xff] }
 0x42c   :  { %10155 = vrcp.f32 %v3591_v61  ;;  %4479 = vmatpush.msrb.mxu1 %v9745_v44  ;;  %9767 = vrot.lane.b32.xlu1 %v15626_v37, %s10430_s8  ;;  %v15635_v44 = vld [vmem:[#allocation123_spill] sm:$0xff] }
 0x42d   :  { %9460 = vmatmul.msk.f32.vlgmr.msra.gmra.mxu3 %vm440_vm0, %v3661_v38  ;;  %9461 = vmatmul.msk.f32.vlgmr.msrb.gmra.mxu0 %vm440_vm0, %v3662_v31  ;;  %v15637_v31 = vld [vmem:[#allocation22_spill] sm:$0xff]  ;;  %v15638_v38 = vld [vmem:[#allocation17_spill] sm:$0xff] }
 0x42e   :  { %4425 = vmatpush.msra.mxu3 %v9740_v55  ;;  %4452 = vmatpush.msrb.mxu0 %v9744_v13  ;;  %v10152_v23 = vpop.eup %10151 }
 0x42f   :  { %v3603_v52 = vpop.xlane.xlu0 %3602  ;;  %v3665_v3 = vmul.f32 %v10152_v23, %v12752_v50 }
 0x430   :  { %v10154_v12 = vpop.eup %10153  ;;  %6790 = vrot.lane.b32.xlu2 %v15627_v7, %s10431_s2  ;;  %6848 = vrot.lane.b32.xlu0 %v15628_v4, %s10431_s2  ;;  %10157 = vrcp.f32 %v3603_v52  ;;  %v15639_v52 = vld [vmem:[#allocation109_spill] sm:$0xff]  ;;  %v15642_v7 = vld [vmem:[#allocation95_spill] sm:$0xff] }
 0x431   :  { %v3660_v5 = vmul.f32 %v10154_v12, %v12754_v10  ;;  %v3588_v51 = vpop.xlane.xlu2 %3587  ;;  %v15631_v10 = vld [vmem:[#allocation88_spill] sm:$0xff]  ;;  %v15640_v12 = vld [vmem:[#allocation125_spill] sm:$0xff] }
 0x432   :  { %v10156_v49 = vpop.eup %10155  ;;  %10159 = vrcp.f32 %v3588_v51  ;;  %v15646_v51 = vld [vmem:[#allocation31_spill] sm:$0xff] }
 0x433   :  { %v3667_v17 = vmul.f32 %v10156_v49, %v12759_v19  ;;  %v3582_v63 = vpop.xlane.xlu1 %3581  ;;  %9459 = vmatmul.msk.f32.vlgmr.msra.gmra.mxu2 %vm440_vm0, %v3660_v5  ;;  %v15645_v5 = vld [vmem:[#allocation20_spill] sm:$0xff] }
 0x434   :  { %10161 = vrcp.f32 %v3582_v63  ;;  %4398 = vmatpush.msra.mxu2 %v9739_v24  ;;  %9782 = vrot.lane.b32.xlu1 %v15630_v40, %s10430_s8  ;;  %v15647_v24 = vld [vmem:[#allocation127_spill] sm:$0xff]  ;;  %v15650_v63 = vld [vmem:[#allocation133_spill] sm:$0xff] }
 0x435   :  { %9464 = vmatmul.msk.f32.vlgmr.msrb.gmra.mxu3 %vm440_vm0, %v3665_v3  ;;  %9466 = vmatmul.msk.f32.vlgmr.msra.gmra.mxu1 %vm440_vm0, %v3667_v17  ;;  %v15648_v3 = vld [vmem:[#allocation74_spill] sm:$0xff]  ;;  %v15649_v17 = vld [vmem:[#allocation117_spill] sm:$0xff] }
 0x436   :  { %4533 = vmatpush.msrb.mxu3 %v9750_v53  ;;  %9475 = vmatpush.xpose.msk.msra.mxu1 %vm440_vm0, %v15631_v10  ;;  %v10158_v50 = vpop.eup %10157  ;;  %v15652_v53 = vld [vmem:[#allocation149_spill] sm:$0xff] }
 0x437   :  { %v3594_v19 = vpop.xlane.xlu0 %3593  ;;  %v3671_v54 = vmul.f32 %v10158_v50, %v12771_v0  ;;  %v15636_v0 = vld [vmem:[#allocation132_spill] sm:$0xff]  ;;  %v15654_v10 = vld [vmem:[#allocation29_spill] sm:$0xff] }
 0x438   :  { %v10160_v60 = vpop.eup %10159  ;;  %6820 = vrot.lane.b32.xlu2 %v15632_v14, %s10431_s2  ;;  %6902 = vrot.lane.b32.xlu0 %v15633_v22, %s10431_s2  ;;  %10163 = vrcp.f32 %v3594_v19  ;;  %v15655_v50 = vld [vmem:[#allocation4_spill] sm:$0xff]  ;;  %v15656_v19 = vld [vmem:[#allocation94_spill] sm:$0xff]  ;;  %v15659_v22 = vld [vmem:[#allocation143_spill] sm:$0xff] }
 0x439   :  { %v3666_v35 = vmul.f32 %v10160_v60, %v12773_v59  ;;  %v3597_v33 = vpop.xlane.xlu2 %3596  ;;  %v15657_v60 = vld [vmem:[#allocation110_spill] sm:$0xff]  ;;  %v15658_v14 = vld [vmem:[#allocation140_spill] sm:$0xff] }
 0x43a   :  { %v10162_v20 = vpop.eup %10161  ;;  %10165 = vrcp.f32 %v3597_v33  ;;  %v15661_v33 = vld [vmem:[#allocation156_spill] sm:$0xff] }
 0x43b   :  { %v3664_v46 = vmul.f32 %v10162_v20, %v12777_v58  ;;  %v3600_v42 = vpop.xlane.xlu1 %3599  ;;  %9465 = vmatmul.msk.f32.vlgmr.msra.gmra.mxu0 %vm440_vm0, %v3666_v35  ;;  %v15660_v35 = vld [vmem:[#allocation145_spill] sm:$0xff]  ;;  %v15662_v20 = vld [vmem:[#allocation24_spill] sm:$0xff] }
 0x43c   :  { %10167 = vrcp.f32 %v3600_v42  ;;  %9473 = vmatpush.xpose.msk.msra.mxu0 %vm440_vm0, %v15634_v9  ;;  %9797 = vrot.lane.b32.xlu1 %v15635_v44, %s10430_s8  ;;  %v15665_v42 = vld [vmem:[#allocation134_spill] sm:$0xff]  ;;  %v15667_v9 = vld [vmem:[#allocation147_spill] sm:$0xff] }
 0x43d   :  { %9463 = vmatmul.msk.f32.vlgmr.msrb.gmra.mxu2 %vm440_vm0, %v3664_v46  ;;  %9470 = vmatmul.msk.f32.vlgmr.msrb.gmra.mxu1 %vm440_vm0, %v3671_v54  ;;  %v15663_v54 = vld [vmem:[#allocation37_spill] sm:$0xff]  ;;  %v15664_v46 = vld [vmem:[#allocation3_spill] sm:$0xff] }
 0x43e   :  { %4506 = vmatpush.msrb.mxu2 %v9749_v26  ;;  %9483 = vmatpush.xpose.msk.msrb.mxu1 %vm440_vm0, %v15636_v0  ;;  %v10164_v59 = vpop.eup %10163  ;;  %v15666_v26 = vld [vmem:[#allocation136_spill] sm:$0xff]  ;;  %v15668_v0 = vld [vmem:[#allocation150_spill] sm:$0xff] }
 0x43f   :  { %v3668_v13 = vmul.f32 %v10164_v59, %v12788_v62  ;;  %v15643_v62 = vld [vmem:[#allocation131_spill] sm:$0xff] }
 0x440   :  { %v10166_v58 = vpop.eup %10165  ;;  %6874 = vrot.lane.b32.xlu2 %v15637_v31, %s10431_s2  ;;  %6932 = vrot.lane.b32.xlu0 %v15638_v38, %s10431_s2  ;;  %v15669_v59 = vld [vmem:[#allocation155_spill] sm:$0xff]  ;;  %v15671_v31 = vld [vmem:[#allocation33_spill] sm:$0xff]  ;;  %v15672_v38 = vld [vmem:[#allocation32_spill] sm:$0xff] }
 0x441   :  { %v3669_v61 = vmul.f32 %v10166_v58, %v12790_v15  ;;  %v3606_v1 = vpop.xlane.xlu2 %3605  ;;  %v15641_v15 = vld [vmem:[#allocation87_spill] sm:$0xff] }
 0x442   :  { %v10168_v55 = vpop.eup %10167  ;;  %10169 = vrcp.f32 %v3606_v1  ;;  %v15670_v58 = vld [vmem:[#allocation163_spill] sm:$0xff]  ;;  %v15674_v1 = vld [vmem:[#allocation141_spill] sm:$0xff] }
 0x443   :  { %v3670_v23 = vmul.f32 %v10168_v55, %v12796_v18  ;;  %9468 = vmatmul.msk.f32.vlgmr.msra.gmra.mxu3 %vm440_vm0, %v3669_v61  ;;  %v15644_v18 = vld [vmem:[#allocation139_spill] sm:$0xff]  ;;  %v15673_v61 = vld [vmem:[#allocation12_spill] sm:$0xff]  ;;  %v15675_v55 = vld [vmem:[#allocation146_spill] sm:$0xff] }
 0x444   :  { %9479 = vmatpush.xpose.msk.msra.mxu3 %vm440_vm0, %v15639_v52  ;;  %9812 = vrot.lane.b32.xlu1 %v15640_v12, %s10430_s8  ;;  %v15678_v52 = vld [vmem:[#allocation162_spill] sm:$0xff] }
 0x445   :  { %9467 = vmatmul.msk.f32.vlgmr.msra.gmra.mxu2 %vm440_vm0, %v3668_v13  ;;  %9469 = vmatmul.msk.f32.vlgmr.msrb.gmra.mxu0 %vm440_vm0, %v3670_v23  ;;  %v15676_v13 = vld [vmem:[#allocation154_spill] sm:$0xff]  ;;  %v15677_v23 = vld [vmem:[#allocation157_spill] sm:$0xff] }
 0x446   :  { %9476 = vmatmul.msk.f32.vlgmr.msra.gmra.mxu1 %vm440_vm0, %v15641_v15  ;;  %9477 = vmatpush.xpose.msk.msra.mxu2 %vm440_vm0, %v15642_v7  ;;  %v15679_v15 = vld [vmem:[#allocation28_spill] sm:$0xff]  ;;  %v15680_v7 = vld [vmem:[#allocation43_spill] sm:$0xff] }
 0x447   :  { %9481 = vmatpush.xpose.msk.msrb.mxu0 %vm440_vm0, %v15643_v62  ;;  %9491 = vmatpush.xpose.msk.msra.mxu1 %vm440_vm0, %v15644_v18  ;;  %v15681_v62 = vld [vmem:[#allocation13_spill] sm:$0xff]  ;;  %v15682_v18 = vld [vmem:[#allocation148_spill] sm:$0xff] }
 0x448   :  { %v10170_v4 = vpop.eup %10169  ;;  %6904 = vrot.lane.b32.xlu2 %v15645_v5, %s10431_s2  ;;  %6986 = vrot.lane.b32.xlu0 %v15646_v51, %s10431_s2  ;;  %v15684_v5 = vld [vmem:[#allocation164_spill] sm:$0xff]  ;;  %v15686_v51 = vld [vmem:[#allocation34_spill] sm:$0xff] }
 0x449   :  { %v3672_v49 = vmul.f32 %v10170_v4, %v12806_v36  ;;  %v15653_v36 = vld [vmem:[#allocation25_spill] sm:$0xff] }
 0x44a   :  { %v15683_v4 = vld [vmem:[#allocation153_spill] sm:$0xff] }
 0x44c   :  { %9827 = vrot.lane.b32.xlu1 %v15647_v24, %s10430_s8 }
 0x44d   :  { %9471 = vmatmul.msk.f32.vlgmr.msrb.gmra.mxu2 %vm440_vm0, %v3672_v49  ;;  %9474 = vmatmul.msk.f32.vlgmr.msra.gmra.mxu0 %vm440_vm0, %v15648_v3  ;;  %v15687_v49 = vld [vmem:[#allocation19_spill] sm:$0xff]  ;;  %v15688_v3 = vld [vmem:[#allocation158_spill] sm:$0xff] }
 0x44e   :  { %9484 = vmatmul.msk.f32.vlgmr.msrb.gmra.mxu1 %vm440_vm0, %v15649_v17  ;;  %9485 = vmatpush.xpose.msk.msrb.mxu2 %vm440_vm0, %v15650_v63  ;;  %v15689_v17 = vld [vmem:[#allocation160_spill] sm:$0xff]  ;;  %v15691_v63 = vld [vmem:[#allocation53_spill] sm:$0xff] }
 0x44f   :  { %9489 = vmatpush.xpose.msk.msra.mxu0 %vm440_vm0, %v15651_v27  ;;  %9499 = vmatpush.xpose.msk.msrb.mxu1 %vm440_vm0, %v15652_v53  ;;  %v5381_v53 = vpop.permute.xlu0 %5380 }
 0x450   :  { %6958 = vrot.lane.b32.xlu2 %v15653_v36, %s10431_s2  ;;  %7016 = vrot.lane.b32.xlu0 %v15654_v10, %s10431_s2  ;;  %v15693_v36 = vld [vmem:[#allocation18_spill] sm:$0xff] }
 0x451   :  { %v15696_v10 = vld [vmem:[#allocation38_spill] sm:$0xff] }
 0x454   :  { %6678 = vrot.lane.b32.xlu1 %v15655_v50, %s10431_s2 }
 0x455   :  { %9478 = vmatmul.msk.f32.vlgmr.msra.gmra.mxu2 %vm440_vm0, %v15656_v19  ;;  %9482 = vmatmul.msk.f32.vlgmr.msrb.gmra.mxu0 %vm440_vm0, %v15657_v60 }
 0x456   :  { %9492 = vmatmul.msk.f32.vlgmr.msra.gmra.mxu1 %vm440_vm0, %v15658_v14  ;;  %9493 = vmatpush.xpose.msk.msra.mxu2 %vm440_vm0, %v15659_v22 }
 0x457   :  { %9497 = vmatpush.xpose.msk.msrb.mxu0 %vm440_vm0, %v15660_v35  ;;  %9507 = vmatpush.xpose.msk.msra.mxu1 %vm440_vm0, %v15661_v33  ;;  %v15699_v35 = vld [vmem:[#allocation40_spill] sm:$0xff]  ;;  %v15700_v33 = vld [vmem:[#allocation137_spill] sm:$0xff] }
 0x458   :  { %6988 = vrot.lane.b32.xlu2 %v15662_v20, %s10431_s2  ;;  %7070 = vrot.lane.b32.xlu0 %v15663_v54, %s10431_s2  ;;  %v15701_v20 = vld [vmem:[#allocation54_spill] sm:$0xff]  ;;  %v15705_v54 = vld [vmem:[#allocation99_spill] sm:$0xff] }
 0x45c   :  { %6708 = vrot.lane.b32.xlu1 %v15664_v46, %s10431_s2  ;;  %v15706_v46 = vld [vmem:[#allocation52_spill] sm:$0xff] }
 0x45d   :  { %9486 = vmatmul.msk.f32.vlgmr.msrb.gmra.mxu2 %vm440_vm0, %v15665_v42  ;;  %9490 = vmatmul.msk.f32.vlgmr.msra.gmra.mxu0 %vm440_vm0, %v15666_v26  ;;  %v15707_v42 = vld [vmem:[#allocation144_spill] sm:$0xff] }
 0x45e   :  { %9500 = vmatmul.msk.f32.vlgmr.msrb.gmra.mxu1 %vm440_vm0, %v15667_v9  ;;  %9501 = vmatpush.xpose.msk.msrb.mxu2 %vm440_vm0, %v15668_v0  ;;  %v15708_v26 = vld [vmem:[#allocation36_spill] sm:$0xff]  ;;  %v9763_v9 = vpop.permute.xlu0 %9762 }
 0x45f   :  { %9505 = vmatpush.xpose.msk.msra.mxu0 %vm440_vm0, %v15669_v59  ;;  %9515 = vmatpush.xpose.msk.msrb.mxu1 %vm440_vm0, %v15670_v58  ;;  %v9765_v58 = vunpack.i.h.bf16 %v9763_v9 }
 0x460   :  { %7042 = vrot.lane.b32.xlu2 %v15671_v31, %s10431_s2  ;;  %7100 = vrot.lane.b32.xlu0 %v15672_v38, %s10431_s2 }
 0x464   :  { %6762 = vrot.lane.b32.xlu1 %v15673_v61, %s10431_s2 }
 0x465   :  { %9494 = vmatmul.msk.f32.vlgmr.msra.gmra.mxu2 %vm440_vm0, %v15674_v1  ;;  %9498 = vmatmul.msk.f32.vlgmr.msrb.gmra.mxu0 %vm440_vm0, %v15675_v55  ;;  %v15712_v55 = vld [vmem:[#allocation135_spill] sm:$0xff] }
 0x466   :  { %9508 = vmatmul.msk.f32.vlgmr.msra.gmra.mxu1 %vm440_vm0, %v15676_v13  ;;  %9509 = vmatpush.xpose.msk.msra.mxu2 %vm440_vm0, %v15677_v23  ;;  %v15713_v13 = vld [vmem:[#allocation47_spill] sm:$0xff] }
 0x467   :  { %9513 = vmatpush.xpose.msk.msrb.mxu0 %vm440_vm0, %v15678_v52  ;;  %9523 = vmatpush.xpose.msk.msra.mxu1 %vm440_vm0, %v12804_v25  ;;  %v15685_v25 = vld [vmem:[#allocation44_spill] sm:$0xff]  ;;  %v15714_v23 = vld [vmem:[#allocation151_spill] sm:$0xff]  ;;  %v15715_v52 = vld [vmem:[#allocation26_spill] sm:$0xff] }
 0x468   :  { %7072 = vrot.lane.b32.xlu2 %v15679_v15, %s10431_s2  ;;  %7154 = vrot.lane.b32.xlu0 %v15680_v7, %s10431_s2 }
 0x46c   :  { %6792 = vrot.lane.b32.xlu1 %v15681_v62, %s10431_s2  ;;  %v15718_v62 = vld [vmem:[#allocation142_spill] sm:$0xff] }
 0x46d   :  { %9502 = vmatmul.msk.f32.vlgmr.msrb.gmra.mxu2 %vm440_vm0, %v15682_v18  ;;  %9506 = vmatmul.msk.f32.vlgmr.msra.gmra.mxu0 %vm440_vm0, %v15683_v4  ;;  %v15719_v18 = vld [vmem:[#allocation161_spill] sm:$0xff] }
 0x46e   :  { %9516 = vmatmul.msk.f32.vlgmr.msrb.gmra.mxu1 %vm440_vm0, %v15684_v5  ;;  %9517 = vmatpush.xpose.msk.msrb.mxu2 %vm440_vm0, %v12766_v28  ;;  %v13100_v28 = vpop.permute.xlu1 %5406 }
 0x46f   :  { %9521 = vmatpush.xpose.msk.msra.mxu0 %vm440_vm0, %v12802_v39  ;;  %9531 = vmatpush.xpose.msk.msrb.mxu1 %vm440_vm0, %v12838_v48  ;;  %v13108_v39 = vpop.permute.xlu2 %5408  ;;  %v15690_v48 = vld [vmem:[#allocation30_spill] sm:$0xff] }
 0x470   :  { %7126 = vrot.lane.b32.xlu2 %v15685_v25, %s10431_s2  ;;  %7184 = vrot.lane.b32.xlu0 %v15686_v51, %s10431_s2  ;;  %v15721_v51 = vld [vmem:[#allocation41_spill] sm:$0xff] }
 0x474   :  { %6846 = vrot.lane.b32.xlu1 %v15687_v49, %s10431_s2 }
 0x475   :  { %9510 = vmatmul.msk.f32.vlgmr.msra.gmra.mxu2 %vm440_vm0, %v15688_v3  ;;  %9514 = vmatmul.msk.f32.vlgmr.msrb.gmra.mxu0 %vm440_vm0, %v15689_v17  ;;  %v15724_v17 = vld [vmem:[#allocation152_spill] sm:$0xff] }
 0x476   :  { %9524 = vmatmul.msk.f32.vlgmr.msra.gmra.mxu1 %vm440_vm0, %v12808_v47  ;;  %9525 = vmatpush.xpose.msk.msra.mxu2 %vm440_vm0, %v12816_v45  ;;  %v15694_v47 = vld [vmem:[#allocation165_spill] sm:$0xff] }
 0x477   :  { %9529 = vmatpush.xpose.msk.msrb.mxu0 %vm440_vm0, %v12822_v43  ;;  %v15695_v43 = vld [vmem:[#allocation49_spill] sm:$0xff]  ;;  %v13129_v50 = vpop.permute.xlu2 %9757 }
 0x478   :  { %7156 = vrot.lane.b32.xlu2 %v15690_v48, %s10431_s2  ;;  %7238 = vrot.lane.b32.xlu0 %v15691_v63, %s10431_s2  ;;  %v9759_v19 = vunpack.i.l.bf16 %v13129_v50  ;;  %v13140_v14 = vpop.f32.mrf.mxu0  ;;  %v15726_v63 = vld [vmem:[#allocation35_spill] sm:$0xff] }
 0x47a   :  { %v13114_v27 = vpop.f32.mrf.mxu1 }
 0x47b   :  { %15692 = vst [vmem:[#allocation5_spill] sm:$0xff] %v13114_v27 }
 0x47c   :  { %6876 = vrot.lane.b32.xlu1 %v15693_v36, %s10431_s2  ;;  %v15728_v36 = vld [vmem:[#allocation159_spill] sm:$0xff] }
 0x47d   :  { %9518 = vmatmul.msk.f32.vlgmr.msrb.gmra.mxu2 %vm440_vm0, %v15694_v47  ;;  %9522 = vmatmul.msk.f32.vlgmr.msra.gmra.mxu0 %vm440_vm0, %v12786_v56  ;;  %v15698_v56 = vld [vmem:[#allocation23_spill] sm:$0xff] }
 0x47e   :  { %9532 = vmatmul.msk.f32.vlgmr.msrb.gmra.mxu1 %vm440_vm0, %v12830_v8  ;;  %v3609_v45 = vpop.xlane.xlu1 %3608  ;;  %9533 = vmatpush.xpose.msk.msrb.mxu2 %vm440_vm0, %v5381_v53 }
 0x47f   :  { %10171 = vrcp.f32 %v3609_v45 }
 0x480   :  { %7210 = vrot.lane.b32.xlu2 %v15695_v43, %s10431_s2  ;;  %7268 = vrot.lane.b32.xlu0 %v15696_v10, %s10431_s2  ;;  %v15731_v43 = vld [vmem:[#allocation46_spill] sm:$0xff] }
 0x481   :  { %v15733_v10 = vld [vmem:[#allocation166_spill] sm:$0xff] }
 0x482   :  { %v13132_v60 = vpop.f32.mrf.mxu1 }
 0x483   :  { %15697 = vst [vmem:[#allocation113_spill] sm:$0xff] %v13132_v60 }
 0x484   :  { %6930 = vrot.lane.b32.xlu1 %v15698_v56, %s10431_s2  ;;  %v13166_v0 = vpop.f32.mrf.mxu2 }
 0x485   :  { %v10172_v8 = vpop.eup %10171  ;;  %9526 = vmatmul.msk.f32.vlgmr.msra.gmra.mxu2 %vm440_vm0, %v12812_v30  ;;  %9530 = vmatmul.msk.f32.vlgmr.msrb.gmra.mxu0 %vm440_vm0, %v12826_v2  ;;  %v15702_v30 = vld [vmem:[#allocation21_spill] sm:$0xff]  ;;  %v13154_v2 = vpop.f32.mrf.mxu0  ;;  %15709 = vst [vmem:[#allocation114_spill] sm:$0xff] %v13166_v0 }
 0x486   :  { %v3673_v22 = vmul.f32 %v10172_v8, %v12872_v16  ;;  %5891 = vmatpush.msra.mxu2 %v9759_v19  ;;  %15703 = vst [vmem:[#allocation108_spill] sm:$0xff] %v13154_v2  ;;  %v9760_v8 = vunpack.i.h.bf16 %v13129_v50 }
 0x488   :  { %9472 = vmatmul.msk.f32.vlgmr.msrb.gmra.mxu3 %vm440_vm0, %v3673_v22  ;;  %7240 = vrot.lane.b32.xlu2 %v15699_v35, %s10431_s2  ;;  %v15738_v35 = vld [vmem:[#allocation167_spill] sm:$0xff] }
 0x489   :  { %9487 = vmatpush.xpose.msk.msrb.mxu3 %vm440_vm0, %v15700_v33  ;;  %7322 = vrot.lane.b32.xlu0 %v15701_v20, %s10431_s2 }
 0x48b   :  { %v13156_v16 = vpop.f32.mrf.mxu1 }
 0x48c   :  { %6960 = vrot.lane.b32.xlu1 %v15702_v30, %s10431_s2  ;;  %15704 = vst [vmem:[#allocation7_spill] sm:$0xff] %v13156_v16 }
 0x48d   :  { %9534 = vmatmul.msk.f32.vlgmr.msrb.gmra.mxu2 %vm440_vm0, %v12834_v34  ;;  %v9764_v34 = vunpack.i.l.bf16 %v9763_v9  ;;  %v13168_v61 = vpop.f32.mrf.mxu0  ;;  %v15742_v9 = vld [vmem:[#allocation42_spill] sm:$0xff] }
 0x48e   :  { %15710 = vst [vmem:[#allocation105_spill] sm:$0xff] %v13168_v61 }
 0x490   :  { %9480 = vmatmul.msk.f32.vlgmr.msra.gmra.mxu3 %vm440_vm0, %v15705_v54  ;;  %7294 = vrot.lane.b32.xlu2 %v15706_v46, %s10431_s2 }
 0x491   :  { %9495 = vmatpush.xpose.msk.msra.mxu3 %vm440_vm0, %v15707_v42 }
 0x493   :  { %v13170_v1 = vpop.f32.mrf.mxu1 }
 0x494   :  { %7014 = vrot.lane.b32.xlu1 %v15708_v26, %s10431_s2  ;;  %15711 = vst [vmem:[#allocation2_spill] sm:$0xff] %v13170_v1 }
 0x496   :  { %v9753_v59 = vpop.permute.xlu1 %9752  ;;  %v13180_v15 = vpop.f32.mrf.mxu2 }
 0x497   :  { %v9755_v31 = vunpack.i.h.bf16 %v9753_v59  ;;  %v9754_v38 = vunpack.i.l.bf16 %v9753_v59  ;;  %15716 = vst [vmem:[#allocation11_spill] sm:$0xff] %v13180_v15 }
 0x498   :  { %9488 = vmatmul.msk.f32.vlgmr.msrb.gmra.mxu3 %vm440_vm0, %v15712_v55  ;;  %7324 = vrot.lane.b32.xlu2 %v15713_v13, %s10431_s2  ;;  %v13182_v7 = vpop.f32.mrf.mxu0 }
 0x499   :  { %9503 = vmatpush.xpose.msk.msrb.mxu3 %vm440_vm0, %v15714_v23  ;;  %5839 = vmatpush.msra.mxu0 %v9754_v38  ;;  %15717 = vst [vmem:[#allocation115_spill] sm:$0xff] %v13182_v7 }
 0x49a   :  { %5865 = vmatpush.msra.mxu1 %v9755_v31 }
 0x49b   :  { %5943 = vmatpush.msrb.mxu0 %v9764_v34  ;;  %v13188_v4 = vpop.f32.mrf.mxu1 }
 0x49c   :  { %5969 = vmatpush.msrb.mxu1 %v9765_v58  ;;  %7044 = vrot.lane.b32.xlu1 %v15715_v52, %s10431_s2  ;;  %15720 = vst [vmem:[#allocation6_spill] sm:$0xff] %v13188_v4 }
 0x49e   :  { %v9768_v5 = vpop.permute.xlu1 %9767 }
 0x49f   :  { %v9769_v25 = vunpack.i.l.bf16 %v9768_v5  ;;  %v9770_v30 = vunpack.i.h.bf16 %v9768_v5 }
 0x4a0   :  { %9496 = vmatmul.msk.f32.vlgmr.msra.gmra.mxu3 %vm440_vm0, %v15718_v62  ;;  %v13192_v49 = vpop.f32.mrf.mxu2 }
 0x4a1   :  { %9511 = vmatpush.xpose.msk.msra.mxu3 %vm440_vm0, %v15719_v18  ;;  %5995 = vmatpush.msrb.mxu2 %v9769_v25  ;;  %15722 = vst [vmem:[#allocation9_spill] sm:$0xff] %v13192_v49 }
 0x4a2   :  { %v13194_v3 = vpop.f32.mrf.mxu0 }
 0x4a3   :  { %15723 = vst [vmem:[#allocation104_spill] sm:$0xff] %v13194_v3 }
 0x4a4   :  { %7098 = vrot.lane.b32.xlu1 %v15721_v51, %s10431_s2 }
 0x4a8   :  { %9504 = vmatmul.msk.f32.vlgmr.msrb.gmra.mxu3 %vm440_vm0, %v15724_v17  ;;  %v13200_v48 = vpop.f32.mrf.mxu1  ;;  %v13204_v53 = vpop.f32.mrf.mxu2 }
 0x4a9   :  { %9519 = vmatpush.xpose.msk.msrb.mxu3 %vm440_vm0, %v12792_v41  ;;  %15725 = vst [vmem:[#allocation128_spill] sm:$0xff] %v13200_v48 }
 0x4aa   :  { %15727 = vst [vmem:[#allocation8_spill] sm:$0xff] %v13204_v53  ;;  %v13210_v47 = vpop.f32.mrf.mxu0 }
 0x4ab   :  { %15729 = vst [vmem:[#allocation15_spill] sm:$0xff] %v13210_v47 }
 0x4ac   :  { %7128 = vrot.lane.b32.xlu1 %v15726_v63, %s10431_s2  ;;  %v13269_v63 = vpop.permute.xlu0 %9772 }
 0x4b0   :  { %9512 = vmatmul.msk.f32.vlgmr.msra.gmra.mxu3 %vm440_vm0, %v15728_v36 }
 0x4b1   :  { %9527 = vmatpush.xpose.msk.msra.mxu3 %vm440_vm0, %v12820_v29  ;;  %v15736_v29 = vld [vmem:[#allocation39_spill] sm:$0xff] }
 0x4b2   :  { %v13212_v45 = vpop.f32.mrf.mxu1 }
 0x4b3   :  { %15730 = vst [vmem:[#allocation106_spill] sm:$0xff] %v13212_v45 }
 0x4b4   :  { %7182 = vrot.lane.b32.xlu1 %v15731_v43, %s10431_s2 }
 0x4b6   :  { %v13216_v41 = vpop.f32.mrf.mxu2 }
 0x4b7   :  { %15732 = vst [vmem:[#allocation111_spill] sm:$0xff] %v13216_v41 }
 0x4b8   :  { %9520 = vmatmul.msk.f32.vlgmr.msrb.gmra.mxu3 %vm440_vm0, %v15733_v10  ;;  %v13222_v19 = vpop.f32.mrf.mxu0 }
 0x4b9   :  { %9535 = vmatpush.xpose.msk.msrb.mxu3 %vm440_vm0, %v13108_v39  ;;  %15734 = vst [vmem:[#allocation129_spill] sm:$0xff] %v13222_v19  ;;  %v15740_v39 = vld [vmem:[#allocation51_spill] sm:$0xff] }
 0x4ba   :  { %v13224_v56 = vpop.f32.mrf.mxu1 }
 0x4bb   :  { %15735 = vst [vmem:[#allocation16_spill] sm:$0xff] %v13224_v56 }
 0x4bc   :  { %7212 = vrot.lane.b32.xlu1 %v15736_v29, %s10431_s2 }
 0x4c0   :  { %v13229_v22 = vpop.f32.mrf.mxu2  ;;  %9528 = vmatmul.msk.f32.vlgmr.msra.gmra.mxu3 %vm440_vm0, %v15738_v35  ;;  %v13279_v35 = vpop.permute.xlu0 %9787 }
 0x4c1   :  { %15737 = vst [vmem:[#allocation14_spill] sm:$0xff] %v13229_v22  ;;  %5917 = vmatpush.msra.mxu3 %v9760_v8 }
 0x4c2   :  { %v13233_v33 = vpop.f32.mrf.mxu0 }
 0x4c3   :  { %15739 = vst [vmem:[#allocation112_spill] sm:$0xff] %v13233_v33  ;;  %v4591_v20 = vpop.f32.mrf.mxu1 }
 0x4c4   :  { %7266 = vrot.lane.b32.xlu1 %v15740_v39, %s10431_s2  ;;  %v13281_v39 = vpop.permute.xlu2 %9777 }
 0x4c8   :  { %9536 = vmatmul.msk.f32.vlgmr.msrb.gmra.mxu3 %vm440_vm0, %v13100_v28  ;;  %v13239_v54 = vpop.f32.mrf.mxu2  ;;  %v13251_v28 = vpop.f32.mrf.mxu3 }
 0x4c9   :  { %6021 = vmatpush.msrb.mxu3 %v9770_v30  ;;  %15741 = vst [vmem:[#allocation121_spill] sm:$0xff] %v13239_v54 }
 0x4ca   :  { %v4563_v50 = vpop.f32.mrf.mxu0 }
 0x4cb   :  { %v13241_v46 = vmul.f32 0.5, %v4563_v50  ;;  %v4703_v42 = vpop.f32.mrf.mxu1  ;;  %v13285_v50 = vmul.f32 0.5, %v4591_v20 }
 0x4cc   :  { %v13243_v26 = vmul.f32 0.5, %v4703_v42  ;;  %7296 = vrot.lane.b32.xlu1 %v15742_v9, %s10431_s2  ;;  %v13289_v9 = vpop.permute.xlu1 %9782 }
 0x4cd   :  { %v5466_v34 = vsel %vm1305_vm1, %v13241_v46, -inf  ;;  %v5469_v42 = vsel %vm1305_vm1, %v13285_v50, -inf }
 0x4ce   :  { %v5481_v59 = vsel %vm1305_vm1, %v13243_v26, -inf  ;;  %5467 = vmax.xlane.f32.xlu0 %v5466_v34  ;;  %v13291_v34 = vpop.permute.xlu0 %9802 }
 0x4cf   :  { %5482 = vmax.xlane.f32.xlu2 %v5481_v59 }
 0x4d0   :  { %v13253_v38 = vpop.f32.mrf.mxu2  ;;  %v13259_v23 = vpop.f32.mrf.mxu3 }
 0x4d1   :  { %15743 = vst [vmem:[#allocation88_spill] sm:$0xff] %v13253_v38 }
 0x4d2   :  { %v4675_v58 = vpop.f32.mrf.mxu0  ;;  %15744 = vst [vmem:[#allocation10_spill] sm:$0xff] %v13259_v23 }
 0x4d3   :  { %v4815_v31 = vpop.f32.mrf.mxu1  ;;  %v13293_v59 = vmul.f32 0.5, %v4675_v58 }
 0x4d4   :  { %v13255_v55 = vmul.f32 0.5, %v4815_v31  ;;  %v13295_v31 = vpop.permute.xlu2 %9792  ;;  %v13301_v20 = vpop.permute.xlu1 %9797 }
 0x4d5   :  { %15749 = vst [vmem:[#allocation17_spill] sm:$0xff] %v13301_v20 }
 0x4d6   :  { %v5493_v13 = vsel %vm1305_vm1, %v13255_v55, -inf }
 0x4d7   :  { %5494 = vmax.xlane.f32.xlu0 %v5493_v13 }
 0x4d8   :  { %v4619_v25 = vpop.f32.mrf.mxu2  ;;  %v13265_v51 = vpop.f32.mrf.mxu3 }
 0x4d9   :  { %15745 = vst [vmem:[#allocation27_spill] sm:$0xff] %v13265_v51  ;;  %v13267_v17 = vmul.f32 0.5, %v4619_v25  ;;  %v13305_v25 = vpop.permute.xlu0 %9817 }
 0x4da   :  { %v4787_v52 = vpop.f32.mrf.mxu0  ;;  %15750 = vst [vmem:[#allocation109_spill] sm:$0xff] %v13305_v25 }
 0x4db   :  { %v13261_v62 = vmul.f32 0.5, %v4787_v52  ;;  %v4927_v18 = vpop.f32.mrf.mxu1  ;;  %v5472_v36 = vsel %vm1305_vm1, %v13267_v17, -inf  ;;  %v5478_v52 = vsel %vm1305_vm1, %v13293_v59, -inf }
 0x4dd   :  { %v5490_v5 = vsel %vm1305_vm1, %v13261_v62, -inf }
 0x4de   :  { %5491 = vmax.xlane.f32.xlu2 %v5490_v5  ;;  %v13303_v5 = vmul.f32 0.5, %v4927_v18 }
 0x4e0   :  { %v13273_v10 = vpop.f32.mrf.mxu3  ;;  %v5505_v58 = vsel %vm1305_vm1, %v13303_v5, -inf }
 0x4e1   :  { %15746 = vst [vmem:[#allocation116_spill] sm:$0xff] %v13273_v10  ;;  %v13317_v56 = vpop.permute.xlu0 %6650 }
 0x4e2   :  { %15754 = vst [vmem:[#allocation139_spill] sm:$0xff] %v13317_v56  ;;  %v4899_v18 = vpop.f32.mrf.mxu0 }
 0x4e3   :  { %v5039_v43 = vpop.f32.mrf.mxu1  ;;  %v13331_v22 = vmul.f32 0.5, %v4899_v18 }
 0x4e4   :  { %v13275_v29 = vmul.f32 0.5, %v5039_v43  ;;  %v13309_v43 = vpop.permute.xlu2 %9807 }
 0x4e5   :  { %15752 = vst [vmem:[#allocation95_spill] sm:$0xff] %v13309_v43  ;;  %v5502_v3 = vsel %vm1305_vm1, %v13331_v22, -inf }
 0x4e6   :  { %5473 = vmax.xlane.f32.xlu2 %v5472_v36  ;;  %v5517_v8 = vsel %vm1305_vm1, %v13275_v29, -inf }
 0x4e8   :  { %v13283_v30 = vpop.f32.mrf.mxu3 }
 0x4e9   :  { %15747 = vst [vmem:[#allocation132_spill] sm:$0xff] %v13283_v30  ;;  %v13325_v45 = vpop.permute.xlu0 %6680 }
 0x4ea   :  { %15757 = vst [vmem:[#allocation74_spill] sm:$0xff] %v13325_v45  ;;  %v5011_v38 = vpop.f32.mrf.mxu0 }
 0x4eb   :  { %v13347_v51 = vmul.f32 0.5, %v5011_v38 }
 0x4ee   :  { %5518 = vmax.xlane.f32.xlu2 %v5517_v8  ;;  %v13313_v8 = vpop.permute.xlu1 %9812 }
 0x4f0   :  { %v13297_v13 = vpop.f32.mrf.mxu3 }
 0x4f1   :  { %15748 = vst [vmem:[#allocation22_spill] sm:$0xff] %v13297_v13 }
 0x4f6   :  { %5470 = vmax.xlane.f32.xlu1 %v5469_v42  ;;  %v13321_v33 = vpop.permute.xlu1 %9827 }
 0x4f7   :  { %15756 = vst [vmem:[#allocation31_spill] sm:$0xff] %v13321_v33 }
 0x4f8   :  { %v13307_v36 = vpop.f32.mrf.mxu3 }
 0x4f9   :  { %15751 = vst [vmem:[#allocation87_spill] sm:$0xff] %v13307_v36 }
 0x4fe   :  { %5479 = vmax.xlane.f32.xlu1 %v5478_v52  ;;  %v13319_v52 = vpop.permute.xlu2 %9822  ;;  %v13335_v53 = vpop.permute.xlu1 %6678 }
 0x4ff   :  { %15755 = vst [vmem:[#allocation20_spill] sm:$0xff] %v13319_v52 }
 0x500   :  { %15759 = vst [vmem:[#allocation133_spill] sm:$0xff] %v13335_v53 }
 0x506   :  { %5506 = vmax.xlane.f32.xlu1 %v5505_v58  ;;  %v13329_v58 = vpop.permute.xlu2 %6652 }
 0x507   :  { %15758 = vst [vmem:[#allocation117_spill] sm:$0xff] %v13329_v58 }
 0x50b   :  { %v13315_v42 = vpop.f32.mrf.mxu3 }
 0x50c   :  { %15753 = vst [vmem:[#allocation131_spill] sm:$0xff] %v13315_v42  ;;  %v4731_v42 = vpop.f32.mrf.mxu2 }
 0x50d   :  { %v13345_v18 = vmul.f32 0.5, %v4731_v42  ;;  %v5514_v42 = vsel %vm1305_vm1, %v13347_v51, -inf }
 0x50e   :  { %v13343_v36 = vpop.permute.xlu2 %6706 }
 0x50f   :  { %15761 = vst [vmem:[#allocation149_spill] sm:$0xff] %v13343_v36 }
 0x513   :  { %v4647_v54 = vpop.f32.mrf.mxu3 }
 0x514   :  { %v13323_v13 = vmul.f32 0.5, %v4647_v54  ;;  %v4843_v61 = vpop.f32.mrf.mxu2 }
 0x515   :  { %v13365_v48 = vmul.f32 0.5, %v4843_v61 }
 0x516   :  { %v5475_v47 = vsel %vm1305_vm1, %v13323_v13, -inf  ;;  %v13367_v60 = vpop.permute.xlu2 %6736 }
 0x517   :  { %5476 = vmax.xlane.f32.xlu0 %v5475_v47  ;;  %v13341_v47 = vpop.permute.xlu0 %6734  ;;  %15764 = vst [vmem:[#allocation4_spill] sm:$0xff] %v13367_v60 }
 0x518   :  { %15760 = vst [vmem:[#allocation138_spill] sm:$0xff] %v13341_v47  ;;  %v13357_v47 = vpop.permute.xlu1 %6708 }
 0x519   :  { %15762 = vst [vmem:[#allocation25_spill] sm:$0xff] %v13357_v47 }
 0x51b   :  { %v4759_v4 = vpop.f32.mrf.mxu3 }
 0x51c   :  { %v13333_v30 = vmul.f32 0.5, %v4759_v4  ;;  %v5151_v4 = vpop.f32.mrf.mxu1  ;;  %v4955_v47 = vpop.f32.mrf.mxu2 }
 0x51e   :  { %v5487_v54 = vsel %vm1305_vm1, %v13333_v30, -inf  ;;  %v13389_v0 = vpop.permute.xlu2 %6790 }
 0x51f   :  { %5488 = vmax.xlane.f32.xlu1 %v5487_v54  ;;  %5503 = vmax.xlane.f32.xlu0 %v5502_v3  ;;  %v5484_v54 = vsel %vm1305_vm1, %v13345_v18, -inf  ;;  %v5123_v3 = vpop.f32.mrf.mxu0  ;;  %v13359_v38 = vpop.permute.xlu0 %6764  ;;  %15767 = vst [vmem:[#allocation140_spill] sm:$0xff] %v13389_v0 }
 0x520   :  { %15763 = vst [vmem:[#allocation29_spill] sm:$0xff] %v13359_v38  ;;  %v13363_v36 = vmul.f32 0.5, %v5123_v3  ;;  %v13375_v3 = vmul.f32 0.5, %v4955_v47  ;;  %v13377_v61 = vpop.permute.xlu1 %6762 }
 0x521   :  { %15765 = vst [vmem:[#allocation94_spill] sm:$0xff] %v13377_v61 }
 0x523   :  { %v4871_v1 = vpop.f32.mrf.mxu3 }
 0x524   :  { %v13349_v19 = vmul.f32 0.5, %v4871_v1  ;;  %v13361_v1 = vmul.f32 0.5, %v5151_v4  ;;  %v5263_v53 = vpop.f32.mrf.mxu1  ;;  %v5496_v4 = vsel %vm1305_vm1, %v13365_v48, -inf  ;;  %v5067_v2 = vpop.f32.mrf.mxu2 }
 0x525   :  { %v13381_v60 = vmul.f32 0.5, %v5263_v53 }
 0x526   :  { %v5499_v49 = vsel %vm1305_vm1, %v13349_v19, -inf }
 0x527   :  { %5500 = vmax.xlane.f32.xlu2 %v5499_v49  ;;  %5485 = vmax.xlane.f32.xlu0 %v5484_v54  ;;  %v5529_v49 = vsel %vm1305_vm1, %v13361_v1, -inf  ;;  %v5526_v54 = vsel %vm1305_vm1, %v13363_v36, -inf  ;;  %v13383_v23 = vpop.permute.xlu0 %6818  ;;  %v5235_v33 = vpop.f32.mrf.mxu0  ;;  %v5541_v47 = vsel %vm1305_vm1, %v13381_v60, -inf }
 0x528   :  { %5515 = vmax.xlane.f32.xlu1 %v5514_v42  ;;  %15766 = vst [vmem:[#allocation110_spill] sm:$0xff] %v13383_v23  ;;  %v13393_v53 = vmul.f32 0.5, %v5235_v33  ;;  %v13399_v61 = vpop.permute.xlu1 %6792 }
 0x529   :  { %15768 = vst [vmem:[#allocation143_spill] sm:$0xff] %v13399_v61 }
 0x52a   :  { %v5538_v0 = vsel %vm1305_vm1, %v13393_v53, -inf }
 0x52b   :  { %v4983_v56 = vpop.f32.mrf.mxu3 }
 0x52c   :  { %v13379_v42 = vmul.f32 0.5, %v4983_v56 }
 0x52e   :  { %v5511_v41 = vsel %vm1305_vm1, %v13379_v42, -inf }
 0x52f   :  { %5530 = vmax.xlane.f32.xlu0 %v5529_v49  ;;  %5527 = vmax.xlane.f32.xlu2 %v5526_v54  ;;  %v5508_v49 = vsel %vm1305_vm1, %v13375_v3, -inf  ;;  %v5375_v54 = vpop.f32.mrf.mxu1  ;;  %v13401_v38 = vpop.permute.xlu0 %6848 }
 0x530   :  { %5497 = vmax.xlane.f32.xlu1 %v5496_v4  ;;  %v13395_v4 = vmul.f32 0.5, %v5375_v54  ;;  %15769 = vst [vmem:[#allocation145_spill] sm:$0xff] %v13401_v38  ;;  %v5347_v33 = vpop.f32.mrf.mxu0  ;;  %v13409_v54 = vpop.permute.xlu2 %6820 }
 0x531   :  { %15770 = vst [vmem:[#allocation156_spill] sm:$0xff] %v13409_v54  ;;  %v13415_v38 = vpop.permute.xlu1 %6846  ;;  %v15777_v54 = vld [vmem:[#allocation58_spill] sm:$0xff] }
 0x532   :  { %15771 = vst [vmem:[#allocation24_spill] sm:$0xff] %v13415_v38 }
 0x533   :  { %v5095_v56 = vpop.f32.mrf.mxu3 }
 0x534   :  { %v13397_v23 = vmul.f32 0.5, %v5095_v56  ;;  %v13413_v56 = vmul.f32 0.5, %v5347_v33 }
 0x536   :  { %v5550_v10 = vsel %vm1305_vm1, %v13413_v56, -inf }
 0x537   :  { %5512 = vmax.xlane.f32.xlu0 %v5511_v41  ;;  %5509 = vmax.xlane.f32.xlu2 %v5508_v49  ;;  %v5553_v41 = vsel %vm1305_vm1, %v13395_v4, -inf  ;;  %v5523_v49 = vsel %vm1305_vm1, %v13397_v23, -inf  ;;  %v13421_v24 = vpop.permute.xlu0 %6902 }
 0x538   :  { %5542 = vmax.xlane.f32.xlu1 %v5541_v47  ;;  %v13411_v47 = vmul.f32 0.5, %v5067_v2  ;;  %15772 = vst [vmem:[#allocation37_spill] sm:$0xff] %v13421_v24 }
 0x539   :  { %v13429_v33 = vpop.permute.xlu1 %6876 }
 0x53a   :  { %v5520_v61 = vsel %vm1305_vm1, %v13411_v47, -inf  ;;  %15774 = vst [vmem:[#allocation134_spill] sm:$0xff] %v13429_v33 }
 0x53f   :  { %5554 = vmax.xlane.f32.xlu2 %v5553_v41  ;;  %5539 = vmax.xlane.f32.xlu0 %v5538_v0  ;;  %v5179_v0 = vpop.f32.mrf.mxu2  ;;  %v13423_v41 = vpop.permute.xlu2 %6874 }
 0x540   :  { %5524 = vmax.xlane.f32.xlu1 %v5523_v49  ;;  %15773 = vst [vmem:[#allocation3_spill] sm:$0xff] %v13423_v41  ;;  %v13425_v49 = vmul.f32 0.5, %v5179_v0  ;;  %v13431_v38 = vpop.permute.xlu0 %6932 }
 0x541   :  { %15775 = vst [vmem:[#allocation136_spill] sm:$0xff] %v13431_v38  ;;  %v13437_v24 = vpop.permute.xlu1 %6930  ;;  %v15785_v38 = vld [vmem:[#allocation60_spill] sm:$0xff] }
 0x542   :  { %v5532_v2 = vsel %vm1305_vm1, %v13425_v49, -inf  ;;  %15778 = vst [vmem:[#allocation150_spill] sm:$0xff] %v13437_v24 }
 0x547   :  { %5521 = vmax.xlane.f32.xlu0 %v5520_v61  ;;  %v13433_v61 = vpop.permute.xlu2 %6904 }
 0x548   :  { %5551 = vmax.xlane.f32.xlu1 %v5550_v10  ;;  %15776 = vst [vmem:[#allocation147_spill] sm:$0xff] %v13433_v61  ;;  %v15779_v10 = vld [vmem:[#allocation48_spill] sm:$0xff]  ;;  %v13441_v0 = vpop.permute.xlu0 %6986 }
 0x549   :  { %15780 = vst [vmem:[#allocation155_spill] sm:$0xff] %v13441_v0  ;;  %v13445_v58 = vpop.permute.xlu1 %6960 }
 0x54a   :  { %15782 = vst [vmem:[#allocation33_spill] sm:$0xff] %v13445_v58 }
 0x54f   :  { %v13443_v41 = vpop.permute.xlu2 %6958 }
 0x550   :  { %5533 = vmax.xlane.f32.xlu1 %v5532_v2  ;;  %15781 = vst [vmem:[#allocation163_spill] sm:$0xff] %v13443_v41  ;;  %v13447_v33 = vpop.permute.xlu0 %7016  ;;  %v5291_v41 = vpop.f32.mrf.mxu2 }
 0x551   :  { %15783 = vst [vmem:[#allocation32_spill] sm:$0xff] %v13447_v33  ;;  %v13453_v61 = vpop.permute.xlu1 %7014 }
 0x552   :  { %15786 = vst [vmem:[#allocation141_spill] sm:$0xff] %v13453_v61 }
 0x557   :  { %7378 = vrot.lane.b32.xlu2 %v15777_v54, %s10431_s2  ;;  %v13449_v2 = vpop.permute.xlu2 %6988 }
 0x558   :  { %15784 = vst [vmem:[#allocation12_spill] sm:$0xff] %v13449_v2  ;;  %v13455_v54 = vpop.permute.xlu0 %7070 }
 0x559   :  { %15787 = vst [vmem:[#allocation146_spill] sm:$0xff] %v13455_v54  ;;  %v13459_v25 = vpop.permute.xlu1 %7044 }
 0x55a   :  { %15789 = vst [vmem:[#allocation157_spill] sm:$0xff] %v13459_v25 }
 0x55b   :  { %7352 = vrot.lane.b32.xlu0 %v15779_v10, %s10431_s2  ;;  %v5207_v10 = vpop.f32.mrf.mxu3 }
 0x55c   :  { %v13463_v58 = vmul.f32 0.5, %v5207_v10  ;;  %v5403_v10 = vpop.f32.mrf.mxu2 }
 0x55d   :  { %v13483_v7 = vmul.f32 0.5, %v5403_v10 }
 0x55f   :  { %v13457_v24 = vpop.permute.xlu2 %7042 }
 0x560   :  { %15788 = vst [vmem:[#allocation154_spill] sm:$0xff] %v13457_v24  ;;  %v13461_v0 = vpop.permute.xlu0 %7100  ;;  %v13473_v24 = vmul.f32 0.5, %v5291_v41  ;;  %v5556_v41 = vsel %vm1305_vm1, %v13483_v7, -inf }
 0x561   :  { %15790 = vst [vmem:[#allocation162_spill] sm:$0xff] %v13461_v0  ;;  %v13471_v54 = vpop.permute.xlu1 %7098 }
 0x562   :  { %15792 = vst [vmem:[#allocation43_spill] sm:$0xff] %v13471_v54 }
 0x563   :  { %v5319_v2 = vpop.f32.mrf.mxu3 }
 0x564   :  { %v13469_v27 = vmul.f32 0.5, %v5319_v2 }
 0x566   :  { %v5547_v25 = vsel %vm1305_vm1, %v13469_v27, -inf }
 0x567   :  { %v13465_v33 = vpop.permute.xlu2 %7072 }
 0x568   :  { %15791 = vst [vmem:[#allocation28_spill] sm:$0xff] %v13465_v33  ;;  %v13475_v61 = vpop.permute.xlu0 %7154  ;;  %v5544_v33 = vsel %vm1305_vm1, %v13473_v24, -inf }
 0x569   :  { %7350 = vrot.lane.b32.xlu1 %v15785_v38, %s10431_s2  ;;  %v5535_v38 = vsel %vm1305_vm1, %v13463_v58, -inf  ;;  %15793 = vst [vmem:[#allocation13_spill] sm:$0xff] %v13475_v61 }
 0x56b   :  { %v5431_v2 = vpop.f32.mrf.mxu3 }
 0x56c   :  { %v13491_v54 = vmul.f32 0.5, %v5431_v2  ;;  %v15803_v2 = vld [vmem:[#allocation61_spill] sm:$0xff] }
 0x56f   :  { %v13479_v0 = vpop.permute.xlu2 %7126 }
 0x570   :  { %15794 = vst [vmem:[#allocation148_spill] sm:$0xff] %v13479_v0  ;;  %v13489_v61 = vpop.permute.xlu0 %7184  ;;  %v5559_v0 = vsel %vm1305_vm1, %v13491_v54, -inf }
 0x571   :  { %15796 = vst [vmem:[#allocation164_spill] sm:$0xff] %v13489_v61 }
 0x580   :  { %5536 = vmax.xlane.f32.xlu2 %v5535_v38  ;;  %v13485_v38 = vpop.permute.xlu1 %7128 }
 0x581   :  { %15795 = vst [vmem:[#allocation153_spill] sm:$0xff] %v13485_v38 }
 0x585   :  { %5548 = vmax.xlane.f32.xlu0 %v5547_v25  ;;  %v13493_v25 = vpop.permute.xlu2 %7156 }
 0x586   :  { %15797 = vst [vmem:[#allocation44_spill] sm:$0xff] %v13493_v25 }
 0x588   :  { %5545 = vmax.xlane.f32.xlu2 %v5544_v33  ;;  %v13497_v10 = vpop.permute.xlu1 %7182  ;;  %v13499_v33 = vpop.permute.xlu0 %7238 }
 0x589   :  { %15798 = vst [vmem:[#allocation34_spill] sm:$0xff] %v13497_v10  ;;  %v15807_v10 = vld [vmem:[#allocation55_spill] sm:$0xff] }
 0x58a   :  { %15799 = vst [vmem:[#allocation19_spill] sm:$0xff] %v13499_v33 }
 0x58d   :  { %5557 = vmax.xlane.f32.xlu0 %v5556_v41  ;;  %v13501_v12 = vpop.permute.xlu2 %7210  ;;  %v15802_v41 = vld [vmem:[#allocation50_spill] sm:$0xff] }
 0x58e   :  { %15800 = vst [vmem:[#allocation158_spill] sm:$0xff] %v13501_v12 }
 0x590   :  { %v13503_v38 = vpop.permute.xlu1 %7212  ;;  %v13509_v61 = vpop.permute.xlu0 %7268 }
 0x591   :  { %15801 = vst [vmem:[#allocation160_spill] sm:$0xff] %v13503_v38  ;;  %v15810_v38 = vld [vmem:[#allocation45_spill] sm:$0xff] }
 0x592   :  { %15804 = vst [vmem:[#allocation30_spill] sm:$0xff] %v13509_v61  ;;  %v15813_v61 = vld [vmem:[#allocation63_spill] sm:$0xff] }
 0x593   :  { %5560 = vmax.xlane.f32.xlu1 %v5559_v0  ;;  %v15806_v0 = vld [vmem:[#allocation64_spill] sm:$0xff] }
 0x595   :  { %v13511_v25 = vpop.permute.xlu2 %7240 }
 0x596   :  { %15805 = vst [vmem:[#allocation53_spill] sm:$0xff] %v13511_v25 }
 0x598   :  { %v13517_v33 = vpop.permute.xlu1 %7266  ;;  %v13519_v12 = vpop.permute.xlu0 %7322 }
 0x599   :  { %15808 = vst [vmem:[#allocation18_spill] sm:$0xff] %v13517_v33 }
 0x59a   :  { %15809 = vst [vmem:[#allocation165_spill] sm:$0xff] %v13519_v12  ;;  %v15817_v12 = vld [vmem:[#allocation57_spill] sm:$0xff] }
 0x5a0   :  { %7408 = vrot.lane.b32.xlu2 %v15802_v41, %s10431_s2  ;;  %v13523_v41 = vpop.permute.xlu2 %7294  ;;  %v13529_v25 = vpop.permute.xlu1 %7296 }
 0x5a1   :  { %7406 = vrot.lane.b32.xlu0 %v15803_v2, %s10431_s2  ;;  %15811 = vst [vmem:[#allocation49_spill] sm:$0xff] %v13523_v41  ;;  %v15812_v2 = vld [vmem:[#allocation56_spill] sm:$0xff] }
 0x5a2   :  { %15814 = vst [vmem:[#allocation38_spill] sm:$0xff] %v13529_v25 }
 0x5a8   :  { %7462 = vrot.lane.b32.xlu2 %v15806_v0, %s10431_s2  ;;  %v15815_v0 = vld [vmem:[#allocation62_spill] sm:$0xff]  ;;  %v13533_v33 = vpop.permute.xlu2 %7324  ;;  %v5471_v41 = vpop.xlane.xlu1 %5470 }
 0x5a9   :  { %7436 = vrot.lane.b32.xlu0 %v15807_v10, %s10431_s2  ;;  %v5468_v10 = vpop.xlane.xlu0 %5467  ;;  %15816 = vst [vmem:[#allocation23_spill] sm:$0xff] %v13533_v33 }
 0x5ac   :  { %7380 = vrot.lane.b32.xlu1 %v15810_v38, %s10431_s2  ;;  %v15818_v38 = vld [vmem:[#allocation59_spill] sm:$0xff] }
 0x5b0   :  { %7492 = vrot.lane.b32.xlu2 %v15812_v2, %s10431_s2  ;;  %v5483_v2 = vpop.xlane.xlu2 %5482  ;;  %v5480_v25 = vpop.xlane.xlu1 %5479 }
 0x5b1   :  { %7490 = vrot.lane.b32.xlu0 %v15813_v61, %s10431_s2  ;;  %v5495_v45 = vpop.xlane.xlu0 %5494  ;;  %v5562_v61 = vsub.f32 %v13241_v46, %v5468_v10  ;;  %v5566_v10 = vsub.f32 %v13293_v59, %v5480_v25 }
 0x5b2   :  { %v5571_v33 = vsub.f32 %v13255_v55, %v5495_v45 }
 0x5b4   :  { %7434 = vrot.lane.b32.xlu1 %v15815_v0, %s10431_s2  ;;  %v5594_v0 = vmul.f32 1.442695, %v5562_v61  ;;  %v5602_v61 = vmul.f32 1.442695, %v5566_v10 }
 0x5b6   :  { %10173 = vpow2.f32 %v5594_v0 }
 0x5b8   :  { %v5492_v16 = vpop.xlane.xlu2 %5491  ;;  %v5507_v44 = vpop.xlane.xlu1 %5506 }
 0x5b9   :  { %7520 = vrot.lane.b32.xlu0 %v15817_v12, %s10431_s2  ;;  %v5477_v43 = vpop.xlane.xlu0 %5476  ;;  %v5563_v12 = vsub.f32 %v13285_v50, %v5471_v41  ;;  %v5567_v50 = vsub.f32 %v13243_v26, %v5483_v2  ;;  %v5575_v59 = vsub.f32 %v13303_v5, %v5507_v44  ;;  %v5570_v2 = vsub.f32 %v13261_v62, %v5492_v16 }
 0x5bb   :  { %v5596_v15 = vmul.f32 1.442695, %v5563_v12  ;;  %v5610_v5 = vmul.f32 1.442695, %v5570_v2 }
 0x5bc   :  { %7464 = vrot.lane.b32.xlu1 %v15818_v38, %s10431_s2  ;;  %v5612_v38 = vmul.f32 1.442695, %v5571_v33  ;;  %v13544_v6 = vpop.eup %10173 }
 0x5bd   :  { %v5658_v46 = vsel %vm1305_vm1, %v13544_v6, 0.0 }
 0x5be   :  { %10175 = vpow2.f32 %v5612_v38 }
 0x5bf   :  { %10177 = vpow2.f32 %v5596_v15 }
 0x5c0   :  { %v5474_v20 = vpop.xlane.xlu2 %5473  ;;  %v5489_v45 = vpop.xlane.xlu1 %5488 }
 0x5c1   :  { %v5504_v52 = vpop.xlane.xlu0 %5503 }
 0x5c4   :  { %7518 = vrot.lane.b32.xlu1 %v15819_v32, %s10431_s2  ;;  %v5565_v32 = vsub.f32 %v13323_v13, %v5477_v43  ;;  %v13551_v33 = vpop.eup %10175  ;;  %v5574_v13 = vsub.f32 %v13331_v22, %v5504_v52  ;;  %v5604_v43 = vmul.f32 1.442695, %v5567_v50  ;;  %v5620_v22 = vmul.f32 1.442695, %v5575_v59 }
 0x5c5   :  { %v13553_v0 = vpop.eup %10177  ;;  %v5685_v15 = vsel %vm1305_vm1, %v13551_v33, 0.0  ;;  %v5569_v50 = vsub.f32 %v13333_v30, %v5489_v45 }
 0x5c6   :  { %v5600_v55 = vmul.f32 1.442695, %v5565_v32  ;;  %v5661_v26 = vsel %vm1305_vm1, %v13553_v0, 0.0  ;;  %v5618_v25 = vmul.f32 1.442695, %v5574_v13  ;;  %v5564_v13 = vsub.f32 %v13267_v17, %v5474_v20 }
 0x5c8   :  { %v5519_v12 = vpop.xlane.xlu2 %5518  ;;  %10179 = vpow2.f32 %v5600_v55  ;;  %v5516_v38 = vpop.xlane.xlu1 %5515  ;;  %v5598_v59 = vmul.f32 1.442695, %v5564_v13 }
 0x5c9   :  { %v5486_v41 = vpop.xlane.xlu0 %5485  ;;  %10181 = vpow2.f32 %v5602_v61  ;;  %v5578_v17 = vsub.f32 %v13347_v51, %v5516_v38 }
 0x5ca   :  { %10183 = vpow2.f32 %v5604_v43  ;;  %v5568_v44 = vsub.f32 %v13345_v18, %v5486_v41  ;;  %v5608_v18 = vmul.f32 1.442695, %v5569_v50 }
 0x5cb   :  { %10185 = vpow2.f32 %v5618_v25 }
 0x5cc   :  { %10187 = vpow2.f32 %v5620_v22  ;;  %v5606_v61 = vmul.f32 1.442695, %v5568_v44 }
 0x5cd   :  { %10189 = vpow2.f32 %v5610_v5  ;;  %v5626_v5 = vmul.f32 1.442695, %v5578_v17 }
 0x5ce   :  { %v13562_v32 = vpop.eup %10179  ;;  %10191 = vpow2.f32 %v5606_v61 }
 0x5cf   :  { %v5667_v55 = vsel %vm1305_vm1, %v13562_v32, 0.0  ;;  %10193 = vpow2.f32 %v5608_v18 }
 0x5d0   :  { %v5501_v10 = vpop.xlane.xlu2 %5500  ;;  %10195 = vpow2.f32 %v5598_v59 }
 0x5d1   :  { %v5531_v52 = vpop.xlane.xlu0 %5530 }
 0x5d2   :  { %v5583_v45 = vsub.f32 %v13361_v1, %v5531_v52  ;;  %v5579_v1 = vsub.f32 %v13275_v29, %v5519_v12 }
 0x5d4   :  { %v5636_v44 = vmul.f32 1.442695, %v5583_v45  ;;  %v5628_v50 = vmul.f32 1.442695, %v5579_v1 }
 0x5d6   :  { %10197 = vpow2.f32 %v5636_v44 }
 0x5d7   :  { %10199 = vpow2.f32 %v5626_v5 }
 0x5d8   :  { %v5528_v20 = vpop.xlane.xlu2 %5527  ;;  %10201 = vpow2.f32 %v5628_v50 }
 0x5d9   :  { %5659 = vadd.xlane.f32.xlu2 %v5658_v46  ;;  %v13564_v46 = vpop.eup %10181 }
 0x5da   :  { %v13570_v16 = vpop.eup %10183  ;;  %v5670_v62 = vsel %vm1305_vm1, %v13564_v46, 0.0 }
 0x5db   :  { %v13575_v43 = vpop.eup %10185  ;;  %v5673_v41 = vsel %vm1305_vm1, %v13570_v16, 0.0 }
 0x5dc   :  { %v13579_v30 = vpop.eup %10187  ;;  %v5694_v25 = vsel %vm1305_vm1, %v13575_v43, 0.0 }
 0x5dd   :  { %v13585_v2 = vpop.eup %10189  ;;  %v5697_v22 = vsel %vm1305_vm1, %v13579_v30, 0.0 }
 0x5de   :  { %v13590_v52 = vpop.eup %10191 }
 0x5df   :  { %v13594_v51 = vpop.eup %10193  ;;  %v5676_v61 = vsel %vm1305_vm1, %v13590_v52, 0.0 }
 0x5e0   :  { %v13600_v12 = vpop.eup %10195  ;;  %v5679_v18 = vsel %vm1305_vm1, %v13594_v51, 0.0  ;;  %v5510_v45 = vpop.xlane.xlu2 %5509 }
 0x5e1   :  { %5686 = vadd.xlane.f32.xlu2 %v5685_v15  ;;  %v5498_v15 = vpop.xlane.xlu1 %5497  ;;  %v13605_v59 = vpop.eup %10197 }
 0x5e2   :  { %v5572_v29 = vsub.f32 %v13365_v48, %v5498_v15  ;;  %v13609_v48 = vpop.eup %10199 }
 0x5e3   :  { %5662 = vadd.xlane.f32.xlu0 %v5661_v26  ;;  %v5513_v26 = vpop.xlane.xlu0 %5512  ;;  %v5706_v1 = vsel %vm1305_vm1, %v13609_v48, 0.0 }
 0x5e4   :  { %v5577_v38 = vsub.f32 %v13379_v42, %v5513_v26  ;;  %v5573_v42 = vsub.f32 %v13349_v19, %v5501_v10  ;;  %v5614_v26 = vmul.f32 1.442695, %v5572_v29  ;;  %v13615_v19 = vpop.eup %10201 }
 0x5e6   :  { %v5616_v17 = vmul.f32 1.442695, %v5573_v42 }
 0x5e9   :  { %5668 = vadd.xlane.f32.xlu2 %v5667_v55  ;;  %v5682_v55 = vsel %vm1305_vm1, %v13585_v2, 0.0 }
 0x5eb   :  { %5671 = vadd.xlane.f32.xlu0 %v5670_v62  ;;  %v5543_v62 = vpop.xlane.xlu1 %5542  ;;  %v5540_v13 = vpop.xlane.xlu0 %5539 }
 0x5ec   :  { %v5586_v15 = vsub.f32 %v13393_v53, %v5540_v13  ;;  %v5587_v44 = vsub.f32 %v13381_v60, %v5543_v62  ;;  %v5709_v60 = vsel %vm1305_vm1, %v13615_v19, 0.0 }
 0x5ee   :  { %5674 = vadd.xlane.f32.xlu1 %v5673_v41  ;;  %v5624_v41 = vmul.f32 1.442695, %v5577_v38  ;;  %v5642_v5 = vmul.f32 1.442695, %v5586_v15  ;;  %v5644_v50 = vmul.f32 1.442695, %v5587_v44 }
 0x5f0   :  { %10203 = vpow2.f32 %v5624_v41 }
 0x5f1   :  { %5695 = vadd.xlane.f32.xlu2 %v5694_v25  ;;  %v5664_v25 = vsel %vm1305_vm1, %v13600_v12, 0.0  ;;  %10205 = vpow2.f32 %v5614_v26  ;;  %v5576_v26 = vsub.f32 %v13375_v3, %v5510_v45 }
 0x5f2   :  { %10207 = vpow2.f32 %v5616_v17 }
 0x5f3   :  { %5698 = vadd.xlane.f32.xlu0 %v5697_v22  ;;  %v5721_v22 = vsel %vm1305_vm1, %v13605_v59, 0.0  ;;  %v5525_v10 = vpop.xlane.xlu1 %5524  ;;  %v5522_v53 = vpop.xlane.xlu0 %5521  ;;  %10209 = vpow2.f32 %v5642_v5  ;;  %v5622_v44 = vmul.f32 1.442695, %v5576_v26 }
 0x5f4   :  { %v5580_v29 = vsub.f32 %v13411_v47, %v5522_v53  ;;  %10211 = vpow2.f32 %v5644_v50 }
 0x5f6   :  { %5683 = vadd.xlane.f32.xlu1 %v5682_v55  ;;  %v5582_v55 = vsub.f32 %v13363_v36, %v5528_v20  ;;  %v13620_v38 = vpop.eup %10203  ;;  %v5581_v36 = vsub.f32 %v13397_v23, %v5525_v10  ;;  %v5630_v42 = vmul.f32 1.442695, %v5580_v29 }
 0x5f7   :  { %v13624_v62 = vpop.eup %10205 }
 0x5f8   :  { %v5634_v13 = vmul.f32 1.442695, %v5582_v55  ;;  %v13630_v20 = vpop.eup %10207  ;;  %v5688_v41 = vsel %vm1305_vm1, %v13624_v62, 0.0  ;;  %v5632_v15 = vmul.f32 1.442695, %v5581_v36 }
 0x5f9   :  { %5677 = vadd.xlane.f32.xlu2 %v5676_v61  ;;  %v5555_v61 = vpop.xlane.xlu2 %5554  ;;  %v13635_v47 = vpop.eup %10209  ;;  %v5691_v17 = vsel %vm1305_vm1, %v13630_v20, 0.0 }
 0x5fa   :  { %10213 = vpow2.f32 %v5634_v13  ;;  %v13639_v23 = vpop.eup %10211  ;;  %v5730_v10 = vsel %vm1305_vm1, %v13635_v47, 0.0  ;;  %v5591_v5 = vsub.f32 %v13395_v4, %v5555_v61 }
 0x5fb   :  { %5680 = vadd.xlane.f32.xlu0 %v5679_v18  ;;  %v5703_v18 = vsel %vm1305_vm1, %v13620_v38, 0.0  ;;  %10215 = vpow2.f32 %v5630_v42  ;;  %v13655_v29 = vpop.permute.xlu0 %7352 }
 0x5fc   :  { %10217 = vpow2.f32 %v5632_v15 }
 0x5fd   :  { %10219 = vpow2.f32 %v5622_v44 }
 0x5fe   :  { %5665 = vadd.xlane.f32.xlu1 %v5664_v25  ;;  %v5552_v25 = vpop.xlane.xlu1 %5551 }
 0x5ff   :  { %v5590_v3 = vsub.f32 %v13413_v56, %v5552_v25 }
 0x600   :  { %v13646_v45 = vpop.eup %10213 }
 0x601   :  { %5722 = vadd.xlane.f32.xlu2 %v5721_v22  ;;  %v13641_v22 = vpop.permute.xlu2 %7378  ;;  %v13651_v55 = vpop.eup %10215  ;;  %v5650_v53 = vmul.f32 1.442695, %v5590_v3  ;;  %v5718_v50 = vsel %vm1305_vm1, %v13646_v45, 0.0 }
 0x602   :  { %15820 = vst [vmem:[#allocation40_spill] sm:$0xff] %v13641_v22  ;;  %v13657_v56 = vpop.eup %10217  ;;  %v5712_v36 = vsel %vm1305_vm1, %v13651_v55, 0.0 }
 0x603   :  { %5707 = vadd.xlane.f32.xlu0 %v5706_v1  ;;  %v5733_v1 = vsel %vm1305_vm1, %v13639_v23, 0.0  ;;  %10221 = vpow2.f32 %v5650_v53  ;;  %v13662_v61 = vpop.eup %10219  ;;  %v5549_v15 = vpop.xlane.xlu0 %5548 }
 0x604   :  { %v5700_v25 = vsel %vm1305_vm1, %v13662_v61, 0.0 }
 0x606   :  { %5710 = vadd.xlane.f32.xlu1 %v5709_v60  ;;  %v5534_v60 = vpop.xlane.xlu1 %5533 }
 0x607   :  { %v5584_v4 = vsub.f32 %v13425_v49, %v5534_v60 }
 0x609   :  { %5704 = vadd.xlane.f32.xlu2 %v5703_v18  ;;  %v5537_v13 = vpop.xlane.xlu2 %5536  ;;  %v5652_v18 = vmul.f32 1.442695, %v5591_v5  ;;  %v5638_v26 = vmul.f32 1.442695, %v5584_v4 }
 0x60a   :  { %v5585_v42 = vsub.f32 %v13463_v58, %v5537_v13 }
 0x60b   :  { %5689 = vadd.xlane.f32.xlu0 %v5688_v41  ;;  %v5715_v41 = vsel %vm1305_vm1, %v13657_v56, 0.0  ;;  %10223 = vpow2.f32 %v5652_v18  ;;  %v5558_v60 = vpop.xlane.xlu0 %5557 }
 0x60c   :  { %v5640_v44 = vmul.f32 1.442695, %v5585_v42  ;;  %10225 = vpow2.f32 %v5638_v26  ;;  %v15823_v42 = vld [vmem:[#allocation118_spill] sm:$0xff] }
 0x60e   :  { %5692 = vadd.xlane.f32.xlu1 %v5691_v17  ;;  %v13669_v17 = vpop.eup %10221  ;;  %10227 = vpow2.f32 %v5640_v44  ;;  %v13680_v53 = vpop.permute.xlu1 %7350 }
 0x60f   :  { %v5742_v3 = vsel %vm1305_vm1, %v13669_v17, 0.0 }
 0x611   :  { %5731 = vadd.xlane.f32.xlu2 %v5730_v10  ;;  %v5546_v49 = vpop.xlane.xlu2 %5545  ;;  %v13671_v10 = vpop.eup %10223 }
 0x612   :  { %v5588_v58 = vsub.f32 %v13473_v24, %v5546_v49  ;;  %v13678_v5 = vpop.eup %10225 }
 0x613   :  { %5734 = vadd.xlane.f32.xlu0 %v5733_v1  ;;  %v5745_v1 = vsel %vm1305_vm1, %v13671_v10, 0.0  ;;  %v5724_v18 = vsel %vm1305_vm1, %v13678_v5, 0.0  ;;  %v13690_v4 = vpop.permute.xlu0 %7406 }
 0x614   :  { %v13682_v13 = vpop.eup %10227  ;;  %15822 = vst [vmem:[#allocation54_spill] sm:$0xff] %v13690_v4 }
 0x615   :  { %v5727_v24 = vsel %vm1305_vm1, %v13682_v13, 0.0 }
 0x616   :  { %5719 = vadd.xlane.f32.xlu1 %v5718_v50  ;;  %v5646_v50 = vmul.f32 1.442695, %v5588_v58  ;;  %v15825_v58 = vld [vmem:[#allocation119_spill] sm:$0xff] }
 0x618   :  { %10229 = vpow2.f32 %v5646_v50 }
 0x619   :  { %5713 = vadd.xlane.f32.xlu2 %v5712_v36  ;;  %v13688_v36 = vpop.permute.xlu2 %7408 }
 0x61a   :  { %15821 = vst [vmem:[#allocation137_spill] sm:$0xff] %v13688_v36 }
 0x61b   :  { %5716 = vadd.xlane.f32.xlu0 %v5715_v41  ;;  %v5561_v41 = vpop.xlane.xlu1 %5560 }
 0x61e   :  { %5701 = vadd.xlane.f32.xlu1 %v5700_v25  ;;  %v13694_v26 = vpop.eup %10229 }
 0x61f   :  { %v5736_v25 = vsel %vm1305_vm1, %v13694_v26, 0.0 }
 0x621   :  { %v13700_v49 = vpop.permute.xlu2 %7462 }
 0x623   :  { %5743 = vadd.xlane.f32.xlu0 %v5742_v3  ;;  %v13698_v44 = vpop.permute.xlu1 %7380  ;;  %v13702_v3 = vpop.permute.xlu0 %7436 }
 0x624   :  { %15824 = vst [vmem:[#allocation21_spill] sm:$0xff] %v13698_v44 }
 0x626   :  { %5746 = vadd.xlane.f32.xlu1 %v5745_v1 }
 0x629   :  { %v13708_v50 = vpop.permute.xlu2 %7492 }
 0x62a   :  { %15826 = vst [vmem:[#allocation99_spill] sm:$0xff] %v13708_v50 }
 0x62b   :  { %5725 = vadd.xlane.f32.xlu0 %v5724_v18  ;;  %v13706_v1 = vpop.permute.xlu1 %7434  ;;  %v13710_v18 = vpop.permute.xlu0 %7490 }
 0x62c   :  { %15827 = vst [vmem:[#allocation52_spill] sm:$0xff] %v13710_v18 }
 0x62e   :  { %5728 = vadd.xlane.f32.xlu1 %v5727_v24  ;;  %v5589_v24 = vsub.f32 %v13469_v27, %v5549_v15  ;;  %v9774_v27 = vunpack.i.l.bf16 %v13269_v63 }
 0x631   :  { %9842 = vrot.lane.b32.xlu2 %v15823_v42, %s10431_s2  ;;  %v5648_v42 = vmul.f32 1.442695, %v5589_v24 }
 0x633   :  { %v13715_v22 = vpop.permute.xlu0 %7520 }
 0x636   :  { %5737 = vadd.xlane.f32.xlu1 %v5736_v25  ;;  %v13713_v25 = vpop.permute.xlu1 %7464 }
 0x63f   :  { %9837 = vrot.lane.b32.xlu0 %v15825_v58, %s10431_s2  ;;  %v5592_v58 = vsub.f32 %v13483_v7, %v5558_v60  ;;  %v13728_v7 = vpop.permute.xlu1 %7518 }
 0x641   :  { %v5654_v44 = vmul.f32 1.442695, %v5592_v58  ;;  %v9775_v58 = vunpack.i.h.bf16 %v13269_v63 }
 0x64c   :  { %v5660_v4 = vpop.xlane.xlu2 %5659 }
 0x64d   :  { %10231 = vrcp.f32 %v5660_v4  ;;  %v5593_v4 = vsub.f32 %v13491_v54, %v5561_v41 }
 0x64e   :  { %10233 = vpow2.f32 %v5648_v42 }
 0x64f   :  { %9832 = vrot.lane.b32.xlu1 %v15621_v21, %s10431_s2  ;;  %v15828_v21 = vld [vmem:[#allocation122_spill] sm:$0xff]  ;;  %v5656_v60 = vmul.f32 1.442695, %v5593_v4 }
 0x653   :  { %v10232_v36 = vpop.eup %10231 }
 0x654   :  { %v5786_v50 = vmul.f32 %v10232_v36, %v13544_v6  ;;  %v5687_v18 = vpop.xlane.xlu2 %5686  ;;  %v13722_v15 = vpop.eup %10233 }
 0x655   :  { %v5739_v6 = vsel %vm1305_vm1, %v13722_v15, 0.0 }
 0x656   :  { %9537 = vmatmul.msk.f32.vlgmr.msra.gmra.mxu0 %vm440_vm0, %v5786_v50  ;;  %v5663_v24 = vpop.xlane.xlu0 %5662 }
 0x657   :  { %6047 = vmatpush.msra.mxu0 %v9774_v27  ;;  %10235 = vrcp.f32 %v5663_v24  ;;  %9852 = vrot.lane.b32.xlu1 %v15828_v21, %s10431_s2  ;;  %v15829_v27 = vld [vmem:[#allocation124_spill] sm:$0xff] }
 0x658   :  { %10237 = vpow2.f32 %v5654_v44 }
 0x65a   :  { %5740 = vadd.xlane.f32.xlu2 %v5739_v6 }
 0x65c   :  { %v5669_v36 = vpop.xlane.xlu2 %5668 }
 0x65d   :  { %v10236_v42 = vpop.eup %10235  ;;  %10239 = vrcp.f32 %v5669_v36 }
 0x65e   :  { %v13732_v54 = vpop.eup %10237  ;;  %10241 = vpow2.f32 %v5656_v60  ;;  %v5787_v41 = vmul.f32 %v10236_v42, %v13553_v0  ;;  %v5672_v50 = vpop.xlane.xlu0 %5671  ;;  %v9780_v60 = vunpack.i.h.bf16 %v13281_v39 }
 0x65f   :  { %10243 = vrcp.f32 %v5672_v50  ;;  %9867 = vrot.lane.b32.xlu1 %v15829_v27, %s10431_s2  ;;  %v5748_v4 = vsel %vm1305_vm1, %v13732_v54, 0.0  ;;  %v15830_v50 = vld [vmem:[#allocation126_spill] sm:$0xff] }
 0x660   :  { %9538 = vmatmul.msk.f32.vlgmr.msra.gmra.mxu1 %vm440_vm0, %v5787_v41  ;;  %v9784_v41 = vunpack.i.l.bf16 %v13289_v9 }
 0x661   :  { %6073 = vmatpush.msra.mxu1 %v9775_v58  ;;  %v5675_v44 = vpop.xlane.xlu1 %5674 }
 0x662   :  { %10245 = vrcp.f32 %v5675_v44  ;;  %5749 = vadd.xlane.f32.xlu2 %v5748_v4  ;;  %v9785_v44 = vunpack.i.h.bf16 %v13289_v9  ;;  %v9795_v9 = vunpack.i.h.bf16 %v13295_v31 }
 0x663   :  { %v10240_v24 = vpop.eup %10239  ;;  %10247 = vrcp.f32 %v5687_v18 }
 0x664   :  { %v13741_v21 = vpop.eup %10241  ;;  %v5789_v0 = vmul.f32 %v10240_v24, %v13562_v32  ;;  %v5696_v6 = vpop.xlane.xlu2 %5695 }
 0x665   :  { %v10244_v63 = vpop.eup %10243  ;;  %v5751_v32 = vsel %vm1305_vm1, %v13741_v21, 0.0 }
 0x666   :  { %v5790_v36 = vmul.f32 %v10244_v63, %v13564_v46  ;;  %9540 = vmatmul.msk.f32.vlgmr.msra.gmra.mxu3 %vm440_vm0, %v5789_v0  ;;  %v5699_v42 = vpop.xlane.xlu0 %5698 }
 0x667   :  { %6125 = vmatpush.msra.mxu3 %v9780_v60  ;;  %9882 = vrot.lane.b32.xlu1 %v15830_v50, %s10431_s2 }
 0x668   :  { %v10246_v58 = vpop.eup %10245  ;;  %9541 = vmatmul.msk.f32.vlgmr.msrb.gmra.mxu0 %vm440_vm0, %v5790_v36  ;;  %v9794_v36 = vunpack.i.l.bf16 %v13295_v31 }
 0x669   :  { %v5791_v27 = vmul.f32 %v10246_v58, %v13570_v16  ;;  %6151 = vmatpush.msrb.mxu0 %v9784_v41  ;;  %v5684_v46 = vpop.xlane.xlu1 %5683  ;;  %5752 = vadd.xlane.f32.xlu0 %v5751_v32  ;;  %v10248_v24 = vpop.eup %10247 }
 0x66a   :  { %10249 = vrcp.f32 %v5684_v46  ;;  %v5795_v16 = vmul.f32 %v10248_v24, %v13551_v33 }
 0x66b   :  { %9542 = vmatmul.msk.f32.vlgmr.msrb.gmra.mxu1 %vm440_vm0, %v5791_v27  ;;  %v9779_v27 = vunpack.i.l.bf16 %v13281_v39 }
 0x66c   :  { %6177 = vmatpush.msrb.mxu1 %v9785_v44  ;;  %v5678_v4 = vpop.xlane.xlu2 %5677  ;;  %v15831_v44 = vld [vmem:[#allocation130_spill] sm:$0xff] }
 0x66e   :  { %v5681_v0 = vpop.xlane.xlu0 %5680 }
 0x66f   :  { %10251 = vrcp.f32 %v5681_v0  ;;  %9897 = vrot.lane.b32.xlu1 %v11961_v57, %s10431_s2 }
 0x670   :  { %v10250_v18 = vpop.eup %10249  ;;  %10253 = vrcp.f32 %v5696_v6 }
 0x671   :  { %10255 = vrcp.f32 %v5699_v42  ;;  %v5794_v63 = vmul.f32 %v10250_v18, %v13585_v2  ;;  %v5666_v60 = vpop.xlane.xlu1 %5665  ;;  %v9790_v2 = vunpack.i.h.bf16 %v13279_v35 }
 0x672   :  { %10257 = vrcp.f32 %v5666_v60 }
 0x673   :  { %9545 = vmatmul.msk.f32.vlgmr.msra.gmra.mxu0 %vm440_vm0, %v5794_v63  ;;  %9546 = vmatmul.msk.f32.vlgmr.msra.gmra.mxu1 %vm440_vm0, %v5795_v16  ;;  %10259 = vrcp.f32 %v5678_v4  ;;  %v9804_v4 = vunpack.i.l.bf16 %v13291_v34  ;;  %v9789_v63 = vunpack.i.l.bf16 %v13279_v35 }
 0x674   :  { %6255 = vmatpush.msra.mxu0 %v9794_v36  ;;  %6281 = vmatpush.msra.mxu1 %v9795_v9  ;;  %v5723_v50 = vpop.xlane.xlu2 %5722  ;;  %v15833_v36 = vld [vmem:[#allocation17_spill] sm:$0xff] }
 0x675   :  { %v10252_v57 = vpop.eup %10251 }
 0x676   :  { %v10254_v41 = vpop.eup %10253  ;;  %v5793_v6 = vmul.f32 %v10252_v57, %v13594_v51  ;;  %v5708_v33 = vpop.xlane.xlu0 %5707  ;;  %v9800_v57 = vunpack.i.h.bf16 %v15833_v36 }
 0x677   :  { %v10256_v42 = vpop.eup %10255  ;;  %8794 = vrot.lane.b32.xlu1 %v13140_v14, %s10432_s5  ;;  %10261 = vrcp.f32 %v5708_v33  ;;  %v5798_v58 = vmul.f32 %v10254_v41, %v13575_v43  ;;  %v9805_v14 = vunpack.i.h.bf16 %v13291_v34  ;;  %v9799_v41 = vunpack.i.l.bf16 %v15833_v36 }
 0x678   :  { %v10258_v31 = vpop.eup %10257  ;;  %9544 = vmatmul.msk.f32.vlgmr.msrb.gmra.mxu3 %vm440_vm0, %v5793_v6  ;;  %v5799_v46 = vmul.f32 %v10256_v42, %v13579_v30 }
 0x679   :  { %v5788_v32 = vmul.f32 %v10258_v31, %v13600_v12  ;;  %6229 = vmatpush.msrb.mxu3 %v9790_v2  ;;  %v5711_v51 = vpop.xlane.xlu1 %5710  ;;  %v10260_v43 = vpop.eup %10259  ;;  %v15836_v2 = vld [vmem:[#allocation123_spill] sm:$0xff] }
 0x67a   :  { %10263 = vrcp.f32 %v5711_v51  ;;  %9857 = vrot.lane.b32.xlu2 %v15831_v44, %s10431_s2  ;;  %v5792_v34 = vmul.f32 %v10260_v43, %v13590_v52 }
 0x67b   :  { %9539 = vmatmul.msk.f32.vlgmr.msra.gmra.mxu2 %vm440_vm0, %v5788_v32  ;;  %9549 = vmatmul.msk.f32.vlgmr.msrb.gmra.mxu0 %vm440_vm0, %v5798_v58 }
 0x67c   :  { %6099 = vmatpush.msra.mxu2 %v9779_v27  ;;  %9550 = vmatmul.msk.f32.vlgmr.msrb.gmra.mxu1 %vm440_vm0, %v5799_v46  ;;  %v5705_v18 = vpop.xlane.xlu2 %5704  ;;  %v15838_v46 = vld [vmem:[#allocation95_spill] sm:$0xff] }
 0x67d   :  { %6359 = vmatpush.msrb.mxu0 %v9804_v4  ;;  %6385 = vmatpush.msrb.mxu1 %v9805_v14  ;;  %v10262_v39 = vpop.eup %10261  ;;  %v9810_v44 = vunpack.i.h.bf16 %v15838_v46  ;;  %v15839_v4 = vld [vmem:[#allocation71_spill] sm:$0xff] }
 0x67e   :  { %9847 = vrot.lane.b32.xlu0 %v15626_v37, %s10431_s2  ;;  %v5690_v30 = vpop.xlane.xlu0 %5689  ;;  %v5802_v24 = vmul.f32 %v10262_v39, %v13609_v48  ;;  %v9815_v37 = vunpack.i.h.bf16 %v13313_v8  ;;  %v15840_v39 = vld [vmem:[#allocation74_spill] sm:$0xff] }
 0x67f   :  { %8800 = vrot.lane.b32.xlu1 %v13251_v28, %s10432_s5  ;;  %10265 = vrcp.f32 %v5690_v30  ;;  %v9814_v28 = vunpack.i.l.bf16 %v13313_v8  ;;  %v15841_v30 = vld [vmem:[#allocation125_spill] sm:$0xff] }
 0x680   :  { %v10264_v12 = vpop.eup %10263  ;;  %10267 = vrcp.f32 %v5723_v50 }
 0x681   :  { %v5803_v0 = vmul.f32 %v10264_v12, %v13615_v19  ;;  %v5693_v16 = vpop.xlane.xlu1 %5692 }
 0x682   :  { %10269 = vrcp.f32 %v5693_v16  ;;  %9872 = vrot.lane.b32.xlu2 %v12066_v11, %s10431_s2  ;;  %v15832_v11 = vld [vmem:[#allocation11_spill] sm:$0xff] }
 0x683   :  { %9543 = vmatmul.msk.f32.vlgmr.msrb.gmra.mxu2 %vm440_vm0, %v5792_v34  ;;  %9553 = vmatmul.msk.f32.vlgmr.msra.gmra.mxu0 %vm440_vm0, %v5802_v24  ;;  %10271 = vrcp.f32 %v5705_v18 }
 0x684   :  { %6203 = vmatpush.msrb.mxu2 %v9789_v63  ;;  %9554 = vmatmul.msk.f32.vlgmr.msra.gmra.mxu1 %vm440_vm0, %v5803_v0  ;;  %v5732_v33 = vpop.xlane.xlu2 %5731  ;;  %v9809_v63 = vunpack.i.l.bf16 %v15838_v46  ;;  %v15860_v46 = vld [vmem:[#allocation128_spill] sm:$0xff] }
 0x685   :  { %6463 = vmatpush.msra.mxu0 %v9814_v28  ;;  %6489 = vmatpush.msra.mxu1 %v9815_v37  ;;  %v10266_v52 = vpop.eup %10265  ;;  %v15843_v28 = vld [vmem:[#allocation5_spill] sm:$0xff] }
 0x686   :  { %9862 = vrot.lane.b32.xlu0 %v15630_v40, %s10431_s2  ;;  %v5735_v35 = vpop.xlane.xlu0 %5734  ;;  %v10268_v48 = vpop.eup %10267  ;;  %v5796_v8 = vmul.f32 %v10266_v52, %v13624_v62  ;;  %v15834_v40 = vld [vmem:[#allocation68_spill] sm:$0xff]  ;;  %v15844_v52 = vld [vmem:[#allocation109_spill] sm:$0xff] }
 0x687   :  { %8806 = vrot.lane.b32.xlu1 %v15832_v11, %s10432_s5  ;;  %10273 = vrcp.f32 %v5735_v35  ;;  %v5807_v6 = vmul.f32 %v10268_v48, %v13605_v59  ;;  %v15835_v62 = vld [vmem:[#allocation20_spill] sm:$0xff]  ;;  %v15837_v59 = vld [vmem:[#allocation7_spill] sm:$0xff]  ;;  %v9820_v35 = vunpack.i.h.bf16 %v15844_v52 }
 0x688   :  { %v10270_v19 = vpop.eup %10269  ;;  %v9825_v42 = vunpack.i.h.bf16 %v15835_v62  ;;  %v9824_v14 = vunpack.i.l.bf16 %v15835_v62 }
 0x689   :  { %v5797_v60 = vmul.f32 %v10270_v19, %v13630_v20  ;;  %v5720_v9 = vpop.xlane.xlu1 %5719  ;;  %v10272_v20 = vpop.eup %10271  ;;  %v15847_v19 = vld [vmem:[#allocation116_spill] sm:$0xff] }
 0x68a   :  { %10275 = vrcp.f32 %v5720_v9  ;;  %9887 = vrot.lane.b32.xlu2 %v15834_v40, %s10431_s2  ;;  %v5801_v32 = vmul.f32 %v10272_v20, %v13620_v38  ;;  %v15848_v40 = vld [vmem:[#allocation108_spill] sm:$0xff] }
 0x68b   :  { %9547 = vmatmul.msk.f32.vlgmr.msra.gmra.mxu2 %vm440_vm0, %v5796_v8  ;;  %9548 = vmatmul.msk.f32.vlgmr.msra.gmra.mxu3 %vm440_vm0, %v5797_v60 }
 0x68c   :  { %6307 = vmatpush.msra.mxu2 %v9799_v41  ;;  %6333 = vmatpush.msra.mxu3 %v9800_v57  ;;  %v5714_v38 = vpop.xlane.xlu2 %5713  ;;  %v9819_v57 = vunpack.i.l.bf16 %v15844_v52  ;;  %v15877_v52 = vld [vmem:[#allocation155_spill] sm:$0xff] }
 0x68d   :  { %9558 = vmatmul.msk.f32.vlgmr.msrb.gmra.mxu1 %vm440_vm0, %v5807_v6  ;;  %v10274_v31 = vpop.eup %10273  ;;  %v15849_v6 = vld [vmem:[#allocation29_spill] sm:$0xff] }
 0x68e   :  { %6593 = vmatpush.msrb.mxu1 %v9825_v42  ;;  %9877 = vrot.lane.b32.xlu0 %v15836_v2, %s10431_s2  ;;  %v5717_v50 = vpop.xlane.xlu0 %5716  ;;  %v5811_v43 = vmul.f32 %v10274_v31, %v13639_v23  ;;  %v15842_v23 = vld [vmem:[#allocation115_spill] sm:$0xff] }
 0x68f   :  { %8812 = vrot.lane.b32.xlu1 %v15837_v59, %s10432_s5  ;;  %10277 = vrcp.f32 %v5717_v50  ;;  %v15853_v50 = vld [vmem:[#allocation31_spill] sm:$0xff] }
 0x690   :  { %v10276_v58 = vpop.eup %10275  ;;  %10279 = vrcp.f32 %v5732_v33  ;;  %v15852_v33 = vld [vmem:[#allocation111_spill] sm:$0xff]  ;;  %v9830_v31 = vunpack.i.h.bf16 %v15853_v50  ;;  %v9829_v59 = vunpack.i.l.bf16 %v15853_v50 }
 0x691   :  { %v5806_v51 = vmul.f32 %v10276_v58, %v13646_v45  ;;  %v5702_v27 = vpop.xlane.xlu1 %5701  ;;  %v15854_v58 = vld [vmem:[#allocation10_spill] sm:$0xff] }
 0x692   :  { %10281 = vrcp.f32 %v5702_v27  ;;  %9902 = vrot.lane.b32.xlu2 %v15839_v4, %s10431_s2  ;;  %v15859_v27 = vld [vmem:[#allocation113_spill] sm:$0xff] }
 0x693   :  { %9552 = vmatmul.msk.f32.vlgmr.msrb.gmra.mxu3 %vm440_vm0, %v5801_v32  ;;  %9557 = vmatmul.msk.f32.vlgmr.msrb.gmra.mxu0 %vm440_vm0, %v5806_v51  ;;  %10283 = vrcp.f32 %v5714_v38  ;;  %v15855_v32 = vld [vmem:[#allocation139_spill] sm:$0xff]  ;;  %v15861_v4 = vld [vmem:[#allocation9_spill] sm:$0xff]  ;;  %v15863_v38 = vld [vmem:[#allocation94_spill] sm:$0xff] }
 0x694   :  { %6437 = vmatpush.msrb.mxu3 %v9810_v44  ;;  %6567 = vmatpush.msrb.mxu0 %v9824_v14  ;;  %v15858_v51 = vld [vmem:[#allocation147_spill] sm:$0xff] }
 0x695   :  { %9562 = vmatmul.msk.f32.vlgmr.msra.gmra.mxu1 %vm440_vm0, %v5811_v43  ;;  %v10278_v45 = vpop.eup %10277  ;;  %v15862_v43 = vld [vmem:[#allocation25_spill] sm:$0xff] }
 0x696   :  { %9571 = vmatpush.xpose.msk.msra.mxu1 %vm440_vm0, %v15840_v39  ;;  %9892 = vrot.lane.b32.xlu0 %v15841_v30, %s10431_s2  ;;  %v5744_v12 = vpop.xlane.xlu0 %5743  ;;  %v10280_v34 = vpop.eup %10279  ;;  %v5805_v0 = vmul.f32 %v10278_v45, %v13657_v56  ;;  %v15845_v56 = vld [vmem:[#allocation117_spill] sm:$0xff]  ;;  %v15864_v45 = vld [vmem:[#allocation140_spill] sm:$0xff] }
 0x697   :  { %8818 = vrot.lane.b32.xlu1 %v15842_v23, %s10432_s5  ;;  %10285 = vrcp.f32 %v5744_v12  ;;  %v5810_v37 = vmul.f32 %v10280_v34, %v13635_v47  ;;  %v15846_v47 = vld [vmem:[#allocation127_spill] sm:$0xff]  ;;  %v15865_v39 = vld [vmem:[#allocation12_spill] sm:$0xff]  ;;  %v15868_v12 = vld [vmem:[#allocation129_spill] sm:$0xff] }
 0x698   :  { %v10282_v24 = vpop.eup %10281  ;;  %v15866_v30 = vld [vmem:[#allocation32_spill] sm:$0xff]  ;;  %v15869_v34 = vld [vmem:[#allocation2_spill] sm:$0xff]  ;;  %v15870_v23 = vld [vmem:[#allocation3_spill] sm:$0xff] }
 0x699   :  { %v5800_v18 = vmul.f32 %v10282_v24, %v13662_v61  ;;  %v5747_v16 = vpop.xlane.xlu1 %5746  ;;  %v10284_v61 = vpop.eup %10283  ;;  %v15871_v24 = vld [vmem:[#allocation37_spill] sm:$0xff] }
 0x69a   :  { %10287 = vrcp.f32 %v5747_v16  ;;  %8796 = vrot.lane.b32.xlu2 %v15843_v28, %s10432_s5  ;;  %v5804_v60 = vmul.f32 %v10284_v61, %v13651_v55  ;;  %v15850_v55 = vld [vmem:[#allocation143_spill] sm:$0xff]  ;;  %v9843_v28 = vpop.permute.xlu2 %9842  ;;  %v15880_v61 = vld [vmem:[#allocation53_spill] sm:$0xff] }
 0x69b   :  { %9551 = vmatmul.msk.f32.vlgmr.msrb.gmra.mxu2 %vm440_vm0, %v5800_v18  ;;  %9556 = vmatmul.msk.f32.vlgmr.msra.gmra.mxu3 %vm440_vm0, %v5805_v0  ;;  %v15872_v0 = vld [vmem:[#allocation162_spill] sm:$0xff]  ;;  %v15873_v18 = vld [vmem:[#allocation153_spill] sm:$0xff]  ;;  %v15874_v16 = vld [vmem:[#allocation27_spill] sm:$0xff] }
 0x69c   :  { %6411 = vmatpush.msrb.mxu2 %v9809_v63  ;;  %9561 = vmatmul.msk.f32.vlgmr.msra.gmra.mxu0 %vm440_vm0, %v5810_v37  ;;  %v15875_v63 = vld [vmem:[#allocation87_spill] sm:$0xff]  ;;  %v15876_v37 = vld [vmem:[#allocation104_spill] sm:$0xff] }
 0x69d   :  { %6541 = vmatpush.msra.mxu3 %v9820_v35  ;;  %9569 = vmatpush.xpose.msk.msra.mxu0 %vm440_vm0, %v15845_v56  ;;  %v10286_v11 = vpop.eup %10285  ;;  %v15878_v35 = vld [vmem:[#allocation141_spill] sm:$0xff]  ;;  %v15879_v56 = vld [vmem:[#allocation160_spill] sm:$0xff] }
 0x69e   :  { %9907 = vrot.lane.b32.xlu0 %v15846_v47, %s10431_s2  ;;  %v5726_v48 = vpop.xlane.xlu0 %5725  ;;  %v5814_v41 = vmul.f32 %v10286_v11, %v13669_v17  ;;  %v15851_v17 = vld [vmem:[#allocation114_spill] sm:$0xff]  ;;  %v15881_v47 = vld [vmem:[#allocation8_spill] sm:$0xff] }
 0x69f   :  { %8824 = vrot.lane.b32.xlu1 %v15847_v19, %s10432_s5  ;;  %10289 = vrcp.f32 %v5726_v48  ;;  %v15882_v48 = vld [vmem:[#allocation88_spill] sm:$0xff]  ;;  %v15884_v19 = vld [vmem:[#allocation43_spill] sm:$0xff] }
 0x6a0   :  { %v10288_v8 = vpop.eup %10287  ;;  %v15883_v11 = vld [vmem:[#allocation132_spill] sm:$0xff] }
 0x6a1   :  { %v5815_v9 = vmul.f32 %v10288_v8, %v13671_v10  ;;  %v5729_v36 = vpop.xlane.xlu1 %5728  ;;  %v15885_v8 = vld [vmem:[#allocation148_spill] sm:$0xff] }
 0x6a2   :  { %10291 = vrcp.f32 %v5729_v36  ;;  %8802 = vrot.lane.b32.xlu2 %v15848_v40, %s10432_s5  ;;  %v15887_v36 = vld [vmem:[#allocation6_spill] sm:$0xff] }
 0x6a3   :  { %9555 = vmatmul.msk.f32.vlgmr.msra.gmra.mxu2 %vm440_vm0, %v5804_v60  ;;  %9566 = vmatmul.msk.f32.vlgmr.msrb.gmra.mxu1 %vm440_vm0, %v5815_v9  ;;  %v15886_v9 = vld [vmem:[#allocation23_spill] sm:$0xff] }
 0x6a4   :  { %6515 = vmatpush.msra.mxu2 %v9819_v57  ;;  %9565 = vmatmul.msk.f32.vlgmr.msrb.gmra.mxu0 %vm440_vm0, %v5814_v41  ;;  %v15888_v57 = vld [vmem:[#allocation14_spill] sm:$0xff] }
 0x6a5   :  { %9577 = vmatpush.xpose.msk.msrb.mxu0 %vm440_vm0, %v15849_v6  ;;  %9579 = vmatpush.xpose.msk.msrb.mxu1 %vm440_vm0, %v15850_v55  ;;  %v10290_v10 = vpop.eup %10289  ;;  %v15889_v55 = vld [vmem:[#allocation158_spill] sm:$0xff] }
 0x6a6   :  { %8798 = vrot.lane.b32.xlu0 %v15851_v17, %s10432_s5  ;;  %v5808_v42 = vmul.f32 %v10290_v10, %v13678_v5  ;;  %v15856_v5 = vld [vmem:[#allocation133_spill] sm:$0xff]  ;;  %v15890_v10 = vld [vmem:[#allocation19_spill] sm:$0xff] }
 0x6a7   :  { %8830 = vrot.lane.b32.xlu1 %v15852_v33, %s10432_s5 }
 0x6a8   :  { %v10292_v62 = vpop.eup %10291 }
 0x6a9   :  { %v5809_v20 = vmul.f32 %v10292_v62, %v13682_v13  ;;  %v5738_v2 = vpop.xlane.xlu1 %5737  ;;  %v15857_v13 = vld [vmem:[#allocation134_spill] sm:$0xff] }
 0x6aa   :  { %10293 = vrcp.f32 %v5738_v2  ;;  %8808 = vrot.lane.b32.xlu2 %v15854_v58, %s10432_s5  ;;  %v15896_v58 = vld [vmem:[#allocation156_spill] sm:$0xff] }
 0x6ab   :  { %9559 = vmatmul.msk.f32.vlgmr.msrb.gmra.mxu2 %vm440_vm0, %v5808_v42  ;;  %9560 = vmatmul.msk.f32.vlgmr.msrb.gmra.mxu3 %vm440_vm0, %v5809_v20  ;;  %v15893_v42 = vld [vmem:[#allocation106_spill] sm:$0xff] }
 0x6ac   :  { %6619 = vmatpush.msrb.mxu2 %v9829_v59  ;;  %6645 = vmatpush.msrb.mxu3 %v9830_v31  ;;  %v15895_v59 = vld [vmem:[#allocation22_spill] sm:$0xff] }
 0x6ad   :  { %9570 = vmatmul.msk.f32.vlgmr.msra.gmra.mxu0 %vm440_vm0, %v15855_v32  ;;  %9572 = vmatmul.msk.f32.vlgmr.msra.gmra.mxu1 %vm440_vm0, %v15856_v5  ;;  %v9844_v5 = vunpack.i.l.bf16 %v9843_v28 }
 0x6ae   :  { %9585 = vmatpush.xpose.msk.msra.mxu0 %vm440_vm0, %v15857_v13  ;;  %9587 = vmatpush.xpose.msk.msra.mxu1 %vm440_vm0, %v15858_v51 }
 0x6af   :  { %8804 = vrot.lane.b32.xlu0 %v15859_v27, %s10432_s5  ;;  %8836 = vrot.lane.b32.xlu1 %v15860_v46, %s10432_s5  ;;  %v15898_v27 = vld [vmem:[#allocation121_spill] sm:$0xff] }
 0x6b0   :  { %v10294_v44 = vpop.eup %10293  ;;  %v15899_v46 = vld [vmem:[#allocation145_spill] sm:$0xff] }
 0x6b1   :  { %v5812_v14 = vmul.f32 %v10294_v44, %v13694_v26  ;;  %v15867_v26 = vld [vmem:[#allocation105_spill] sm:$0xff]  ;;  %v13943_v40 = vpop.permute.xlu0 %9837 }
 0x6b2   :  { %8814 = vrot.lane.b32.xlu2 %v15861_v4, %s10432_s5  ;;  %v15903_v4 = vld [vmem:[#allocation16_spill] sm:$0xff] }
 0x6b3   :  { %9563 = vmatmul.msk.f32.vlgmr.msra.gmra.mxu2 %vm440_vm0, %v5812_v14  ;;  %v15900_v14 = vld [vmem:[#allocation149_spill] sm:$0xff] }
 0x6b4   :  { %9573 = vmatpush.xpose.msk.msra.mxu2 %vm440_vm0, %v15862_v43  ;;  %v15904_v43 = vld [vmem:[#allocation138_spill] sm:$0xff] }
 0x6b5   :  { %9578 = vmatmul.msk.f32.vlgmr.msrb.gmra.mxu0 %vm440_vm0, %v15863_v38  ;;  %9580 = vmatmul.msk.f32.vlgmr.msrb.gmra.mxu1 %vm440_vm0, %v15864_v45  ;;  %v15905_v38 = vld [vmem:[#allocation33_spill] sm:$0xff]  ;;  %v15906_v45 = vld [vmem:[#allocation110_spill] sm:$0xff] }
 0x6b6   :  { %9593 = vmatpush.xpose.msk.msrb.mxu0 %vm440_vm0, %v15865_v39  ;;  %9595 = vmatpush.xpose.msk.msrb.mxu1 %vm440_vm0, %v15866_v30  ;;  %v15907_v30 = vld [vmem:[#allocation157_spill] sm:$0xff] }
 0x6b7   :  { %8810 = vrot.lane.b32.xlu0 %v15867_v26, %s10432_s5  ;;  %8842 = vrot.lane.b32.xlu1 %v15868_v12, %s10432_s5  ;;  %v15909_v12 = vld [vmem:[#allocation24_spill] sm:$0xff] }
 0x6ba   :  { %8820 = vrot.lane.b32.xlu2 %v15869_v34, %s10432_s5  ;;  %v15910_v34 = vld [vmem:[#allocation28_spill] sm:$0xff] }
 0x6bd   :  { %9586 = vmatmul.msk.f32.vlgmr.msra.gmra.mxu0 %vm440_vm0, %v15870_v23  ;;  %9588 = vmatmul.msk.f32.vlgmr.msra.gmra.mxu1 %vm440_vm0, %v15871_v24  ;;  %v15911_v23 = vld [vmem:[#allocation150_spill] sm:$0xff]  ;;  %v15912_v24 = vld [vmem:[#allocation44_spill] sm:$0xff] }
 0x6be   :  { %9601 = vmatpush.xpose.msk.msra.mxu0 %vm440_vm0, %v15872_v0  ;;  %9603 = vmatpush.xpose.msk.msra.mxu1 %vm440_vm0, %v15873_v18 }
 0x6bf   :  { %8816 = vrot.lane.b32.xlu0 %v15874_v16, %s10432_s5  ;;  %8848 = vrot.lane.b32.xlu1 %v15875_v63, %s10432_s5 }
 0x6c1   :  { %v9833_v33 = vpop.permute.xlu1 %9832 }
 0x6c2   :  { %8826 = vrot.lane.b32.xlu2 %v15876_v37, %s10432_s5  ;;  %v9834_v62 = vunpack.i.l.bf16 %v9833_v33  ;;  %v9835_v2 = vunpack.i.h.bf16 %v9833_v33  ;;  %v15914_v37 = vld [vmem:[#allocation163_spill] sm:$0xff] }
 0x6c5   :  { %9594 = vmatmul.msk.f32.vlgmr.msrb.gmra.mxu0 %vm440_vm0, %v15877_v52  ;;  %9596 = vmatmul.msk.f32.vlgmr.msrb.gmra.mxu1 %vm440_vm0, %v15878_v35  ;;  %v15916_v35 = vld [vmem:[#allocation164_spill] sm:$0xff] }
 0x6c6   :  { %9609 = vmatpush.xpose.msk.msrb.mxu0 %vm440_vm0, %v15879_v56  ;;  %9611 = vmatpush.xpose.msk.msrb.mxu1 %vm440_vm0, %v15880_v61  ;;  %v15917_v56 = vld [vmem:[#allocation30_spill] sm:$0xff] }
 0x6c7   :  { %8822 = vrot.lane.b32.xlu0 %v15881_v47, %s10432_s5  ;;  %8854 = vrot.lane.b32.xlu1 %v15882_v48, %s10432_s5 }
 0x6ca   :  { %8832 = vrot.lane.b32.xlu2 %v15883_v11, %s10432_s5  ;;  %v15919_v11 = vld [vmem:[#allocation146_spill] sm:$0xff] }
 0x6cd   :  { %9602 = vmatmul.msk.f32.vlgmr.msra.gmra.mxu0 %vm440_vm0, %v15884_v19  ;;  %9604 = vmatmul.msk.f32.vlgmr.msra.gmra.mxu1 %vm440_vm0, %v15885_v8  ;;  %v5741_v60 = vpop.xlane.xlu2 %5740  ;;  %v15920_v19 = vld [vmem:[#allocation13_spill] sm:$0xff]  ;;  %v14041_v8 = vpop.permute.xlu1 %9852 }
 0x6ce   :  { %9617 = vmatpush.xpose.msk.msra.mxu0 %vm440_vm0, %v15886_v9  ;;  %9619 = vmatpush.xpose.msk.msra.mxu1 %vm440_vm0, %v13655_v29  ;;  %10295 = vrcp.f32 %v5741_v60  ;;  %v15891_v29 = vld [vmem:[#allocation15_spill] sm:$0xff]  ;;  %v15921_v60 = vld [vmem:[#allocation38_spill] sm:$0xff]  ;;  %v15922_v9 = vld [vmem:[#allocation21_spill] sm:$0xff] }
 0x6cf   :  { %8828 = vrot.lane.b32.xlu0 %v15887_v36, %s10432_s5 }
 0x6d2   :  { %8838 = vrot.lane.b32.xlu2 %v15888_v57, %s10432_s5 }
 0x6d3   :  { %v5841_v13 = vpop.f32.mrf.mxu0 }
 0x6d4   :  { %v10296_v41 = vpop.eup %10295 }
 0x6d5   :  { %v5813_v6 = vmul.f32 %v10296_v41, %v13722_v15  ;;  %9610 = vmatmul.msk.f32.vlgmr.msrb.gmra.mxu0 %vm440_vm0, %v15889_v55  ;;  %9612 = vmatmul.msk.f32.vlgmr.msrb.gmra.mxu1 %vm440_vm0, %v15890_v10  ;;  %v5750_v17 = vpop.xlane.xlu2 %5749  ;;  %v15892_v15 = vld [vmem:[#allocation4_spill] sm:$0xff]  ;;  %v15926_v10 = vld [vmem:[#allocation18_spill] sm:$0xff] }
 0x6d6   :  { %9625 = vmatpush.xpose.msk.msrb.mxu0 %vm440_vm0, %v13702_v3  ;;  %9627 = vmatpush.xpose.msk.msrb.mxu1 %vm440_vm0, %v13713_v25  ;;  %10297 = vrcp.f32 %v5750_v17  ;;  %v15894_v25 = vld [vmem:[#allocation165_spill] sm:$0xff] }
 0x6d7   :  { %8834 = vrot.lane.b32.xlu0 %v15891_v29, %s10432_s5  ;;  %9564 = vmatmul.msk.f32.vlgmr.msra.gmra.mxu3 %vm440_vm0, %v5813_v6  ;;  %v15924_v6 = vld [vmem:[#allocation34_spill] sm:$0xff]  ;;  %v15927_v17 = vld [vmem:[#allocation137_spill] sm:$0xff]  ;;  %v15928_v29 = vld [vmem:[#allocation99_spill] sm:$0xff] }
 0x6d8   :  { %9575 = vmatpush.xpose.msk.msra.mxu3 %vm440_vm0, %v15892_v15  ;;  %v14063_v15 = vpop.permute.xlu1 %9867 }
 0x6da   :  { %8844 = vrot.lane.b32.xlu2 %v15893_v42, %s10432_s5 }
 0x6dc   :  { %v10298_v20 = vpop.eup %10297  ;;  %v5753_v3 = vpop.xlane.xlu0 %5752 }
 0x6dd   :  { %v5816_v50 = vmul.f32 %v10298_v20, %v13732_v54  ;;  %9618 = vmatmul.msk.f32.vlgmr.msra.gmra.mxu0 %vm440_vm0, %v15894_v25  ;;  %9620 = vmatmul.msk.f32.vlgmr.msra.gmra.mxu1 %vm440_vm0, %v13680_v53  ;;  %10299 = vrcp.f32 %v5753_v3  ;;  %v5867_v31 = vpop.f32.mrf.mxu1  ;;  %v15897_v54 = vld [vmem:[#allocation112_spill] sm:$0xff]  ;;  %v9845_v53 = vunpack.i.h.bf16 %v9843_v28  ;;  %v15915_v28 = vld [vmem:[#allocation154_spill] sm:$0xff]  ;;  %v14033_v47 = vpop.permute.xlu2 %9857  ;;  %v15929_v20 = vld [vmem:[#allocation49_spill] sm:$0xff] }
 0x6de   :  { %8924 = vrot.lane.b32.xlu1 %v5867_v31, %s10433_s30  ;;  %7951 = vmatpush.msra.mxu0 %v9834_v62  ;;  %v9839_v62 = vunpack.i.l.bf16 %v13943_v40 }
 0x6df   :  { %8840 = vrot.lane.b32.xlu0 %v15895_v59, %s10432_s5  ;;  %9567 = vmatmul.msk.f32.vlgmr.msrb.gmra.mxu2 %vm440_vm0, %v5816_v50  ;;  %v9840_v59 = vunpack.i.h.bf16 %v13943_v40 }
 0x6e0   :  { %9581 = vmatpush.xpose.msk.msrb.mxu2 %vm440_vm0, %v15896_v58  ;;  %7977 = vmatpush.msra.mxu1 %v9835_v2  ;;  %v15930_v2 = vld [vmem:[#allocation40_spill] sm:$0xff]  ;;  %v14080_v25 = vpop.permute.xlu1 %9882 }
 0x6e2   :  { %8850 = vrot.lane.b32.xlu2 %v15897_v54, %s10432_s5  ;;  %v15933_v54 = vld [vmem:[#allocation54_spill] sm:$0xff] }
 0x6e3   :  { %v10300_v32 = vpop.eup %10299 }
 0x6e4   :  { %v5817_v51 = vmul.f32 %v10300_v32, %v13741_v21  ;;  %v15901_v21 = vld [vmem:[#allocation136_spill] sm:$0xff] }
 0x6e5   :  { %9626 = vmatmul.msk.f32.vlgmr.msrb.gmra.mxu0 %vm440_vm0, %v13706_v1  ;;  %9628 = vmatmul.msk.f32.vlgmr.msrb.gmra.mxu1 %vm440_vm0, %v13700_v49  ;;  %v15902_v49 = vld [vmem:[#allocation131_spill] sm:$0xff]  ;;  %v13992_v1 = vpop.f32.mrf.mxu0  ;;  %v14051_v41 = vpop.permute.xlu2 %9872 }
 0x6e6   :  { %8055 = vmatpush.msrb.mxu0 %v9844_v5  ;;  %8081 = vmatpush.msrb.mxu1 %v9845_v53  ;;  %v15935_v53 = vld [vmem:[#allocation52_spill] sm:$0xff] }
 0x6e7   :  { %8846 = vrot.lane.b32.xlu0 %v15898_v27, %s10432_s5  ;;  %9568 = vmatmul.msk.f32.vlgmr.msrb.gmra.mxu3 %vm440_vm0, %v5817_v51 }
 0x6e8   :  { %9583 = vmatpush.xpose.msk.msrb.mxu3 %vm440_vm0, %v15899_v46  ;;  %v13984_v44 = vpop.f32.mrf.mxu1  ;;  %9574 = vmatmul.msk.f32.vlgmr.msra.gmra.mxu2 %vm440_vm0, %v15900_v14  ;;  %v14095_v51 = vpop.permute.xlu1 %9897 }
 0x6e9   :  { %9589 = vmatpush.xpose.msk.msra.mxu2 %vm440_vm0, %v15901_v21  ;;  %v5919_v18 = vpop.f32.mrf.mxu3  ;;  %15937 = vst [vmem:[#allocation152_spill] sm:$0xff] %v14095_v51 }
 0x6ea   :  { %8856 = vrot.lane.b32.xlu2 %v15902_v49, %s10432_s5 }
 0x6ed   :  { %v14078_v50 = vpop.permute.xlu2 %9887 }
 0x6ee   :  { %15932 = vst [vmem:[#allocation142_spill] sm:$0xff] %v14078_v50 }
 0x6ef   :  { %8852 = vrot.lane.b32.xlu0 %v15903_v4, %s10432_s5  ;;  %9576 = vmatmul.msk.f32.vlgmr.msra.gmra.mxu3 %vm440_vm0, %v15904_v43 }
 0x6f0   :  { %9591 = vmatpush.xpose.msk.msra.mxu3 %vm440_vm0, %v15905_v38  ;;  %9582 = vmatmul.msk.f32.vlgmr.msrb.gmra.mxu2 %vm440_vm0, %v15906_v45  ;;  %v14002_v39 = vpop.f32.mrf.mxu1  ;;  %v14006_v26 = vpop.f32.mrf.mxu0 }
 0x6f1   :  { %9597 = vmatpush.xpose.msk.msrb.mxu2 %vm440_vm0, %v15907_v30  ;;  %15908 = vst [vmem:[#allocation144_spill] sm:$0xff] %v14006_v26  ;;  %v9848_v52 = vpop.permute.xlu0 %9847 }
 0x6f2   :  { %v9849_v31 = vunpack.i.l.bf16 %v9848_v52 }
 0x6f5   :  { %v14093_v5 = vpop.permute.xlu2 %9902 }
 0x6f6   :  { %15936 = vst [vmem:[#allocation41_spill] sm:$0xff] %v14093_v5 }
 0x6f7   :  { %8922 = vrot.lane.b32.xlu0 %v5841_v13, %s10433_s30  ;;  %9584 = vmatmul.msk.f32.vlgmr.msrb.gmra.mxu3 %vm440_vm0, %v15909_v12  ;;  %v9850_v13 = vunpack.i.h.bf16 %v9848_v52 }
 0x6f8   :  { %9599 = vmatpush.xpose.msk.msrb.mxu3 %vm440_vm0, %v15910_v34  ;;  %9590 = vmatmul.msk.f32.vlgmr.msra.gmra.mxu2 %vm440_vm0, %v15911_v23  ;;  %v14019_v16 = vpop.f32.mrf.mxu0 }
 0x6f9   :  { %9605 = vmatpush.xpose.msk.msra.mxu2 %vm440_vm0, %v15912_v24  ;;  %v14017_v0 = vpop.f32.mrf.mxu1  ;;  %15913 = vst [vmem:[#allocation36_spill] sm:$0xff] %v14019_v16  ;;  %v14047_v36 = vpop.permute.xlu0 %9862 }
 0x6fd   :  { %v14111_v38 = vpop.permute.xlu2 %8796 }
 0x6fe   :  { %v5893_v63 = vpop.f32.mrf.mxu2  ;;  %15939 = vst [vmem:[#allocation159_spill] sm:$0xff] %v14111_v38 }
 0x6ff   :  { %8928 = vrot.lane.b32.xlu0 %v5919_v18, %s10433_s30  ;;  %8926 = vrot.lane.b32.xlu2 %v5893_v63, %s10433_s30 }
 0x700   :  { %9592 = vmatmul.msk.f32.vlgmr.msra.gmra.mxu3 %vm440_vm0, %v15914_v37  ;;  %9598 = vmatmul.msk.f32.vlgmr.msrb.gmra.mxu2 %vm440_vm0, %v15915_v28  ;;  %v14035_v48 = vpop.f32.mrf.mxu0  ;;  %v14127_v37 = vpop.f32.mrf.mxu3 }
 0x701   :  { %9607 = vmatpush.xpose.msk.msra.mxu3 %vm440_vm0, %v15916_v35  ;;  %9613 = vmatpush.xpose.msk.msrb.mxu2 %vm440_vm0, %v15917_v56  ;;  %v14031_v61 = vpop.f32.mrf.mxu1  ;;  %v14065_v33 = vpop.permute.xlu0 %9877 }
 0x702   :  { %15918 = vst [vmem:[#allocation135_spill] sm:$0xff] %v14031_v61 }
 0x705   :  { %v14129_v28 = vpop.permute.xlu2 %8802 }
 0x706   :  { %v14101_v14 = vpop.f32.mrf.mxu2  ;;  %15942 = vst [vmem:[#allocation39_spill] sm:$0xff] %v14129_v28 }
 0x708   :  { %9600 = vmatmul.msk.f32.vlgmr.msrb.gmra.mxu3 %vm440_vm0, %v15919_v11  ;;  %9606 = vmatmul.msk.f32.vlgmr.msra.gmra.mxu2 %vm440_vm0, %v15920_v19 }
 0x709   :  { %9615 = vmatpush.xpose.msk.msrb.mxu3 %vm440_vm0, %v15921_v60  ;;  %9621 = vmatpush.xpose.msk.msra.mxu2 %vm440_vm0, %v15922_v9  ;;  %v14083_v58 = vpop.permute.xlu0 %9892 }
 0x70a   :  { %v14049_v57 = vpop.f32.mrf.mxu1 }
 0x70b   :  { %15923 = vst [vmem:[#allocation47_spill] sm:$0xff] %v14049_v57 }
 0x70e   :  { %v14121_v24 = vpop.f32.mrf.mxu2 }
 0x710   :  { %9608 = vmatmul.msk.f32.vlgmr.msra.gmra.mxu3 %vm440_vm0, %v15924_v6  ;;  %v14055_v55 = vpop.f32.mrf.mxu0  ;;  %9614 = vmatmul.msk.f32.vlgmr.msrb.gmra.mxu2 %vm440_vm0, %v15926_v10 }
 0x711   :  { %15925 = vst [vmem:[#allocation151_spill] sm:$0xff] %v14055_v55  ;;  %9623 = vmatpush.xpose.msk.msra.mxu3 %vm440_vm0, %v15927_v17  ;;  %9629 = vmatpush.xpose.msk.msrb.mxu2 %vm440_vm0, %v15928_v29  ;;  %v14099_v40 = vpop.permute.xlu0 %9907  ;;  %v14145_v17 = vpop.f32.mrf.mxu3 }
 0x712   :  { %v14068_v42 = vpop.f32.mrf.mxu1  ;;  %15938 = vst [vmem:[#allocation35_spill] sm:$0xff] %v14099_v40  ;;  %v14147_v29 = vpop.permute.xlu2 %8808 }
 0x713   :  { %15946 = vst [vmem:[#allocation58_spill] sm:$0xff] %v14145_v17 }
 0x714   :  { %15947 = vst [vmem:[#allocation48_spill] sm:$0xff] %v14147_v29 }
 0x718   :  { %9616 = vmatmul.msk.f32.vlgmr.msrb.gmra.mxu3 %vm440_vm0, %v15929_v20  ;;  %9622 = vmatmul.msk.f32.vlgmr.msra.gmra.mxu2 %vm440_vm0, %v15930_v2 }
 0x719   :  { %9631 = vmatpush.xpose.msk.msrb.mxu3 %vm440_vm0, %v13715_v22  ;;  %v14076_v3 = vpop.f32.mrf.mxu0  ;;  %8003 = vmatpush.msra.mxu2 %v9839_v62  ;;  %v14115_v12 = vpop.permute.xlu0 %8798 }
 0x71a   :  { %15931 = vst [vmem:[#allocation26_spill] sm:$0xff] %v14076_v3 }
 0x71b   :  { %15941 = vst [vmem:[#allocation166_spill] sm:$0xff] %v14115_v12 }
 0x71e   :  { %v14137_v60 = vpop.f32.mrf.mxu2 }
 0x71f   :  { %15944 = vst [vmem:[#allocation51_spill] sm:$0xff] %v14137_v60 }
 0x720   :  { %9624 = vmatmul.msk.f32.vlgmr.msra.gmra.mxu3 %vm440_vm0, %v15933_v54  ;;  %v14087_v32 = vpop.f32.mrf.mxu1  ;;  %9630 = vmatmul.msk.f32.vlgmr.msrb.gmra.mxu2 %vm440_vm0, %v15935_v53  ;;  %v14159_v53 = vpop.f32.mrf.mxu3 }
 0x721   :  { %15934 = vst [vmem:[#allocation161_spill] sm:$0xff] %v14087_v32  ;;  %8029 = vmatpush.msra.mxu3 %v9840_v59  ;;  %v14091_v22 = vpop.f32.mrf.mxu0  ;;  %8107 = vmatpush.msrb.mxu2 %v9849_v31  ;;  %v14139_v9 = vpop.permute.xlu0 %8804 }
 0x722   :  { %15945 = vst [vmem:[#allocation42_spill] sm:$0xff] %v14139_v9 }
 0x723   :  { %15951 = vst [vmem:[#allocation64_spill] sm:$0xff] %v14159_v53 }
 0x726   :  { %v14155_v59 = vpop.f32.mrf.mxu2 }
 0x727   :  { %15949 = vst [vmem:[#allocation50_spill] sm:$0xff] %v14155_v59 }
 0x728   :  { %9632 = vmatmul.msk.f32.vlgmr.msrb.gmra.mxu3 %vm440_vm0, %v13728_v7  ;;  %v14113_v7 = vpop.permute.xlu1 %8794 }
 0x729   :  { %8133 = vmatpush.msrb.mxu3 %v9850_v13  ;;  %15940 = vst [vmem:[#allocation46_spill] sm:$0xff] %v14113_v7  ;;  %v14157_v54 = vpop.permute.xlu0 %8810  ;;  %v14161_v13 = vpop.permute.xlu2 %8814 }
 0x72a   :  { %v6675_v27 = vpop.f32.mrf.mxu0  ;;  %v6703_v46 = vpop.f32.mrf.mxu1  ;;  %15950 = vst [vmem:[#allocation61_spill] sm:$0xff] %v14157_v54 }
 0x72b   :  { %v14103_v21 = vmul.f32 0.5, %v6675_v27  ;;  %v14105_v49 = vmul.f32 0.5, %v6703_v46  ;;  %15952 = vst [vmem:[#allocation55_spill] sm:$0xff] %v14161_v13 }
 0x72d   :  { %v7578_v4 = vsel %vm1305_vm1, %v14103_v21, -inf  ;;  %v7581_v43 = vsel %vm1305_vm1, %v14105_v49, -inf }
 0x72e   :  { %7579 = vmax.xlane.f32.xlu2 %v7578_v4  ;;  %7582 = vmax.xlane.f32.xlu1 %v7581_v43  ;;  %v14165_v46 = vpop.f32.mrf.mxu2  ;;  %v14169_v43 = vpop.f32.mrf.mxu3 }
 0x730   :  { %v14135_v19 = vpop.permute.xlu1 %8800 }
 0x731   :  { %15943 = vst [vmem:[#allocation167_spill] sm:$0xff] %v14135_v19  ;;  %v14167_v4 = vpop.permute.xlu0 %8816 }
 0x732   :  { %v6787_v45 = vpop.f32.mrf.mxu0  ;;  %v6815_v30 = vpop.f32.mrf.mxu1  ;;  %15954 = vst [vmem:[#allocation56_spill] sm:$0xff] %v14167_v4 }
 0x733   :  { %v14117_v34 = vmul.f32 0.5, %v6787_v45  ;;  %v14119_v23 = vmul.f32 0.5, %v6815_v30  ;;  %v14171_v45 = vpop.permute.xlu2 %8820 }
 0x734   :  { %15955 = vst [vmem:[#allocation63_spill] sm:$0xff] %v14171_v45 }
 0x735   :  { %v7590_v18 = vsel %vm1305_vm1, %v14117_v34, -inf  ;;  %v7593_v63 = vsel %vm1305_vm1, %v14119_v23, -inf }
 0x736   :  { %7591 = vmax.xlane.f32.xlu1 %v7590_v18  ;;  %7594 = vmax.xlane.f32.xlu0 %v7593_v63  ;;  %v14175_v18 = vpop.f32.mrf.mxu3  ;;  %v14177_v63 = vpop.f32.mrf.mxu2 }
 0x737   :  { %15957 = vst [vmem:[#allocation57_spill] sm:$0xff] %v14175_v18 }
 0x738   :  { %v14153_v31 = vpop.permute.xlu1 %8806  ;;  %15958 = vst [vmem:[#allocation59_spill] sm:$0xff] %v14177_v63 }
 0x739   :  { %15948 = vst [vmem:[#allocation60_spill] sm:$0xff] %v14153_v31 }
 0x73a   :  { %v6899_v52 = vpop.f32.mrf.mxu0  ;;  %v6927_v35 = vpop.f32.mrf.mxu1 }
 0x73b   :  { %v14131_v56 = vmul.f32 0.5, %v6899_v52  ;;  %v14133_v11 = vmul.f32 0.5, %v6927_v35  ;;  %v14179_v52 = vpop.permute.xlu0 %8822  ;;  %v14181_v35 = vpop.permute.xlu2 %8826 }
 0x73c   :  { %15959 = vst [vmem:[#allocation65_spill] sm:$0xff] %v14179_v52 }
 0x73d   :  { %v7602_v6 = vsel %vm1305_vm1, %v14131_v56, -inf  ;;  %v7605_v10 = vsel %vm1305_vm1, %v14133_v11, -inf  ;;  %15960 = vst [vmem:[#allocation118_spill] sm:$0xff] %v14181_v35 }
 0x73e   :  { %7603 = vmax.xlane.f32.xlu0 %v7602_v6  ;;  %7606 = vmax.xlane.f32.xlu2 %v7605_v10 }
 0x740   :  { %v14163_v27 = vpop.permute.xlu1 %8812 }
 0x741   :  { %15953 = vst [vmem:[#allocation45_spill] sm:$0xff] %v14163_v27 }
 0x742   :  { %v7039_v62 = vpop.f32.mrf.mxu1  ;;  %v7011_v9 = vpop.f32.mrf.mxu0 }
 0x743   :  { %v14149_v20 = vmul.f32 0.5, %v7039_v62  ;;  %v14191_v4 = vpop.permute.xlu2 %8832 }
 0x744   :  { %15965 = vst [vmem:[#allocation130_spill] sm:$0xff] %v14191_v4 }
 0x745   :  { %v7617_v2 = vsel %vm1305_vm1, %v14149_v20, -inf }
 0x746   :  { %7618 = vmax.xlane.f32.xlu1 %v7617_v2  ;;  %v14189_v2 = vpop.permute.xlu0 %8828 }
 0x747   :  { %15964 = vst [vmem:[#allocation126_spill] sm:$0xff] %v14189_v2 }
 0x748   :  { %v14173_v30 = vpop.permute.xlu1 %8818 }
 0x749   :  { %15956 = vst [vmem:[#allocation62_spill] sm:$0xff] %v14173_v30 }
 0x74a   :  { %v7151_v54 = vpop.f32.mrf.mxu1  ;;  %v7123_v30 = vpop.f32.mrf.mxu0 }
 0x74b   :  { %v14203_v28 = vmul.f32 0.5, %v7151_v54  ;;  %v14207_v2 = vpop.permute.xlu2 %8838 }
 0x74c   :  { %15969 = vst [vmem:[#allocation20_spill] sm:$0xff] %v14207_v2 }
 0x74e   :  { %v14201_v45 = vpop.permute.xlu0 %8834 }
 0x74f   :  { %15968 = vst [vmem:[#allocation68_spill] sm:$0xff] %v14201_v45 }
 0x750   :  { %v14187_v62 = vpop.permute.xlu1 %8824 }
 0x751   :  { %15963 = vst [vmem:[#allocation124_spill] sm:$0xff] %v14187_v62 }
 0x753   :  { %v14225_v4 = vpop.permute.xlu2 %8844 }
 0x754   :  { %15972 = vst [vmem:[#allocation95_spill] sm:$0xff] %v14225_v4 }
 0x756   :  { %v14217_v54 = vpop.permute.xlu0 %8840 }
 0x757   :  { %15971 = vst [vmem:[#allocation7_spill] sm:$0xff] %v14217_v54 }
 0x758   :  { %v14197_v12 = vpop.permute.xlu1 %8830 }
 0x759   :  { %15967 = vst [vmem:[#allocation17_spill] sm:$0xff] %v14197_v12  ;;  %v7629_v12 = vsel %vm1305_vm1, %v14203_v28, -inf }
 0x75a   :  { %v14183_v6 = vpop.f32.mrf.mxu3 }
 0x75b   :  { %15961 = vst [vmem:[#allocation119_spill] sm:$0xff] %v14183_v6 }
 0x760   :  { %v14213_v45 = vpop.permute.xlu1 %8836 }
 0x761   :  { %15970 = vst [vmem:[#allocation123_spill] sm:$0xff] %v14213_v45  ;;  %v14233_v45 = vpop.permute.xlu0 %8846 }
 0x762   :  { %v14185_v10 = vpop.f32.mrf.mxu2  ;;  %15974 = vst [vmem:[#allocation74_spill] sm:$0xff] %v14233_v45 }
 0x763   :  { %15962 = vst [vmem:[#allocation122_spill] sm:$0xff] %v14185_v10 }
 0x768   :  { %v14231_v54 = vpop.permute.xlu1 %8842 }
 0x769   :  { %15973 = vst [vmem:[#allocation71_spill] sm:$0xff] %v14231_v54  ;;  %v14253_v55 = vpop.permute.xlu0 %8852 }
 0x76a   :  { %v14193_v13 = vpop.f32.mrf.mxu3  ;;  %15977 = vst [vmem:[#allocation5_spill] sm:$0xff] %v14253_v55 }
 0x76b   :  { %15966 = vst [vmem:[#allocation11_spill] sm:$0xff] %v14193_v13  ;;  %v6731_v29 = vpop.f32.mrf.mxu2 }
 0x76c   :  { %v14195_v31 = vmul.f32 0.5, %v6731_v29 }
 0x76e   :  { %v7584_v19 = vsel %vm1305_vm1, %v14195_v31, -inf }
 0x76f   :  { %7585 = vmax.xlane.f32.xlu0 %v7584_v19  ;;  %v14215_v19 = vmul.f32 0.5, %v7011_v9 }
 0x770   :  { %v14251_v18 = vpop.permute.xlu1 %8848 }
 0x771   :  { %v7614_v2 = vsel %vm1305_vm1, %v14215_v19, -inf  ;;  %15976 = vst [vmem:[#allocation115_spill] sm:$0xff] %v14251_v18 }
 0x772   :  { %v6759_v27 = vpop.f32.mrf.mxu3 }
 0x773   :  { %v14205_v38 = vmul.f32 0.5, %v6759_v27  ;;  %v6843_v7 = vpop.f32.mrf.mxu2 }
 0x774   :  { %v14229_v9 = vmul.f32 0.5, %v6843_v7 }
 0x775   :  { %v7587_v29 = vsel %vm1305_vm1, %v14205_v38, -inf }
 0x776   :  { %7588 = vmax.xlane.f32.xlu2 %v7587_v29  ;;  %v7596_v4 = vsel %vm1305_vm1, %v14229_v9, -inf }
 0x777   :  { %7630 = vmax.xlane.f32.xlu0 %v7629_v12  ;;  %v14227_v12 = vmul.f32 0.5, %v7123_v30  ;;  %v7235_v30 = vpop.f32.mrf.mxu0 }
 0x778   :  { %v14249_v54 = vmul.f32 0.5, %v7235_v30 }
 0x779   :  { %v7626_v63 = vsel %vm1305_vm1, %v14227_v12, -inf }
 0x77a   :  { %v6871_v62 = vpop.f32.mrf.mxu3 }
 0x77b   :  { %v14219_v27 = vmul.f32 0.5, %v6871_v62  ;;  %v6955_v52 = vpop.f32.mrf.mxu2  ;;  %v7263_v62 = vpop.f32.mrf.mxu1 }
 0x77c   :  { %v14245_v45 = vmul.f32 0.5, %v7263_v62  ;;  %v7638_v62 = vsel %vm1305_vm1, %v14249_v54, -inf }
 0x77d   :  { %v7599_v29 = vsel %vm1305_vm1, %v14219_v27, -inf }
 0x77e   :  { %7615 = vmax.xlane.f32.xlu2 %v7614_v2  ;;  %7600 = vmax.xlane.f32.xlu1 %v7599_v29  ;;  %v14243_v29 = vpop.permute.xlu2 %8850 }
 0x77f   :  { %15975 = vst [vmem:[#allocation125_spill] sm:$0xff] %v14243_v29  ;;  %v7347_v3 = vpop.f32.mrf.mxu0 }
 0x783   :  { %v6983_v35 = vpop.f32.mrf.mxu3  ;;  %v7067_v2 = vpop.f32.mrf.mxu2 }
 0x784   :  { %v14235_v32 = vmul.f32 0.5, %v6983_v35  ;;  %v14247_v35 = vmul.f32 0.5, %v6955_v52  ;;  %v7375_v6 = vpop.f32.mrf.mxu1  ;;  %v14267_v55 = vmul.f32 0.5, %v7067_v2  ;;  %v14279_v2 = vmul.f32 0.5, %v7347_v3 }
 0x786   :  { %7627 = vmax.xlane.f32.xlu1 %v7626_v63  ;;  %v7611_v7 = vsel %vm1305_vm1, %v14235_v32, -inf  ;;  %7597 = vmax.xlane.f32.xlu2 %v7596_v4  ;;  %v7641_v63 = vsel %vm1305_vm1, %v14245_v45, -inf  ;;  %v7608_v4 = vsel %vm1305_vm1, %v14247_v35, -inf  ;;  %v14265_v18 = vpop.permute.xlu2 %8856 }
 0x787   :  { %7612 = vmax.xlane.f32.xlu0 %v7611_v7  ;;  %v14261_v7 = vmul.f32 0.5, %v7375_v6  ;;  %15978 = vst [vmem:[#allocation109_spill] sm:$0xff] %v14265_v18  ;;  %v7620_v6 = vsel %vm1305_vm1, %v14267_v55, -inf }
 0x789   :  { %v7653_v61 = vsel %vm1305_vm1, %v14261_v7, -inf }
 0x78b   :  { %v7095_v10 = vpop.f32.mrf.mxu3  ;;  %v7179_v52 = vpop.f32.mrf.mxu2 }
 0x78c   :  { %v14263_v30 = vmul.f32 0.5, %v7095_v10  ;;  %v7487_v10 = vpop.f32.mrf.mxu1 }
 0x78d   :  { %v14285_v57 = vmul.f32 0.5, %v7487_v10  ;;  %v14299_v10 = vmul.f32 0.5, %v7179_v52 }
 0x78e   :  { %7642 = vmax.xlane.f32.xlu2 %v7641_v63  ;;  %7609 = vmax.xlane.f32.xlu1 %v7608_v4  ;;  %v7623_v40 = vsel %vm1305_vm1, %v14263_v30, -inf  ;;  %v14273_v63 = vpop.permute.xlu1 %8854  ;;  %v14277_v4 = vpop.permute.xlu0 %8922 }
 0x78f   :  { %7639 = vmax.xlane.f32.xlu0 %v7638_v62  ;;  %15979 = vst [vmem:[#allocation117_spill] sm:$0xff] %v14273_v63  ;;  %v14283_v18 = vpop.permute.xlu2 %8926  ;;  %v7665_v3 = vsel %vm1305_vm1, %v14285_v57, -inf }
 0x790   :  { %15980 = vst [vmem:[#allocation127_spill] sm:$0xff] %v14277_v4  ;;  %v7459_v4 = vpop.f32.mrf.mxu0 }
 0x791   :  { %15981 = vst [vmem:[#allocation116_spill] sm:$0xff] %v14283_v18 }
 0x793   :  { %v7207_v29 = vpop.f32.mrf.mxu3  ;;  %v7291_v51 = vpop.f32.mrf.mxu2 }
 0x794   :  { %v14281_v62 = vmul.f32 0.5, %v7207_v29  ;;  %v14295_v29 = vmul.f32 0.5, %v7459_v4 }
 0x796   :  { %7624 = vmax.xlane.f32.xlu2 %v7623_v40  ;;  %7654 = vmax.xlane.f32.xlu1 %v7653_v61  ;;  %v7650_v61 = vsel %vm1305_vm1, %v14279_v2, -inf  ;;  %v7635_v40 = vsel %vm1305_vm1, %v14281_v62, -inf  ;;  %v14291_v63 = vpop.permute.xlu1 %8924 }
 0x797   :  { %7621 = vmax.xlane.f32.xlu0 %v7620_v6  ;;  %15982 = vst [vmem:[#allocation108_spill] sm:$0xff] %v14291_v63  ;;  %v14297_v6 = vpop.permute.xlu0 %8928 }
 0x798   :  { %15983 = vst [vmem:[#allocation29_spill] sm:$0xff] %v14297_v6 }
 0x79b   :  { %v7319_v60 = vpop.f32.mrf.mxu3  ;;  %v7403_v50 = vpop.f32.mrf.mxu2 }
 0x79c   :  { %v14301_v18 = vmul.f32 0.5, %v7319_v60  ;;  %v14310_v60 = vmul.f32 0.5, %v7291_v51 }
 0x79e   :  { %7651 = vmax.xlane.f32.xlu2 %v7650_v61  ;;  %7636 = vmax.xlane.f32.xlu1 %v7635_v40  ;;  %v7662_v61 = vsel %vm1305_vm1, %v14295_v29, -inf  ;;  %v7632_v40 = vsel %vm1305_vm1, %v14299_v10, -inf  ;;  %v7647_v4 = vsel %vm1305_vm1, %v14301_v18, -inf }
 0x79f   :  { %7666 = vmax.xlane.f32.xlu0 %v7665_v3 }
 0x7a1   :  { %v7580_v59 = vpop.xlane.xlu2 %7579  ;;  %v7583_v3 = vpop.xlane.xlu1 %7582 }
 0x7a2   :  { %v7674_v63 = vsub.f32 %v14103_v21, %v7580_v59  ;;  %v14314_v21 = vmul.f32 0.5, %v7403_v50  ;;  %v7675_v59 = vsub.f32 %v14105_v49, %v7583_v3 }
 0x7a3   :  { %v7431_v17 = vpop.f32.mrf.mxu3 }
 0x7a4   :  { %v7706_v52 = vmul.f32 1.442695, %v7674_v63  ;;  %v14312_v6 = vmul.f32 0.5, %v7431_v17  ;;  %v7656_v17 = vsel %vm1305_vm1, %v14314_v21, -inf  ;;  %v7708_v50 = vmul.f32 1.442695, %v7675_v59 }
 0x7a6   :  { %7663 = vmax.xlane.f32.xlu1 %v7662_v61  ;;  %7633 = vmax.xlane.f32.xlu2 %v7632_v40  ;;  %10301 = vpow2.f32 %v7706_v52  ;;  %v7659_v61 = vsel %vm1305_vm1, %v14312_v6, -inf  ;;  %v7644_v40 = vsel %vm1305_vm1, %v14310_v60, -inf }
 0x7a7   :  { %7648 = vmax.xlane.f32.xlu0 %v7647_v4  ;;  %v7515_v4 = vpop.f32.mrf.mxu2  ;;  %10303 = vpow2.f32 %v7708_v50 }
 0x7a8   :  { %v14324_v3 = vmul.f32 0.5, %v7515_v4 }
 0x7a9   :  { %v7595_v53 = vpop.xlane.xlu0 %7594  ;;  %v7592_v49 = vpop.xlane.xlu1 %7591 }
 0x7aa   :  { %v7679_v13 = vsub.f32 %v14119_v23, %v7595_v53  ;;  %v7668_v4 = vsel %vm1305_vm1, %v14324_v3, -inf }
 0x7ab   :  { %v7543_v51 = vpop.f32.mrf.mxu3 }
 0x7ac   :  { %v7716_v63 = vmul.f32 1.442695, %v7679_v13  ;;  %v14326_v23 = vmul.f32 0.5, %v7543_v51  ;;  %v14329_v26 = vpop.eup %10301 }
 0x7ad   :  { %v7770_v51 = vsel %vm1305_vm1, %v14329_v26, 0.0 }
 0x7ae   :  { %7660 = vmax.xlane.f32.xlu2 %v7659_v61  ;;  %7645 = vmax.xlane.f32.xlu1 %v7644_v40  ;;  %v7678_v61 = vsub.f32 %v14117_v34, %v7592_v49  ;;  %10305 = vpow2.f32 %v7716_v63  ;;  %v7671_v13 = vsel %vm1305_vm1, %v14326_v23, -inf  ;;  %v14339_v34 = vpop.eup %10303 }
 0x7af   :  { %7657 = vmax.xlane.f32.xlu0 %v7656_v17 }
 0x7b1   :  { %v7604_v53 = vpop.xlane.xlu0 %7603  ;;  %v7607_v52 = vpop.xlane.xlu2 %7606 }
 0x7b2   :  { %v7683_v5 = vsub.f32 %v14133_v11, %v7607_v52  ;;  %v7682_v40 = vsub.f32 %v14131_v56, %v7604_v53  ;;  %v7714_v11 = vmul.f32 1.442695, %v7678_v61  ;;  %v7773_v53 = vsel %vm1305_vm1, %v14339_v34, 0.0 }
 0x7b4   :  { %v7724_v59 = vmul.f32 1.442695, %v7683_v5  ;;  %v7722_v17 = vmul.f32 1.442695, %v7682_v40  ;;  %v14341_v56 = vpop.eup %10305 }
 0x7b5   :  { %v7785_v49 = vsel %vm1305_vm1, %v14341_v56, 0.0 }
 0x7b6   :  { %7672 = vmax.xlane.f32.xlu1 %v7671_v13  ;;  %7669 = vmax.xlane.f32.xlu2 %v7668_v4  ;;  %10307 = vpow2.f32 %v7724_v59 }
 0x7b7   :  { %7771 = vadd.xlane.f32.xlu0 %v7770_v51  ;;  %10309 = vpow2.f32 %v7714_v11 }
 0x7b8   :  { %10311 = vpow2.f32 %v7722_v17 }
 0x7b9   :  { %v7619_v50 = vpop.xlane.xlu1 %7618 }
 0x7ba   :  { %v7687_v5 = vsub.f32 %v14149_v20, %v7619_v50 }
 0x7bc   :  { %v14344_v63 = vpop.eup %10307  ;;  %v7732_v61 = vmul.f32 1.442695, %v7687_v5 }
 0x7bd   :  { %v7797_v52 = vsel %vm1305_vm1, %v14344_v63, 0.0  ;;  %v14352_v40 = vpop.eup %10309 }
 0x7be   :  { %7786 = vadd.xlane.f32.xlu1 %v7785_v49  ;;  %7774 = vadd.xlane.f32.xlu2 %v7773_v53  ;;  %v14354_v59 = vpop.eup %10311  ;;  %10313 = vpow2.f32 %v7732_v61  ;;  %v7782_v13 = vsel %vm1305_vm1, %v14352_v40, 0.0 }
 0x7bf   :  { %7798 = vadd.xlane.f32.xlu0 %v7797_v52  ;;  %v7794_v20 = vsel %vm1305_vm1, %v14354_v59, 0.0 }
 0x7c4   :  { %v14360_v4 = vpop.eup %10313 }
 0x7c5   :  { %v7809_v51 = vsel %vm1305_vm1, %v14360_v4, 0.0 }
 0x7c6   :  { %7795 = vadd.xlane.f32.xlu1 %v7794_v20  ;;  %7783 = vadd.xlane.f32.xlu2 %v7782_v13 }
 0x7ce   :  { %7810 = vadd.xlane.f32.xlu2 %v7809_v51 }
 0x7e2   :  { %v7586_v11 = vpop.xlane.xlu0 %7585 }
 0x7e3   :  { %v7676_v17 = vsub.f32 %v14195_v31, %v7586_v11 }
 0x7e5   :  { %v7710_v50 = vmul.f32 1.442695, %v7676_v17 }
 0x7e7   :  { %10315 = vpow2.f32 %v7710_v50 }
 0x7e9   :  { %v7589_v5 = vpop.xlane.xlu2 %7588 }
 0x7ea   :  { %v7677_v49 = vsub.f32 %v14205_v38, %v7589_v5  ;;  %v7631_v53 = vpop.xlane.xlu0 %7630 }
 0x7eb   :  { %v7691_v52 = vsub.f32 %v14203_v28, %v7631_v53 }
 0x7ec   :  { %v7712_v61 = vmul.f32 1.442695, %v7677_v49 }
 0x7ed   :  { %v14367_v20 = vpop.eup %10315  ;;  %v7740_v13 = vmul.f32 1.442695, %v7691_v52 }
 0x7ee   :  { %10317 = vpow2.f32 %v7712_v61  ;;  %v7776_v16 = vsel %vm1305_vm1, %v14367_v20, 0.0 }
 0x7ef   :  { %10319 = vpow2.f32 %v7740_v13  ;;  %7777 = vadd.xlane.f32.xlu1 %v7776_v16 }
 0x7f1   :  { %v7616_v51 = vpop.xlane.xlu2 %7615  ;;  %v7601_v31 = vpop.xlane.xlu1 %7600 }
 0x7f2   :  { %v7686_v11 = vsub.f32 %v14215_v19, %v7616_v51  ;;  %v7681_v17 = vsub.f32 %v14219_v27, %v7601_v31 }
 0x7f4   :  { %v14373_v38 = vpop.eup %10317  ;;  %v7730_v50 = vmul.f32 1.442695, %v7686_v11  ;;  %v7720_v28 = vmul.f32 1.442695, %v7681_v17 }
 0x7f5   :  { %v14375_v5 = vpop.eup %10319  ;;  %v7779_v49 = vsel %vm1305_vm1, %v14373_v38, 0.0 }
 0x7f6   :  { %10321 = vpow2.f32 %v7730_v50  ;;  %7780 = vadd.xlane.f32.xlu0 %v7779_v49  ;;  %v7821_v16 = vsel %vm1305_vm1, %v14375_v5, 0.0 }
 0x7f7   :  { %10323 = vpow2.f32 %v7720_v28  ;;  %7822 = vadd.xlane.f32.xlu1 %v7821_v16 }
 0x7f9   :  { %v7598_v53 = vpop.xlane.xlu2 %7597  ;;  %v7628_v19 = vpop.xlane.xlu1 %7627 }
 0x7fa   :  { %v7613_v52 = vpop.xlane.xlu0 %7612  ;;  %v7680_v27 = vsub.f32 %v14229_v9, %v7598_v53  ;;  %v7690_v61 = vsub.f32 %v14227_v12, %v7628_v19 }
 0x7fb   :  { %v7685_v13 = vsub.f32 %v14235_v32, %v7613_v52 }
 0x7fc   :  { %v14384_v51 = vpop.eup %10321  ;;  %v7718_v31 = vmul.f32 1.442695, %v7680_v27  ;;  %v7738_v11 = vmul.f32 1.442695, %v7690_v61 }
 0x7fd   :  { %v14386_v17 = vpop.eup %10323  ;;  %v7728_v50 = vmul.f32 1.442695, %v7685_v13  ;;  %v7806_v28 = vsel %vm1305_vm1, %v14384_v51, 0.0 }
 0x7fe   :  { %10325 = vpow2.f32 %v7718_v31  ;;  %7807 = vadd.xlane.f32.xlu0 %v7806_v28  ;;  %v7791_v49 = vsel %vm1305_vm1, %v14386_v17, 0.0 }
 0x7ff   :  { %10327 = vpow2.f32 %v7728_v50  ;;  %7792 = vadd.xlane.f32.xlu2 %v7791_v49 }
 0x800   :  { %10329 = vpow2.f32 %v7738_v11 }
 0x801   :  { %v7643_v12 = vpop.xlane.xlu2 %7642  ;;  %v7610_v32 = vpop.xlane.xlu1 %7609 }
 0x802   :  { %v7640_v9 = vpop.xlane.xlu0 %7639  ;;  %v7695_v16 = vsub.f32 %v14245_v45, %v7643_v12  ;;  %v7684_v53 = vsub.f32 %v14247_v35, %v7610_v32 }
 0x803   :  { %v7694_v19 = vsub.f32 %v14249_v54, %v7640_v9 }
 0x804   :  { %v14395_v52 = vpop.eup %10325  ;;  %v7748_v27 = vmul.f32 1.442695, %v7695_v16  ;;  %v7726_v61 = vmul.f32 1.442695, %v7684_v53 }
 0x805   :  { %v14397_v13 = vpop.eup %10327  ;;  %v7746_v31 = vmul.f32 1.442695, %v7694_v19  ;;  %v7788_v50 = vsel %vm1305_vm1, %v14395_v52, 0.0 }
 0x806   :  { %v14401_v11 = vpop.eup %10329  ;;  %10331 = vpow2.f32 %v7748_v27  ;;  %v7803_v45 = vsel %vm1305_vm1, %v14397_v13, 0.0  ;;  %7789 = vadd.xlane.f32.xlu0 %v7788_v50 }
 0x807   :  { %10333 = vpow2.f32 %v7746_v31  ;;  %7804 = vadd.xlane.f32.xlu1 %v7803_v45  ;;  %v7818_v54 = vsel %vm1305_vm1, %v14401_v11, 0.0 }
 0x808   :  { %10335 = vpow2.f32 %v7726_v61  ;;  %7819 = vadd.xlane.f32.xlu2 %v7818_v54 }
 0x809   :  { %v7625_v35 = vpop.xlane.xlu2 %7624  ;;  %v7655_v28 = vpop.xlane.xlu1 %7654 }
 0x80a   :  { %v7689_v49 = vsub.f32 %v14263_v30, %v7625_v35  ;;  %v7622_v12 = vpop.xlane.xlu0 %7621  ;;  %v7699_v32 = vsub.f32 %v14261_v7, %v7655_v28 }
 0x80b   :  { %v7688_v9 = vsub.f32 %v14267_v55, %v7622_v12 }
 0x80c   :  { %v14410_v16 = vpop.eup %10331  ;;  %v7736_v53 = vmul.f32 1.442695, %v7689_v49  ;;  %v7756_v19 = vmul.f32 1.442695, %v7699_v32 }
 0x80d   :  { %v14412_v27 = vpop.eup %10333  ;;  %v7734_v31 = vmul.f32 1.442695, %v7688_v9  ;;  %v7833_v61 = vsel %vm1305_vm1, %v14410_v16, 0.0 }
 0x80e   :  { %v14416_v50 = vpop.eup %10335  ;;  %10337 = vpow2.f32 %v7736_v53  ;;  %v7830_v30 = vsel %vm1305_vm1, %v14412_v27, 0.0  ;;  %7834 = vadd.xlane.f32.xlu0 %v7833_v61 }
 0x80f   :  { %10339 = vpow2.f32 %v7734_v31  ;;  %7831 = vadd.xlane.f32.xlu1 %v7830_v30  ;;  %v7800_v55 = vsel %vm1305_vm1, %v14416_v50, 0.0 }
 0x810   :  { %10341 = vpow2.f32 %v7756_v19  ;;  %7801 = vadd.xlane.f32.xlu2 %v7800_v55 }
 0x811   :  { %v7652_v7 = vpop.xlane.xlu2 %7651  ;;  %v7637_v45 = vpop.xlane.xlu1 %7636 }
 0x812   :  { %v7698_v54 = vsub.f32 %v14279_v2, %v7652_v7  ;;  %v7667_v35 = vpop.xlane.xlu0 %7666  ;;  %v7693_v28 = vsub.f32 %v14281_v62, %v7637_v45 }
 0x813   :  { %v7703_v49 = vsub.f32 %v14285_v57, %v7667_v35 }
 0x814   :  { %v14425_v12 = vpop.eup %10337  ;;  %v7754_v32 = vmul.f32 1.442695, %v7698_v54  ;;  %v7744_v9 = vmul.f32 1.442695, %v7693_v28 }
 0x815   :  { %v14427_v53 = vpop.eup %10339  ;;  %v7764_v31 = vmul.f32 1.442695, %v7703_v49  ;;  %v7815_v19 = vsel %vm1305_vm1, %v14425_v12, 0.0 }
 0x816   :  { %v14431_v61 = vpop.eup %10341  ;;  %10343 = vpow2.f32 %v7754_v32  ;;  %v7812_v2 = vsel %vm1305_vm1, %v14427_v53, 0.0  ;;  %7816 = vadd.xlane.f32.xlu0 %v7815_v19 }
 0x817   :  { %10345 = vpow2.f32 %v7764_v31  ;;  %7813 = vadd.xlane.f32.xlu1 %v7812_v2  ;;  %v7845_v57 = vsel %vm1305_vm1, %v14431_v61, 0.0 }
 0x818   :  { %10347 = vpow2.f32 %v7744_v9  ;;  %7846 = vadd.xlane.f32.xlu2 %v7845_v57 }
 0x819   :  { %v7634_v62 = vpop.xlane.xlu2 %7633  ;;  %v7664_v30 = vpop.xlane.xlu1 %7663 }
 0x81a   :  { %v7649_v55 = vpop.xlane.xlu0 %7648  ;;  %v7692_v7 = vsub.f32 %v14299_v10, %v7634_v62  ;;  %v7702_v45 = vsub.f32 %v14295_v29, %v7664_v30 }
 0x81b   :  { %v7697_v54 = vsub.f32 %v14301_v18, %v7649_v55 }
 0x81c   :  { %v14440_v35 = vpop.eup %10343  ;;  %v7742_v28 = vmul.f32 1.442695, %v7692_v7  ;;  %v7762_v49 = vmul.f32 1.442695, %v7702_v45 }
 0x81d   :  { %v14442_v32 = vpop.eup %10345  ;;  %v7752_v31 = vmul.f32 1.442695, %v7697_v54  ;;  %v7842_v9 = vsel %vm1305_vm1, %v14440_v35, 0.0 }
 0x81e   :  { %v14446_v19 = vpop.eup %10347  ;;  %10349 = vpow2.f32 %v7742_v28  ;;  %v7857_v10 = vsel %vm1305_vm1, %v14442_v32, 0.0  ;;  %7843 = vadd.xlane.f32.xlu0 %v7842_v9 }
 0x81f   :  { %10351 = vpow2.f32 %v7752_v31  ;;  %7858 = vadd.xlane.f32.xlu1 %v7857_v10  ;;  %v7827_v18 = vsel %vm1305_vm1, %v14446_v19, 0.0 }
 0x820   :  { %10353 = vpow2.f32 %v7762_v49  ;;  %7828 = vadd.xlane.f32.xlu2 %v7827_v18 }
 0x821   :  { %v14452_v29 = vpop.xlane.xlu2 %7660  ;;  %v7646_v2 = vpop.xlane.xlu1 %7645 }
 0x822   :  { %v7658_v57 = vpop.xlane.xlu0 %7657  ;;  %v7696_v62 = vsub.f32 %v14310_v60, %v7646_v2 }
 0x823   :  { %v7700_v30 = vsub.f32 %v14314_v21, %v7658_v57 }
 0x824   :  { %v14456_v55 = vpop.eup %10349  ;;  %v7750_v7 = vmul.f32 1.442695, %v7696_v62 }
 0x825   :  { %v14458_v45 = vpop.eup %10351  ;;  %v7758_v54 = vmul.f32 1.442695, %v7700_v30  ;;  %v7824_v28 = vsel %vm1305_vm1, %v14456_v55, 0.0 }
 0x826   :  { %v14462_v31 = vpop.eup %10353  ;;  %v7839_v49 = vsel %vm1305_vm1, %v14458_v45, 0.0  ;;  %7825 = vadd.xlane.f32.xlu0 %v7824_v28  ;;  %v9854_v28 = vunpack.i.l.bf16 %v14041_v8 }
 0x827   :  { %10355 = vpow2.f32 %v7758_v54  ;;  %7840 = vadd.xlane.f32.xlu1 %v7839_v49  ;;  %v7854_v60 = vsel %vm1305_vm1, %v14462_v31, 0.0 }
 0x828   :  { %10357 = vpow2.f32 %v7750_v7  ;;  %7855 = vadd.xlane.f32.xlu2 %v7854_v60 }
 0x829   :  { %v14468_v21 = vpop.xlane.xlu2 %7669  ;;  %v14470_v9 = vpop.xlane.xlu1 %7672 }
 0x82a   :  { %v7772_v10 = vpop.xlane.xlu0 %7771 }
 0x82b   :  { %10359 = vrcp.f32 %v7772_v10 }
 0x82d   :  { %v14472_v18 = vpop.eup %10355 }
 0x82e   :  { %15984 = vst [vmem:[#allocation143_spill] sm:$0xff] %v14472_v18  ;;  %v14474_v2 = vpop.eup %10357  ;;  %v7848_v57 = vsel %vm1305_vm1, %v14472_v18, 0.0  ;;  %v9855_v18 = vunpack.i.h.bf16 %v14041_v8  ;;  %v9864_v8 = vunpack.i.l.bf16 %v14047_v36 }
 0x82f   :  { %7849 = vadd.xlane.f32.xlu1 %v7848_v57  ;;  %v7836_v62 = vsel %vm1305_vm1, %v14474_v2, 0.0 }
 0x830   :  { %7837 = vadd.xlane.f32.xlu2 %v7836_v62 }
 0x831   :  { %v10360_v30 = vpop.eup %10359  ;;  %v7775_v7 = vpop.xlane.xlu2 %7774 }
 0x832   :  { %v7898_v54 = vmul.f32 %v10360_v30, %v14329_v26  ;;  %10361 = vrcp.f32 %v7775_v7  ;;  %v7787_v49 = vpop.xlane.xlu1 %7786  ;;  %v7799_v26 = vpop.xlane.xlu0 %7798 }
 0x833   :  { %10363 = vrcp.f32 %v7787_v49 }
 0x834   :  { %9633 = vmatmul.msk.f32.vlgmr.msra.gmra.mxu0 %vm440_vm0, %v7898_v54 }
 0x835   :  { %8159 = vmatpush.msra.mxu0 %v9854_v28  ;;  %v9865_v28 = vunpack.i.h.bf16 %v14047_v36 }
 0x838   :  { %v10362_v60 = vpop.eup %10361 }
 0x839   :  { %v7899_v10 = vmul.f32 %v10362_v60, %v14339_v34  ;;  %v7784_v57 = vpop.xlane.xlu2 %7783  ;;  %v10364_v30 = vpop.eup %10363  ;;  %v9874_v60 = vunpack.i.l.bf16 %v14051_v41 }
 0x83a   :  { %10365 = vrcp.f32 %v7784_v57  ;;  %8934 = vrot.lane.b32.xlu0 %v14101_v14, %s10433_s30  ;;  %v7796_v62 = vpop.xlane.xlu1 %7795  ;;  %v7903_v54 = vmul.f32 %v10364_v30, %v14341_v56 }
 0x83b   :  { %9634 = vmatmul.msk.f32.vlgmr.msra.gmra.mxu1 %vm440_vm0, %v7899_v10  ;;  %10367 = vrcp.f32 %v7799_v26 }
 0x83c   :  { %8185 = vmatpush.msra.mxu1 %v9855_v18  ;;  %10369 = vrcp.f32 %v7796_v62 }
 0x840   :  { %v10366_v7 = vpop.eup %10365 }
 0x841   :  { %v7902_v34 = vmul.f32 %v10366_v7, %v14352_v40  ;;  %v10368_v14 = vpop.eup %10367  ;;  %v7811_v18 = vpop.xlane.xlu2 %7810  ;;  %v9875_v40 = vunpack.i.h.bf16 %v14051_v41 }
 0x842   :  { %v10370_v49 = vpop.eup %10369  ;;  %10371 = vrcp.f32 %v7811_v18  ;;  %v7907_v56 = vmul.f32 %v10368_v14, %v14344_v63  ;;  %v7701_v63 = vsub.f32 %v14312_v6, %v14452_v29  ;;  %v9895_v18 = vunpack.i.h.bf16 %v14083_v58 }
 0x843   :  { %9637 = vmatmul.msk.f32.vlgmr.msrb.gmra.mxu0 %vm440_vm0, %v7902_v34  ;;  %9638 = vmatmul.msk.f32.vlgmr.msrb.gmra.mxu1 %vm440_vm0, %v7903_v54  ;;  %v7906_v36 = vmul.f32 %v10370_v49, %v14354_v59  ;;  %v7704_v59 = vsub.f32 %v14324_v3, %v14468_v21 }
 0x844   :  { %8263 = vmatpush.msrb.mxu0 %v9864_v8  ;;  %8289 = vmatpush.msrb.mxu1 %v9865_v28  ;;  %v7760_v41 = vmul.f32 1.442695, %v7701_v63  ;;  %v9860_v28 = vunpack.i.h.bf16 %v14033_v47 }
 0x845   :  { %v7766_v57 = vmul.f32 1.442695, %v7704_v59 }
 0x846   :  { %10373 = vpow2.f32 %v7760_v41  ;;  %v9880_v41 = vunpack.i.h.bf16 %v14065_v33 }
 0x847   :  { %10375 = vpow2.f32 %v7766_v57 }
 0x848   :  { %8932 = vrot.lane.b32.xlu2 %v13984_v44, %s10433_s30  ;;  %8930 = vrot.lane.b32.xlu1 %v13992_v1, %s10433_s30  ;;  %v10372_v10 = vpop.eup %10371  ;;  %v9885_v1 = vunpack.i.h.bf16 %v14080_v25 }
 0x849   :  { %v7911_v44 = vmul.f32 %v10372_v10, %v14360_v4 }
 0x84b   :  { %9641 = vmatmul.msk.f32.vlgmr.msra.gmra.mxu0 %vm440_vm0, %v7906_v36  ;;  %9642 = vmatmul.msk.f32.vlgmr.msra.gmra.mxu1 %vm440_vm0, %v7907_v56 }
 0x84c   :  { %8367 = vmatpush.msra.mxu0 %v9874_v60  ;;  %8393 = vmatpush.msra.mxu1 %v9875_v40  ;;  %v14517_v4 = vpop.eup %10373  ;;  %v9870_v40 = vunpack.i.h.bf16 %v14063_v15 }
 0x84d   :  { %v14523_v26 = vpop.eup %10375 }
 0x84e   :  { %v7860_v62 = vsel %vm1305_vm1, %v14523_v26, 0.0 }
 0x850   :  { %8936 = vrot.lane.b32.xlu1 %v14127_v37, %s10433_s30  ;;  %v7705_v37 = vsub.f32 %v14326_v23, %v14470_v9  ;;  %v9859_v9 = vunpack.i.l.bf16 %v14033_v47 }
 0x852   :  { %v7768_v29 = vmul.f32 1.442695, %v7705_v37 }
 0x853   :  { %9646 = vmatmul.msk.f32.vlgmr.msrb.gmra.mxu1 %vm440_vm0, %v7911_v44  ;;  %v9869_v44 = vunpack.i.l.bf16 %v14063_v15 }
 0x854   :  { %8497 = vmatpush.msrb.mxu1 %v9885_v1 }
 0x858   :  { %8942 = vrot.lane.b32.xlu1 %v14121_v24, %s10433_s30  ;;  %v7851_v24 = vsel %vm1305_vm1, %v14517_v4, 0.0 }
 0x860   :  { %8948 = vrot.lane.b32.xlu1 %v14017_v0, %s10433_s30 }
 0x862   :  { %v7778_v6 = vpop.xlane.xlu1 %7777 }
 0x863   :  { %10377 = vrcp.f32 %v7778_v6  ;;  %v15987_v6 = vld [vmem:[#allocation41_spill] sm:$0xff] }
 0x864   :  { %7852 = vadd.xlane.f32.xlu0 %v7851_v24  ;;  %10379 = vpow2.f32 %v7768_v29  ;;  %v9905_v29 = vunpack.i.h.bf16 %v15987_v6 }
 0x868   :  { %8954 = vrot.lane.b32.xlu1 %v14035_v48, %s10433_s30 }
 0x869   :  { %v10378_v3 = vpop.eup %10377  ;;  %v7781_v23 = vpop.xlane.xlu0 %7780 }
 0x86a   :  { %v7900_v21 = vmul.f32 %v10378_v3, %v14367_v20  ;;  %10381 = vrcp.f32 %v7781_v23  ;;  %v7823_v0 = vpop.xlane.xlu1 %7822  ;;  %v14532_v30 = vpop.eup %10379 }
 0x86b   :  { %10383 = vrcp.f32 %v7823_v0  ;;  %v7863_v48 = vsel %vm1305_vm1, %v14532_v30, 0.0  ;;  %v15988_v0 = vld [vmem:[#allocation11_spill] sm:$0xff] }
 0x86c   :  { %7861 = vadd.xlane.f32.xlu0 %v7860_v62  ;;  %9635 = vmatmul.msk.f32.vlgmr.msra.gmra.mxu2 %vm440_vm0, %v7900_v21  ;;  %v9904_v21 = vunpack.i.l.bf16 %v15987_v6  ;;  %v16003_v6 = vld [vmem:[#allocation122_spill] sm:$0xff] }
 0x86d   :  { %8211 = vmatpush.msra.mxu2 %v9859_v9 }
 0x870   :  { %v10382_v7 = vpop.eup %10381  ;;  %8960 = vrot.lane.b32.xlu1 %v14169_v43, %s10433_s30 }
 0x871   :  { %v10384_v20 = vpop.eup %10383  ;;  %v7901_v54 = vmul.f32 %v10382_v7, %v14373_v38  ;;  %7864 = vadd.xlane.f32.xlu2 %v7863_v48  ;;  %v7808_v34 = vpop.xlane.xlu0 %7807 }
 0x872   :  { %v7915_v8 = vmul.f32 %v10384_v20, %v14375_v5  ;;  %10385 = vrcp.f32 %v7808_v34  ;;  %v7793_v14 = vpop.xlane.xlu2 %7792  ;;  %v9884_v5 = vunpack.i.l.bf16 %v14080_v25  ;;  %v15991_v20 = vld [vmem:[#allocation142_spill] sm:$0xff] }
 0x873   :  { %10387 = vrcp.f32 %v7793_v14  ;;  %9636 = vmatmul.msk.f32.vlgmr.msra.gmra.mxu3 %vm440_vm0, %v7901_v54  ;;  %v9890_v54 = vunpack.i.h.bf16 %v15991_v20 }
 0x874   :  { %8237 = vmatpush.msra.mxu3 %v9860_v28  ;;  %9650 = vmatmul.msk.f32.vlgmr.msra.gmra.mxu1 %vm440_vm0, %v7915_v8 }
 0x875   :  { %8601 = vmatpush.msra.mxu1 %v9895_v18  ;;  %v9889_v18 = vunpack.i.l.bf16 %v15991_v20 }
 0x878   :  { %v10386_v43 = vpop.eup %10385  ;;  %8966 = vrot.lane.b32.xlu1 %v14165_v46, %s10433_s30 }
 0x879   :  { %v10388_v38 = vpop.eup %10387  ;;  %v7910_v47 = vmul.f32 %v10386_v43, %v14384_v51  ;;  %v7790_v49 = vpop.xlane.xlu0 %7789 }
 0x87a   :  { %v7905_v56 = vmul.f32 %v10388_v38, %v14386_v17  ;;  %10389 = vrcp.f32 %v7790_v49  ;;  %v7805_v36 = vpop.xlane.xlu1 %7804  ;;  %v15993_v38 = vld [vmem:[#allocation51_spill] sm:$0xff] }
 0x87b   :  { %v7820_v60 = vpop.xlane.xlu2 %7819  ;;  %10391 = vrcp.f32 %v7805_v36  ;;  %9645 = vmatmul.msk.f32.vlgmr.msrb.gmra.mxu0 %vm440_vm0, %v7910_v47 }
 0x87c   :  { %10393 = vrcp.f32 %v7820_v60  ;;  %9640 = vmatmul.msk.f32.vlgmr.msrb.gmra.mxu3 %vm440_vm0, %v7905_v56  ;;  %8471 = vmatpush.msrb.mxu0 %v9884_v5  ;;  %v15994_v60 = vld [vmem:[#allocation152_spill] sm:$0xff] }
 0x87d   :  { %8341 = vmatpush.msrb.mxu3 %v9870_v40 }
 0x880   :  { %v10390_v46 = vpop.eup %10389  ;;  %8972 = vrot.lane.b32.xlu1 %v14068_v42, %s10433_s30  ;;  %8940 = vrot.lane.b32.xlu0 %v14002_v39, %s10433_s30  ;;  %v9894_v39 = vunpack.i.l.bf16 %v14083_v58  ;;  %v15985_v42 = vld [vmem:[#allocation36_spill] sm:$0xff] }
 0x881   :  { %v10392_v25 = vpop.eup %10391  ;;  %v7904_v51 = vmul.f32 %v10390_v46, %v14395_v52  ;;  %v7835_v17 = vpop.xlane.xlu0 %7834  ;;  %v15986_v58 = vld [vmem:[#allocation144_spill] sm:$0xff]  ;;  %v9900_v46 = vunpack.i.h.bf16 %v15994_v60 }
 0x882   :  { %v10394_v10 = vpop.eup %10393  ;;  %v7909_v1 = vmul.f32 %v10392_v25, %v14397_v13  ;;  %10395 = vrcp.f32 %v7835_v17  ;;  %v7832_v63 = vpop.xlane.xlu1 %7831  ;;  %v15995_v25 = vld [vmem:[#allocation47_spill] sm:$0xff] }
 0x883   :  { %v7914_v59 = vmul.f32 %v10394_v10, %v14401_v11  ;;  %v7802_v57 = vpop.xlane.xlu2 %7801  ;;  %10397 = vrcp.f32 %v7832_v63  ;;  %9639 = vmatmul.msk.f32.vlgmr.msrb.gmra.mxu2 %vm440_vm0, %v7904_v51  ;;  %v9899_v10 = vunpack.i.l.bf16 %v15994_v60 }
 0x884   :  { %10399 = vrcp.f32 %v7802_v57  ;;  %9644 = vmatmul.msk.f32.vlgmr.msra.gmra.mxu3 %vm440_vm0, %v7909_v1  ;;  %8315 = vmatpush.msrb.mxu2 %v9869_v44  ;;  %v15998_v57 = vld [vmem:[#allocation26_spill] sm:$0xff] }
 0x885   :  { %9649 = vmatmul.msk.f32.vlgmr.msra.gmra.mxu0 %vm440_vm0, %v7914_v59  ;;  %8445 = vmatpush.msra.mxu3 %v9880_v41  ;;  %v15997_v41 = vld [vmem:[#allocation35_spill] sm:$0xff] }
 0x886   :  { %8575 = vmatpush.msra.mxu0 %v9894_v39  ;;  %v9910_v59 = vunpack.i.h.bf16 %v15997_v41 }
 0x888   :  { %v10396_v15 = vpop.eup %10395  ;;  %8978 = vrot.lane.b32.xlu1 %v14091_v22, %s10433_s30  ;;  %8946 = vrot.lane.b32.xlu0 %v15985_v42, %s10433_s30 }
 0x889   :  { %v10398_v52 = vpop.eup %10397  ;;  %v7919_v13 = vmul.f32 %v10396_v15, %v14410_v16  ;;  %8938 = vrot.lane.b32.xlu2 %v15986_v58, %s10433_s30  ;;  %v7817_v11 = vpop.xlane.xlu0 %7816  ;;  %v9879_v16 = vunpack.i.l.bf16 %v14065_v33  ;;  %v15990_v33 = vld [vmem:[#allocation58_spill] sm:$0xff]  ;;  %v9909_v15 = vunpack.i.l.bf16 %v15997_v41  ;;  %v16002_v58 = vld [vmem:[#allocation143_spill] sm:$0xff] }
 0x88a   :  { %v10400_v37 = vpop.eup %10399  ;;  %v7918_v24 = vmul.f32 %v10398_v52, %v14412_v27  ;;  %10401 = vrcp.f32 %v7817_v11  ;;  %v7814_v3 = vpop.xlane.xlu1 %7813  ;;  %v16000_v52 = vld [vmem:[#allocation119_spill] sm:$0xff] }
 0x88b   :  { %v7908_v23 = vmul.f32 %v10400_v37, %v14416_v50  ;;  %v7847_v22 = vpop.xlane.xlu2 %7846  ;;  %10403 = vrcp.f32 %v7814_v3  ;;  %9654 = vmatmul.msk.f32.vlgmr.msrb.gmra.mxu1 %vm440_vm0, %v7919_v13  ;;  %v15989_v50 = vld [vmem:[#allocation64_spill] sm:$0xff]  ;;  %v16001_v13 = vld [vmem:[#allocation57_spill] sm:$0xff] }
 0x88c   :  { %10405 = vrcp.f32 %v7847_v22  ;;  %8705 = vmatpush.msrb.mxu1 %v9905_v29  ;;  %v16004_v29 = vld [vmem:[#allocation59_spill] sm:$0xff]  ;;  %v16005_v22 = vld [vmem:[#allocation161_spill] sm:$0xff] }
 0x88d   :  { %9643 = vmatmul.msk.f32.vlgmr.msra.gmra.mxu2 %vm440_vm0, %v7908_v23  ;;  %9653 = vmatmul.msk.f32.vlgmr.msrb.gmra.mxu0 %vm440_vm0, %v7918_v24 }
 0x88e   :  { %8419 = vmatpush.msra.mxu2 %v9879_v16  ;;  %8679 = vmatpush.msrb.mxu0 %v9904_v21 }
 0x890   :  { %v10402_v27 = vpop.eup %10401  ;;  %8984 = vrot.lane.b32.xlu1 %v15988_v0, %s10433_s30  ;;  %8952 = vrot.lane.b32.xlu0 %v15989_v50, %s10433_s30 }
 0x891   :  { %v10404_v9 = vpop.eup %10403  ;;  %v7913_v62 = vmul.f32 %v10402_v27, %v14425_v12  ;;  %8944 = vrot.lane.b32.xlu2 %v15990_v33, %s10433_s30  ;;  %v7844_v7 = vpop.xlane.xlu0 %7843 }
 0x892   :  { %v10406_v48 = vpop.eup %10405  ;;  %v7912_v34 = vmul.f32 %v10404_v9, %v14427_v53  ;;  %10407 = vrcp.f32 %v7844_v7  ;;  %v7859_v28 = vpop.xlane.xlu1 %7858  ;;  %v15992_v53 = vld [vmem:[#allocation50_spill] sm:$0xff] }
 0x893   :  { %v7923_v8 = vmul.f32 %v10406_v48, %v14431_v61  ;;  %v7829_v14 = vpop.xlane.xlu2 %7828  ;;  %10409 = vrcp.f32 %v7859_v28  ;;  %9648 = vmatmul.msk.f32.vlgmr.msrb.gmra.mxu3 %vm440_vm0, %v7913_v62  ;;  %v16006_v7 = vld [vmem:[#allocation118_spill] sm:$0xff]  ;;  %v16007_v48 = vld [vmem:[#allocation76_spill] sm:$0xff] }
 0x894   :  { %10411 = vrcp.f32 %v7829_v14  ;;  %8549 = vmatpush.msrb.mxu3 %v9890_v54  ;;  %v9162_v20 = vsel %vm440_vm0, %v16007_v48, %v16006_v7 }
 0x895   :  { %9647 = vmatmul.msk.f32.vlgmr.msrb.gmra.mxu2 %vm440_vm0, %v7912_v34  ;;  %9658 = vmatmul.msk.f32.vlgmr.msra.gmra.mxu1 %vm440_vm0, %v7923_v8 }
 0x896   :  { %8523 = vmatpush.msrb.mxu2 %v9889_v18 }
 0x898   :  { %v10408_v12 = vpop.eup %10407  ;;  %8958 = vrot.lane.b32.xlu0 %v15992_v53, %s10433_s30  ;;  %v16009_v53 = vld [vmem:[#allocation120_spill] sm:$0xff] }
 0x899   :  { %v10410_v43 = vpop.eup %10409  ;;  %v7922_v61 = vmul.f32 %v10408_v12, %v14440_v35  ;;  %8950 = vrot.lane.b32.xlu2 %v15993_v38, %s10433_s30  ;;  %v7826_v47 = vpop.xlane.xlu0 %7825  ;;  %v16008_v12 = vld [vmem:[#allocation130_spill] sm:$0xff] }
 0x89a   :  { %v10412_v49 = vpop.eup %10411  ;;  %v7927_v5 = vmul.f32 %v10410_v43, %v14442_v32  ;;  %10413 = vrcp.f32 %v7826_v47  ;;  %v7841_v56 = vpop.xlane.xlu1 %7840  ;;  %v9165_v43 = vsel %vm440_vm0, %v16009_v53, %v16008_v12 }
 0x89b   :  { %v7917_v36 = vmul.f32 %v10412_v49, %v14446_v19  ;;  %v7856_v40 = vpop.xlane.xlu2 %7855  ;;  %10415 = vrcp.f32 %v7841_v56  ;;  %9657 = vmatmul.msk.f32.vlgmr.msra.gmra.mxu0 %vm440_vm0, %v7922_v61  ;;  %v15996_v19 = vld [vmem:[#allocation135_spill] sm:$0xff]  ;;  %v16011_v56 = vld [vmem:[#allocation90_spill] sm:$0xff] }
 0x89c   :  { %10417 = vrcp.f32 %v7856_v40 }
 0x89d   :  { %9652 = vmatmul.msk.f32.vlgmr.msra.gmra.mxu3 %vm440_vm0, %v7917_v36  ;;  %9662 = vmatmul.msk.f32.vlgmr.msrb.gmra.mxu1 %vm440_vm0, %v7927_v5 }
 0x89e   :  { %8653 = vmatpush.msra.mxu3 %v9900_v46 }
 0x8a0   :  { %v10414_v35 = vpop.eup %10413  ;;  %8964 = vrot.lane.b32.xlu0 %v15995_v25, %s10433_s30 }
 0x8a1   :  { %v10416_v32 = vpop.eup %10415  ;;  %v7916_v51 = vmul.f32 %v10414_v35, %v14456_v55  ;;  %8956 = vrot.lane.b32.xlu2 %v15996_v19, %s10433_s30 }
 0x8a2   :  { %v10418_v17 = vpop.eup %10417  ;;  %v7921_v44 = vmul.f32 %v10416_v32, %v14458_v45  ;;  %v7850_v55 = vpop.xlane.xlu1 %7849  ;;  %v15999_v45 = vld [vmem:[#allocation151_spill] sm:$0xff] }
 0x8a3   :  { %v7926_v1 = vmul.f32 %v10418_v17, %v14462_v31  ;;  %v7838_v63 = vpop.xlane.xlu2 %7837  ;;  %9651 = vmatmul.msk.f32.vlgmr.msra.gmra.mxu2 %vm440_vm0, %v7916_v51  ;;  %v16013_v51 = vld [vmem:[#allocation84_spill] sm:$0xff] }
 0x8a4   :  { %10419 = vrcp.f32 %v7838_v63  ;;  %8627 = vmatpush.msra.mxu2 %v9899_v10 }
 0x8a5   :  { %9656 = vmatmul.msk.f32.vlgmr.msrb.gmra.mxu3 %vm440_vm0, %v7921_v44  ;;  %9661 = vmatmul.msk.f32.vlgmr.msrb.gmra.mxu0 %vm440_vm0, %v7926_v1  ;;  %10421 = vrcp.f32 %v7850_v55  ;;  %v16015_v55 = vld [vmem:[#allocation85_spill] sm:$0xff] }
 0x8a6   :  { %8757 = vmatpush.msrb.mxu3 %v9910_v59  ;;  %v16014_v59 = vld [vmem:[#allocation62_spill] sm:$0xff] }
 0x8a8   :  { %8970 = vrot.lane.b32.xlu0 %v15998_v57, %s10433_s30  ;;  %v9158_v57 = vsel %vm440_vm0, %v16015_v55, %v16014_v59  ;;  %v16032_v59 = vld [vmem:[#allocation7_spill] sm:$0xff] }
 0x8a9   :  { %8962 = vrot.lane.b32.xlu2 %v15999_v45, %s10433_s30  ;;  %v16016_v45 = vld [vmem:[#allocation125_spill] sm:$0xff]  ;;  %v16033_v55 = vld [vmem:[#allocation83_spill] sm:$0xff] }
 0x8aa   :  { %v10420_v31 = vpop.eup %10419 }
 0x8ab   :  { %v7920_v39 = vmul.f32 %v10420_v31, %v14474_v2  ;;  %v10422_v42 = vpop.eup %10421  ;;  %v14659_v28 = vpop.permute.xlu2 %8932  ;;  %v16017_v31 = vld [vmem:[#allocation100_spill] sm:$0xff] }
 0x8ac   :  { %v7924_v11 = vmul.f32 %v10422_v42, %v16002_v58  ;;  %v14647_v50 = vpop.permute.xlu0 %8934  ;;  %v16018_v58 = vld [vmem:[#allocation65_spill] sm:$0xff] }
 0x8ad   :  { %9655 = vmatmul.msk.f32.vlgmr.msrb.gmra.mxu2 %vm440_vm0, %v7920_v39  ;;  %v9174_v39 = vsel %vm440_vm0, %v16017_v31, %v16016_v45 }
 0x8ae   :  { %8731 = vmatpush.msrb.mxu2 %v9909_v15 }
 0x8b0   :  { %8976 = vrot.lane.b32.xlu0 %v16000_v52, %s10433_s30 }
 0x8b1   :  { %8968 = vrot.lane.b32.xlu2 %v16001_v13, %s10433_s30  ;;  %v7953_v37 = vpop.f32.mrf.mxu0 }
 0x8b5   :  { %9659 = vmatmul.msk.f32.vlgmr.msra.gmra.mxu2 %vm440_vm0, %v7924_v11  ;;  %v16019_v11 = vld [vmem:[#allocation82_spill] sm:$0xff] }
 0x8b8   :  { %8982 = vrot.lane.b32.xlu0 %v16003_v6, %s10433_s30  ;;  %v7979_v2 = vpop.f32.mrf.mxu1 }
 0x8b9   :  { %8974 = vrot.lane.b32.xlu2 %v16004_v29, %s10433_s30  ;;  %v16020_v29 = vld [vmem:[#allocation109_spill] sm:$0xff] }
 0x8ba   :  { %v14634_v24 = vpop.permute.xlu1 %8930 }
 0x8c0   :  { %9052 = vrot.lane.b32.xlu0 %v7979_v2, %s10434_s10  ;;  %v8057_v3 = vpop.f32.mrf.mxu0  ;;  %v8083_v23 = vpop.f32.mrf.mxu1 }
 0x8c1   :  { %8980 = vrot.lane.b32.xlu2 %v16005_v22, %s10433_s30  ;;  %9060 = vrot.lane.b32.xlu1 %v8083_v23, %s10434_s10 }
 0x8c2   :  { %v14640_v21 = vpop.permute.xlu1 %8936 }
 0x8c8   :  { %v8187_v16 = vpop.f32.mrf.mxu1  ;;  %9058 = vrot.lane.b32.xlu0 %v8057_v3, %s10434_s10  ;;  %v8161_v27 = vpop.f32.mrf.mxu0  ;;  %v16021_v3 = vld [vmem:[#allocation102_spill] sm:$0xff] }
 0x8c9   :  { %9050 = vrot.lane.b32.xlu2 %v7953_v37, %s10434_s10  ;;  %9066 = vrot.lane.b32.xlu1 %v8161_v27, %s10434_s10  ;;  %v9160_v37 = vsel %vm440_vm0, %v16019_v11, %v16018_v58  ;;  %v9177_v23 = vsel %vm440_vm0, %v16021_v3, %v16020_v29  ;;  %v16022_v27 = vld [vmem:[#allocation124_spill] sm:$0xff] }
 0x8ca   :  { %v14645_v0 = vpop.permute.xlu1 %8942 }
 0x8d0   :  { %v8291_v9 = vpop.f32.mrf.mxu1 }
 0x8d1   :  { %9068 = vrot.lane.b32.xlu2 %v8187_v16, %s10434_s10  ;;  %9076 = vrot.lane.b32.xlu0 %v8291_v9, %s10434_s10  ;;  %v16023_v9 = vld [vmem:[#allocation101_spill] sm:$0xff] }
 0x8d2   :  { %v14651_v62 = vpop.permute.xlu1 %8948 }
 0x8d7   :  { %v7853_v33 = vpop.xlane.xlu0 %7852 }
 0x8d8   :  { %10423 = vrcp.f32 %v7853_v33  ;;  %v9161_v33 = vsel %vm440_vm0, %v16023_v9, %v16022_v27 }
 0x8da   :  { %v8955_v54 = vpop.permute.xlu1 %8954 }
 0x8db   :  { %v14657_v34 = vsel %vm9178_vm2, %v9162_v20, %v8955_v54  ;;  %v16024_v20 = vld [vmem:[#allocation126_spill] sm:$0xff]  ;;  %v16025_v54 = vld [vmem:[#allocation80_spill] sm:$0xff] }
 0x8de   :  { %v10424_v8 = vpop.eup %10423 }
 0x8df   :  { %v7925_v14 = vmul.f32 %v10424_v8, %v14517_v4  ;;  %v7862_v18 = vpop.xlane.xlu0 %7861  ;;  %v16010_v4 = vld [vmem:[#allocation20_spill] sm:$0xff]  ;;  %v9163_v8 = vsel %vm440_vm0, %v16025_v54, %v16024_v20  ;;  %v16038_v54 = vld [vmem:[#allocation115_spill] sm:$0xff] }
 0x8e0   :  { %10425 = vrcp.f32 %v7862_v18  ;;  %v9168_v36 = vsel %vm440_vm0, %v16011_v56, %v16010_v4  ;;  %v16028_v56 = vld [vmem:[#allocation68_spill] sm:$0xff] }
 0x8e1   :  { %9660 = vmatmul.msk.f32.vlgmr.msra.gmra.mxu3 %vm440_vm0, %v7925_v14 }
 0x8e2   :  { %v8961_v61 = vpop.permute.xlu1 %8960 }
 0x8e3   :  { %v14667_v38 = vsel %vm9178_vm2, %v9165_v43, %v8961_v61 }
 0x8e4   :  { %v7865_v47 = vpop.xlane.xlu2 %7864 }
 0x8e5   :  { %10427 = vrcp.f32 %v7865_v47  ;;  %v16026_v47 = vld [vmem:[#allocation17_spill] sm:$0xff] }
 0x8e6   :  { %v10426_v49 = vpop.eup %10425 }
 0x8e7   :  { %v7928_v5 = vmul.f32 %v10426_v49, %v14523_v26  ;;  %v16012_v26 = vld [vmem:[#allocation95_spill] sm:$0xff]  ;;  %v16027_v49 = vld [vmem:[#allocation98_spill] sm:$0xff] }
 0x8e8   :  { %v9171_v19 = vsel %vm440_vm0, %v16013_v51, %v16012_v26 }
 0x8e9   :  { %9663 = vmatmul.msk.f32.vlgmr.msrb.gmra.mxu2 %vm440_vm0, %v7928_v5  ;;  %v9164_v5 = vsel %vm440_vm0, %v16027_v49, %v16026_v47 }
 0x8ea   :  { %v8967_v40 = vpop.permute.xlu1 %8966 }
 0x8eb   :  { %v10428_v60 = vpop.eup %10427  ;;  %v14675_v46 = vsel %vm9178_vm2, %v9168_v36, %v8967_v40  ;;  %v16029_v36 = vld [vmem:[#allocation86_spill] sm:$0xff] }
 0x8ec   :  { %v7929_v35 = vmul.f32 %v10428_v60, %v14532_v30  ;;  %v14678_v25 = vpop.permute.xlu2 %8938  ;;  %v9166_v40 = vsel %vm440_vm0, %v16029_v36, %v16028_v56 }
 0x8ee   :  { %9664 = vmatmul.msk.f32.vlgmr.msrb.gmra.mxu3 %vm440_vm0, %v7929_v35 }
 0x8ef   :  { %v8005_v32 = vpop.f32.mrf.mxu2 }
 0x8f0   :  { %9054 = vrot.lane.b32.xlu1 %v8005_v32, %s10434_s10 }
 0x8f1   :  { %v8395_v30 = vpop.f32.mrf.mxu1 }
 0x8f2   :  { %v8973_v17 = vpop.permute.xlu1 %8972  ;;  %v14685_v10 = vpop.permute.xlu0 %8940 }
 0x8f3   :  { %v14688_v44 = vsel %vm9178_vm2, %v9171_v19, %v8973_v17  ;;  %v16030_v17 = vld [vmem:[#allocation123_spill] sm:$0xff] }
 0x8f4   :  { %v14690_v1 = vpop.permute.xlu2 %8944 }
 0x8f6   :  { %v8031_v41 = vpop.f32.mrf.mxu3 }
 0x8f8   :  { %9084 = vrot.lane.b32.xlu1 %v8395_v30, %s10434_s10  ;;  %v8265_v63 = vpop.f32.mrf.mxu0  ;;  %v16031_v30 = vld [vmem:[#allocation91_spill] sm:$0xff] }
 0x8f9   :  { %9074 = vrot.lane.b32.xlu2 %v8265_v63, %s10434_s10  ;;  %v9167_v63 = vsel %vm440_vm0, %v16031_v30, %v16030_v17 }
 0x8fa   :  { %v8979_v15 = vpop.permute.xlu1 %8978  ;;  %v8947_v42 = vpop.permute.xlu0 %8946 }
 0x8fb   :  { %v14701_v52 = vsel %vm9178_vm2, %v9174_v39, %v8979_v15  ;;  %v14704_v13 = vsel %vm9178_vm2, %v9158_v57, %v8947_v42  ;;  %v9169_v57 = vsel %vm440_vm0, %v16033_v55, %v16032_v59 }
 0x8fc   :  { %v8951_v6 = vpop.permute.xlu2 %8950 }
 0x8fd   :  { %v14710_v2 = vsel %vm9178_vm2, %v9160_v37, %v8951_v6  ;;  %v16034_v37 = vld [vmem:[#allocation71_spill] sm:$0xff]  ;;  %v16035_v6 = vld [vmem:[#allocation96_spill] sm:$0xff] }
 0x8fe   :  { %v9170_v29 = vsel %vm440_vm0, %v16035_v6, %v16034_v37  ;;  %v16050_v37 = vld [vmem:[#allocation75_spill] sm:$0xff] }
 0x8ff   :  { %v8135_v14 = vpop.f32.mrf.mxu3 }
 0x901   :  { %9056 = vrot.lane.b32.xlu2 %v8031_v41, %s10434_s10 }
 0x902   :  { %v8369_v22 = vpop.f32.mrf.mxu0  ;;  %v8985_v16 = vpop.permute.xlu1 %8984 }
 0x903   :  { %v14720_v7 = vsel %vm9178_vm2, %v9177_v23, %v8985_v16  ;;  %9082 = vrot.lane.b32.xlu0 %v8369_v22, %s10434_s10  ;;  %v8953_v48 = vpop.permute.xlu0 %8952  ;;  %v16036_v23 = vld [vmem:[#allocation74_spill] sm:$0xff]  ;;  %v16037_v22 = vld [vmem:[#allocation107_spill] sm:$0xff] }
 0x904   :  { %v14727_v18 = vsel %vm9178_vm2, %v9161_v33, %v8953_v48  ;;  %v8957_v12 = vpop.permute.xlu2 %8956  ;;  %v9172_v16 = vsel %vm440_vm0, %v16037_v22, %v16036_v23  ;;  %v16053_v22 = vld [vmem:[#allocation108_spill] sm:$0xff] }
 0x905   :  { %v14730_v53 = vsel %vm9178_vm2, %v9163_v8, %v8957_v12  ;;  %v16039_v8 = vld [vmem:[#allocation78_spill] sm:$0xff] }
 0x906   :  { %v8109_v43 = vpop.f32.mrf.mxu2 }
 0x907   :  { %v8239_v26 = vpop.f32.mrf.mxu3 }
 0x908   :  { %v8499_v51 = vpop.f32.mrf.mxu1 }
 0x909   :  { %9062 = vrot.lane.b32.xlu2 %v8109_v43, %s10434_s10  ;;  %v16040_v43 = vld [vmem:[#allocation5_spill] sm:$0xff] }
 0x90a   :  { %v8473_v61 = vpop.f32.mrf.mxu0 }
 0x90b   :  { %9064 = vrot.lane.b32.xlu0 %v8135_v14, %s10434_s10  ;;  %9090 = vrot.lane.b32.xlu1 %v8473_v61, %s10434_s10  ;;  %v8959_v4 = vpop.permute.xlu0 %8958  ;;  %v9173_v14 = vsel %vm440_vm0, %v16039_v8, %v16038_v54  ;;  %v16041_v61 = vld [vmem:[#allocation103_spill] sm:$0xff] }
 0x90c   :  { %v14742_v60 = vsel %vm9178_vm2, %v9164_v5, %v8959_v4  ;;  %v8963_v35 = vpop.permute.xlu2 %8962  ;;  %v9175_v47 = vsel %vm440_vm0, %v16041_v61, %v16040_v43  ;;  %v16055_v61 = vld [vmem:[#allocation77_spill] sm:$0xff] }
 0x90d   :  { %v14745_v32 = vsel %vm9178_vm2, %v9166_v40, %v8963_v35  ;;  %v16042_v40 = vld [vmem:[#allocation46_spill] sm:$0xff]  ;;  %v16043_v35 = vld [vmem:[#allocation69_spill] sm:$0xff] }
 0x910   :  { %v8213_v19 = vpop.f32.mrf.mxu2 }
 0x911   :  { %9092 = vrot.lane.b32.xlu2 %v8499_v51, %s10434_s10  ;;  %v16044_v51 = vld [vmem:[#allocation117_spill] sm:$0xff] }
 0x912   :  { %v8603_v58 = vpop.f32.mrf.mxu1 }
 0x913   :  { %9070 = vrot.lane.b32.xlu0 %v8213_v19, %s10434_s10  ;;  %9072 = vrot.lane.b32.xlu1 %v8239_v26, %s10434_s10  ;;  %v8965_v41 = vpop.permute.xlu0 %8964  ;;  %v9146_v26 = vsel %vm440_vm0, %v16043_v35, %v16042_v40  ;;  %v16045_v19 = vld [vmem:[#allocation93_spill] sm:$0xff] }
 0x914   :  { %v14757_v45 = vsel %vm9178_vm2, %v9167_v63, %v8965_v41  ;;  %v8969_v31 = vpop.permute.xlu2 %8968  ;;  %v9176_v17 = vsel %vm440_vm0, %v16045_v19, %v16044_v51  ;;  %v16046_v63 = vld [vmem:[#allocation127_spill] sm:$0xff] }
 0x915   :  { %v14760_v39 = vsel %vm9178_vm2, %v9169_v57, %v8969_v31  ;;  %v9179_v41 = vsel %vm9178_vm2, %v9146_v26, %v16046_v63 }
 0x916   :  { %v8343_v15 = vpop.f32.mrf.mxu3 }
 0x918   :  { %v8577_v42 = vpop.f32.mrf.mxu0  ;;  %v8317_v11 = vpop.f32.mrf.mxu2 }
 0x919   :  { %9098 = vrot.lane.b32.xlu2 %v8577_v42, %s10434_s10  ;;  %v16048_v42 = vld [vmem:[#allocation73_spill] sm:$0xff] }
 0x91b   :  { %9100 = vrot.lane.b32.xlu0 %v8603_v58, %s10434_s10  ;;  %9078 = vrot.lane.b32.xlu1 %v8317_v11, %s10434_s10  ;;  %v8971_v3 = vpop.permute.xlu0 %8970  ;;  %v16049_v11 = vld [vmem:[#allocation42_spill] sm:$0xff] }
 0x91c   :  { %v14772_v27 = vsel %vm9178_vm2, %v9170_v29, %v8971_v3  ;;  %v8975_v9 = vpop.permute.xlu2 %8974  ;;  %v9151_v6 = vsel %vm440_vm0, %v16050_v37, %v16049_v11  ;;  %v16051_v29 = vld [vmem:[#allocation45_spill] sm:$0xff]  ;;  %v16052_v3 = vld [vmem:[#allocation79_spill] sm:$0xff] }
 0x91d   :  { %v14775_v33 = vsel %vm9178_vm2, %v9172_v16, %v8975_v9  ;;  %v9155_v23 = vsel %vm440_vm0, %v16052_v3, %v16051_v29  ;;  %v9184_v9 = vsel %vm9178_vm2, %v9151_v6, %v14659_v28  ;;  %v16062_v11 = vld [vmem:[#allocation29_spill] sm:$0xff]  ;;  %v16064_v3 = vld [vmem:[#allocation67_spill] sm:$0xff] }
 0x91e   :  { %v9188_v54 = vsel %vm9178_vm2, %v9155_v23, %v14685_v10  ;;  %v16054_v10 = vld [vmem:[#allocation39_spill] sm:$0xff] }
 0x920   :  { %v8447_v48 = vpop.f32.mrf.mxu3 }
 0x921   :  { %9080 = vrot.lane.b32.xlu2 %v8343_v15, %s10434_s10  ;;  %v16047_v15 = vld [vmem:[#allocation159_spill] sm:$0xff] }
 0x922   :  { %v8681_v20 = vpop.f32.mrf.mxu0  ;;  %v9147_v58 = vsel %vm440_vm0, %v16048_v42, %v16047_v15  ;;  %v16060_v42 = vld [vmem:[#allocation167_spill] sm:$0xff] }
 0x923   :  { %9106 = vrot.lane.b32.xlu0 %v8681_v20, %s10434_s10  ;;  %v8977_v12 = vpop.permute.xlu0 %8976  ;;  %v9180_v16 = vsel %vm9178_vm2, %v9147_v58, %v16053_v22  ;;  %v16061_v58 = vld [vmem:[#allocation89_spill] sm:$0xff]  ;;  %v16065_v22 = vld [vmem:[#allocation60_spill] sm:$0xff] }
 0x924   :  { %v14786_v49 = vsel %vm9178_vm2, %v9173_v14, %v8977_v12  ;;  %v8981_v5 = vpop.permute.xlu2 %8980 }
 0x925   :  { %v14789_v4 = vsel %vm9178_vm2, %v9175_v47, %v8981_v5  ;;  %v9150_v47 = vsel %vm440_vm0, %v16055_v61, %v16054_v10  ;;  %v16056_v5 = vld [vmem:[#allocation61_spill] sm:$0xff] }
 0x926   :  { %v8421_v56 = vpop.f32.mrf.mxu2  ;;  %v9183_v40 = vsel %vm9178_vm2, %v9150_v47, %v14634_v24  ;;  %v8707_v24 = vpop.f32.mrf.mxu1 }
 0x928   :  { %v8551_v36 = vpop.f32.mrf.mxu3 }
 0x929   :  { %9096 = vrot.lane.b32.xlu1 %v8551_v36, %s10434_s10  ;;  %9086 = vrot.lane.b32.xlu2 %v8421_v56, %s10434_s10  ;;  %v16057_v56 = vld [vmem:[#allocation66_spill] sm:$0xff] }
 0x92a   :  { %v9154_v36 = vsel %vm440_vm0, %v16057_v56, %v16056_v5 }
 0x92b   :  { %9088 = vrot.lane.b32.xlu0 %v8447_v48, %s10434_s10  ;;  %v8983_v30 = vpop.permute.xlu0 %8982  ;;  %v9187_v35 = vsel %vm9178_vm2, %v9154_v36, %v14678_v25  ;;  %v16058_v25 = vld [vmem:[#allocation63_spill] sm:$0xff] }
 0x92c   :  { %v14803_v59 = vsel %vm9178_vm2, %v9176_v17, %v8983_v30  ;;  %v9051_v55 = vpop.permute.xlu2 %9050  ;;  %v16059_v30 = vld [vmem:[#allocation70_spill] sm:$0xff] }
 0x92d   :  { %v9212_v57 = vsel %vm9211_vm3, %v9179_v41, %v9051_v55  ;;  %v9159_v63 = vsel %vm440_vm0, %v16059_v30, %v16058_v25 }
 0x92e   :  { %9245 = vst.msk [vmem:[%s15059_s9] sm:$0xf] %vm9244_vm4, %v9212_v57  ;;  %v9192_v41 = vsel %vm9178_vm2, %v9159_v63, %v14651_v62  ;;  %v9149_v62 = vsel %vm440_vm0, %v16061_v58, %v16060_v42  ;;  %v16071_v63 = vld [vmem:[#allocation72_spill] sm:$0xff] }
 0x92f   :  { %v9182_v37 = vsel %vm9178_vm2, %v9149_v62, %v16062_v11 }
 0x930   :  { %v8525_v31 = vpop.f32.mrf.mxu2 }
 0x933   :  { %9094 = vrot.lane.b32.xlu0 %v8525_v31, %s10434_s10  ;;  %v9053_v48 = vpop.permute.xlu0 %9052  ;;  %v9061_v20 = vpop.permute.xlu1 %9060 }
 0x934   :  { %v9213_v8 = vsel %vm9211_vm3, %v9180_v16, %v9053_v48  ;;  %v9069_v14 = vpop.permute.xlu2 %9068  ;;  %v9217_v12 = vsel %vm9211_vm3, %v9184_v9, %v9061_v20  ;;  %v16066_v16 = vld [vmem:[#allocation81_spill] sm:$0xff]  ;;  %v16067_v48 = vld [vmem:[#allocation116_spill] sm:$0xff] }
 0x935   :  { %9246 = vst.msk [vmem:[%s15059_s9 + $0x4] sm:$0xf] %vm9244_vm4, %v9213_v8  ;;  %v9221_v43 = vsel %vm9211_vm3, %v9188_v54, %v9069_v14  ;;  %v9152_v9 = vsel %vm440_vm0, %v16066_v16, %v16065_v22 }
 0x936   :  { %9254 = vst.msk [vmem:[%s15059_s9 + $0x24] sm:$0xf] %vm9244_vm4, %v9221_v43  ;;  %v9185_v8 = vsel %vm9178_vm2, %v9152_v9, %v14647_v50 }
 0x937   :  { %9250 = vst.msk [vmem:[%s15059_s9 + $0x14] sm:$0xf] %vm9244_vm4, %v9217_v12 }
 0x938   :  { %v8629_v28 = vpop.f32.mrf.mxu2 }
 0x939   :  { %9102 = vrot.lane.b32.xlu1 %v8629_v28, %s10434_s10 }
 0x93b   :  { %v9059_v26 = vpop.permute.xlu0 %9058  ;;  %v9067_v51 = vpop.permute.xlu1 %9066 }
 0x93c   :  { %v9216_v19 = vsel %vm9211_vm3, %v9183_v40, %v9059_v26  ;;  %v9220_v17 = vsel %vm9211_vm3, %v9187_v35, %v9067_v51  ;;  %v16068_v26 = vld [vmem:[#allocation48_spill] sm:$0xff] }
 0x93d   :  { %9249 = vst.msk [vmem:[%s15059_s9 + $0x10] sm:$0xf] %vm9244_vm4, %v9216_v19  ;;  %v16069_v51 = vld [vmem:[#allocation92_spill] sm:$0xff] }
 0x93e   :  { %9253 = vst.msk [vmem:[%s15059_s9 + $0x20] sm:$0xf] %vm9244_vm4, %v9220_v17  ;;  %v9153_v19 = vsel %vm440_vm0, %v16069_v51, %v16068_v26 }
 0x93f   :  { %v9186_v17 = vsel %vm9178_vm2, %v9153_v19, %v14640_v21 }
 0x941   :  { %9108 = vrot.lane.b32.xlu1 %v8707_v24, %s10434_s10 }
 0x943   :  { %v9077_v55 = vpop.permute.xlu0 %9076 }
 0x944   :  { %v9225_v57 = vsel %vm9211_vm3, %v9192_v41, %v9077_v55  ;;  %v16072_v55 = vld [vmem:[#allocation56_spill] sm:$0xff] }
 0x945   :  { %9258 = vst.msk [vmem:[%s15059_s9 + $0x34] sm:$0xf] %vm9244_vm4, %v9225_v57  ;;  %v16073_v57 = vld [vmem:[#allocation97_spill] sm:$0xff] }
 0x953   :  { %v9075_v31 = vpop.permute.xlu2 %9074 }
 0x954   :  { %v9224_v15 = vsel %vm9211_vm3, %v14704_v13, %v9075_v31  ;;  %v16063_v13 = vld [vmem:[#allocation166_spill] sm:$0xff]  ;;  %v9157_v31 = vsel %vm440_vm0, %v16073_v57, %v16072_v55 }
 0x955   :  { %9257 = vst.msk [vmem:[%s15059_s9 + $0x30] sm:$0xf] %vm9244_vm4, %v9224_v15  ;;  %v9148_v23 = vsel %vm440_vm0, %v16064_v3, %v16063_v13  ;;  %v9190_v42 = vsel %vm9178_vm2, %v9157_v31, %v14690_v1 }
 0x956   :  { %v9181_v20 = vsel %vm9178_vm2, %v9148_v23, %v16067_v48 }
 0x95b   :  { %v9057_v6 = vpop.permute.xlu2 %9056 }
 0x95c   :  { %v9215_v29 = vsel %vm9211_vm3, %v9182_v37, %v9057_v6 }
 0x95d   :  { %9248 = vst.msk [vmem:[%s15059_s9 + $0xc] sm:$0xf] %vm9244_vm4, %v9215_v29 }
 0x962   :  { %v9055_v54 = vpop.permute.xlu1 %9054 }
 0x963   :  { %v9214_v14 = vsel %vm9211_vm3, %v9181_v20, %v9055_v54  ;;  %v9063_v12 = vpop.permute.xlu2 %9062 }
 0x964   :  { %9247 = vst.msk [vmem:[%s15059_s9 + $0x8] sm:$0xf] %vm9244_vm4, %v9214_v14  ;;  %v9218_v43 = vsel %vm9211_vm3, %v9185_v8, %v9063_v12  ;;  %v8655_v28 = vpop.f32.mrf.mxu3 }
 0x965   :  { %9251 = vst.msk [vmem:[%s15059_s9 + $0x18] sm:$0xf] %vm9244_vm4, %v9218_v43  ;;  %9104 = vrot.lane.b32.xlu2 %v8655_v28, %s10434_s10 }
 0x96a   :  { %v9085_v10 = vpop.permute.xlu1 %9084 }
 0x96b   :  { %v9229_v50 = vsel %vm9211_vm3, %v14730_v53, %v9085_v10  ;;  %v9093_v61 = vpop.permute.xlu2 %9092 }
 0x96c   :  { %9262 = vst.msk [vmem:[%s15059_s9 + $0x44] sm:$0xf] %vm9244_vm4, %v9229_v50  ;;  %v9233_v47 = vsel %vm9211_vm3, %v14757_v45, %v9093_v61  ;;  %v8733_v5 = vpop.f32.mrf.mxu2 }
 0x96d   :  { %9266 = vst.msk [vmem:[%s15059_s9 + $0x54] sm:$0xf] %vm9244_vm4, %v9233_v47  ;;  %9110 = vrot.lane.b32.xlu2 %v8733_v5, %s10434_s10 }
 0x971   :  { %v8759_v56 = vpop.f32.mrf.mxu3 }
 0x972   :  { %9112 = vrot.lane.b32.xlu0 %v8759_v56, %s10434_s10 }
 0x973   :  { %v9099_v53 = vpop.permute.xlu2 %9098 }
 0x974   :  { %v9236_v36 = vsel %vm9211_vm3, %v14772_v27, %v9099_v53 }
 0x975   :  { %v9083_v40 = vpop.permute.xlu0 %9082  ;;  %9269 = vst.msk [vmem:[%s15059_s9 + $0x60] sm:$0xf] %vm9244_vm4, %v9236_v36 }
 0x976   :  { %v9228_v45 = vsel %vm9211_vm3, %v14657_v34, %v9083_v40 }
 0x977   :  { %9261 = vst.msk [vmem:[%s15059_s9 + $0x40] sm:$0xf] %vm9244_vm4, %v9228_v45 }
 0x97b   :  { %v9081_v35 = vpop.permute.xlu2 %9080 }
 0x97c   :  { %v9227_v27 = vsel %vm9211_vm3, %v14727_v18, %v9081_v35  ;;  %v16070_v18 = vld [vmem:[#allocation55_spill] sm:$0xff] }
 0x97d   :  { %v9065_v24 = vpop.permute.xlu0 %9064  ;;  %v9091_v25 = vpop.permute.xlu1 %9090  ;;  %9260 = vst.msk [vmem:[%s15059_s9 + $0x3c] sm:$0xf] %vm9244_vm4, %v9227_v27  ;;  %v9156_v41 = vsel %vm440_vm0, %v16071_v63, %v16070_v18 }
 0x97e   :  { %v9219_v34 = vsel %vm9211_vm3, %v9186_v17, %v9065_v24  ;;  %v9232_v30 = vsel %vm9211_vm3, %v14745_v32, %v9091_v25  ;;  %v9189_v15 = vsel %vm9178_vm2, %v9156_v41, %v14645_v0 }
 0x97f   :  { %9252 = vst.msk [vmem:[%s15059_s9 + $0x1c] sm:$0xf] %vm9244_vm4, %v9219_v34 }
 0x980   :  { %9265 = vst.msk [vmem:[%s15059_s9 + $0x50] sm:$0xf] %vm9244_vm4, %v9232_v30 }
 0x983   :  { %v9087_v21 = vpop.permute.xlu2 %9086 }
 0x984   :  { %v9230_v32 = vsel %vm9211_vm3, %v14742_v60, %v9087_v21 }
 0x985   :  { %v9071_v58 = vpop.permute.xlu0 %9070  ;;  %v9073_v62 = vpop.permute.xlu1 %9072  ;;  %9263 = vst.msk [vmem:[%s15059_s9 + $0x48] sm:$0xf] %vm9244_vm4, %v9230_v32 }
 0x986   :  { %v9222_v11 = vsel %vm9211_vm3, %v9189_v15, %v9071_v58  ;;  %v9223_v37 = vsel %vm9211_vm3, %v9190_v42, %v9073_v62 }
 0x987   :  { %9255 = vst.msk [vmem:[%s15059_s9 + $0x28] sm:$0xf] %vm9244_vm4, %v9222_v11 }
 0x988   :  { %9256 = vst.msk [vmem:[%s15059_s9 + $0x2c] sm:$0xf] %vm9244_vm4, %v9223_v37 }
 0x98d   :  { %v9101_v0 = vpop.permute.xlu0 %9100  ;;  %v9079_v1 = vpop.permute.xlu1 %9078 }
 0x98e   :  { %v9237_v60 = vsel %vm9211_vm3, %v14688_v44, %v9101_v0  ;;  %v9226_v6 = vsel %vm9211_vm3, %v14710_v2, %v9079_v1 }
 0x98f   :  { %9270 = vst.msk [vmem:[%s15059_s9 + $0x64] sm:$0xf] %vm9244_vm4, %v9237_v60 }
 0x990   :  { %9259 = vst.msk [vmem:[%s15059_s9 + $0x38] sm:$0xf] %vm9244_vm4, %v9226_v6 }
 0x995   :  { %v9107_v29 = vpop.permute.xlu0 %9106 }
 0x996   :  { %v9240_v13 = vsel %vm9211_vm3, %v14701_v52, %v9107_v29 }
 0x997   :  { %9273 = vst.msk [vmem:[%s15059_s9 + $0x70] sm:$0xf] %vm9244_vm4, %v9240_v13 }
 0x99b   :  { %v9097_v44 = vpop.permute.xlu1 %9096 }
 0x99c   :  { %v9235_v2 = vsel %vm9211_vm3, %v14760_v39, %v9097_v44 }
 0x99d   :  { %9268 = vst.msk [vmem:[%s15059_s9 + $0x5c] sm:$0xf] %vm9244_vm4, %v9235_v2  ;;  %v9089_v3 = vpop.permute.xlu0 %9088 }
 0x99e   :  { %v9231_v23 = vsel %vm9211_vm3, %v14667_v38, %v9089_v3 }
 0x99f   :  { %9264 = vst.msk [vmem:[%s15059_s9 + $0x4c] sm:$0xf] %vm9244_vm4, %v9231_v23 }
 0x9a5   :  { %v9095_v52 = vpop.permute.xlu0 %9094 }
 0x9a6   :  { %v9234_v22 = vsel %vm9211_vm3, %v14675_v46, %v9095_v52 }
 0x9a7   :  { %9267 = vst.msk [vmem:[%s15059_s9 + $0x58] sm:$0xf] %vm9244_vm4, %v9234_v22 }
 0x9ab   :  { %v9103_v39 = vpop.permute.xlu1 %9102 }
 0x9ac   :  { %v9238_v16 = vsel %vm9211_vm3, %v14775_v33, %v9103_v39 }
 0x9ad   :  { %9271 = vst.msk [vmem:[%s15059_s9 + $0x68] sm:$0xf] %vm9244_vm4, %v9238_v16 }
 0x9b3   :  { %v9109_v38 = vpop.permute.xlu1 %9108 }
 0x9b4   :  { %v9241_v9 = vsel %vm9211_vm3, %v14789_v4, %v9109_v38 }
 0x9b5   :  { %9274 = vst.msk [vmem:[%s15059_s9 + $0x74] sm:$0xf] %vm9244_vm4, %v9241_v9 }
 0x9bf   :  { %v9105_v46 = vpop.permute.xlu2 %9104 }
 0x9c0   :  { %v9239_v48 = vsel %vm9211_vm3, %v14786_v49, %v9105_v46 }
 0x9c1   :  { %9272 = vst.msk [vmem:[%s15059_s9 + $0x6c] sm:$0xf] %vm9244_vm4, %v9239_v48 }
 0x9c7   :  { %v9111_v33 = vpop.permute.xlu2 %9110 }
 0x9c8   :  { %v9242_v20 = vsel %vm9211_vm3, %v14803_v59, %v9111_v33 }
 0x9c9   :  { %9275 = vst.msk [vmem:[%s15059_s9 + $0x78] sm:$0xf] %vm9244_vm4, %v9242_v20 }
 0x9e4   :  { %v9113_v4 = vpop.permute.xlu0 %9112 }
 0x9e5   :  { %v9243_v54 = vsel %vm9211_vm3, %v14720_v7, %v9113_v4 }
 0x9e6   :  { %9276 = vst.msk [vmem:[%s15059_s9 + $0x7c] sm:$0xf] %vm9244_vm4, %v9243_v54 }

</bundles_post_ra>
